<compile_context>
chip_gen: v5e
topology: v5e:2x2
jax: 0.10.0
libtpu: 0.0.40
codegen_flags: <defaults>
</compile_context>

<pallas_src>
import jax
import jax.numpy as jnp
from jax.experimental import pallas as pl
from jax.experimental.pallas import tpu as pltpu

_TAPS = ((0, 0), (0, 1), (1, 0), (1, 1))   # 2x2 kernel tap order (di, dj), row-major
_H1, _C1 = 13, 16                          # conv1 output: 13x13 spatial, 16 channels
_H2, _C2 = 12, 32                          # conv2 output: 12x12 spatial, 32 channels


# ----------------------------- fused Pallas kernel -----------------------------

def _fused_siamese_kernel(x_ref, e_ref, b1_ref, k_ref, b2_ref, w5_ref,
                          bfc1_ref, wfc2_ref, bfc2_ref, wfca_ref, wfcb_ref,
                          o_ref, a1_ref, a2_ref):
    B = x_ref.shape[0]
    nb = 2 * B                      # both digit towers batched together

    # Bias tiles: load once, reuse across the unrolled per-image loop.
    b1 = b1_ref[...]                # (1, 208)
    b2 = b2_ref[...]                # (1, 384)

    # ---- conv towers (per digit image; plain 2D MXU matmuls, VMEM resident) ----
    for d in range(2):              # digit index (input channel 0 / 1)
        for b in range(B):
            n = d * B + b           # rows 0..B-1 = digit 0, rows B..2B-1 = digit 1

            # conv1 + ReLU.  a1 lanes are (col q, channel c16) -> q*16 + c
            acc1 = jnp.zeros((_H1, _H1 * _C1), dtype=jnp.float32)
            for t, (di, dj) in enumerate(_TAPS):
                tap = x_ref[b, d, di:di + _H1, dj:dj + _H1]            # (13, 13)
                acc1 = acc1 + jnp.dot(tap, e_ref[t],
                                      preferred_element_type=jnp.float32)
            a1_ref[n] = jnp.maximum(acc1 + b1, 0.0)

            # conv2 (no ReLU in the 2-conv net).  a2 lanes are (col j, channel c32)
            acc2 = jnp.zeros((_H2, _H2 * _C2), dtype=jnp.float32)
            for t, (di, dj) in enumerate(_TAPS):
                tap = a1_ref[n, di:di + _H2, dj * _C1:dj * _C1 + _H2 * _C1]  # (12, 192)
                acc2 = acc2 + jnp.dot(tap, k_ref[t],
                                      preferred_element_type=jnp.float32)
            a2_ref[n] = acc2 + b2

    # ---- fc1 + ReLU (flatten folded into w5, batched over both towers) ----
    h = jnp.zeros((nb, 64), dtype=jnp.float32)
    for i in range(_H2):            # sum over the 12 image rows
        h = h + jnp.dot(a2_ref[:, i, :], w5_ref[i],
                        preferred_element_type=jnp.float32)
    h = jnp.maximum(h + bfc1_ref[...], 0.0)

    # ---- fc2 + softmax(dim=1) ----
    logits = jnp.dot(h, wfc2_ref[...], preferred_element_type=jnp.float32) + bfc2_ref[...]
    m = jnp.max(logits, axis=-1, keepdims=True)
    e = jnp.exp(logits - m)
    s = jnp.sum(e, axis=-1, keepdims=True)
    probs = e * pl.reciprocal(s, approx=True)

    # ---- siamese head: concat([p1, p2], 1) @ W.T with split weight, no bias ----
    p1 = probs[0:B, :]
    p2 = probs[B:2 * B, :]
    o_ref[...] = (jnp.dot(p1, wfca_ref[...], preferred_element_type=jnp.float32)
                  + jnp.dot(p2, wfcb_ref[...], preferred_element_type=jnp.float32))


def _vmem_spec():
    return pl.BlockSpec(memory_space=pltpu.MemorySpace.VMEM)


def siamese_forward(x, prm):
    """x: (B, 2, 14, 14) f32 -> (B, 2) f32, one fused pallas_call."""
    B = x.shape[0]
    return pl.pallas_call(
        _fused_siamese_kernel,
        out_shape=jax.ShapeDtypeStruct((B, 2), jnp.float32),
        in_specs=[_vmem_spec() for _ in range(11)],
        out_specs=_vmem_spec(),
        scratch_shapes=[
            pltpu.VMEM((2 * B, _H1, _H1 * _C1), jnp.float32),   # a1 (conv1 activations)
            pltpu.VMEM((2 * B, _H2, _H2 * _C2), jnp.float32),   # a2 (conv2 activations)
        ],
    )(x, prm["e"], prm["b1t"], prm["k"], prm["b2t"], prm["w5"],
      prm["bfc1"], prm["wfc2_t"], prm["bfc2"], prm["wfc_a"], prm["wfc_b"])


# ----------------------------- parameter setup (one-time) -----------------------------

def init_params(key):
    """Deterministic PyTorch-shaped params + kernel-friendly (pre-folded) forms."""
    def unif(k, shape, fan_in):
        bound = 1.0 / jnp.sqrt(jnp.float32(fan_in))
        return jax.random.uniform(k, shape, jnp.float32, -bound, bound)

    ks = jax.random.split(key, 9)
    raw = {
        "conv1_w": unif(ks[0], (16, 1, 2, 2), 1 * 2 * 2),
        "conv1_b": unif(ks[1], (16,), 1 * 2 * 2),
        "conv2_w": unif(ks[2], (32, 16, 2, 2), 16 * 2 * 2),
        "conv2_b": unif(ks[3], (32,), 16 * 2 * 2),
        "fc1_w":   unif(ks[4], (64, 32 * 12 * 12), 32 * 12 * 12),
        "fc1_b":   unif(ks[5], (64,), 32 * 12 * 12),
        "fc2_w":   unif(ks[6], (10, 64), 64),
        "fc2_b":   unif(ks[7], (10,), 64),
        "fc_w":    unif(ks[8], (2, 20), 20),        # final_bias=False
    }

    # conv1 tap (di,dj) as a (13,13) @ (13, 13*16) matmul: E_t = kron(I_13, w1_tap_row)
    e = jnp.stack([jnp.kron(jnp.eye(_H1, dtype=jnp.float32),
                            raw["conv1_w"][:, 0, di, dj][None, :])
                   for di, dj in _TAPS])                                  # (4, 13, 208)
    # conv2 tap as a (12,192) @ (192, 12*32) block-diag matmul: K_t = kron(I_12, w2_tap.T)
    k = jnp.stack([jnp.kron(jnp.eye(_H2, dtype=jnp.float32),
                            raw["conv2_w"][:, :, di, dj].T)
                   for di, dj in _TAPS])                                  # (4, 192, 384)
    # fc1 weight re-blocked per image row i with lanes (j, c32), folding PyTorch's
    # NCHW channel-major flatten into the weight (free, one-time).
    w5 = jnp.transpose(raw["fc1_w"].reshape(64, 32, _H2, _H2),
                       (2, 3, 1, 0)).reshape(_H2, _H2 * _C2, 64)          # (12, 384, 64)

    prm = {
        "e": e,
        "b1t": jnp.tile(raw["conv1_b"], _H1).reshape(1, _H1 * _C1),       # (1, 208)
        "k": k,
        "b2t": jnp.tile(raw["conv2_b"], _H2).reshape(1, _H2 * _C2),       # (1, 384)
        "w5": w5,
        "bfc1": raw["fc1_b"].reshape(1, 64),
        "wfc2_t": raw["fc2_w"].T,                                         # (64, 10)
        "bfc2": raw["fc2_b"].reshape(1, 10),
        "wfc_a": raw["fc_w"][:, 0:10].T,                                  # (10, 2)
        "wfc_b": raw["fc_w"][:, 10:20].T,                                 # (10, 2)
    }
    return raw, prm


# ----------------------------- pure-JAX reference -----------------------------

def reference_forward(x, raw):
    def conv2d(a, w, b):
        y = jax.lax.conv_general_dilated(
            a, w, (1, 1), "VALID",
            dimension_numbers=("NCHW", "OIHW", "NCHW"),
            precision=jax.lax.Precision.HIGHEST)
        return y + b[None, :, None, None]

    def digit(a):
        a = jnp.maximum(conv2d(a, raw["conv1_w"], raw["conv1_b"]), 0.0)
        a = conv2d(a, raw["conv2_w"], raw["conv2_b"])
        a = a.reshape(a.shape[0], -1)
        a = jnp.maximum(
            jnp.dot(a, raw["fc1_w"].T, precision=jax.lax.Precision.HIGHEST) + raw["fc1_b"], 0.0)
        a = jnp.dot(a, raw["fc2_w"].T, precision=jax.lax.Precision.HIGHEST) + raw["fc2_b"]
        return jax.nn.softmax(a, axis=1)

    p1 = digit(x[:, 0:1, :, :])
    p2 = digit(x[:, 1:2, :, :])
    cat = jnp.concatenate([p1, p2], axis=1)
    return jnp.dot(cat, raw["fc_w"].T, precision=jax.lax.Precision.HIGHEST)


# ----------------------------- main -----------------------------

if __name__ == "__main__":
    key = jax.random.PRNGKey(0)
    k_x, k_p = jax.random.split(key)

    B = 2
    x = jax.random.normal(k_x, (B, 2, 14, 14), dtype=jnp.float32)  # two 14x14 digits / sample

    raw, prm = init_params(k_p)

    out = jax.jit(siamese_forward)(x, prm)
    out = jax.block_until_ready(out)
    assert out.shape == (B, 2) and out.dtype == jnp.float32

    ref = reference_forward(x, raw)
    assert jnp.allclose(out, ref, rtol=1e-2, atol=2e-3), (out, ref)

    print("KERNEL_OK")
</pallas_src>

<mosaic_0001>
module attributes {stable_mosaic.version = 11 : i64} {
  func.func @_fused_siamese_kernel(%arg0: memref<2x2x14x14xf32, #tpu.memory_space<vmem>>, %arg1: memref<4x13x208xf32, #tpu.memory_space<vmem>>, %arg2: memref<1x208xf32, #tpu.memory_space<vmem>>, %arg3: memref<4x192x384xf32, #tpu.memory_space<vmem>>, %arg4: memref<1x384xf32, #tpu.memory_space<vmem>>, %arg5: memref<12x384x64xf32, #tpu.memory_space<vmem>>, %arg6: memref<1x64xf32, #tpu.memory_space<vmem>>, %arg7: memref<64x10xf32, #tpu.memory_space<vmem>>, %arg8: memref<1x10xf32, #tpu.memory_space<vmem>>, %arg9: memref<10x2xf32, #tpu.memory_space<vmem>>, %arg10: memref<10x2xf32, #tpu.memory_space<vmem>>, %arg11: memref<2x2xf32, #tpu.memory_space<vmem>>, %arg12: memref<4x13x208xf32, #tpu.memory_space<vmem>>, %arg13: memref<4x12x384xf32, #tpu.memory_space<vmem>>) attributes {dimension_semantics = [], scalar_prefetch = 0 : i64, scratch_operands = 2 : i64, tpu.core_type = #tpu.core_type<tc>} {
    %c0 = arith.constant 0 : index
    %c0_0 = arith.constant 0 : index
    %0 = vector.load %arg2[%c0, %c0_0] : memref<1x208xf32, #tpu.memory_space<vmem>>, vector<1x208xf32>
    %c0_1 = arith.constant 0 : index
    %c0_2 = arith.constant 0 : index
    %1 = vector.load %arg4[%c0_1, %c0_2] : memref<1x384xf32, #tpu.memory_space<vmem>>, vector<1x384xf32>
    %cst = arith.constant 0.000000e+00 : f32
    %2 = vector.broadcast %cst : f32 to vector<13x208xf32>
    %c0_3 = arith.constant 0 : index
    %c0_4 = arith.constant 0 : index
    %c0_5 = arith.constant 0 : index
    %c0_6 = arith.constant 0 : index
    %3 = vector.load %arg0[%c0_3, %c0_4, %c0_5, %c0_6] : memref<2x2x14x14xf32, #tpu.memory_space<vmem>>, vector<1x1x13x13xf32>
    %4 = vector.shape_cast %3 : vector<1x1x13x13xf32> to vector<13x13xf32>
    %c0_7 = arith.constant 0 : index
    %c0_8 = arith.constant 0 : index
    %c0_9 = arith.constant 0 : index
    %5 = vector.load %arg1[%c0_7, %c0_8, %c0_9] : memref<4x13x208xf32, #tpu.memory_space<vmem>>, vector<1x13x208xf32>
    %6 = vector.shape_cast %5 : vector<1x13x208xf32> to vector<13x208xf32>
    %cst_10 = arith.constant dense<0.000000e+00> : vector<13x208xf32>
    %7 = tpu.matmul %4, %6, %cst_10 {dimension_numbers = #tpu.dot_dimension_numbers<[1], [0], [0], [1], [0, 0, 1, 1], [], []>} : vector<13x13xf32>, vector<13x208xf32>, vector<13x208xf32> -> vector<13x208xf32>
    %8 = arith.addf %2, %7 : vector<13x208xf32>
    %c0_11 = arith.constant 0 : index
    %c0_12 = arith.constant 0 : index
    %c0_13 = arith.constant 0 : index
    %c1 = arith.constant 1 : index
    %9 = vector.load %arg0[%c0_11, %c0_12, %c0_13, %c1] : memref<2x2x14x14xf32, #tpu.memory_space<vmem>>, vector<1x1x13x13xf32>
    %10 = vector.shape_cast %9 : vector<1x1x13x13xf32> to vector<13x13xf32>
    %c1_14 = arith.constant 1 : index
    %c0_15 = arith.constant 0 : index
    %c0_16 = arith.constant 0 : index
    %11 = vector.load %arg1[%c1_14, %c0_15, %c0_16] : memref<4x13x208xf32, #tpu.memory_space<vmem>>, vector<1x13x208xf32>
    %12 = vector.shape_cast %11 : vector<1x13x208xf32> to vector<13x208xf32>
    %cst_17 = arith.constant dense<0.000000e+00> : vector<13x208xf32>
    %13 = tpu.matmul %10, %12, %cst_17 {dimension_numbers = #tpu.dot_dimension_numbers<[1], [0], [0], [1], [0, 0, 1, 1], [], []>} : vector<13x13xf32>, vector<13x208xf32>, vector<13x208xf32> -> vector<13x208xf32>
    %14 = arith.addf %8, %13 : vector<13x208xf32>
    %c0_18 = arith.constant 0 : index
    %c0_19 = arith.constant 0 : index
    %c1_20 = arith.constant 1 : index
    %c0_21 = arith.constant 0 : index
    %15 = vector.load %arg0[%c0_18, %c0_19, %c1_20, %c0_21] : memref<2x2x14x14xf32, #tpu.memory_space<vmem>>, vector<1x1x13x13xf32>
    %16 = vector.shape_cast %15 : vector<1x1x13x13xf32> to vector<13x13xf32>
    %c2 = arith.constant 2 : index
    %c0_22 = arith.constant 0 : index
    %c0_23 = arith.constant 0 : index
    %17 = vector.load %arg1[%c2, %c0_22, %c0_23] : memref<4x13x208xf32, #tpu.memory_space<vmem>>, vector<1x13x208xf32>
    %18 = vector.shape_cast %17 : vector<1x13x208xf32> to vector<13x208xf32>
    %cst_24 = arith.constant dense<0.000000e+00> : vector<13x208xf32>
    %19 = tpu.matmul %16, %18, %cst_24 {dimension_numbers = #tpu.dot_dimension_numbers<[1], [0], [0], [1], [0, 0, 1, 1], [], []>} : vector<13x13xf32>, vector<13x208xf32>, vector<13x208xf32> -> vector<13x208xf32>
    %20 = arith.addf %14, %19 : vector<13x208xf32>
    %c0_25 = arith.constant 0 : index
    %c0_26 = arith.constant 0 : index
    %c1_27 = arith.constant 1 : index
    %c1_28 = arith.constant 1 : index
    %21 = vector.load %arg0[%c0_25, %c0_26, %c1_27, %c1_28] : memref<2x2x14x14xf32, #tpu.memory_space<vmem>>, vector<1x1x13x13xf32>
    %22 = vector.shape_cast %21 : vector<1x1x13x13xf32> to vector<13x13xf32>
    %c3 = arith.constant 3 : index
    %c0_29 = arith.constant 0 : index
    %c0_30 = arith.constant 0 : index
    %23 = vector.load %arg1[%c3, %c0_29, %c0_30] : memref<4x13x208xf32, #tpu.memory_space<vmem>>, vector<1x13x208xf32>
    %24 = vector.shape_cast %23 : vector<1x13x208xf32> to vector<13x208xf32>
    %cst_31 = arith.constant dense<0.000000e+00> : vector<13x208xf32>
    %25 = tpu.matmul %22, %24, %cst_31 {dimension_numbers = #tpu.dot_dimension_numbers<[1], [0], [0], [1], [0, 0, 1, 1], [], []>} : vector<13x13xf32>, vector<13x208xf32>, vector<13x208xf32> -> vector<13x208xf32>
    %26 = arith.addf %20, %25 : vector<13x208xf32>
    %27 = vector.broadcast %0 : vector<1x208xf32> to vector<13x208xf32>
    %28 = arith.addf %26, %27 : vector<13x208xf32>
    %cst_32 = arith.constant 0.000000e+00 : f32
    %29 = vector.broadcast %cst_32 : f32 to vector<13x208xf32>
    %30 = arith.maximumf %28, %29 : vector<13x208xf32>
    %c0_33 = arith.constant 0 : index
    %c0_34 = arith.constant 0 : index
    %c0_35 = arith.constant 0 : index
    %31 = vector.load %arg12[%c0_33, %c0_34, %c0_35] : memref<4x13x208xf32, #tpu.memory_space<vmem>>, vector<1x13x208xf32>
    %32 = vector.shape_cast %31 : vector<1x13x208xf32> to vector<13x208xf32>
    %33 = vector.shape_cast %30 : vector<13x208xf32> to vector<1x13x208xf32>
    tpu.vector_store %arg12[%c0_33, %c0_34, %c0_35], %33 {strides = array<i32>} : memref<4x13x208xf32, #tpu.memory_space<vmem>>, vector<1x13x208xf32>,
    %cst_36 = arith.constant 0.000000e+00 : f32
    %34 = vector.broadcast %cst_36 : f32 to vector<12x384xf32>
    %c0_37 = arith.constant 0 : index
    %c0_38 = arith.constant 0 : index
    %c0_39 = arith.constant 0 : index
    %35 = vector.load %arg12[%c0_37, %c0_38, %c0_39] : memref<4x13x208xf32, #tpu.memory_space<vmem>>, vector<1x12x192xf32>
    %36 = vector.shape_cast %35 : vector<1x12x192xf32> to vector<12x192xf32>
    %c0_40 = arith.constant 0 : index
    %c0_41 = arith.constant 0 : index
    %c0_42 = arith.constant 0 : index
    %37 = vector.load %arg3[%c0_40, %c0_41, %c0_42] : memref<4x192x384xf32, #tpu.memory_space<vmem>>, vector<1x192x384xf32>
    %38 = vector.shape_cast %37 : vector<1x192x384xf32> to vector<192x384xf32>
    %cst_43 = arith.constant dense<0.000000e+00> : vector<12x384xf32>
    %39 = tpu.matmul %36, %38, %cst_43 {dimension_numbers = #tpu.dot_dimension_numbers<[1], [0], [0], [1], [0, 0, 1, 1], [], []>} : vector<12x192xf32>, vector<192x384xf32>, vector<12x384xf32> -> vector<12x384xf32>
    %40 = arith.addf %34, %39 : vector<12x384xf32>
    %c0_44 = arith.constant 0 : index
    %c0_45 = arith.constant 0 : index
    %c16 = arith.constant 16 : index
    %41 = vector.load %arg12[%c0_44, %c0_45, %c16] : memref<4x13x208xf32, #tpu.memory_space<vmem>>, vector<1x12x192xf32>
    %42 = vector.shape_cast %41 : vector<1x12x192xf32> to vector<12x192xf32>
    %c1_46 = arith.constant 1 : index
    %c0_47 = arith.constant 0 : index
    %c0_48 = arith.constant 0 : index
    %43 = vector.load %arg3[%c1_46, %c0_47, %c0_48] : memref<4x192x384xf32, #tpu.memory_space<vmem>>, vector<1x192x384xf32>
    %44 = vector.shape_cast %43 : vector<1x192x384xf32> to vector<192x384xf32>
    %cst_49 = arith.constant dense<0.000000e+00> : vector<12x384xf32>
    %45 = tpu.matmul %42, %44, %cst_49 {dimension_numbers = #tpu.dot_dimension_numbers<[1], [0], [0], [1], [0, 0, 1, 1], [], []>} : vector<12x192xf32>, vector<192x384xf32>, vector<12x384xf32> -> vector<12x384xf32>
    %46 = arith.addf %40, %45 : vector<12x384xf32>
    %c0_50 = arith.constant 0 : index
    %c1_51 = arith.constant 1 : index
    %c0_52 = arith.constant 0 : index
    %47 = vector.load %arg12[%c0_50, %c1_51, %c0_52] : memref<4x13x208xf32, #tpu.memory_space<vmem>>, vector<1x12x192xf32>
    %48 = vector.shape_cast %47 : vector<1x12x192xf32> to vector<12x192xf32>
    %c2_53 = arith.constant 2 : index
    %c0_54 = arith.constant 0 : index
    %c0_55 = arith.constant 0 : index
    %49 = vector.load %arg3[%c2_53, %c0_54, %c0_55] : memref<4x192x384xf32, #tpu.memory_space<vmem>>, vector<1x192x384xf32>
    %50 = vector.shape_cast %49 : vector<1x192x384xf32> to vector<192x384xf32>
    %cst_56 = arith.constant dense<0.000000e+00> : vector<12x384xf32>
    %51 = tpu.matmul %48, %50, %cst_56 {dimension_numbers = #tpu.dot_dimension_numbers<[1], [0], [0], [1], [0, 0, 1, 1], [], []>} : vector<12x192xf32>, vector<192x384xf32>, vector<12x384xf32> -> vector<12x384xf32>
    %52 = arith.addf %46, %51 : vector<12x384xf32>
    %c0_57 = arith.constant 0 : index
    %c1_58 = arith.constant 1 : index
    %c16_59 = arith.constant 16 : index
    %53 = vector.load %arg12[%c0_57, %c1_58, %c16_59] : memref<4x13x208xf32, #tpu.memory_space<vmem>>, vector<1x12x192xf32>
    %54 = vector.shape_cast %53 : vector<1x12x192xf32> to vector<12x192xf32>
    %c3_60 = arith.constant 3 : index
    %c0_61 = arith.constant 0 : index
    %c0_62 = arith.constant 0 : index
    %55 = vector.load %arg3[%c3_60, %c0_61, %c0_62] : memref<4x192x384xf32, #tpu.memory_space<vmem>>, vector<1x192x384xf32>
    %56 = vector.shape_cast %55 : vector<1x192x384xf32> to vector<192x384xf32>
    %cst_63 = arith.constant dense<0.000000e+00> : vector<12x384xf32>
    %57 = tpu.matmul %54, %56, %cst_63 {dimension_numbers = #tpu.dot_dimension_numbers<[1], [0], [0], [1], [0, 0, 1, 1], [], []>} : vector<12x192xf32>, vector<192x384xf32>, vector<12x384xf32> -> vector<12x384xf32>
    %58 = arith.addf %52, %57 : vector<12x384xf32>
    %59 = vector.broadcast %1 : vector<1x384xf32> to vector<12x384xf32>
    %60 = arith.addf %58, %59 : vector<12x384xf32>
    %c0_64 = arith.constant 0 : index
    %c0_65 = arith.constant 0 : index
    %c0_66 = arith.constant 0 : index
    %61 = vector.load %arg13[%c0_64, %c0_65, %c0_66] : memref<4x12x384xf32, #tpu.memory_space<vmem>>, vector<1x12x384xf32>
    %62 = vector.shape_cast %61 : vector<1x12x384xf32> to vector<12x384xf32>
    %63 = vector.shape_cast %60 : vector<12x384xf32> to vector<1x12x384xf32>
    tpu.vector_store %arg13[%c0_64, %c0_65, %c0_66], %63 {strides = array<i32>} : memref<4x12x384xf32, #tpu.memory_space<vmem>>, vector<1x12x384xf32>,
    %cst_67 = arith.constant 0.000000e+00 : f32
    %64 = vector.broadcast %cst_67 : f32 to vector<13x208xf32>
    %c1_68 = arith.constant 1 : index
    %c0_69 = arith.constant 0 : index
    %c0_70 = arith.constant 0 : index
    %c0_71 = arith.constant 0 : index
    %65 = vector.load %arg0[%c1_68, %c0_69, %c0_70, %c0_71] : memref<2x2x14x14xf32, #tpu.memory_space<vmem>>, vector<1x1x13x13xf32>
    %66 = vector.shape_cast %65 : vector<1x1x13x13xf32> to vector<13x13xf32>
    %c0_72 = arith.constant 0 : index
    %c0_73 = arith.constant 0 : index
    %c0_74 = arith.constant 0 : index
    %67 = vector.load %arg1[%c0_72, %c0_73, %c0_74] : memref<4x13x208xf32, #tpu.memory_space<vmem>>, vector<1x13x208xf32>
    %68 = vector.shape_cast %67 : vector<1x13x208xf32> to vector<13x208xf32>
    %cst_75 = arith.constant dense<0.000000e+00> : vector<13x208xf32>
    %69 = tpu.matmul %66, %68, %cst_75 {dimension_numbers = #tpu.dot_dimension_numbers<[1], [0], [0], [1], [0, 0, 1, 1], [], []>} : vector<13x13xf32>, vector<13x208xf32>, vector<13x208xf32> -> vector<13x208xf32>
    %70 = arith.addf %64, %69 : vector<13x208xf32>
    %c1_76 = arith.constant 1 : index
    %c0_77 = arith.constant 0 : index
    %c0_78 = arith.constant 0 : index
    %c1_79 = arith.constant 1 : index
    %71 = vector.load %arg0[%c1_76, %c0_77, %c0_78, %c1_79] : memref<2x2x14x14xf32, #tpu.memory_space<vmem>>, vector<1x1x13x13xf32>
    %72 = vector.shape_cast %71 : vector<1x1x13x13xf32> to vector<13x13xf32>
    %c1_80 = arith.constant 1 : index
    %c0_81 = arith.constant 0 : index
    %c0_82 = arith.constant 0 : index
    %73 = vector.load %arg1[%c1_80, %c0_81, %c0_82] : memref<4x13x208xf32, #tpu.memory_space<vmem>>, vector<1x13x208xf32>
    %74 = vector.shape_cast %73 : vector<1x13x208xf32> to vector<13x208xf32>
    %cst_83 = arith.constant dense<0.000000e+00> : vector<13x208xf32>
    %75 = tpu.matmul %72, %74, %cst_83 {dimension_numbers = #tpu.dot_dimension_numbers<[1], [0], [0], [1], [0, 0, 1, 1], [], []>} : vector<13x13xf32>, vector<13x208xf32>, vector<13x208xf32> -> vector<13x208xf32>
    %76 = arith.addf %70, %75 : vector<13x208xf32>
    %c1_84 = arith.constant 1 : index
    %c0_85 = arith.constant 0 : index
    %c1_86 = arith.constant 1 : index
    %c0_87 = arith.constant 0 : index
    %77 = vector.load %arg0[%c1_84, %c0_85, %c1_86, %c0_87] : memref<2x2x14x14xf32, #tpu.memory_space<vmem>>, vector<1x1x13x13xf32>
    %78 = vector.shape_cast %77 : vector<1x1x13x13xf32> to vector<13x13xf32>
    %c2_88 = arith.constant 2 : index
    %c0_89 = arith.constant 0 : index
    %c0_90 = arith.constant 0 : index
    %79 = vector.load %arg1[%c2_88, %c0_89, %c0_90] : memref<4x13x208xf32, #tpu.memory_space<vmem>>, vector<1x13x208xf32>
    %80 = vector.shape_cast %79 : vector<1x13x208xf32> to vector<13x208xf32>
    %cst_91 = arith.constant dense<0.000000e+00> : vector<13x208xf32>
    %81 = tpu.matmul %78, %80, %cst_91 {dimension_numbers = #tpu.dot_dimension_numbers<[1], [0], [0], [1], [0, 0, 1, 1], [], []>} : vector<13x13xf32>, vector<13x208xf32>, vector<13x208xf32> -> vector<13x208xf32>
    %82 = arith.addf %76, %81 : vector<13x208xf32>
    %c1_92 = arith.constant 1 : index
    %c0_93 = arith.constant 0 : index
    %c1_94 = arith.constant 1 : index
    %c1_95 = arith.constant 1 : index
    %83 = vector.load %arg0[%c1_92, %c0_93, %c1_94, %c1_95] : memref<2x2x14x14xf32, #tpu.memory_space<vmem>>, vector<1x1x13x13xf32>
    %84 = vector.shape_cast %83 : vector<1x1x13x13xf32> to vector<13x13xf32>
    %c3_96 = arith.constant 3 : index
    %c0_97 = arith.constant 0 : index
    %c0_98 = arith.constant 0 : index
    %85 = vector.load %arg1[%c3_96, %c0_97, %c0_98] : memref<4x13x208xf32, #tpu.memory_space<vmem>>, vector<1x13x208xf32>
    %86 = vector.shape_cast %85 : vector<1x13x208xf32> to vector<13x208xf32>
    %cst_99 = arith.constant dense<0.000000e+00> : vector<13x208xf32>
    %87 = tpu.matmul %84, %86, %cst_99 {dimension_numbers = #tpu.dot_dimension_numbers<[1], [0], [0], [1], [0, 0, 1, 1], [], []>} : vector<13x13xf32>, vector<13x208xf32>, vector<13x208xf32> -> vector<13x208xf32>
    %88 = arith.addf %82, %87 : vector<13x208xf32>
    %89 = vector.broadcast %0 : vector<1x208xf32> to vector<13x208xf32>
    %90 = arith.addf %88, %89 : vector<13x208xf32>
    %cst_100 = arith.constant 0.000000e+00 : f32
    %91 = vector.broadcast %cst_100 : f32 to vector<13x208xf32>
    %92 = arith.maximumf %90, %91 : vector<13x208xf32>
    %c1_101 = arith.constant 1 : index
    %c0_102 = arith.constant 0 : index
    %c0_103 = arith.constant 0 : index
    %93 = vector.load %arg12[%c1_101, %c0_102, %c0_103] : memref<4x13x208xf32, #tpu.memory_space<vmem>>, vector<1x13x208xf32>
    %94 = vector.shape_cast %93 : vector<1x13x208xf32> to vector<13x208xf32>
    %95 = vector.shape_cast %92 : vector<13x208xf32> to vector<1x13x208xf32>
    tpu.vector_store %arg12[%c1_101, %c0_102, %c0_103], %95 {strides = array<i32>} : memref<4x13x208xf32, #tpu.memory_space<vmem>>, vector<1x13x208xf32>,
    %cst_104 = arith.constant 0.000000e+00 : f32
    %96 = vector.broadcast %cst_104 : f32 to vector<12x384xf32>
    %c1_105 = arith.constant 1 : index
    %c0_106 = arith.constant 0 : index
    %c0_107 = arith.constant 0 : index
    %97 = vector.load %arg12[%c1_105, %c0_106, %c0_107] : memref<4x13x208xf32, #tpu.memory_space<vmem>>, vector<1x12x192xf32>
    %98 = vector.shape_cast %97 : vector<1x12x192xf32> to vector<12x192xf32>
    %c0_108 = arith.constant 0 : index
    %c0_109 = arith.constant 0 : index
    %c0_110 = arith.constant 0 : index
    %99 = vector.load %arg3[%c0_108, %c0_109, %c0_110] : memref<4x192x384xf32, #tpu.memory_space<vmem>>, vector<1x192x384xf32>
    %100 = vector.shape_cast %99 : vector<1x192x384xf32> to vector<192x384xf32>
    %cst_111 = arith.constant dense<0.000000e+00> : vector<12x384xf32>
    %101 = tpu.matmul %98, %100, %cst_111 {dimension_numbers = #tpu.dot_dimension_numbers<[1], [0], [0], [1], [0, 0, 1, 1], [], []>} : vector<12x192xf32>, vector<192x384xf32>, vector<12x384xf32> -> vector<12x384xf32>
    %102 = arith.addf %96, %101 : vector<12x384xf32>
    %c1_112 = arith.constant 1 : index
    %c0_113 = arith.constant 0 : index
    %c16_114 = arith.constant 16 : index
    %103 = vector.load %arg12[%c1_112, %c0_113, %c16_114] : memref<4x13x208xf32, #tpu.memory_space<vmem>>, vector<1x12x192xf32>
    %104 = vector.shape_cast %103 : vector<1x12x192xf32> to vector<12x192xf32>
    %c1_115 = arith.constant 1 : index
    %c0_116 = arith.constant 0 : index
    %c0_117 = arith.constant 0 : index
    %105 = vector.load %arg3[%c1_115, %c0_116, %c0_117] : memref<4x192x384xf32, #tpu.memory_space<vmem>>, vector<1x192x384xf32>
    %106 = vector.shape_cast %105 : vector<1x192x384xf32> to vector<192x384xf32>
    %cst_118 = arith.constant dense<0.000000e+00> : vector<12x384xf32>
    %107 = tpu.matmul %104, %106, %cst_118 {dimension_numbers = #tpu.dot_dimension_numbers<[1], [0], [0], [1], [0, 0, 1, 1], [], []>} : vector<12x192xf32>, vector<192x384xf32>, vector<12x384xf32> -> vector<12x384xf32>
    %108 = arith.addf %102, %107 : vector<12x384xf32>
    %c1_119 = arith.constant 1 : index
    %c1_120 = arith.constant 1 : index
    %c0_121 = arith.constant 0 : index
    %109 = vector.load %arg12[%c1_119, %c1_120, %c0_121] : memref<4x13x208xf32, #tpu.memory_space<vmem>>, vector<1x12x192xf32>
    %110 = vector.shape_cast %109 : vector<1x12x192xf32> to vector<12x192xf32>
    %c2_122 = arith.constant 2 : index
    %c0_123 = arith.constant 0 : index
    %c0_124 = arith.constant 0 : index
    %111 = vector.load %arg3[%c2_122, %c0_123, %c0_124] : memref<4x192x384xf32, #tpu.memory_space<vmem>>, vector<1x192x384xf32>
    %112 = vector.shape_cast %111 : vector<1x192x384xf32> to vector<192x384xf32>
    %cst_125 = arith.constant dense<0.000000e+00> : vector<12x384xf32>
    %113 = tpu.matmul %110, %112, %cst_125 {dimension_numbers = #tpu.dot_dimension_numbers<[1], [0], [0], [1], [0, 0, 1, 1], [], []>} : vector<12x192xf32>, vector<192x384xf32>, vector<12x384xf32> -> vector<12x384xf32>
    %114 = arith.addf %108, %113 : vector<12x384xf32>
    %c1_126 = arith.constant 1 : index
    %c1_127 = arith.constant 1 : index
    %c16_128 = arith.constant 16 : index
    %115 = vector.load %arg12[%c1_126, %c1_127, %c16_128] : memref<4x13x208xf32, #tpu.memory_space<vmem>>, vector<1x12x192xf32>
    %116 = vector.shape_cast %115 : vector<1x12x192xf32> to vector<12x192xf32>
    %c3_129 = arith.constant 3 : index
    %c0_130 = arith.constant 0 : index
    %c0_131 = arith.constant 0 : index
    %117 = vector.load %arg3[%c3_129, %c0_130, %c0_131] : memref<4x192x384xf32, #tpu.memory_space<vmem>>, vector<1x192x384xf32>
    %118 = vector.shape_cast %117 : vector<1x192x384xf32> to vector<192x384xf32>
    %cst_132 = arith.constant dense<0.000000e+00> : vector<12x384xf32>
    %119 = tpu.matmul %116, %118, %cst_132 {dimension_numbers = #tpu.dot_dimension_numbers<[1], [0], [0], [1], [0, 0, 1, 1], [], []>} : vector<12x192xf32>, vector<192x384xf32>, vector<12x384xf32> -> vector<12x384xf32>
    %120 = arith.addf %114, %119 : vector<12x384xf32>
    %121 = vector.broadcast %1 : vector<1x384xf32> to vector<12x384xf32>
    %122 = arith.addf %120, %121 : vector<12x384xf32>
    %c1_133 = arith.constant 1 : index
    %c0_134 = arith.constant 0 : index
    %c0_135 = arith.constant 0 : index
    %123 = vector.load %arg13[%c1_133, %c0_134, %c0_135] : memref<4x12x384xf32, #tpu.memory_space<vmem>>, vector<1x12x384xf32>
    %124 = vector.shape_cast %123 : vector<1x12x384xf32> to vector<12x384xf32>
    %125 = vector.shape_cast %122 : vector<12x384xf32> to vector<1x12x384xf32>
    tpu.vector_store %arg13[%c1_133, %c0_134, %c0_135], %125 {strides = array<i32>} : memref<4x12x384xf32, #tpu.memory_space<vmem>>, vector<1x12x384xf32>,
    %cst_136 = arith.constant 0.000000e+00 : f32
    %126 = vector.broadcast %cst_136 : f32 to vector<13x208xf32>
    %c0_137 = arith.constant 0 : index
    %c1_138 = arith.constant 1 : index
    %c0_139 = arith.constant 0 : index
    %c0_140 = arith.constant 0 : index
    %127 = vector.load %arg0[%c0_137, %c1_138, %c0_139, %c0_140] : memref<2x2x14x14xf32, #tpu.memory_space<vmem>>, vector<1x1x13x13xf32>
    %128 = vector.shape_cast %127 : vector<1x1x13x13xf32> to vector<13x13xf32>
    %c0_141 = arith.constant 0 : index
    %c0_142 = arith.constant 0 : index
    %c0_143 = arith.constant 0 : index
    %129 = vector.load %arg1[%c0_141, %c0_142, %c0_143] : memref<4x13x208xf32, #tpu.memory_space<vmem>>, vector<1x13x208xf32>
    %130 = vector.shape_cast %129 : vector<1x13x208xf32> to vector<13x208xf32>
    %cst_144 = arith.constant dense<0.000000e+00> : vector<13x208xf32>
    %131 = tpu.matmul %128, %130, %cst_144 {dimension_numbers = #tpu.dot_dimension_numbers<[1], [0], [0], [1], [0, 0, 1, 1], [], []>} : vector<13x13xf32>, vector<13x208xf32>, vector<13x208xf32> -> vector<13x208xf32>
    %132 = arith.addf %126, %131 : vector<13x208xf32>
    %c0_145 = arith.constant 0 : index
    %c1_146 = arith.constant 1 : index
    %c0_147 = arith.constant 0 : index
    %c1_148 = arith.constant 1 : index
    %133 = vector.load %arg0[%c0_145, %c1_146, %c0_147, %c1_148] : memref<2x2x14x14xf32, #tpu.memory_space<vmem>>, vector<1x1x13x13xf32>
    %134 = vector.shape_cast %133 : vector<1x1x13x13xf32> to vector<13x13xf32>
    %c1_149 = arith.constant 1 : index
    %c0_150 = arith.constant 0 : index
    %c0_151 = arith.constant 0 : index
    %135 = vector.load %arg1[%c1_149, %c0_150, %c0_151] : memref<4x13x208xf32, #tpu.memory_space<vmem>>, vector<1x13x208xf32>
    %136 = vector.shape_cast %135 : vector<1x13x208xf32> to vector<13x208xf32>
    %cst_152 = arith.constant dense<0.000000e+00> : vector<13x208xf32>
    %137 = tpu.matmul %134, %136, %cst_152 {dimension_numbers = #tpu.dot_dimension_numbers<[1], [0], [0], [1], [0, 0, 1, 1], [], []>} : vector<13x13xf32>, vector<13x208xf32>, vector<13x208xf32> -> vector<13x208xf32>
    %138 = arith.addf %132, %137 : vector<13x208xf32>
    %c0_153 = arith.constant 0 : index
    %c1_154 = arith.constant 1 : index
    %c1_155 = arith.constant 1 : index
    %c0_156 = arith.constant 0 : index
    %139 = vector.load %arg0[%c0_153, %c1_154, %c1_155, %c0_156] : memref<2x2x14x14xf32, #tpu.memory_space<vmem>>, vector<1x1x13x13xf32>
    %140 = vector.shape_cast %139 : vector<1x1x13x13xf32> to vector<13x13xf32>
    %c2_157 = arith.constant 2 : index
    %c0_158 = arith.constant 0 : index
    %c0_159 = arith.constant 0 : index
    %141 = vector.load %arg1[%c2_157, %c0_158, %c0_159] : memref<4x13x208xf32, #tpu.memory_space<vmem>>, vector<1x13x208xf32>
    %142 = vector.shape_cast %141 : vector<1x13x208xf32> to vector<13x208xf32>
    %cst_160 = arith.constant dense<0.000000e+00> : vector<13x208xf32>
    %143 = tpu.matmul %140, %142, %cst_160 {dimension_numbers = #tpu.dot_dimension_numbers<[1], [0], [0], [1], [0, 0, 1, 1], [], []>} : vector<13x13xf32>, vector<13x208xf32>, vector<13x208xf32> -> vector<13x208xf32>
    %144 = arith.addf %138, %143 : vector<13x208xf32>
    %c0_161 = arith.constant 0 : index
    %c1_162 = arith.constant 1 : index
    %c1_163 = arith.constant 1 : index
    %c1_164 = arith.constant 1 : index
    %145 = vector.load %arg0[%c0_161, %c1_162, %c1_163, %c1_164] : memref<2x2x14x14xf32, #tpu.memory_space<vmem>>, vector<1x1x13x13xf32>
    %146 = vector.shape_cast %145 : vector<1x1x13x13xf32> to vector<13x13xf32>
    %c3_165 = arith.constant 3 : index
    %c0_166 = arith.constant 0 : index
    %c0_167 = arith.constant 0 : index
    %147 = vector.load %arg1[%c3_165, %c0_166, %c0_167] : memref<4x13x208xf32, #tpu.memory_space<vmem>>, vector<1x13x208xf32>
    %148 = vector.shape_cast %147 : vector<1x13x208xf32> to vector<13x208xf32>
    %cst_168 = arith.constant dense<0.000000e+00> : vector<13x208xf32>
    %149 = tpu.matmul %146, %148, %cst_168 {dimension_numbers = #tpu.dot_dimension_numbers<[1], [0], [0], [1], [0, 0, 1, 1], [], []>} : vector<13x13xf32>, vector<13x208xf32>, vector<13x208xf32> -> vector<13x208xf32>
    %150 = arith.addf %144, %149 : vector<13x208xf32>
    %151 = vector.broadcast %0 : vector<1x208xf32> to vector<13x208xf32>
    %152 = arith.addf %150, %151 : vector<13x208xf32>
    %cst_169 = arith.constant 0.000000e+00 : f32
    %153 = vector.broadcast %cst_169 : f32 to vector<13x208xf32>
    %154 = arith.maximumf %152, %153 : vector<13x208xf32>
    %c2_170 = arith.constant 2 : index
    %c0_171 = arith.constant 0 : index
    %c0_172 = arith.constant 0 : index
    %155 = vector.load %arg12[%c2_170, %c0_171, %c0_172] : memref<4x13x208xf32, #tpu.memory_space<vmem>>, vector<1x13x208xf32>
    %156 = vector.shape_cast %155 : vector<1x13x208xf32> to vector<13x208xf32>
    %157 = vector.shape_cast %154 : vector<13x208xf32> to vector<1x13x208xf32>
    tpu.vector_store %arg12[%c2_170, %c0_171, %c0_172], %157 {strides = array<i32>} : memref<4x13x208xf32, #tpu.memory_space<vmem>>, vector<1x13x208xf32>,
    %cst_173 = arith.constant 0.000000e+00 : f32
    %158 = vector.broadcast %cst_173 : f32 to vector<12x384xf32>
    %c2_174 = arith.constant 2 : index
    %c0_175 = arith.constant 0 : index
    %c0_176 = arith.constant 0 : index
    %159 = vector.load %arg12[%c2_174, %c0_175, %c0_176] : memref<4x13x208xf32, #tpu.memory_space<vmem>>, vector<1x12x192xf32>
    %160 = vector.shape_cast %159 : vector<1x12x192xf32> to vector<12x192xf32>
    %c0_177 = arith.constant 0 : index
    %c0_178 = arith.constant 0 : index
    %c0_179 = arith.constant 0 : index
    %161 = vector.load %arg3[%c0_177, %c0_178, %c0_179] : memref<4x192x384xf32, #tpu.memory_space<vmem>>, vector<1x192x384xf32>
    %162 = vector.shape_cast %161 : vector<1x192x384xf32> to vector<192x384xf32>
    %cst_180 = arith.constant dense<0.000000e+00> : vector<12x384xf32>
    %163 = tpu.matmul %160, %162, %cst_180 {dimension_numbers = #tpu.dot_dimension_numbers<[1], [0], [0], [1], [0, 0, 1, 1], [], []>} : vector<12x192xf32>, vector<192x384xf32>, vector<12x384xf32> -> vector<12x384xf32>
    %164 = arith.addf %158, %163 : vector<12x384xf32>
    %c2_181 = arith.constant 2 : index
    %c0_182 = arith.constant 0 : index
    %c16_183 = arith.constant 16 : index
    %165 = vector.load %arg12[%c2_181, %c0_182, %c16_183] : memref<4x13x208xf32, #tpu.memory_space<vmem>>, vector<1x12x192xf32>
    %166 = vector.shape_cast %165 : vector<1x12x192xf32> to vector<12x192xf32>
    %c1_184 = arith.constant 1 : index
    %c0_185 = arith.constant 0 : index
    %c0_186 = arith.constant 0 : index
    %167 = vector.load %arg3[%c1_184, %c0_185, %c0_186] : memref<4x192x384xf32, #tpu.memory_space<vmem>>, vector<1x192x384xf32>
    %168 = vector.shape_cast %167 : vector<1x192x384xf32> to vector<192x384xf32>
    %cst_187 = arith.constant dense<0.000000e+00> : vector<12x384xf32>
    %169 = tpu.matmul %166, %168, %cst_187 {dimension_numbers = #tpu.dot_dimension_numbers<[1], [0], [0], [1], [0, 0, 1, 1], [], []>} : vector<12x192xf32>, vector<192x384xf32>, vector<12x384xf32> -> vector<12x384xf32>
    %170 = arith.addf %164, %169 : vector<12x384xf32>
    %c2_188 = arith.constant 2 : index
    %c1_189 = arith.constant 1 : index
    %c0_190 = arith.constant 0 : index
    %171 = vector.load %arg12[%c2_188, %c1_189, %c0_190] : memref<4x13x208xf32, #tpu.memory_space<vmem>>, vector<1x12x192xf32>
    %172 = vector.shape_cast %171 : vector<1x12x192xf32> to vector<12x192xf32>
    %c2_191 = arith.constant 2 : index
    %c0_192 = arith.constant 0 : index
    %c0_193 = arith.constant 0 : index
    %173 = vector.load %arg3[%c2_191, %c0_192, %c0_193] : memref<4x192x384xf32, #tpu.memory_space<vmem>>, vector<1x192x384xf32>
    %174 = vector.shape_cast %173 : vector<1x192x384xf32> to vector<192x384xf32>
    %cst_194 = arith.constant dense<0.000000e+00> : vector<12x384xf32>
    %175 = tpu.matmul %172, %174, %cst_194 {dimension_numbers = #tpu.dot_dimension_numbers<[1], [0], [0], [1], [0, 0, 1, 1], [], []>} : vector<12x192xf32>, vector<192x384xf32>, vector<12x384xf32> -> vector<12x384xf32>
    %176 = arith.addf %170, %175 : vector<12x384xf32>
    %c2_195 = arith.constant 2 : index
    %c1_196 = arith.constant 1 : index
    %c16_197 = arith.constant 16 : index
    %177 = vector.load %arg12[%c2_195, %c1_196, %c16_197] : memref<4x13x208xf32, #tpu.memory_space<vmem>>, vector<1x12x192xf32>
    %178 = vector.shape_cast %177 : vector<1x12x192xf32> to vector<12x192xf32>
    %c3_198 = arith.constant 3 : index
    %c0_199 = arith.constant 0 : index
    %c0_200 = arith.constant 0 : index
    %179 = vector.load %arg3[%c3_198, %c0_199, %c0_200] : memref<4x192x384xf32, #tpu.memory_space<vmem>>, vector<1x192x384xf32>
    %180 = vector.shape_cast %179 : vector<1x192x384xf32> to vector<192x384xf32>
    %cst_201 = arith.constant dense<0.000000e+00> : vector<12x384xf32>
    %181 = tpu.matmul %178, %180, %cst_201 {dimension_numbers = #tpu.dot_dimension_numbers<[1], [0], [0], [1], [0, 0, 1, 1], [], []>} : vector<12x192xf32>, vector<192x384xf32>, vector<12x384xf32> -> vector<12x384xf32>
    %182 = arith.addf %176, %181 : vector<12x384xf32>
    %183 = vector.broadcast %1 : vector<1x384xf32> to vector<12x384xf32>
    %184 = arith.addf %182, %183 : vector<12x384xf32>
    %c2_202 = arith.constant 2 : index
    %c0_203 = arith.constant 0 : index
    %c0_204 = arith.constant 0 : index
    %185 = vector.load %arg13[%c2_202, %c0_203, %c0_204] : memref<4x12x384xf32, #tpu.memory_space<vmem>>, vector<1x12x384xf32>
    %186 = vector.shape_cast %185 : vector<1x12x384xf32> to vector<12x384xf32>
    %187 = vector.shape_cast %184 : vector<12x384xf32> to vector<1x12x384xf32>
    tpu.vector_store %arg13[%c2_202, %c0_203, %c0_204], %187 {strides = array<i32>} : memref<4x12x384xf32, #tpu.memory_space<vmem>>, vector<1x12x384xf32>,
    %cst_205 = arith.constant 0.000000e+00 : f32
    %188 = vector.broadcast %cst_205 : f32 to vector<13x208xf32>
    %c1_206 = arith.constant 1 : index
    %c1_207 = arith.constant 1 : index
    %c0_208 = arith.constant 0 : index
    %c0_209 = arith.constant 0 : index
    %189 = vector.load %arg0[%c1_206, %c1_207, %c0_208, %c0_209] : memref<2x2x14x14xf32, #tpu.memory_space<vmem>>, vector<1x1x13x13xf32>
    %190 = vector.shape_cast %189 : vector<1x1x13x13xf32> to vector<13x13xf32>
    %c0_210 = arith.constant 0 : index
    %c0_211 = arith.constant 0 : index
    %c0_212 = arith.constant 0 : index
    %191 = vector.load %arg1[%c0_210, %c0_211, %c0_212] : memref<4x13x208xf32, #tpu.memory_space<vmem>>, vector<1x13x208xf32>
    %192 = vector.shape_cast %191 : vector<1x13x208xf32> to vector<13x208xf32>
    %cst_213 = arith.constant dense<0.000000e+00> : vector<13x208xf32>
    %193 = tpu.matmul %190, %192, %cst_213 {dimension_numbers = #tpu.dot_dimension_numbers<[1], [0], [0], [1], [0, 0, 1, 1], [], []>} : vector<13x13xf32>, vector<13x208xf32>, vector<13x208xf32> -> vector<13x208xf32>
    %194 = arith.addf %188, %193 : vector<13x208xf32>
    %c1_214 = arith.constant 1 : index
    %c1_215 = arith.constant 1 : index
    %c0_216 = arith.constant 0 : index
    %c1_217 = arith.constant 1 : index
    %195 = vector.load %arg0[%c1_214, %c1_215, %c0_216, %c1_217] : memref<2x2x14x14xf32, #tpu.memory_space<vmem>>, vector<1x1x13x13xf32>
    %196 = vector.shape_cast %195 : vector<1x1x13x13xf32> to vector<13x13xf32>
    %c1_218 = arith.constant 1 : index
    %c0_219 = arith.constant 0 : index
    %c0_220 = arith.constant 0 : index
    %197 = vector.load %arg1[%c1_218, %c0_219, %c0_220] : memref<4x13x208xf32, #tpu.memory_space<vmem>>, vector<1x13x208xf32>
    %198 = vector.shape_cast %197 : vector<1x13x208xf32> to vector<13x208xf32>
    %cst_221 = arith.constant dense<0.000000e+00> : vector<13x208xf32>
    %199 = tpu.matmul %196, %198, %cst_221 {dimension_numbers = #tpu.dot_dimension_numbers<[1], [0], [0], [1], [0, 0, 1, 1], [], []>} : vector<13x13xf32>, vector<13x208xf32>, vector<13x208xf32> -> vector<13x208xf32>
    %200 = arith.addf %194, %199 : vector<13x208xf32>
    %c1_222 = arith.constant 1 : index
    %c1_223 = arith.constant 1 : index
    %c1_224 = arith.constant 1 : index
    %c0_225 = arith.constant 0 : index
    %201 = vector.load %arg0[%c1_222, %c1_223, %c1_224, %c0_225] : memref<2x2x14x14xf32, #tpu.memory_space<vmem>>, vector<1x1x13x13xf32>
    %202 = vector.shape_cast %201 : vector<1x1x13x13xf32> to vector<13x13xf32>
    %c2_226 = arith.constant 2 : index
    %c0_227 = arith.constant 0 : index
    %c0_228 = arith.constant 0 : index
    %203 = vector.load %arg1[%c2_226, %c0_227, %c0_228] : memref<4x13x208xf32, #tpu.memory_space<vmem>>, vector<1x13x208xf32>
    %204 = vector.shape_cast %203 : vector<1x13x208xf32> to vector<13x208xf32>
    %cst_229 = arith.constant dense<0.000000e+00> : vector<13x208xf32>
    %205 = tpu.matmul %202, %204, %cst_229 {dimension_numbers = #tpu.dot_dimension_numbers<[1], [0], [0], [1], [0, 0, 1, 1], [], []>} : vector<13x13xf32>, vector<13x208xf32>, vector<13x208xf32> -> vector<13x208xf32>
    %206 = arith.addf %200, %205 : vector<13x208xf32>
    %c1_230 = arith.constant 1 : index
    %c1_231 = arith.constant 1 : index
    %c1_232 = arith.constant 1 : index
    %c1_233 = arith.constant 1 : index
    %207 = vector.load %arg0[%c1_230, %c1_231, %c1_232, %c1_233] : memref<2x2x14x14xf32, #tpu.memory_space<vmem>>, vector<1x1x13x13xf32>
    %208 = vector.shape_cast %207 : vector<1x1x13x13xf32> to vector<13x13xf32>
    %c3_234 = arith.constant 3 : index
    %c0_235 = arith.constant 0 : index
    %c0_236 = arith.constant 0 : index
    %209 = vector.load %arg1[%c3_234, %c0_235, %c0_236] : memref<4x13x208xf32, #tpu.memory_space<vmem>>, vector<1x13x208xf32>
    %210 = vector.shape_cast %209 : vector<1x13x208xf32> to vector<13x208xf32>
    %cst_237 = arith.constant dense<0.000000e+00> : vector<13x208xf32>
    %211 = tpu.matmul %208, %210, %cst_237 {dimension_numbers = #tpu.dot_dimension_numbers<[1], [0], [0], [1], [0, 0, 1, 1], [], []>} : vector<13x13xf32>, vector<13x208xf32>, vector<13x208xf32> -> vector<13x208xf32>
    %212 = arith.addf %206, %211 : vector<13x208xf32>
    %213 = vector.broadcast %0 : vector<1x208xf32> to vector<13x208xf32>
    %214 = arith.addf %212, %213 : vector<13x208xf32>
    %cst_238 = arith.constant 0.000000e+00 : f32
    %215 = vector.broadcast %cst_238 : f32 to vector<13x208xf32>
    %216 = arith.maximumf %214, %215 : vector<13x208xf32>
    %c3_239 = arith.constant 3 : index
    %c0_240 = arith.constant 0 : index
    %c0_241 = arith.constant 0 : index
    %217 = vector.load %arg12[%c3_239, %c0_240, %c0_241] : memref<4x13x208xf32, #tpu.memory_space<vmem>>, vector<1x13x208xf32>
    %218 = vector.shape_cast %217 : vector<1x13x208xf32> to vector<13x208xf32>
    %219 = vector.shape_cast %216 : vector<13x208xf32> to vector<1x13x208xf32>
    tpu.vector_store %arg12[%c3_239, %c0_240, %c0_241], %219 {strides = array<i32>} : memref<4x13x208xf32, #tpu.memory_space<vmem>>, vector<1x13x208xf32>,
    %cst_242 = arith.constant 0.000000e+00 : f32
    %220 = vector.broadcast %cst_242 : f32 to vector<12x384xf32>
    %c3_243 = arith.constant 3 : index
    %c0_244 = arith.constant 0 : index
    %c0_245 = arith.constant 0 : index
    %221 = vector.load %arg12[%c3_243, %c0_244, %c0_245] : memref<4x13x208xf32, #tpu.memory_space<vmem>>, vector<1x12x192xf32>
    %222 = vector.shape_cast %221 : vector<1x12x192xf32> to vector<12x192xf32>
    %c0_246 = arith.constant 0 : index
    %c0_247 = arith.constant 0 : index
    %c0_248 = arith.constant 0 : index
    %223 = vector.load %arg3[%c0_246, %c0_247, %c0_248] : memref<4x192x384xf32, #tpu.memory_space<vmem>>, vector<1x192x384xf32>
    %224 = vector.shape_cast %223 : vector<1x192x384xf32> to vector<192x384xf32>
    %cst_249 = arith.constant dense<0.000000e+00> : vector<12x384xf32>
    %225 = tpu.matmul %222, %224, %cst_249 {dimension_numbers = #tpu.dot_dimension_numbers<[1], [0], [0], [1], [0, 0, 1, 1], [], []>} : vector<12x192xf32>, vector<192x384xf32>, vector<12x384xf32> -> vector<12x384xf32>
    %226 = arith.addf %220, %225 : vector<12x384xf32>
    %c3_250 = arith.constant 3 : index
    %c0_251 = arith.constant 0 : index
    %c16_252 = arith.constant 16 : index
    %227 = vector.load %arg12[%c3_250, %c0_251, %c16_252] : memref<4x13x208xf32, #tpu.memory_space<vmem>>, vector<1x12x192xf32>
    %228 = vector.shape_cast %227 : vector<1x12x192xf32> to vector<12x192xf32>
    %c1_253 = arith.constant 1 : index
    %c0_254 = arith.constant 0 : index
    %c0_255 = arith.constant 0 : index
    %229 = vector.load %arg3[%c1_253, %c0_254, %c0_255] : memref<4x192x384xf32, #tpu.memory_space<vmem>>, vector<1x192x384xf32>
    %230 = vector.shape_cast %229 : vector<1x192x384xf32> to vector<192x384xf32>
    %cst_256 = arith.constant dense<0.000000e+00> : vector<12x384xf32>
    %231 = tpu.matmul %228, %230, %cst_256 {dimension_numbers = #tpu.dot_dimension_numbers<[1], [0], [0], [1], [0, 0, 1, 1], [], []>} : vector<12x192xf32>, vector<192x384xf32>, vector<12x384xf32> -> vector<12x384xf32>
    %232 = arith.addf %226, %231 : vector<12x384xf32>
    %c3_257 = arith.constant 3 : index
    %c1_258 = arith.constant 1 : index
    %c0_259 = arith.constant 0 : index
    %233 = vector.load %arg12[%c3_257, %c1_258, %c0_259] : memref<4x13x208xf32, #tpu.memory_space<vmem>>, vector<1x12x192xf32>
    %234 = vector.shape_cast %233 : vector<1x12x192xf32> to vector<12x192xf32>
    %c2_260 = arith.constant 2 : index
    %c0_261 = arith.constant 0 : index
    %c0_262 = arith.constant 0 : index
    %235 = vector.load %arg3[%c2_260, %c0_261, %c0_262] : memref<4x192x384xf32, #tpu.memory_space<vmem>>, vector<1x192x384xf32>
    %236 = vector.shape_cast %235 : vector<1x192x384xf32> to vector<192x384xf32>
    %cst_263 = arith.constant dense<0.000000e+00> : vector<12x384xf32>
    %237 = tpu.matmul %234, %236, %cst_263 {dimension_numbers = #tpu.dot_dimension_numbers<[1], [0], [0], [1], [0, 0, 1, 1], [], []>} : vector<12x192xf32>, vector<192x384xf32>, vector<12x384xf32> -> vector<12x384xf32>
    %238 = arith.addf %232, %237 : vector<12x384xf32>
    %c3_264 = arith.constant 3 : index
    %c1_265 = arith.constant 1 : index
    %c16_266 = arith.constant 16 : index
    %239 = vector.load %arg12[%c3_264, %c1_265, %c16_266] : memref<4x13x208xf32, #tpu.memory_space<vmem>>, vector<1x12x192xf32>
    %240 = vector.shape_cast %239 : vector<1x12x192xf32> to vector<12x192xf32>
    %c3_267 = arith.constant 3 : index
    %c0_268 = arith.constant 0 : index
    %c0_269 = arith.constant 0 : index
    %241 = vector.load %arg3[%c3_267, %c0_268, %c0_269] : memref<4x192x384xf32, #tpu.memory_space<vmem>>, vector<1x192x384xf32>
    %242 = vector.shape_cast %241 : vector<1x192x384xf32> to vector<192x384xf32>
    %cst_270 = arith.constant dense<0.000000e+00> : vector<12x384xf32>
    %243 = tpu.matmul %240, %242, %cst_270 {dimension_numbers = #tpu.dot_dimension_numbers<[1], [0], [0], [1], [0, 0, 1, 1], [], []>} : vector<12x192xf32>, vector<192x384xf32>, vector<12x384xf32> -> vector<12x384xf32>
    %244 = arith.addf %238, %243 : vector<12x384xf32>
    %245 = vector.broadcast %1 : vector<1x384xf32> to vector<12x384xf32>
    %246 = arith.addf %244, %245 : vector<12x384xf32>
    %c3_271 = arith.constant 3 : index
    %c0_272 = arith.constant 0 : index
    %c0_273 = arith.constant 0 : index
    %247 = vector.load %arg13[%c3_271, %c0_272, %c0_273] : memref<4x12x384xf32, #tpu.memory_space<vmem>>, vector<1x12x384xf32>
    %248 = vector.shape_cast %247 : vector<1x12x384xf32> to vector<12x384xf32>
    %249 = vector.shape_cast %246 : vector<12x384xf32> to vector<1x12x384xf32>
    tpu.vector_store %arg13[%c3_271, %c0_272, %c0_273], %249 {strides = array<i32>} : memref<4x12x384xf32, #tpu.memory_space<vmem>>, vector<1x12x384xf32>,
    %cst_274 = arith.constant 0.000000e+00 : f32
    %250 = vector.broadcast %cst_274 : f32 to vector<4x64xf32>
    %c0_275 = arith.constant 0 : index
    %c0_276 = arith.constant 0 : index
    %c0_277 = arith.constant 0 : index
    %251 = vector.load %arg13[%c0_275, %c0_276, %c0_277] : memref<4x12x384xf32, #tpu.memory_space<vmem>>, vector<4x1x384xf32>
    %252 = vector.shape_cast %251 : vector<4x1x384xf32> to vector<4x384xf32>
    %c0_278 = arith.constant 0 : index
    %c0_279 = arith.constant 0 : index
    %c0_280 = arith.constant 0 : index
    %253 = vector.load %arg5[%c0_278, %c0_279, %c0_280] : memref<12x384x64xf32, #tpu.memory_space<vmem>>, vector<1x384x64xf32>
    %254 = vector.shape_cast %253 : vector<1x384x64xf32> to vector<384x64xf32>
    %cst_281 = arith.constant dense<0.000000e+00> : vector<4x64xf32>
    %255 = tpu.matmul %252, %254, %cst_281 {dimension_numbers = #tpu.dot_dimension_numbers<[1], [0], [0], [1], [0, 0, 1, 1], [], []>} : vector<4x384xf32>, vector<384x64xf32>, vector<4x64xf32> -> vector<4x64xf32>
    %256 = arith.addf %250, %255 : vector<4x64xf32>
    %c0_282 = arith.constant 0 : index
    %c1_283 = arith.constant 1 : index
    %c0_284 = arith.constant 0 : index
    %257 = vector.load %arg13[%c0_282, %c1_283, %c0_284] : memref<4x12x384xf32, #tpu.memory_space<vmem>>, vector<4x1x384xf32>
    %258 = vector.shape_cast %257 : vector<4x1x384xf32> to vector<4x384xf32>
    %c1_285 = arith.constant 1 : index
    %c0_286 = arith.constant 0 : index
    %c0_287 = arith.constant 0 : index
    %259 = vector.load %arg5[%c1_285, %c0_286, %c0_287] : memref<12x384x64xf32, #tpu.memory_space<vmem>>, vector<1x384x64xf32>
    %260 = vector.shape_cast %259 : vector<1x384x64xf32> to vector<384x64xf32>
    %cst_288 = arith.constant dense<0.000000e+00> : vector<4x64xf32>
    %261 = tpu.matmul %258, %260, %cst_288 {dimension_numbers = #tpu.dot_dimension_numbers<[1], [0], [0], [1], [0, 0, 1, 1], [], []>} : vector<4x384xf32>, vector<384x64xf32>, vector<4x64xf32> -> vector<4x64xf32>
    %262 = arith.addf %256, %261 : vector<4x64xf32>
    %c0_289 = arith.constant 0 : index
    %c2_290 = arith.constant 2 : index
    %c0_291 = arith.constant 0 : index
    %263 = vector.load %arg13[%c0_289, %c2_290, %c0_291] : memref<4x12x384xf32, #tpu.memory_space<vmem>>, vector<4x1x384xf32>
    %264 = vector.shape_cast %263 : vector<4x1x384xf32> to vector<4x384xf32>
    %c2_292 = arith.constant 2 : index
    %c0_293 = arith.constant 0 : index
    %c0_294 = arith.constant 0 : index
    %265 = vector.load %arg5[%c2_292, %c0_293, %c0_294] : memref<12x384x64xf32, #tpu.memory_space<vmem>>, vector<1x384x64xf32>
    %266 = vector.shape_cast %265 : vector<1x384x64xf32> to vector<384x64xf32>
    %cst_295 = arith.constant dense<0.000000e+00> : vector<4x64xf32>
    %267 = tpu.matmul %264, %266, %cst_295 {dimension_numbers = #tpu.dot_dimension_numbers<[1], [0], [0], [1], [0, 0, 1, 1], [], []>} : vector<4x384xf32>, vector<384x64xf32>, vector<4x64xf32> -> vector<4x64xf32>
    %268 = arith.addf %262, %267 : vector<4x64xf32>
    %c0_296 = arith.constant 0 : index
    %c3_297 = arith.constant 3 : index
    %c0_298 = arith.constant 0 : index
    %269 = vector.load %arg13[%c0_296, %c3_297, %c0_298] : memref<4x12x384xf32, #tpu.memory_space<vmem>>, vector<4x1x384xf32>
    %270 = vector.shape_cast %269 : vector<4x1x384xf32> to vector<4x384xf32>
    %c3_299 = arith.constant 3 : index
    %c0_300 = arith.constant 0 : index
    %c0_301 = arith.constant 0 : index
    %271 = vector.load %arg5[%c3_299, %c0_300, %c0_301] : memref<12x384x64xf32, #tpu.memory_space<vmem>>, vector<1x384x64xf32>
    %272 = vector.shape_cast %271 : vector<1x384x64xf32> to vector<384x64xf32>
    %cst_302 = arith.constant dense<0.000000e+00> : vector<4x64xf32>
    %273 = tpu.matmul %270, %272, %cst_302 {dimension_numbers = #tpu.dot_dimension_numbers<[1], [0], [0], [1], [0, 0, 1, 1], [], []>} : vector<4x384xf32>, vector<384x64xf32>, vector<4x64xf32> -> vector<4x64xf32>
    %274 = arith.addf %268, %273 : vector<4x64xf32>
    %c0_303 = arith.constant 0 : index
    %c4 = arith.constant 4 : index
    %c0_304 = arith.constant 0 : index
    %275 = vector.load %arg13[%c0_303, %c4, %c0_304] : memref<4x12x384xf32, #tpu.memory_space<vmem>>, vector<4x1x384xf32>
    %276 = vector.shape_cast %275 : vector<4x1x384xf32> to vector<4x384xf32>
    %c4_305 = arith.constant 4 : index
    %c0_306 = arith.constant 0 : index
    %c0_307 = arith.constant 0 : index
    %277 = vector.load %arg5[%c4_305, %c0_306, %c0_307] : memref<12x384x64xf32, #tpu.memory_space<vmem>>, vector<1x384x64xf32>
    %278 = vector.shape_cast %277 : vector<1x384x64xf32> to vector<384x64xf32>
    %cst_308 = arith.constant dense<0.000000e+00> : vector<4x64xf32>
    %279 = tpu.matmul %276, %278, %cst_308 {dimension_numbers = #tpu.dot_dimension_numbers<[1], [0], [0], [1], [0, 0, 1, 1], [], []>} : vector<4x384xf32>, vector<384x64xf32>, vector<4x64xf32> -> vector<4x64xf32>
    %280 = arith.addf %274, %279 : vector<4x64xf32>
    %c0_309 = arith.constant 0 : index
    %c5 = arith.constant 5 : index
    %c0_310 = arith.constant 0 : index
    %281 = vector.load %arg13[%c0_309, %c5, %c0_310] : memref<4x12x384xf32, #tpu.memory_space<vmem>>, vector<4x1x384xf32>
    %282 = vector.shape_cast %281 : vector<4x1x384xf32> to vector<4x384xf32>
    %c5_311 = arith.constant 5 : index
    %c0_312 = arith.constant 0 : index
    %c0_313 = arith.constant 0 : index
    %283 = vector.load %arg5[%c5_311, %c0_312, %c0_313] : memref<12x384x64xf32, #tpu.memory_space<vmem>>, vector<1x384x64xf32>
    %284 = vector.shape_cast %283 : vector<1x384x64xf32> to vector<384x64xf32>
    %cst_314 = arith.constant dense<0.000000e+00> : vector<4x64xf32>
    %285 = tpu.matmul %282, %284, %cst_314 {dimension_numbers = #tpu.dot_dimension_numbers<[1], [0], [0], [1], [0, 0, 1, 1], [], []>} : vector<4x384xf32>, vector<384x64xf32>, vector<4x64xf32> -> vector<4x64xf32>
    %286 = arith.addf %280, %285 : vector<4x64xf32>
    %c0_315 = arith.constant 0 : index
    %c6 = arith.constant 6 : index
    %c0_316 = arith.constant 0 : index
    %287 = vector.load %arg13[%c0_315, %c6, %c0_316] : memref<4x12x384xf32, #tpu.memory_space<vmem>>, vector<4x1x384xf32>
    %288 = vector.shape_cast %287 : vector<4x1x384xf32> to vector<4x384xf32>
    %c6_317 = arith.constant 6 : index
    %c0_318 = arith.constant 0 : index
    %c0_319 = arith.constant 0 : index
    %289 = vector.load %arg5[%c6_317, %c0_318, %c0_319] : memref<12x384x64xf32, #tpu.memory_space<vmem>>, vector<1x384x64xf32>
    %290 = vector.shape_cast %289 : vector<1x384x64xf32> to vector<384x64xf32>
    %cst_320 = arith.constant dense<0.000000e+00> : vector<4x64xf32>
    %291 = tpu.matmul %288, %290, %cst_320 {dimension_numbers = #tpu.dot_dimension_numbers<[1], [0], [0], [1], [0, 0, 1, 1], [], []>} : vector<4x384xf32>, vector<384x64xf32>, vector<4x64xf32> -> vector<4x64xf32>
    %292 = arith.addf %286, %291 : vector<4x64xf32>
    %c0_321 = arith.constant 0 : index
    %c7 = arith.constant 7 : index
    %c0_322 = arith.constant 0 : index
    %293 = vector.load %arg13[%c0_321, %c7, %c0_322] : memref<4x12x384xf32, #tpu.memory_space<vmem>>, vector<4x1x384xf32>
    %294 = vector.shape_cast %293 : vector<4x1x384xf32> to vector<4x384xf32>
    %c7_323 = arith.constant 7 : index
    %c0_324 = arith.constant 0 : index
    %c0_325 = arith.constant 0 : index
    %295 = vector.load %arg5[%c7_323, %c0_324, %c0_325] : memref<12x384x64xf32, #tpu.memory_space<vmem>>, vector<1x384x64xf32>
    %296 = vector.shape_cast %295 : vector<1x384x64xf32> to vector<384x64xf32>
    %cst_326 = arith.constant dense<0.000000e+00> : vector<4x64xf32>
    %297 = tpu.matmul %294, %296, %cst_326 {dimension_numbers = #tpu.dot_dimension_numbers<[1], [0], [0], [1], [0, 0, 1, 1], [], []>} : vector<4x384xf32>, vector<384x64xf32>, vector<4x64xf32> -> vector<4x64xf32>
    %298 = arith.addf %292, %297 : vector<4x64xf32>
    %c0_327 = arith.constant 0 : index
    %c8 = arith.constant 8 : index
    %c0_328 = arith.constant 0 : index
    %299 = vector.load %arg13[%c0_327, %c8, %c0_328] : memref<4x12x384xf32, #tpu.memory_space<vmem>>, vector<4x1x384xf32>
    %300 = vector.shape_cast %299 : vector<4x1x384xf32> to vector<4x384xf32>
    %c8_329 = arith.constant 8 : index
    %c0_330 = arith.constant 0 : index
    %c0_331 = arith.constant 0 : index
    %301 = vector.load %arg5[%c8_329, %c0_330, %c0_331] : memref<12x384x64xf32, #tpu.memory_space<vmem>>, vector<1x384x64xf32>
    %302 = vector.shape_cast %301 : vector<1x384x64xf32> to vector<384x64xf32>
    %cst_332 = arith.constant dense<0.000000e+00> : vector<4x64xf32>
    %303 = tpu.matmul %300, %302, %cst_332 {dimension_numbers = #tpu.dot_dimension_numbers<[1], [0], [0], [1], [0, 0, 1, 1], [], []>} : vector<4x384xf32>, vector<384x64xf32>, vector<4x64xf32> -> vector<4x64xf32>
    %304 = arith.addf %298, %303 : vector<4x64xf32>
    %c0_333 = arith.constant 0 : index
    %c9 = arith.constant 9 : index
    %c0_334 = arith.constant 0 : index
    %305 = vector.load %arg13[%c0_333, %c9, %c0_334] : memref<4x12x384xf32, #tpu.memory_space<vmem>>, vector<4x1x384xf32>
    %306 = vector.shape_cast %305 : vector<4x1x384xf32> to vector<4x384xf32>
    %c9_335 = arith.constant 9 : index
    %c0_336 = arith.constant 0 : index
    %c0_337 = arith.constant 0 : index
    %307 = vector.load %arg5[%c9_335, %c0_336, %c0_337] : memref<12x384x64xf32, #tpu.memory_space<vmem>>, vector<1x384x64xf32>
    %308 = vector.shape_cast %307 : vector<1x384x64xf32> to vector<384x64xf32>
    %cst_338 = arith.constant dense<0.000000e+00> : vector<4x64xf32>
    %309 = tpu.matmul %306, %308, %cst_338 {dimension_numbers = #tpu.dot_dimension_numbers<[1], [0], [0], [1], [0, 0, 1, 1], [], []>} : vector<4x384xf32>, vector<384x64xf32>, vector<4x64xf32> -> vector<4x64xf32>
    %310 = arith.addf %304, %309 : vector<4x64xf32>
    %c0_339 = arith.constant 0 : index
    %c10 = arith.constant 10 : index
    %c0_340 = arith.constant 0 : index
    %311 = vector.load %arg13[%c0_339, %c10, %c0_340] : memref<4x12x384xf32, #tpu.memory_space<vmem>>, vector<4x1x384xf32>
    %312 = vector.shape_cast %311 : vector<4x1x384xf32> to vector<4x384xf32>
    %c10_341 = arith.constant 10 : index
    %c0_342 = arith.constant 0 : index
    %c0_343 = arith.constant 0 : index
    %313 = vector.load %arg5[%c10_341, %c0_342, %c0_343] : memref<12x384x64xf32, #tpu.memory_space<vmem>>, vector<1x384x64xf32>
    %314 = vector.shape_cast %313 : vector<1x384x64xf32> to vector<384x64xf32>
    %cst_344 = arith.constant dense<0.000000e+00> : vector<4x64xf32>
    %315 = tpu.matmul %312, %314, %cst_344 {dimension_numbers = #tpu.dot_dimension_numbers<[1], [0], [0], [1], [0, 0, 1, 1], [], []>} : vector<4x384xf32>, vector<384x64xf32>, vector<4x64xf32> -> vector<4x64xf32>
    %316 = arith.addf %310, %315 : vector<4x64xf32>
    %c0_345 = arith.constant 0 : index
    %c11 = arith.constant 11 : index
    %c0_346 = arith.constant 0 : index
    %317 = vector.load %arg13[%c0_345, %c11, %c0_346] : memref<4x12x384xf32, #tpu.memory_space<vmem>>, vector<4x1x384xf32>
    %318 = vector.shape_cast %317 : vector<4x1x384xf32> to vector<4x384xf32>
    %c11_347 = arith.constant 11 : index
    %c0_348 = arith.constant 0 : index
    %c0_349 = arith.constant 0 : index
    %319 = vector.load %arg5[%c11_347, %c0_348, %c0_349] : memref<12x384x64xf32, #tpu.memory_space<vmem>>, vector<1x384x64xf32>
    %320 = vector.shape_cast %319 : vector<1x384x64xf32> to vector<384x64xf32>
    %cst_350 = arith.constant dense<0.000000e+00> : vector<4x64xf32>
    %321 = tpu.matmul %318, %320, %cst_350 {dimension_numbers = #tpu.dot_dimension_numbers<[1], [0], [0], [1], [0, 0, 1, 1], [], []>} : vector<4x384xf32>, vector<384x64xf32>, vector<4x64xf32> -> vector<4x64xf32>
    %322 = arith.addf %316, %321 : vector<4x64xf32>
    %c0_351 = arith.constant 0 : index
    %c0_352 = arith.constant 0 : index
    %323 = vector.load %arg6[%c0_351, %c0_352] : memref<1x64xf32, #tpu.memory_space<vmem>>, vector<1x64xf32>
    %324 = vector.broadcast %323 : vector<1x64xf32> to vector<4x64xf32>
    %325 = arith.addf %322, %324 : vector<4x64xf32>
    %cst_353 = arith.constant 0.000000e+00 : f32
    %326 = vector.broadcast %cst_353 : f32 to vector<4x64xf32>
    %327 = arith.maximumf %325, %326 : vector<4x64xf32>
    %c0_354 = arith.constant 0 : index
    %c0_355 = arith.constant 0 : index
    %328 = vector.load %arg7[%c0_354, %c0_355] : memref<64x10xf32, #tpu.memory_space<vmem>>, vector<64x10xf32>
    %cst_356 = arith.constant dense<0.000000e+00> : vector<4x10xf32>
    %329 = tpu.matmul %327, %328, %cst_356 {dimension_numbers = #tpu.dot_dimension_numbers<[1], [0], [0], [1], [0, 0, 1, 1], [], []>} : vector<4x64xf32>, vector<64x10xf32>, vector<4x10xf32> -> vector<4x10xf32>
    %c0_357 = arith.constant 0 : index
    %c0_358 = arith.constant 0 : index
    %330 = vector.load %arg8[%c0_357, %c0_358] : memref<1x10xf32, #tpu.memory_space<vmem>>, vector<1x10xf32>
    %331 = vector.broadcast %330 : vector<1x10xf32> to vector<4x10xf32>
    %332 = arith.addf %329, %331 : vector<4x10xf32>
    %cst_359 = arith.constant dense<0xFF800000> : vector<4xf32>
    %333 = vector.multi_reduction <maximumf>, %332, %cst_359 [1] : vector<4x10xf32> to vector<4xf32>
    %334 = vector.shape_cast %333 : vector<4xf32> to vector<4x1xf32>
    %335 = vector.broadcast %334 : vector<4x1xf32> to vector<4x10xf32>
    %336 = arith.subf %332, %335 : vector<4x10xf32>
    %337 = math.exp %336 : vector<4x10xf32>
    %cst_360 = arith.constant dense<0.000000e+00> : vector<4xf32>
    %338 = vector.multi_reduction <add>, %337, %cst_360 [1] : vector<4x10xf32> to vector<4xf32>
    %339 = vector.shape_cast %338 : vector<4xf32> to vector<4x1xf32>
    %340 = tpu.reciprocal %339 {approx = true} : vector<4x1xf32> -> vector<4x1xf32>
    %341 = vector.broadcast %340 : vector<4x1xf32> to vector<4x10xf32>
    %342 = arith.mulf %337, %341 : vector<4x10xf32>
    %343 = vector.extract_strided_slice %342 {offsets = [0, 0], sizes = [2, 10], strides = [1, 1]} : vector<4x10xf32> to vector<2x10xf32>
    %344 = vector.extract_strided_slice %342 {offsets = [2, 0], sizes = [2, 10], strides = [1, 1]} : vector<4x10xf32> to vector<2x10xf32>
    %c0_361 = arith.constant 0 : index
    %c0_362 = arith.constant 0 : index
    %345 = vector.load %arg9[%c0_361, %c0_362] : memref<10x2xf32, #tpu.memory_space<vmem>>, vector<10x2xf32>
    %cst_363 = arith.constant dense<0.000000e+00> : vector<2x2xf32>
    %346 = tpu.matmul %343, %345, %cst_363 {dimension_numbers = #tpu.dot_dimension_numbers<[1], [0], [0], [1], [0, 0, 1, 1], [], []>} : vector<2x10xf32>, vector<10x2xf32>, vector<2x2xf32> -> vector<2x2xf32>
    %c0_364 = arith.constant 0 : index
    %c0_365 = arith.constant 0 : index
    %347 = vector.load %arg10[%c0_364, %c0_365] : memref<10x2xf32, #tpu.memory_space<vmem>>, vector<10x2xf32>
    %cst_366 = arith.constant dense<0.000000e+00> : vector<2x2xf32>
    %348 = tpu.matmul %344, %347, %cst_366 {dimension_numbers = #tpu.dot_dimension_numbers<[1], [0], [0], [1], [0, 0, 1, 1], [], []>} : vector<2x10xf32>, vector<10x2xf32>, vector<2x2xf32> -> vector<2x2xf32>
    %349 = arith.addf %346, %348 : vector<2x2xf32>
    %c0_367 = arith.constant 0 : index
    %c0_368 = arith.constant 0 : index
    %350 = vector.load %arg11[%c0_367, %c0_368] : memref<2x2xf32, #tpu.memory_space<vmem>>, vector<2x2xf32>
    tpu.vector_store %arg11[%c0_367, %c0_368], %349 {strides = array<i32>} : memref<2x2xf32, #tpu.memory_space<vmem>>, vector<2x2xf32>,
    return
  }
}

</mosaic_0001>

<bundles_post_ra>
// kernel: siamese_forward.1
= control target key start
LH: loop header
LB: loop body
LE: loop exit
PB: predicated region body
PF: predicated region fallthrough
CT: control target
= control target key end

     0   :  { %vm63_vm0 = vcmask 1044480   ;;  %s8325_s21 = smov 127   ;;  %vm58_vm1 = vcmask 105472   ;;  %s14787_s0 = inlined_call_operand.vmem [shape: f32[2,2,14,14], index: 0, kind: input, shape index: {}]   ;;  %s14788_s1 = inlined_call_operand.vmem [shape: f32[4,13,208], index: 1, kind: input, shape index: {}]   ;;  %s14789_s2 = inlined_call_operand.vmem [shape: f32[1,208], index: 2, kind: input, shape index: {}]   ;;  %s14790_s3 = inlined_call_operand.vmem [shape: f32[4,192,384], index: 3, kind: input, shape index: {}]   ;;  %s14791_s4 = inlined_call_operand.vmem [shape: f32[1,384], index: 4, kind: input, shape index: {}]   ;;  %s14792_s5 = inlined_call_operand.vmem [shape: f32[12,384,64], index: 5, kind: input, shape index: {}]   ;;  %s14793_s6 = inlined_call_operand.vmem [shape: f32[1,64], index: 6, kind: input, shape index: {}]   ;;  %s14794_s7 = inlined_call_operand.vmem [shape: f32[64,10], index: 7, kind: input, shape index: {}]   ;;  %s14795_s8 = inlined_call_operand.vmem [shape: f32[1,10], index: 8, kind: input, shape index: {}]   ;;  %s14796_s9 = inlined_call_operand.vmem [shape: f32[10,2], index: 9, kind: input, shape index: {}]   ;;  %s14797_s10 = inlined_call_operand.vmem [shape: f32[10,2], index: 10, kind: input, shape index: {}]   ;;  %s14798_s11 = inlined_call_operand.hbm [shape: f32[2,2], index: 11, kind: output, shape index: {}]  }
   0x1   :  { %v42_v0 = vld [vmem:[%s14787_s0 + $0x8] sm:$0x1f]  ;;  %v45_v2 = vld [vmem:[%s14788_s1 + $0x10] sm:$0x1f]  ;;  %v43_v3 = vld [vmem:[%s14788_s1] sm:$0xff] }
   0x2   :  { %v172_v1 = vld [vmem:[%s14787_s0 + $0x1] sm:$0xff]  ;;  %56 = vrot.lane.b32.xlu0 %v42_v0, %s8325_s21  ;;  %6646 = vmatpush.msk.msra.mxu2 %vm63_vm0, %v45_v2  ;;  %v6638_v4 = vld [vmem:[%s14788_s1 + $0x30] sm:$0x1f] }
   0x3   :  { %246 = vrot.lane.b32.xlu1 %v172_v1, %s8325_s21  ;;  %v6636_v5 = vld [vmem:[%s14788_s1 + $0x20] sm:$0xff]  ;;  %8285 = vmatpush.msk.msra.mxu3 %vm63_vm0, %v6638_v4 }
   0x4   :  { %6640 = vmatpush.msk.msra.mxu0 %vm63_vm0, %v6638_v4 }
   0x5   :  { %16 = vsyncpa [#allocation5], 0  ;;  %v41_v6 = vld [vmem:[%s14787_s0] sm:$0xff]  ;;  %141 = vmatpush.msra.mxu2 %v43_v3  ;;  %8286 = vmatpush.msra.mxu3 %v6636_v5  ;;  %v173_v7 = vld [vmem:[%s14787_s0 + $0x9] sm:$0x1f]  ;;  %vm324_vm2 = vcmask 654336  }
   0x6   :  { %6647 = vmatmul.msk.f32.vlgmr.msra.gmra.mxu2 %vm58_vm1, %v41_v6  ;;  %85 = vmatpush.msra.mxu0 %v6636_v5  ;;  %v6639_v8 = vld [vmem:[%s14788_s1 + $0x38] sm:$0x1f]  ;;  %v6637_v10 = vld [vmem:[%s14788_s1 + $0x28] sm:$0xff]  ;;  %v6664_v12 = vld [vmem:[%s14788_s1 + $0x70] sm:$0x1f]  ;;  %vm327_vm3 = vcmask 651264  }
   0x7   :  { %v46_v9 = vld [vmem:[%s14788_s1 + $0x18] sm:$0x1f]  ;;  %6643 = vmatpush.msk.msra.mxu1 %vm63_vm0, %v6639_v8  ;;  %v44_v11 = vld [vmem:[%s14788_s1 + $0x8] sm:$0xff]  ;;  %v6662_v13 = vld [vmem:[%s14788_s1 + $0x60] sm:$0xff]  ;;  %6666 = vmatpush.msk.msrb.mxu2 %vm63_vm0, %v6664_v12  ;;  %vm861_vm4 = vcmask 1046528   ;;  %vm495_vm5 = vcmask 523264  }
   0x8   :  { %6649 = vmatpush.msk.msrb.mxu3 %vm63_vm0, %v46_v9  ;;  %v6654_v14 = vld [vmem:[%s14788_s1 + $0x50] sm:$0x1f]  ;;  %v6652_v15 = vld [vmem:[%s14788_s1 + $0x40] sm:$0xff]  ;;  %v6655_v16 = vld [vmem:[%s14788_s1 + $0x58] sm:$0x1f]  ;;  %vm490_vm6 = vcmask 916480  }
   0x9   :  { %108 = vmatpush.msra.mxu1 %v6637_v10  ;;  %6656 = vmatpush.msk.msrb.mxu0 %vm63_vm0, %v6654_v14  ;;  %v6653_v17 = vld [vmem:[%s14788_s1 + $0x48] sm:$0xff]  ;;  %v6665_v18 = vld [vmem:[%s14788_s1 + $0x78] sm:$0x1f]  ;;  %v39_v29 = vld [vmem:[%s14789_s2] sm:$0x3]  ;;  %s8326_s2 = smov 112  }
   0xa   :  { %54 = vrot.lane.b32.xlu0 %v41_v6, %s8325_s21  ;;  %164 = vmatpush.msrb.mxu3 %v44_v11  ;;  %v6663_v21 = vld [vmem:[%s14788_s1 + $0x68] sm:$0xff]  ;;  %v8480_v36 = vperm.slane %v39_v29, 0  ;;  %v8489_v50 = vperm.slane %v39_v29, 1  ;;  %v6714_v60 = vld [vmem:[%s14790_s3 + $0x390] sm:$0xff]  ;;  %v6711_v2 = vld [vmem:[%s14790_s3 + $0x378] sm:$0xff]  ;;  %vm6548_vm7 = vcmask 76800  }
   0xb   :  { %248 = vrot.lane.b32.xlu1 %v173_v7, %s8325_s21  ;;  %275 = vmatpush.msrb.mxu2 %v6662_v13  ;;  %v6717_v59 = vld [vmem:[%s14790_s3 + $0x3a8] sm:$0xff]  ;;  %v6738_v63 = vld [vmem:[%s14790_s3 + $0x450] sm:$0xff]  ;;  %v6735_v3 = vld [vmem:[%s14790_s3 + $0x438] sm:$0xff]  ;;  %vm6569_vm8 = vcmask 1041408   ;;  %vm6566_vm9 = vcmask 80896   ;;  %vm6618_vm10 = vcmask 9216  }
   0xc   :  { %206 = vmatpush.msrb.mxu0 %v6652_v15  ;;  %6659 = vmatpush.msk.msrb.mxu1 %vm63_vm0, %v6655_v16  ;;  %v6741_v61 = vld [vmem:[%s14790_s3 + $0x468] sm:$0xff]  ;;  %v6708_v5 = vld [vmem:[%s14790_s3 + $0x360] sm:$0xff]  ;;  %v6715_v10 = vld [vmem:[%s14790_s3 + $0x398] sm:$0xff] }
   0xd   :  { %v6705_v9 = vld [vmem:[%s14790_s3 + $0x348] sm:$0xff]  ;;  %v6912_v13 = vld [vmem:[%s14787_s0 + $0x20] sm:$0xff]  ;;  %v6702_v14 = vld [vmem:[%s14790_s3 + $0x330] sm:$0xff] }
   0xe   :  { %6648 = vmatmul.msk.f32.gmra.mxu2 %vm58_vm1, %v42_v0  ;;  %229 = vmatpush.msrb.mxu1 %v6653_v17  ;;  %v6729_v12 = vld [vmem:[%s14790_s3 + $0x408] sm:$0xff]  ;;  %v6742_v15 = vld [vmem:[%s14790_s3 + $0x470] sm:$0xff]  ;;  %v6712_v17 = vld [vmem:[%s14790_s3 + $0x380] sm:$0xff] }
   0xf   :  { %v6726_v16 = vld [vmem:[%s14790_s3 + $0x3f0] sm:$0xff] }
  0x74   :  { %v57_v19 = vpop.permute.xlu0 %56 }
  0x75   :  { %v247_v20 = vpop.permute.xlu1 %246  ;;  %6642 = vmatmul.msk.f32.vlgmr.msra.gmra.mxu3 %vm58_vm1, %v57_v19 }
  0x76   :  { %6667 = vmatmul.msk.f32.vlgmr.msrb.gmra.mxu2 %vm58_vm1, %v247_v20  ;;  %6669 = vmatpush.msk.msra.mxu3 %vm63_vm0, %v6665_v18  ;;  %v6699_v18 = vld [vmem:[%s14790_s3 + $0x318] sm:$0xff] }
  0x78   :  { %298 = vmatpush.msra.mxu3 %v6663_v21  ;;  %v6709_v21 = vld [vmem:[%s14790_s3 + $0x368] sm:$0xff] }
  0x7c   :  { %v55_v22 = vpop.permute.xlu0 %54 }
  0x7d   :  { %v249_v23 = vpop.permute.xlu1 %248  ;;  %6641 = vmatmul.msk.f32.vlgmr.msra.gmra.mxu0 %vm58_vm1, %v55_v22  ;;  %6644 = vmatmul.msk.f32.vlgmr.msra.gmra.mxu1 %vm58_vm1, %v55_v22  ;;  %v6696_v22 = vld [vmem:[%s14790_s3 + $0x300] sm:$0xff] }
  0x7e   :  { %6650 = vmatmul.msk.f32.vlgmr.msrb.gmra.mxu3 %vm58_vm1, %v41_v6  ;;  %6668 = vmatmul.msk.f32.gmra.mxu2 %vm58_vm1, %v249_v23  ;;  %v6732_v6 = vld [vmem:[%s14790_s3 + $0x420] sm:$0xff] }
  0x7f   :  { %500 = vmatpush.msra.mxu0 %v6717_v59  ;;  %531 = vmatpush.msra.mxu1 %v6741_v61  ;;  %v6721_v59 = vld [vmem:[%s14790_s3 + $0x3c8] sm:$0xff]  ;;  %v6691_v61 = vld [vmem:[%s14790_s3 + $0x2d8] sm:$0xff] }
  0x80   :  { %577 = vmatpush.msrb.mxu3 %v6742_v15  ;;  %v369_v15 = vld [vmem:[%s14790_s3 + $0x120] sm:$0xff] }
  0x81   :  { %501 = vmatpush.msra.mxu0 %v6714_v60  ;;  %532 = vmatpush.msra.mxu1 %v6738_v63  ;;  %v6701_v60 = vld [vmem:[%s14790_s3 + $0x328] sm:$0xff]  ;;  %v6743_v63 = vld [vmem:[%s14790_s3 + $0x478] sm:$0xff] }
  0x83   :  { %502 = vmatpush.msra.mxu0 %v6711_v2  ;;  %533 = vmatpush.msra.mxu1 %v6735_v3  ;;  %v378_v2 = vld [vmem:[%s14790_s3 + $0x168] sm:$0xff]  ;;  %v6698_v3 = vld [vmem:[%s14790_s3 + $0x310] sm:$0xff] }
  0x85   :  { %6645 = vmatmul.msk.f32.gmra.mxu1 %vm58_vm1, %v57_v19  ;;  %6657 = vmatmul.msk.f32.vlgmr.msrb.gmra.mxu0 %vm58_vm1, %v172_v1  ;;  %v6739_v19 = vld [vmem:[%s14790_s3 + $0x458] sm:$0xff] }
  0x86   :  { %6651 = vmatmul.msk.f32.gmra.mxu3 %vm58_vm1, %v42_v0  ;;  %503 = vmatpush.msra.mxu0 %v6708_v5 }
  0x87   :  { %534 = vmatpush.msra.mxu1 %v6732_v6  ;;  %578 = vmatpush.msrb.mxu3 %v6739_v19  ;;  %v375_v6 = vld [vmem:[%s14790_s3 + $0x150] sm:$0xff]  ;;  %v366_v19 = vld [vmem:[%s14790_s3 + $0x108] sm:$0xff] }
  0x88   :  { %504 = vmatpush.msra.mxu0 %v6705_v9  ;;  %v6685_v9 = vld [vmem:[%s14790_s3 + $0x2a8] sm:$0xff] }
  0x89   :  { %v143_v24 = vpop.f32.mrf.mxu2  ;;  %535 = vmatpush.msra.mxu1 %v6729_v12  ;;  %v6737_v12 = vld [vmem:[%s14790_s3 + $0x448] sm:$0xff] }
  0x8a   :  { %505 = vmatpush.msra.mxu0 %v6702_v14  ;;  %v6682_v14 = vld [vmem:[%s14790_s3 + $0x290] sm:$0xff] }
  0x8b   :  { %536 = vmatpush.msra.mxu1 %v6726_v16  ;;  %v6734_v16 = vld [vmem:[%s14790_s3 + $0x430] sm:$0xff] }
  0x8c   :  { %506 = vmatpush.msra.mxu0 %v6699_v18  ;;  %v6679_v18 = vld [vmem:[%s14790_s3 + $0x278] sm:$0xff] }
  0x8d   :  { %6658 = vmatmul.msk.f32.gmra.mxu0 %vm58_vm1, %v173_v7  ;;  %6660 = vmatmul.msk.f32.vlgmr.msrb.gmra.mxu1 %vm58_vm1, %v172_v1 }
  0x8e   :  { %6670 = vmatmul.msk.f32.vlgmr.msra.gmra.mxu3 %vm58_vm1, %v247_v20  ;;  %v6723_v20 = vld [vmem:[%s14790_s3 + $0x3d8] sm:$0xff]  ;;  %507 = vmatpush.msra.mxu0 %v6696_v22  ;;  %v6676_v22 = vld [vmem:[%s14790_s3 + $0x260] sm:$0xff] }
  0x8f   :  { %537 = vmatpush.msra.mxu1 %v6723_v20  ;;  %v6731_v20 = vld [vmem:[%s14790_s3 + $0x418] sm:$0xff] }
  0x91   :  { %v146_v26 = vpop.f32.mrf.mxu2 }
  0x95   :  { %6661 = vmatmul.msk.f32.gmra.mxu1 %vm58_vm1, %v173_v7  ;;  %v6718_v7 = vld [vmem:[%s14790_s3 + $0x3b0] sm:$0xff] }
  0x96   :  { %6671 = vmatmul.msk.f32.gmra.mxu3 %vm58_vm1, %v249_v23  ;;  %546 = vmatpush.msra.mxu2 %v6718_v7  ;;  %v6736_v23 = vld [vmem:[%s14790_s3 + $0x440] sm:$0xff] }
  0x97   :  { %579 = vmatpush.msrb.mxu3 %v6736_v23  ;;  %v6740_v7 = vld [vmem:[%s14790_s3 + $0x460] sm:$0xff]  ;;  %v363_v23 = vld [vmem:[%s14790_s3 + $0xf0] sm:$0xff] }
  0x98   :  { %547 = vmatpush.msra.mxu2 %v6715_v10  ;;  %v372_v10 = vld [vmem:[%s14790_s3 + $0x138] sm:$0xff] }
  0x9a   :  { %548 = vmatpush.msra.mxu2 %v6712_v17  ;;  %v6689_v17 = vld [vmem:[%s14790_s3 + $0x2c8] sm:$0xff] }
  0x9c   :  { %549 = vmatpush.msra.mxu2 %v6709_v21  ;;  %v6686_v21 = vld [vmem:[%s14790_s3 + $0x2b0] sm:$0xff] }
  0xf8   :  { %v90_v25 = vpop.f32.mrf.mxu3 }
  0xf9   :  { %v277_v30 = vpop.f32.mrf.mxu2  ;;  %v147_v39 = vadd.f32 %v146_v26, %v90_v25  ;;  %v6693_v26 = vld [vmem:[%s14790_s3 + $0x2e8] sm:$0xff] }
  0xfa   :  { %v87_v27 = vpop.f32.mrf.mxu0  ;;  %v110_v28 = vpop.f32.mrf.mxu1  ;;  %508 = vmatpush.msra.mxu0 %v6693_v26  ;;  %v6673_v26 = vld [vmem:[%s14790_s3 + $0x248] sm:$0xff] }
  0xfb   :  { %v144_v31 = vadd.f32 %v143_v24, %v87_v27  ;;  %v6720_v24 = vld [vmem:[%s14790_s3 + $0x3c0] sm:$0xff]  ;;  %v6719_v27 = vld [vmem:[%s14790_s3 + $0x3b8] sm:$0xff] }
  0xfc   :  { %538 = vmatpush.msra.mxu1 %v6720_v24  ;;  %v6728_v24 = vld [vmem:[%s14790_s3 + $0x400] sm:$0xff] }
  0xfe   :  { %592 = vmatpush.msrb.mxu1 %v6719_v27  ;;  %v360_v27 = vld [vmem:[%s14790_s3 + $0xd8] sm:$0xff] }
 0x101   :  { %v166_v32 = vpop.f32.mrf.mxu3  ;;  %v280_v43 = vpop.f32.mrf.mxu2 }
 0x102   :  { %v113_v33 = vpop.f32.mrf.mxu1  ;;  %v208_v34 = vpop.f32.mrf.mxu0  ;;  %v167_v47 = vadd.f32 %v166_v32, %v110_v28  ;;  %v6690_v32 = vld [vmem:[%s14790_s3 + $0x2d0] sm:$0xff] }
 0x103   :  { %v237_v35 = vadd.f32 %v208_v34, %v144_v31  ;;  %v6716_v34 = vld [vmem:[%s14790_s3 + $0x3a0] sm:$0xff]  ;;  %509 = vmatpush.msra.mxu0 %v6690_v32  ;;  %v402_v32 = vld [vmem:[%s14790_s3 + $0x228] sm:$0xff] }
 0x104   :  { %593 = vmatpush.msrb.mxu1 %v6716_v34  ;;  %v357_v34 = vld [vmem:[%s14790_s3 + $0xc0] sm:$0xff] }
 0x105   :  { %v306_v37 = vadd.f32 %v277_v30, %v237_v35  ;;  %v6706_v30 = vld [vmem:[%s14790_s3 + $0x350] sm:$0xff]  ;;  %v6733_v35 = vld [vmem:[%s14790_s3 + $0x428] sm:$0xff] }
 0x106   :  { %550 = vmatpush.msra.mxu2 %v6706_v30  ;;  %580 = vmatpush.msrb.mxu3 %v6733_v35  ;;  %v6680_v30 = vld [vmem:[%s14790_s3 + $0x280] sm:$0xff]  ;;  %v6722_v35 = vld [vmem:[%s14790_s3 + $0x3d0] sm:$0xff] }
 0x107   :  { %v315_v38 = vadd.f32 %v8480_v36, %v306_v37 }
 0x109   :  { %v8483_v40 = vmax.f32 %v315_v38, 0.0  ;;  %v169_v41 = vpop.f32.mrf.mxu3  ;;  %v6687_v38 = vld [vmem:[%s14790_s3 + $0x2b8] sm:$0xff] }
 0x10a   :  { %v211_v42 = vpop.f32.mrf.mxu0  ;;  %v231_v45 = vpop.f32.mrf.mxu1  ;;  %v170_v56 = vadd.f32 %v169_v41, %v113_v33  ;;  %v6713_v41 = vld [vmem:[%s14790_s3 + $0x388] sm:$0xff]  ;;  %510 = vmatpush.msra.mxu0 %v6687_v38 }
 0x10b   :  { %323 = vst [vmem:[#allocation2] sm:$0xff] %v8483_v40  ;;  %v239_v44 = vadd.f32 %v211_v42, %v147_v39  ;;  %482 = vrot.lane.b32.xlu0 %v8483_v40, %s8326_s2  ;;  %v238_v49 = vadd.f32 %v231_v45, %v167_v47  ;;  %v6703_v39 = vld [vmem:[%s14790_s3 + $0x338] sm:$0xff]  ;;  %v6730_v42 = vld [vmem:[%s14790_s3 + $0x410] sm:$0xff]  ;;  %594 = vmatpush.msrb.mxu1 %v6713_v41  ;;  %v6681_v47 = vld [vmem:[%s14790_s3 + $0x288] sm:$0xff] }
 0x10c   :  { %551 = vmatpush.msra.mxu2 %v6703_v39  ;;  %581 = vmatpush.msrb.mxu3 %v6730_v42  ;;  %v354_v38 = vld [vmem:[%s14790_s3 + $0xa8] sm:$0xff]  ;;  %v399_v39 = vld [vmem:[%s14790_s3 + $0x210] sm:$0xff]  ;;  %v396_v41 = vld [vmem:[%s14790_s3 + $0x1f8] sm:$0xff] }
 0x10d   :  { %v308_v46 = vadd.f32 %v280_v43, %v239_v44  ;;  %v6684_v43 = vld [vmem:[%s14790_s3 + $0x2a0] sm:$0xff] }
 0x10e   :  { %v6700_v44 = vld [vmem:[%s14790_s3 + $0x320] sm:$0xff]  ;;  %511 = vmatpush.msra.mxu0 %v6684_v43  ;;  %v390_v43 = vld [vmem:[%s14790_s3 + $0x1c8] sm:$0xff] }
 0x10f   :  { %v317_v48 = vadd.f32 %v8480_v36, %v308_v46  ;;  %v6710_v46 = vld [vmem:[%s14790_s3 + $0x370] sm:$0xff]  ;;  %552 = vmatpush.msra.mxu2 %v6700_v44  ;;  %v393_v42 = vld [vmem:[%s14790_s3 + $0x1e0] sm:$0xff] }
 0x110   :  { %595 = vmatpush.msrb.mxu1 %v6710_v46  ;;  %512 = vmatpush.msra.mxu0 %v6681_v47  ;;  %v6674_v44 = vld [vmem:[%s14790_s3 + $0x250] sm:$0xff]  ;;  %v6913_v47 = vld [vmem:[%s14787_s0 + $0x28] sm:$0x1f] }
 0x111   :  { %v321_v51 = vmax.f32 %v317_v48, 0.0  ;;  %v300_v52 = vpop.f32.mrf.mxu3  ;;  %v6727_v48 = vld [vmem:[%s14790_s3 + $0x3f8] sm:$0xff]  ;;  %v351_v46 = vld [vmem:[%s14790_s3 + $0x90] sm:$0xff] }
 0x112   :  { %v307_v53 = vadd.f32 %v300_v52, %v238_v49  ;;  %v234_v55 = vpop.f32.mrf.mxu1  ;;  %v6697_v52 = vld [vmem:[%s14790_s3 + $0x308] sm:$0xff]  ;;  %582 = vmatpush.msrb.mxu3 %v6727_v48  ;;  %v384_v48 = vld [vmem:[%s14790_s3 + $0x198] sm:$0xff] }
 0x113   :  { %326 = vst [vmem:[#allocation2 + $0x10] sm:$0x1f] %v321_v51  ;;  %v240_v58 = vadd.f32 %v234_v55, %v170_v56  ;;  %v6707_v51 = vld [vmem:[%s14790_s3 + $0x358] sm:$0xff]  ;;  %v6704_v55 = vld [vmem:[%s14790_s3 + $0x340] sm:$0xff]  ;;  %v6694_v56 = vld [vmem:[%s14790_s3 + $0x2f0] sm:$0xff]  ;;  %553 = vmatpush.msra.mxu2 %v6697_v52 }
 0x114   :  { %v316_v54 = vadd.f32 %v8489_v50, %v307_v53  ;;  %v6678_v53 = vld [vmem:[%s14790_s3 + $0x270] sm:$0xff]  ;;  %596 = vmatpush.msrb.mxu1 %v6707_v51  ;;  %v348_v51 = vld [vmem:[%s14790_s3 + $0x78] sm:$0xff]  ;;  %v381_v52 = vld [vmem:[%s14790_s3 + $0x180] sm:$0xff] }
 0x115   :  { %513 = vmatpush.msra.mxu0 %v6678_v53  ;;  %554 = vmatpush.msra.mxu2 %v6694_v56  ;;  %v345_v53 = vld [vmem:[%s14790_s3 + $0x60] sm:$0xff]  ;;  %v336_v56 = vld [vmem:[%s14790_s3 + $0x18] sm:$0xff] }
 0x116   :  { %v320_v57 = vmax.f32 %v316_v54, 0.0  ;;  %v6724_v54 = vld [vmem:[%s14790_s3 + $0x3e0] sm:$0xff]  ;;  %597 = vmatpush.msrb.mxu1 %v6704_v55  ;;  %v339_v55 = vld [vmem:[%s14790_s3 + $0x30] sm:$0xff] }
 0x117   :  { %583 = vmatpush.msrb.mxu3 %v6724_v54  ;;  %555 = vmatpush.msra.mxu2 %v6691_v61  ;;  %v342_v54 = vld [vmem:[%s14790_s3 + $0x48] sm:$0xff]  ;;  %v376_v61 = vld [vmem:[%s14790_s3 + $0x158] sm:$0xff] }
 0x118   :  { %325 = vst.msk [vmem:[#allocation2 + $0x8] sm:$0xff] %vm324_vm2, %v320_v57  ;;  %v780_v57 = vld [vmem:[#allocation2] sm:$0xfe]  ;;  %598 = vmatpush.msrb.mxu1 %v6701_v60 }
 0x119   :  { %v303_v62 = vpop.f32.mrf.mxu3  ;;  %584 = vmatpush.msrb.mxu3 %v6721_v59  ;;  %v403_v59 = vld [vmem:[%s14790_s3 + $0x230] sm:$0xff] }
 0x11a   :  { %v309_v0 = vadd.f32 %v303_v62, %v240_v58  ;;  %v8505_v1 = vld [vmem:[#allocation2 + $0x10] sm:$0xf]  ;;  %v6672_v62 = vld [vmem:[%s14790_s3 + $0x240] sm:$0xff]  ;;  %599 = vmatpush.msrb.mxu1 %v6698_v3 }
 0x11b   :  { %486 = vrot.lane.b32.xlu1 %v8505_v1, %s8326_s2  ;;  %v782_v25 = vld [vmem:[#allocation2 + $0x10] sm:$0x1f]  ;;  %623 = vmatpush.msra.mxu3 %v6743_v63  ;;  %v8844_v63 = vld [vmem:[%s14787_s0 + $0x29] sm:$0x1f] }
 0x11c   :  { %v318_v4 = vadd.f32 %v8489_v50, %v309_v0  ;;  %v8594_v33 = vrot.slane %v782_v25, 1  ;;  %v6675_v58 = vld [vmem:[%s14790_s3 + $0x258] sm:$0xff]  ;;  %v862_v0 = vrot.slane %v780_v57, 1  ;;  %v333_v57 = vld [vmem:[%s14790_s3] sm:$0xff] }
 0x11d   :  { %514 = vmatpush.msra.mxu0 %v6675_v58  ;;  %624 = vmatpush.msra.mxu3 %v6740_v7  ;;  %v6683_v25 = vld [vmem:[%s14790_s3 + $0x298] sm:$0xff]  ;;  %v379_v58 = vld [vmem:[%s14790_s3 + $0x170] sm:$0xff] }
 0x11e   :  { %v322_v8 = vmax.f32 %v318_v4, 0.0  ;;  %v6688_v4 = vld [vmem:[%s14790_s3 + $0x2c0] sm:$0xff]  ;;  %v8686_v5 = vsel %vm861_vm4, %v862_v0, %v8594_v33  ;;  %v404_v7 = vld [vmem:[%s14790_s3 + $0x238] sm:$0xff] }
 0x11f   :  { %v8531_v11 = vld [vmem:[#allocation2 + $0x8] sm:$0xff]  ;;  %515 = vmatpush.msra.mxu0 %v6672_v62  ;;  %556 = vmatpush.msra.mxu2 %v6688_v4  ;;  %v400_v62 = vld [vmem:[%s14790_s3 + $0x218] sm:$0xff]  ;;  %v373_v0 = vld [vmem:[%s14790_s3 + $0x140] sm:$0xff] }
 0x120   :  { %328 = vst.msk [vmem:[#allocation2 + $0x18] sm:$0x1f] %vm327_vm3, %v322_v8  ;;  %484 = vrot.lane.b32.xlu2 %v8531_v11, %s8326_s2  ;;  %v781_v37 = vld [vmem:[#allocation2 + $0x8] sm:$0xfe]  ;;  %v6695_v8 = vld [vmem:[%s14790_s3 + $0x2f8] sm:$0xff]  ;;  %625 = vmatpush.msra.mxu3 %v6737_v12 }
 0x121   :  { %v865_v45 = vrot.slane %v781_v37, 1  ;;  %642 = vmatpush.msrb.mxu0 %v378_v2  ;;  %600 = vmatpush.msrb.mxu1 %v6695_v8  ;;  %v6677_v37 = vld [vmem:[%s14790_s3 + $0x268] sm:$0xff]  ;;  %v397_v2 = vld [vmem:[%s14790_s3 + $0x200] sm:$0xff]  ;;  %v391_v12 = vld [vmem:[%s14790_s3 + $0x1d0] sm:$0xff] }
 0x122   :  { %557 = vmatpush.msra.mxu2 %v6685_v9  ;;  %626 = vmatpush.msra.mxu3 %v6734_v16  ;;  %v370_v8 = vld [vmem:[%s14790_s3 + $0x128] sm:$0xff]  ;;  %v364_v16 = vld [vmem:[%s14790_s3 + $0xf8] sm:$0xff] }
 0x123   :  { %1283 = vrot.lane.b32.xlu1 %v6912_v13, %s8325_s21  ;;  %643 = vmatpush.msrb.mxu0 %v375_v6  ;;  %v6692_v13 = vld [vmem:[%s14790_s3 + $0x2e0] sm:$0xff]  ;;  %v380_v6 = vld [vmem:[%s14790_s3 + $0x178] sm:$0xff]  ;;  %v394_v9 = vld [vmem:[%s14790_s3 + $0x1e8] sm:$0xff] }
 0x124   :  { %601 = vmatpush.msrb.mxu1 %v6692_v13  ;;  %558 = vmatpush.msra.mxu2 %v6682_v14  ;;  %v377_v14 = vld [vmem:[%s14790_s3 + $0x160] sm:$0xff] }
 0x125   :  { %644 = vmatpush.msrb.mxu0 %v372_v10  ;;  %627 = vmatpush.msra.mxu3 %v6731_v20  ;;  %v367_v10 = vld [vmem:[%s14790_s3 + $0x110] sm:$0xff]  ;;  %v361_v20 = vld [vmem:[%s14790_s3 + $0xe0] sm:$0xff] }
 0x126   :  { %602 = vmatpush.msrb.mxu1 %v6689_v17  ;;  %559 = vmatpush.msra.mxu2 %v6679_v18  ;;  %v388_v17 = vld [vmem:[%s14790_s3 + $0x1b8] sm:$0xff]  ;;  %v374_v18 = vld [vmem:[%s14790_s3 + $0x148] sm:$0xff] }
 0x127   :  { %v8582_v28 = vld [vmem:[#allocation2 + $0x18] sm:$0xf]  ;;  %645 = vmatpush.msrb.mxu0 %v369_v15  ;;  %628 = vmatpush.msra.mxu3 %v6728_v24  ;;  %v358_v24 = vld [vmem:[%s14790_s3 + $0xc8] sm:$0xff] }
 0x128   :  { %v783_v29 = vld [vmem:[#allocation2 + $0x18] sm:$0x1f]  ;;  %488 = vrot.lane.b32.xlu2 %v8582_v28, %s8326_s2  ;;  %603 = vmatpush.msrb.mxu1 %v6686_v21 }
 0x129   :  { %v8589_v31 = vrot.slane %v783_v29, 1  ;;  %646 = vmatpush.msrb.mxu0 %v366_v19  ;;  %560 = vmatpush.msra.mxu2 %v6676_v22  ;;  %v6725_v29 = vld [vmem:[%s14790_s3 + $0x3e8] sm:$0xff]  ;;  %v401_v15 = vld [vmem:[%s14790_s3 + $0x220] sm:$0xff]  ;;  %v371_v22 = vld [vmem:[%s14790_s3 + $0x130] sm:$0xff] }
 0x12a   :  { %604 = vmatpush.msrb.mxu1 %v6683_v25  ;;  %629 = vmatpush.msra.mxu3 %v6725_v29  ;;  %v398_v19 = vld [vmem:[%s14790_s3 + $0x208] sm:$0xff]  ;;  %v385_v21 = vld [vmem:[%s14790_s3 + $0x1a0] sm:$0xff]  ;;  %v368_v29 = vld [vmem:[%s14790_s3 + $0x118] sm:$0xff] }
 0x12b   :  { %1097 = vrot.lane.b32.xlu0 %v8589_v31, %s8326_s2  ;;  %1095 = vrot.lane.b32.xlu1 %v8594_v33, %s8326_s2  ;;  %v8635_v49 = vsel %vm861_vm4, %v865_v45, %v8589_v31  ;;  %v387_v45 = vld [vmem:[%s14790_s3 + $0x1b0] sm:$0xff]  ;;  %v382_v25 = vld [vmem:[%s14790_s3 + $0x188] sm:$0xff] }
 0x12c   :  { %647 = vmatpush.msrb.mxu0 %v363_v23  ;;  %561 = vmatpush.msra.mxu2 %v6673_v26  ;;  %v395_v23 = vld [vmem:[%s14790_s3 + $0x1f0] sm:$0xff] }
 0x12d   :  { %605 = vmatpush.msrb.mxu1 %v6680_v30  ;;  %630 = vmatpush.msra.mxu3 %v6722_v35  ;;  %v355_v26 = vld [vmem:[%s14790_s3 + $0xb0] sm:$0xff]  ;;  %v392_v30 = vld [vmem:[%s14790_s3 + $0x1d8] sm:$0xff] }
 0x12e   :  { %648 = vmatpush.msrb.mxu0 %v360_v27  ;;  %673 = vmatpush.msrb.mxu2 %v402_v32  ;;  %v6801_v27 = vld [vmem:[%s14790_s3 + $0x5e8] sm:$0xff]  ;;  %v352_v32 = vld [vmem:[%s14790_s3 + $0x98] sm:$0xff] }
 0x12f   :  { %606 = vmatpush.msrb.mxu1 %v6677_v37  ;;  %v349_v37 = vld [vmem:[%s14790_s3 + $0x80] sm:$0xff] }
 0x130   :  { %1093 = vrot.lane.b32.xlu2 %v8635_v49, %s8326_s2  ;;  %649 = vmatpush.msrb.mxu0 %v357_v34  ;;  %v6798_v34 = vld [vmem:[%s14790_s3 + $0x5d0] sm:$0xff] }
 0x131   :  { %674 = vmatpush.msrb.mxu2 %v399_v39  ;;  %607 = vmatpush.msrb.mxu1 %v6674_v44  ;;  %v6792_v44 = vld [vmem:[%s14790_s3 + $0x5a0] sm:$0xff] }
 0x132   :  { %650 = vmatpush.msrb.mxu0 %v354_v38  ;;  %v6795_v38 = vld [vmem:[%s14790_s3 + $0x5b8] sm:$0xff] }
 0x133   :  { %675 = vmatpush.msrb.mxu2 %v396_v41  ;;  %1285 = vrot.lane.b32.xlu0 %v6913_v47, %s8325_s21  ;;  %v365_v41 = vld [vmem:[%s14790_s3 + $0x100] sm:$0xff]  ;;  %v362_v47 = vld [vmem:[%s14790_s3 + $0xe8] sm:$0xff] }
 0x134   :  { %651 = vmatpush.msrb.mxu0 %v351_v46  ;;  %v6789_v46 = vld [vmem:[%s14790_s3 + $0x588] sm:$0xff] }
 0x135   :  { %676 = vmatpush.msrb.mxu2 %v393_v42  ;;  %v389_v42 = vld [vmem:[%s14790_s3 + $0x1c0] sm:$0xff] }
 0x136   :  { %652 = vmatpush.msrb.mxu0 %v348_v51  ;;  %v340_v51 = vld [vmem:[%s14790_s3 + $0x38] sm:$0xff] }
 0x137   :  { %677 = vmatpush.msrb.mxu2 %v390_v43  ;;  %v346_v43 = vld [vmem:[%s14790_s3 + $0x68] sm:$0xff] }
 0x138   :  { %1091 = vrot.lane.b32.xlu2 %v8686_v5, %s8326_s2  ;;  %653 = vmatpush.msrb.mxu0 %v345_v53  ;;  %v359_v53 = vld [vmem:[%s14790_s3 + $0xd0] sm:$0xff] }
 0x139   :  { %678 = vmatpush.msrb.mxu2 %v387_v45  ;;  %v343_v45 = vld [vmem:[%s14790_s3 + $0x50] sm:$0xff] }
 0x13a   :  { %654 = vmatpush.msrb.mxu0 %v342_v54  ;;  %v383_v54 = vld [vmem:[%s14790_s3 + $0x190] sm:$0xff] }
 0x13b   :  { %679 = vmatpush.msrb.mxu2 %v384_v48  ;;  %1473 = vrot.lane.b32.xlu0 %v8844_v63, %s8325_s21  ;;  %v386_v48 = vld [vmem:[%s14790_s3 + $0x1a8] sm:$0xff] }
 0x13c   :  { %655 = vmatpush.msrb.mxu0 %v339_v55  ;;  %v337_v55 = vld [vmem:[%s14790_s3 + $0x20] sm:$0xff] }
 0x13d   :  { %680 = vmatpush.msrb.mxu2 %v381_v52  ;;  %v6786_v52 = vld [vmem:[%s14790_s3 + $0x570] sm:$0xff] }
 0x13e   :  { %656 = vmatpush.msrb.mxu0 %v336_v56  ;;  %v6783_v56 = vld [vmem:[%s14790_s3 + $0x558] sm:$0xff] }
 0x140   :  { %657 = vmatpush.msrb.mxu0 %v333_v57  ;;  %v356_v57 = vld [vmem:[%s14790_s3 + $0xb8] sm:$0xff] }
 0x17a   :  { %v8829_v60 = vpop.permute.xlu2 %484 }
 0x17b   :  { %6744 = vmatmul.msk.f32.vlgmr.msra.gmra.mxu1 %vm495_vm5, %v8829_v60  ;;  %6746 = vmatmul.msk.f32.vlgmr.msrb.gmra.mxu3 %vm495_vm5, %v8829_v60 }
 0x17c   :  { %688 = vmatpush.msrb.mxu3 %v379_v58  ;;  %719 = vmatpush.msra.mxu1 %v403_v59  ;;  %v6802_v58 = vld [vmem:[%s14790_s3 + $0x5f0] sm:$0xff]  ;;  %v334_v59 = vld [vmem:[%s14790_s3 + $0x8] sm:$0xff] }
 0x17d   :  { %v483_v3 = vpop.permute.xlu0 %482 }
 0x17e   :  { %689 = vmatpush.msrb.mxu3 %v376_v61  ;;  %720 = vmatpush.msra.mxu1 %v400_v62  ;;  %v491_v4 = vsel %vm490_vm6, %v483_v3, %v8829_v60  ;;  %v6825_v61 = vld [vmem:[%s14790_s3 + $0x6a8] sm:$0xff]  ;;  %v353_v62 = vld [vmem:[%s14790_s3 + $0xa0] sm:$0xff] }
 0x17f   :  { %516 = vmatmul.f32.vlgmr.msra.gmra.mxu0 %v491_v4  ;;  %562 = vmatmul.f32.vlgmr.msra.gmra.mxu2 %v491_v4  ;;  %v6777_v3 = vld [vmem:[%s14790_s3 + $0x528] sm:$0xff] }
 0x180   :  { %690 = vmatpush.msrb.mxu3 %v373_v0  ;;  %721 = vmatpush.msra.mxu1 %v397_v2  ;;  %v6799_v0 = vld [vmem:[%s14790_s3 + $0x5d8] sm:$0xff]  ;;  %v350_v2 = vld [vmem:[%s14790_s3 + $0x88] sm:$0xff] }
 0x181   :  { %734 = vmatpush.msra.mxu2 %v380_v6  ;;  %765 = vmatpush.msra.mxu0 %v404_v7  ;;  %v6796_v6 = vld [vmem:[%s14790_s3 + $0x5c0] sm:$0xff]  ;;  %v347_v7 = vld [vmem:[%s14790_s3 + $0x70] sm:$0xff] }
 0x182   :  { %691 = vmatpush.msrb.mxu3 %v370_v8  ;;  %722 = vmatpush.msra.mxu1 %v394_v9  ;;  %v8874_v13 = vpop.permute.xlu2 %488  ;;  %v6774_v8 = vld [vmem:[%s14790_s3 + $0x510] sm:$0xff]  ;;  %v6819_v9 = vld [vmem:[%s14790_s3 + $0x678] sm:$0xff] }
 0x183   :  { %6745 = vmatmul.msk.f32.gmra.mxu1 %vm495_vm5, %v8874_v13  ;;  %6747 = vmatmul.msk.f32.gmra.mxu3 %vm495_vm5, %v8874_v13 }
 0x184   :  { %692 = vmatpush.msrb.mxu3 %v367_v10  ;;  %723 = vmatpush.msra.mxu1 %v391_v12  ;;  %v6793_v10 = vld [vmem:[%s14790_s3 + $0x5a8] sm:$0xff]  ;;  %v6771_v12 = vld [vmem:[%s14790_s3 + $0x4f8] sm:$0xff] }
 0x185   :  { %735 = vmatpush.msra.mxu2 %v377_v14  ;;  %766 = vmatpush.msra.mxu0 %v401_v15  ;;  %v6816_v14 = vld [vmem:[%s14790_s3 + $0x660] sm:$0xff]  ;;  %v6790_v15 = vld [vmem:[%s14790_s3 + $0x590] sm:$0xff] }
 0x186   :  { %693 = vmatpush.msrb.mxu3 %v364_v16  ;;  %724 = vmatpush.msra.mxu1 %v388_v17  ;;  %v6768_v16 = vld [vmem:[%s14790_s3 + $0x4e0] sm:$0xff] }
 0x187   :  { %736 = vmatpush.msra.mxu2 %v374_v18  ;;  %767 = vmatpush.msra.mxu0 %v398_v19  ;;  %v341_v17 = vld [vmem:[%s14790_s3 + $0x40] sm:$0xff]  ;;  %v6813_v18 = vld [vmem:[%s14790_s3 + $0x648] sm:$0xff]  ;;  %v6787_v19 = vld [vmem:[%s14790_s3 + $0x578] sm:$0xff] }
 0x188   :  { %694 = vmatpush.msrb.mxu3 %v361_v20  ;;  %725 = vmatpush.msra.mxu1 %v385_v21  ;;  %v338_v20 = vld [vmem:[%s14790_s3 + $0x28] sm:$0xff] }
 0x189   :  { %737 = vmatpush.msra.mxu2 %v371_v22  ;;  %768 = vmatpush.msra.mxu0 %v395_v23  ;;  %v6765_v21 = vld [vmem:[%s14790_s3 + $0x4c8] sm:$0xff]  ;;  %v6810_v22 = vld [vmem:[%s14790_s3 + $0x630] sm:$0xff]  ;;  %v6784_v23 = vld [vmem:[%s14790_s3 + $0x560] sm:$0xff] }
 0x18a   :  { %695 = vmatpush.msrb.mxu3 %v358_v24  ;;  %726 = vmatpush.msra.mxu1 %v382_v25  ;;  %v335_v24 = vld [vmem:[%s14790_s3 + $0x10] sm:$0xff] }
 0x18b   :  { %608 = vmatmul.f32.vlgmr.msrb.gmra.mxu1 %v491_v4  ;;  %6748 = vmatmul.msk.f32.vlgmr.msra.gmra.mxu3 %vm495_vm5, %v8829_v60  ;;  %v6780_v60 = vld [vmem:[%s14790_s3 + $0x540] sm:$0xff]  ;;  %v6822_v4 = vld [vmem:[%s14790_s3 + $0x690] sm:$0xff] }
 0x18c   :  { %696 = vmatpush.msrb.mxu3 %v355_v26  ;;  %874 = vmatpush.msrb.mxu1 %v6801_v27  ;;  %v6762_v25 = vld [vmem:[%s14790_s3 + $0x4b0] sm:$0xff]  ;;  %v6807_v26 = vld [vmem:[%s14790_s3 + $0x618] sm:$0xff]  ;;  %v6781_v27 = vld [vmem:[%s14790_s3 + $0x548] sm:$0xff] }
 0x18d   :  { %v487_v35 = vpop.permute.xlu1 %486  ;;  %738 = vmatpush.msra.mxu2 %v368_v29  ;;  %769 = vmatpush.msra.mxu0 %v392_v30  ;;  %v6826_v29 = vld [vmem:[%s14790_s3 + $0x6b0] sm:$0xff]  ;;  %v6759_v30 = vld [vmem:[%s14790_s3 + $0x498] sm:$0xff] }
 0x18e   :  { %697 = vmatpush.msrb.mxu3 %v352_v32  ;;  %875 = vmatpush.msrb.mxu1 %v6798_v34  ;;  %v492_v39 = vsel %vm490_vm6, %v487_v35, %v8874_v13  ;;  %v6804_v32 = vld [vmem:[%s14790_s3 + $0x600] sm:$0xff]  ;;  %v6778_v34 = vld [vmem:[%s14790_s3 + $0x530] sm:$0xff] }
 0x18f   :  { %519 = vmatmul.f32.gmra.mxu0 %v492_v39  ;;  %565 = vmatmul.f32.gmra.mxu2 %v492_v39  ;;  %v6756_v35 = vld [vmem:[%s14790_s3 + $0x480] sm:$0xff] }
 0x190   :  { %698 = vmatpush.msrb.mxu3 %v349_v37  ;;  %876 = vmatpush.msrb.mxu1 %v6795_v38  ;;  %v6823_v37 = vld [vmem:[%s14790_s3 + $0x698] sm:$0xff] }
 0x191   :  { %739 = vmatpush.msra.mxu2 %v365_v41  ;;  %770 = vmatpush.msra.mxu0 %v389_v42  ;;  %v6803_v38 = vld [vmem:[%s14790_s3 + $0x5f8] sm:$0xff]  ;;  %v6800_v42 = vld [vmem:[%s14790_s3 + $0x5e0] sm:$0xff] }
 0x192   :  { %699 = vmatpush.msrb.mxu3 %v346_v43  ;;  %877 = vmatpush.msrb.mxu1 %v6792_v44  ;;  %v6827_v41 = vld [vmem:[%s14790_s3 + $0x6b8] sm:$0xff]  ;;  %v6772_v43 = vld [vmem:[%s14790_s3 + $0x500] sm:$0xff] }
 0x193   :  { %611 = vmatmul.f32.gmra.mxu1 %v492_v39  ;;  %6749 = vmatmul.msk.f32.gmra.mxu3 %vm495_vm5, %v8874_v13  ;;  %v344_v13 = vld [vmem:[%s14790_s3 + $0x58] sm:$0xff]  ;;  %v9120_v39 = vld [vmem:[%s14787_s0 + $0x21] sm:$0xff] }
 0x194   :  { %700 = vmatpush.msrb.mxu3 %v343_v45  ;;  %878 = vmatpush.msrb.mxu1 %v6789_v46  ;;  %v6824_v44 = vld [vmem:[%s14790_s3 + $0x6a0] sm:$0xff]  ;;  %v6817_v45 = vld [vmem:[%s14790_s3 + $0x668] sm:$0xff] }
 0x195   :  { %740 = vmatpush.msra.mxu2 %v362_v47  ;;  %771 = vmatpush.msra.mxu0 %v386_v48  ;;  %v6797_v46 = vld [vmem:[%s14790_s3 + $0x5c8] sm:$0xff] }
 0x196   :  { %701 = vmatpush.msrb.mxu3 %v340_v51  ;;  %879 = vmatpush.msrb.mxu1 %v6786_v52  ;;  %v6769_v47 = vld [vmem:[%s14790_s3 + $0x4e8] sm:$0xff]  ;;  %v6814_v51 = vld [vmem:[%s14790_s3 + $0x650] sm:$0xff] }
 0x197   :  { %741 = vmatpush.msra.mxu2 %v359_v53  ;;  %772 = vmatpush.msra.mxu0 %v383_v54  ;;  %v6821_v48 = vld [vmem:[%s14790_s3 + $0x688] sm:$0xff]  ;;  %v6794_v52 = vld [vmem:[%s14790_s3 + $0x5b0] sm:$0xff] }
 0x198   :  { %702 = vmatpush.msrb.mxu3 %v337_v55  ;;  %880 = vmatpush.msrb.mxu1 %v6783_v56  ;;  %v6818_v53 = vld [vmem:[%s14790_s3 + $0x670] sm:$0xff]  ;;  %v6811_v55 = vld [vmem:[%s14790_s3 + $0x638] sm:$0xff] }
 0x199   :  { %658 = vmatmul.f32.vlgmr.msrb.gmra.mxu0 %v8483_v40  ;;  %6750 = vmatmul.msk.f32.vlgmr.msrb.gmra.mxu2 %vm495_vm5, %v8531_v11  ;;  %v6766_v54 = vld [vmem:[%s14790_s3 + $0x4d0] sm:$0xff]  ;;  %v6791_v56 = vld [vmem:[%s14790_s3 + $0x598] sm:$0xff] }
 0x19a   :  { %742 = vmatpush.msra.mxu2 %v356_v57  ;;  %920 = vmatpush.msrb.mxu0 %v6802_v58  ;;  %v6815_v57 = vld [vmem:[%s14790_s3 + $0x658] sm:$0xff] }
 0x19b   :  { %703 = vmatpush.msrb.mxu3 %v334_v59  ;;  %881 = vmatpush.msrb.mxu1 %v6780_v60  ;;  %v6763_v58 = vld [vmem:[%s14790_s3 + $0x4b8] sm:$0xff]  ;;  %v6788_v59 = vld [vmem:[%s14790_s3 + $0x580] sm:$0xff] }
 0x19c   :  { %743 = vmatpush.msra.mxu2 %v353_v62  ;;  %921 = vmatpush.msrb.mxu0 %v6799_v0  ;;  %v6812_v60 = vld [vmem:[%s14790_s3 + $0x640] sm:$0xff]  ;;  %v6785_v62 = vld [vmem:[%s14790_s3 + $0x568] sm:$0xff] }
 0x19d   :  { %905 = vmatpush.msra.mxu3 %v6825_v61  ;;  %6752 = vmatmul.msk.f32.vlgmr.msra.gmra.mxu1 %vm495_vm5, %v8531_v11  ;;  %v6805_v61 = vld [vmem:[%s14790_s3 + $0x608] sm:$0xff] }
 0x19e   :  { %704 = vmatmul.f32.vlgmr.msrb.gmra.mxu3 %v8483_v40  ;;  %744 = vmatpush.msra.mxu2 %v350_v2  ;;  %v6757_v0 = vld [vmem:[%s14790_s3 + $0x488] sm:$0xff] }
 0x19f   :  { %882 = vmatpush.msrb.mxu1 %v6777_v3  ;;  %906 = vmatpush.msra.mxu3 %v6822_v4  ;;  %v6809_v2 = vld [vmem:[%s14790_s3 + $0x628] sm:$0xff]  ;;  %v6782_v4 = vld [vmem:[%s14790_s3 + $0x550] sm:$0xff] }
 0x1a0   :  { %922 = vmatpush.msrb.mxu0 %v6796_v6  ;;  %745 = vmatpush.msra.mxu2 %v347_v7  ;;  %v6879_v3 = vld [vmem:[%s14790_s3 + $0x828] sm:$0xff]  ;;  %v6806_v7 = vld [vmem:[%s14790_s3 + $0x610] sm:$0xff] }
 0x1a1   :  { %883 = vmatpush.msrb.mxu1 %v6774_v8  ;;  %907 = vmatpush.msra.mxu3 %v6819_v9  ;;  %v6903_v6 = vld [vmem:[%s14790_s3 + $0x8e8] sm:$0xff]  ;;  %v6876_v8 = vld [vmem:[%s14790_s3 + $0x810] sm:$0xff]  ;;  %v6779_v9 = vld [vmem:[%s14790_s3 + $0x538] sm:$0xff] }
 0x1a2   :  { %923 = vmatpush.msrb.mxu0 %v6793_v10  ;;  %6751 = vmatmul.msk.f32.gmra.mxu2 %vm495_vm5, %v8582_v28  ;;  %v6900_v10 = vld [vmem:[%s14790_s3 + $0x8d0] sm:$0xff] }
 0x1a3   :  { %884 = vmatpush.msrb.mxu1 %v6771_v12  ;;  %661 = vmatmul.f32.gmra.mxu0 %v8505_v1  ;;  %v6880_v12 = vld [vmem:[%s14790_s3 + $0x830] sm:$0xff] }
 0x1a4   :  { %746 = vmatpush.msra.mxu2 %v344_v13  ;;  %908 = vmatpush.msra.mxu3 %v6816_v14  ;;  %v6873_v13 = vld [vmem:[%s14790_s3 + $0x7f8] sm:$0xff]  ;;  %v6776_v14 = vld [vmem:[%s14790_s3 + $0x520] sm:$0xff] }
 0x1a5   :  { %924 = vmatpush.msrb.mxu0 %v6790_v15  ;;  %885 = vmatpush.msrb.mxu1 %v6768_v16  ;;  %v6897_v15 = vld [vmem:[%s14790_s3 + $0x8b8] sm:$0xff] }
 0x1a6   :  { %747 = vmatpush.msra.mxu2 %v341_v17  ;;  %909 = vmatpush.msra.mxu3 %v6813_v18  ;;  %v6877_v16 = vld [vmem:[%s14790_s3 + $0x818] sm:$0xff]  ;;  %v6870_v17 = vld [vmem:[%s14790_s3 + $0x7e0] sm:$0xff]  ;;  %v6773_v18 = vld [vmem:[%s14790_s3 + $0x508] sm:$0xff] }
 0x1a7   :  { %925 = vmatpush.msrb.mxu0 %v6787_v19  ;;  %707 = vmatmul.f32.gmra.mxu3 %v8505_v1  ;;  %v6894_v19 = vld [vmem:[%s14790_s3 + $0x8a0] sm:$0xff] }
 0x1a8   :  { %6753 = vmatmul.msk.f32.gmra.mxu1 %vm495_vm5, %v8582_v28  ;;  %748 = vmatpush.msra.mxu2 %v338_v20  ;;  %v6874_v20 = vld [vmem:[%s14790_s3 + $0x800] sm:$0xff] }
 0x1a9   :  { %886 = vmatpush.msrb.mxu1 %v6765_v21  ;;  %910 = vmatpush.msra.mxu3 %v6810_v22  ;;  %v6867_v21 = vld [vmem:[%s14790_s3 + $0x7c8] sm:$0xff]  ;;  %v6770_v22 = vld [vmem:[%s14790_s3 + $0x4f0] sm:$0xff] }
 0x1aa   :  { %926 = vmatpush.msrb.mxu0 %v6784_v23  ;;  %749 = vmatpush.msra.mxu2 %v335_v24  ;;  %v6871_v23 = vld [vmem:[%s14790_s3 + $0x7e8] sm:$0xff]  ;;  %v6864_v24 = vld [vmem:[%s14790_s3 + $0x7b0] sm:$0xff] }
 0x1ab   :  { %887 = vmatpush.msrb.mxu1 %v6762_v25  ;;  %911 = vmatpush.msra.mxu3 %v6807_v26  ;;  %v6767_v25 = vld [vmem:[%s14790_s3 + $0x4d8] sm:$0xff]  ;;  %v6888_v26 = vld [vmem:[%s14790_s3 + $0x870] sm:$0xff] }
 0x1ac   :  { %927 = vmatpush.msrb.mxu0 %v6781_v27  ;;  %951 = vmatpush.msrb.mxu2 %v6826_v29  ;;  %v6868_v27 = vld [vmem:[%s14790_s3 + $0x7d0] sm:$0xff]  ;;  %v6861_v29 = vld [vmem:[%s14790_s3 + $0x798] sm:$0xff] }
 0x1ad   :  { %888 = vmatpush.msrb.mxu1 %v6759_v30  ;;  %750 = vmatmul.f32.vlgmr.msra.gmra.mxu2 %v8483_v40  ;;  %v6775_v40 = vld [vmem:[%s14790_s3 + $0x518] sm:$0xff]  ;;  %v6764_v30 = vld [vmem:[%s14790_s3 + $0x4c0] sm:$0xff] }
 0x1ae   :  { %6754 = vmatmul.msk.f32.vlgmr.msra.gmra.mxu0 %vm495_vm5, %v8531_v11  ;;  %912 = vmatpush.msra.mxu3 %v6804_v32  ;;  %v6820_v11 = vld [vmem:[%s14790_s3 + $0x680] sm:$0xff]  ;;  %v6885_v32 = vld [vmem:[%s14790_s3 + $0x858] sm:$0xff] }
 0x1af   :  { %928 = vmatpush.msrb.mxu0 %v6778_v34  ;;  %889 = vmatpush.msrb.mxu1 %v6756_v35  ;;  %v6865_v34 = vld [vmem:[%s14790_s3 + $0x7b8] sm:$0xff]  ;;  %v6858_v35 = vld [vmem:[%s14790_s3 + $0x780] sm:$0xff] }
 0x1b0   :  { %952 = vmatpush.msrb.mxu2 %v6823_v37  ;;  %966 = vmatpush.msrb.mxu3 %v6803_v38  ;;  %v6761_v37 = vld [vmem:[%s14790_s3 + $0x4a8] sm:$0xff]  ;;  %v6882_v38 = vld [vmem:[%s14790_s3 + $0x840] sm:$0xff] }
 0x1b1   :  { %1471 = vrot.lane.b32.xlu2 %v9120_v39, %s8325_s21  ;;  %929 = vmatpush.msrb.mxu0 %v6775_v40  ;;  %v6862_v40 = vld [vmem:[%s14790_s3 + $0x7a0] sm:$0xff] }
 0x1b2   :  { %997 = vmatpush.msra.mxu1 %v6827_v41  ;;  %6828 = vmatmul.msk.f32.vlgmr.msra.gmra.mxu3 %vm495_vm5, %v8635_v49  ;;  %v6855_v41 = vld [vmem:[%s14790_s3 + $0x768] sm:$0xff] }
 0x1b3   :  { %890 = vmatmul.f32.vlgmr.msrb.gmra.mxu1 %v8686_v5  ;;  %953 = vmatpush.msrb.mxu2 %v6820_v11  ;;  %v6881_v11 = vld [vmem:[%s14790_s3 + $0x838] sm:$0xff] }
 0x1b4   :  { %967 = vmatpush.msrb.mxu3 %v6800_v42  ;;  %930 = vmatpush.msrb.mxu0 %v6772_v43  ;;  %v6758_v42 = vld [vmem:[%s14790_s3 + $0x490] sm:$0xff] }
 0x1b5   :  { %998 = vmatpush.msra.mxu1 %v6824_v44  ;;  %954 = vmatpush.msrb.mxu2 %v6817_v45  ;;  %v6852_v43 = vld [vmem:[%s14790_s3 + $0x750] sm:$0xff]  ;;  %v6878_v44 = vld [vmem:[%s14790_s3 + $0x820] sm:$0xff] }
 0x1b6   :  { %968 = vmatpush.msrb.mxu3 %v6797_v46  ;;  %931 = vmatpush.msrb.mxu0 %v6769_v47  ;;  %v6856_v45 = vld [vmem:[%s14790_s3 + $0x770] sm:$0xff]  ;;  %v9338_v46 = vpop.permute.xlu2 %1093 }
 0x1b7   :  { %999 = vmatpush.msra.mxu1 %v6821_v48  ;;  %955 = vmatpush.msrb.mxu2 %v6814_v51  ;;  %v6904_v47 = vld [vmem:[%s14790_s3 + $0x8f0] sm:$0xff]  ;;  %v6849_v48 = vld [vmem:[%s14790_s3 + $0x738] sm:$0xff]  ;;  %v6875_v51 = vld [vmem:[%s14790_s3 + $0x808] sm:$0xff] }
 0x1b8   :  { %969 = vmatpush.msrb.mxu3 %v6794_v52  ;;  %753 = vmatmul.f32.gmra.mxu2 %v8505_v1  ;;  %v6808_v1 = vld [vmem:[%s14790_s3 + $0x620] sm:$0xff]  ;;  %v6901_v52 = vld [vmem:[%s14790_s3 + $0x8d8] sm:$0xff] }
 0x1b9   :  { %6755 = vmatmul.msk.f32.gmra.mxu0 %vm495_vm5, %v8582_v28  ;;  %1000 = vmatpush.msra.mxu1 %v6818_v53  ;;  %v6760_v28 = vld [vmem:[%s14790_s3 + $0x4a0] sm:$0xff] }
 0x1ba   :  { %932 = vmatpush.msrb.mxu0 %v6766_v54  ;;  %956 = vmatpush.msrb.mxu2 %v6811_v55  ;;  %v6846_v53 = vld [vmem:[%s14790_s3 + $0x720] sm:$0xff]  ;;  %v6872_v54 = vld [vmem:[%s14790_s3 + $0x7f0] sm:$0xff] }
 0x1bb   :  { %970 = vmatpush.msrb.mxu3 %v6791_v56  ;;  %1001 = vmatpush.msra.mxu1 %v6815_v57  ;;  %v6850_v55 = vld [vmem:[%s14790_s3 + $0x740] sm:$0xff]  ;;  %v6843_v57 = vld [vmem:[%s14790_s3 + $0x708] sm:$0xff] }
 0x1bc   :  { %933 = vmatpush.msrb.mxu0 %v6763_v58  ;;  %893 = vmatmul.f32.gmra.mxu1 %v8594_v33  ;;  %v6898_v56 = vld [vmem:[%s14790_s3 + $0x8c0] sm:$0xff]  ;;  %v6869_v58 = vld [vmem:[%s14790_s3 + $0x7d8] sm:$0xff] }
 0x1bd   :  { %6829 = vmatmul.msk.f32.gmra.mxu3 %vm495_vm5, %v8589_v31  ;;  %957 = vmatpush.msrb.mxu2 %v6808_v1  ;;  %v6847_v1 = vld [vmem:[%s14790_s3 + $0x728] sm:$0xff] }
 0x1be   :  { %971 = vmatpush.msrb.mxu3 %v6788_v59  ;;  %934 = vmatpush.msrb.mxu0 %v6760_v28  ;;  %v6895_v59 = vld [vmem:[%s14790_s3 + $0x8a8] sm:$0xff]  ;;  %v6840_v28 = vld [vmem:[%s14790_s3 + $0x6f0] sm:$0xff] }
 0x1bf   :  { %1002 = vmatpush.msra.mxu1 %v6812_v60  ;;  %958 = vmatpush.msrb.mxu2 %v6805_v61  ;;  %v6866_v60 = vld [vmem:[%s14790_s3 + $0x7c0] sm:$0xff]  ;;  %v6844_v61 = vld [vmem:[%s14790_s3 + $0x710] sm:$0xff] }
 0x1c0   :  { %972 = vmatpush.msrb.mxu3 %v6785_v62  ;;  %935 = vmatpush.msrb.mxu0 %v6757_v0  ;;  %v9391_v62 = vpop.permute.xlu1 %1283  ;;  %v9393_v0 = vpop.permute.xlu0 %1097 }
 0x1c1   :  { %1003 = vmatpush.msra.mxu1 %v6809_v2  ;;  %1107 = vmatpush.msra.mxu2 %v6879_v3  ;;  %v6892_v2 = vld [vmem:[%s14790_s3 + $0x890] sm:$0xff]  ;;  %v6837_v3 = vld [vmem:[%s14790_s3 + $0x6d8] sm:$0xff] }
 0x1c2   :  { %973 = vmatpush.msrb.mxu3 %v6782_v4  ;;  %1138 = vmatpush.msra.mxu0 %v6903_v6  ;;  %v6863_v4 = vld [vmem:[%s14790_s3 + $0x7a8] sm:$0xff]  ;;  %v6841_v6 = vld [vmem:[%s14790_s3 + $0x6f8] sm:$0xff] }
 0x1c3   :  { %936 = vmatmul.f32.vlgmr.msrb.gmra.mxu0 %v8686_v5  ;;  %6830 = vmatmul.msk.f32.vlgmr.msrb.gmra.mxu2 %vm495_vm5, %v8635_v49 }
 0x1c4   :  { %1004 = vmatpush.msra.mxu1 %v6806_v7  ;;  %1108 = vmatpush.msra.mxu2 %v6876_v8  ;;  %v1092_v7 = vpop.permute.xlu2 %1091  ;;  %v6889_v8 = vld [vmem:[%s14790_s3 + $0x878] sm:$0xff] }
 0x1c5   :  { %974 = vmatpush.msrb.mxu3 %v6779_v9  ;;  %1139 = vmatpush.msra.mxu0 %v6900_v10  ;;  %v6860_v9 = vld [vmem:[%s14790_s3 + $0x790] sm:$0xff]  ;;  %v6838_v10 = vld [vmem:[%s14790_s3 + $0x6e0] sm:$0xff] }
 0x1c6   :  { %1153 = vmatpush.msrb.mxu1 %v6880_v12  ;;  %1109 = vmatpush.msra.mxu2 %v6873_v13  ;;  %v6886_v12 = vld [vmem:[%s14790_s3 + $0x860] sm:$0xff]  ;;  %v9427_v13 = vsel %vm490_vm6, %v1092_v7, %v9338_v46 }
 0x1c7   :  { %975 = vmatpush.msrb.mxu3 %v6776_v14  ;;  %6832 = vmatmul.msk.f32.vlgmr.msra.gmra.mxu1 %vm495_vm5, %v8635_v49  ;;  %v6891_v49 = vld [vmem:[%s14790_s3 + $0x888] sm:$0xff]  ;;  %v6857_v14 = vld [vmem:[%s14790_s3 + $0x778] sm:$0xff] }
 0x1c8   :  { %1140 = vmatpush.msra.mxu0 %v6897_v15  ;;  %1154 = vmatpush.msrb.mxu1 %v6877_v16  ;;  %v6905_v15 = vld [vmem:[%s14790_s3 + $0x8f8] sm:$0xff]  ;;  %v6835_v16 = vld [vmem:[%s14790_s3 + $0x6c8] sm:$0xff] }
 0x1c9   :  { %1110 = vmatpush.msra.mxu2 %v6870_v17  ;;  %976 = vmatpush.msrb.mxu3 %v6773_v18  ;;  %v6883_v17 = vld [vmem:[%s14790_s3 + $0x848] sm:$0xff]  ;;  %v6854_v18 = vld [vmem:[%s14790_s3 + $0x760] sm:$0xff] }
 0x1ca   :  { %1141 = vmatpush.msra.mxu0 %v6894_v19  ;;  %1155 = vmatpush.msrb.mxu1 %v6874_v20  ;;  %v6902_v19 = vld [vmem:[%s14790_s3 + $0x8e0] sm:$0xff]  ;;  %v6916_v20 = vld [vmem:[%s14788_s1 + $0x30] sm:$0x1f] }
 0x1cb   :  { %1111 = vmatpush.msra.mxu2 %v6867_v21  ;;  %977 = vmatpush.msrb.mxu3 %v6770_v22  ;;  %v6917_v21 = vld [vmem:[%s14788_s1 + $0x38] sm:$0x1f]  ;;  %v1096_v22 = vpop.permute.xlu1 %1095 }
 0x1cc   :  { %1142 = vmatpush.msra.mxu0 %v6891_v49  ;;  %1156 = vmatpush.msrb.mxu1 %v6871_v23  ;;  %v6851_v49 = vld [vmem:[%s14790_s3 + $0x748] sm:$0xff] }
 0x1cd   :  { %939 = vmatmul.f32.gmra.mxu0 %v8594_v33  ;;  %6831 = vmatmul.msk.f32.gmra.mxu2 %vm495_vm5, %v8589_v31  ;;  %v6899_v23 = vld [vmem:[%s14790_s3 + $0x8c8] sm:$0xff] }
 0x1ce   :  { %1112 = vmatpush.msra.mxu2 %v6864_v24  ;;  %978 = vmatpush.msrb.mxu3 %v6767_v25  ;;  %v6914_v24 = vld [vmem:[%s14788_s1 + $0x20] sm:$0xff]  ;;  %v6848_v25 = vld [vmem:[%s14790_s3 + $0x730] sm:$0xff] }
 0x1cf   :  { %1143 = vmatpush.msra.mxu0 %v6888_v26  ;;  %1157 = vmatpush.msrb.mxu1 %v6868_v27  ;;  %v6896_v26 = vld [vmem:[%s14790_s3 + $0x8b0] sm:$0xff]  ;;  %v1100_v27 = vsel %vm490_vm6, %v1096_v22, %v9393_v0 }
 0x1d0   :  { %1113 = vmatpush.msra.mxu2 %v6861_v29  ;;  %979 = vmatpush.msrb.mxu3 %v6764_v30  ;;  %v6915_v29 = vld [vmem:[%s14788_s1 + $0x28] sm:$0xff]  ;;  %v1276_v30 = vld [vmem:[%s14788_s1 + $0x18] sm:$0x1f] }
 0x1d1   :  { %6833 = vmatmul.msk.f32.gmra.mxu1 %vm495_vm5, %v8589_v31  ;;  %1144 = vmatpush.msra.mxu0 %v6885_v32  ;;  %v6859_v31 = vld [vmem:[%s14790_s3 + $0x788] sm:$0xff]  ;;  %v6845_v32 = vld [vmem:[%s14790_s3 + $0x718] sm:$0xff] }
 0x1d2   :  { %1158 = vmatpush.msrb.mxu1 %v6865_v34  ;;  %1114 = vmatpush.msra.mxu2 %v6858_v35  ;;  %v6893_v34 = vld [vmem:[%s14790_s3 + $0x898] sm:$0xff]  ;;  %v6842_v35 = vld [vmem:[%s14790_s3 + $0x700] sm:$0xff] }
 0x1d3   :  { %980 = vmatpush.msrb.mxu3 %v6761_v37  ;;  %1145 = vmatpush.msra.mxu0 %v6882_v38  ;;  %v6890_v37 = vld [vmem:[%s14790_s3 + $0x880] sm:$0xff]  ;;  %v1274_v38 = vld [vmem:[%s14788_s1 + $0x8] sm:$0xff] }
 0x1d4   :  { %1159 = vmatpush.msrb.mxu1 %v6862_v40  ;;  %1115 = vmatpush.msra.mxu2 %v6855_v41  ;;  %v6935_v40 = vld [vmem:[%s14788_s1 + $0x58] sm:$0x1f]  ;;  %v6839_v41 = vld [vmem:[%s14790_s3 + $0x6e8] sm:$0xff] }
 0x1d5   :  { %1199 = vmatpush.msrb.mxu0 %v6881_v11  ;;  %981 = vmatpush.msrb.mxu3 %v6758_v42  ;;  %v6887_v11 = vld [vmem:[%s14790_s3 + $0x868] sm:$0xff] }
 0x1d6   :  { %1160 = vmatpush.msrb.mxu1 %v6859_v31  ;;  %982 = vmatmul.f32.vlgmr.msrb.gmra.mxu3 %v8686_v5  ;;  %v6853_v5 = vld [vmem:[%s14790_s3 + $0x758] sm:$0xff]  ;;  %v6933_v42 = vld [vmem:[%s14788_s1 + $0x48] sm:$0xff]  ;;  %v6836_v31 = vld [vmem:[%s14790_s3 + $0x6d0] sm:$0xff] }
 0x1d7   :  { %1116 = vmatpush.msra.mxu2 %v6852_v43  ;;  %6906 = vmatmul.msk.f32.vlgmr.msra.gmra.mxu0 %vm495_vm5, %v9338_v46  ;;  %v6884_v43 = vld [vmem:[%s14790_s3 + $0x850] sm:$0xff] }
 0x1d8   :  { %1200 = vmatpush.msrb.mxu0 %v6878_v44  ;;  %1161 = vmatpush.msrb.mxu1 %v6856_v45  ;;  %v1275_v44 = vld [vmem:[%s14788_s1 + $0x10] sm:$0x1f] }
 0x1d9   :  { %1184 = vmatpush.msra.mxu3 %v6904_v47  ;;  %1117 = vmatpush.msra.mxu2 %v6849_v48  ;;  %v6934_v45 = vld [vmem:[%s14788_s1 + $0x50] sm:$0x1f]  ;;  %v1273_v47 = vld [vmem:[%s14788_s1] sm:$0xff] }
 0x1da   :  { %1201 = vmatpush.msrb.mxu0 %v6875_v51  ;;  %1162 = vmatpush.msrb.mxu1 %v6853_v5  ;;  %v6932_v48 = vld [vmem:[%s14788_s1 + $0x40] sm:$0xff]  ;;  %v6944_v51 = vld [vmem:[%s14788_s1 + $0x70] sm:$0x1f] }
 0x1db   :  { %1185 = vmatpush.msra.mxu3 %v6901_v52  ;;  %1118 = vmatpush.msra.mxu2 %v6846_v53  ;;  %v6942_v5 = vld [vmem:[%s14788_s1 + $0x60] sm:$0xff]  ;;  %v6943_v52 = vld [vmem:[%s14788_s1 + $0x68] sm:$0xff]  ;;  %v1286_v53 = vpop.permute.xlu0 %1285 }
 0x1dc   :  { %1202 = vmatpush.msrb.mxu0 %v6872_v54  ;;  %1163 = vmatpush.msrb.mxu1 %v6850_v55  ;;  %v8296_v54 = vld [vmem:[%s14787_s0 + $0x20] sm:$0xff] }
 0x1dd   :  { %1186 = vmatpush.msra.mxu3 %v6898_v56  ;;  %1119 = vmatpush.msra.mxu2 %v6843_v57  ;;  %v8297_v57 = vld [vmem:[%s14787_s0 + $0x28] sm:$0x1f] }
 0x1de   :  { %1203 = vmatpush.msrb.mxu0 %v6869_v58  ;;  %1164 = vmatpush.msrb.mxu1 %v6847_v1 }
 0x1df   :  { %1187 = vmatpush.msra.mxu3 %v6895_v59  ;;  %1120 = vmatpush.msra.mxu2 %v6840_v28 }
 0x1e0   :  { %985 = vmatmul.f32.gmra.mxu3 %v8594_v33  ;;  %6907 = vmatmul.msk.f32.gmra.mxu0 %vm495_vm5, %v9393_v0  ;;  %v6834_v33 = vld [vmem:[%s14790_s3 + $0x6c0] sm:$0xff] }
 0x1e1   :  { %1204 = vmatpush.msrb.mxu0 %v6866_v60  ;;  %1165 = vmatpush.msrb.mxu1 %v6844_v61 }
 0x1e2   :  { %1188 = vmatpush.msra.mxu3 %v6892_v2  ;;  %1121 = vmatpush.msra.mxu2 %v6837_v3 }
 0x1e3   :  { %1205 = vmatpush.msrb.mxu0 %v6863_v4  ;;  %1166 = vmatpush.msrb.mxu1 %v6841_v6 }
 0x1e4   :  { %1189 = vmatpush.msra.mxu3 %v6889_v8  ;;  %1122 = vmatpush.msra.mxu2 %v6834_v33 }
 0x1e5   :  { %1206 = vmatpush.msrb.mxu0 %v6860_v9  ;;  %1123 = vmatmul.f32.vlgmr.msra.gmra.mxu2 %v9427_v13 }
 0x1e6   :  { %1167 = vmatpush.msrb.mxu1 %v6838_v10  ;;  %1190 = vmatpush.msra.mxu3 %v6886_v12 }
 0x1e7   :  { %1207 = vmatpush.msrb.mxu0 %v6857_v14  ;;  %1230 = vmatpush.msrb.mxu2 %v6905_v15 }
 0x1e8   :  { %1168 = vmatpush.msrb.mxu1 %v6835_v16  ;;  %1191 = vmatpush.msra.mxu3 %v6883_v17 }
 0x1e9   :  { %1169 = vmatmul.f32.vlgmr.msrb.gmra.mxu1 %v9427_v13  ;;  %6908 = vmatmul.msk.f32.vlgmr.msra.gmra.mxu3 %vm495_vm5, %v9338_v46 }
 0x1ea   :  { %1208 = vmatpush.msrb.mxu0 %v6854_v18  ;;  %1231 = vmatpush.msrb.mxu2 %v6902_v19 }
 0x1eb   :  { %6918 = vmatpush.msk.msrb.mxu3 %vm63_vm0, %v6916_v20  ;;  %6921 = vmatpush.msk.msra.mxu1 %vm63_vm0, %v6917_v21 }
 0x1ec   :  { %1209 = vmatpush.msrb.mxu0 %v6851_v49  ;;  %1232 = vmatpush.msrb.mxu2 %v6899_v23 }
 0x1ed   :  { %1126 = vmatmul.f32.gmra.mxu2 %v1100_v27  ;;  %1312 = vmatpush.msrb.mxu3 %v6914_v24 }
 0x1ee   :  { %1210 = vmatpush.msrb.mxu0 %v6848_v25  ;;  %1233 = vmatpush.msrb.mxu2 %v6896_v26 }
 0x1ef   :  { %1335 = vmatpush.msra.mxu1 %v6915_v29  ;;  %6927 = vmatpush.msk.msra.mxu3 %vm63_vm0, %v1276_v30 }
 0x1f0   :  { %1211 = vmatpush.msrb.mxu0 %v6845_v32  ;;  %1234 = vmatpush.msrb.mxu2 %v6893_v34 }
 0x1f1   :  { %1172 = vmatmul.f32.gmra.mxu1 %v1100_v27  ;;  %6909 = vmatmul.msk.f32.gmra.mxu3 %vm495_vm5, %v9393_v0 }
 0x1f2   :  { %1212 = vmatpush.msrb.mxu0 %v6842_v35  ;;  %1235 = vmatpush.msrb.mxu2 %v6890_v37  ;;  %v40_v37 = vld [vmem:[%s14791_s4] sm:$0x7] }
 0x1f3   :  { %1391 = vmatpush.msra.mxu3 %v1274_v38  ;;  %6939 = vmatpush.msk.msrb.mxu1 %vm63_vm0, %v6935_v40 }
 0x1f4   :  { %1213 = vmatpush.msrb.mxu0 %v6839_v41  ;;  %1236 = vmatpush.msrb.mxu2 %v6887_v11 }
 0x1f5   :  { %1455 = vmatpush.msrb.mxu1 %v6933_v42 }
 0x1f6   :  { %1214 = vmatpush.msrb.mxu0 %v6836_v31  ;;  %1237 = vmatpush.msrb.mxu2 %v6884_v43  ;;  %v9597_v43 = vperm.slane %v40_v37, 0 }
 0x1f7   :  { %1215 = vmatmul.f32.vlgmr.msrb.gmra.mxu0 %v9427_v13  ;;  %6910 = vmatmul.msk.f32.vlgmr.msrb.gmra.mxu2 %vm495_vm5, %v9338_v46  ;;  %v6945_v46 = vld [vmem:[%s14788_s1 + $0x78] sm:$0x1f] }
 0x1f8   :  { %6924 = vmatpush.msk.msra.mxu2 %vm63_vm0, %v1275_v44  ;;  %6936 = vmatpush.msk.msra.mxu0 %vm63_vm0, %v6934_v45  ;;  %v540_v55 = vpop.f32.mrf.mxu1 }
 0x1f9   :  { %6919 = vmatmul.msk.f32.vlgmr.msrb.gmra.mxu3 %vm58_vm1, %v9391_v62  ;;  %6922 = vmatmul.msk.f32.vlgmr.msra.gmra.mxu1 %vm58_vm1, %v9391_v62 }
 0x1fa   :  { %1368 = vmatpush.msra.mxu2 %v1273_v47  ;;  %1432 = vmatpush.msra.mxu0 %v6932_v48 }
 0x1fb   :  { %6949 = vmatpush.msk.msrb.mxu3 %vm63_vm0, %v6945_v46 }
 0x1fc   :  { %6946 = vmatpush.msk.msrb.mxu2 %vm63_vm0, %v6944_v51  ;;  %v517_v28 = vpop.f32.mrf.mxu0 }
 0x1fd   :  { %1523 = vmatpush.msrb.mxu3 %v6943_v52 }
 0x1fe   :  { %1500 = vmatpush.msrb.mxu2 %v6942_v5  ;;  %v586_v56 = vpop.f32.mrf.mxu3 }
 0x1ff   :  { %1218 = vmatmul.f32.gmra.mxu0 %v1100_v27  ;;  %6911 = vmatmul.msk.f32.gmra.mxu2 %vm495_vm5, %v9393_v0  ;;  %v541_v27 = vadd.f32 %v540_v55, %v517_v28 }
 0x200   :  { %v543_v58 = vpop.f32.mrf.mxu1 }
 0x201   :  { %6920 = vmatmul.msk.f32.gmra.mxu3 %vm58_vm1, %v1286_v53  ;;  %6923 = vmatmul.msk.f32.gmra.mxu1 %vm58_vm1, %v1286_v53 }
 0x202   :  { %v563_v61 = vpop.f32.mrf.mxu2 }
 0x203   :  { %v587_v32 = vadd.f32 %v586_v56, %v563_v61  ;;  %v9600_v56 = vperm.slane %v40_v37, 1 }
 0x206   :  { %v589_v59 = vpop.f32.mrf.mxu3 }
 0x207   :  { %6925 = vmatmul.msk.f32.vlgmr.msra.gmra.mxu2 %vm58_vm1, %v8296_v54  ;;  %6937 = vmatmul.msk.f32.vlgmr.msra.gmra.mxu0 %vm58_vm1, %v9120_v39 }
 0x208   :  { %v9578_v60 = vpop.f32.mrf.mxu1 }
 0x209   :  { %6928 = vmatmul.msk.f32.vlgmr.msra.gmra.mxu3 %vm58_vm1, %v8296_v54  ;;  %6940 = vmatmul.msk.f32.vlgmr.msrb.gmra.mxu1 %vm58_vm1, %v9120_v39  ;;  %v1474_v39 = vpop.permute.xlu0 %1473 }
 0x20b   :  { %v1472_v1 = vpop.permute.xlu2 %1471 }
 0x20c   :  { %v520_v62 = vpop.f32.mrf.mxu0 }
 0x20d   :  { %v544_v44 = vadd.f32 %v543_v58, %v520_v62 }
 0x20e   :  { %v9581_v0 = vpop.f32.mrf.mxu3 }
 0x20f   :  { %6926 = vmatmul.msk.f32.gmra.mxu2 %vm58_vm1, %v8297_v57  ;;  %6938 = vmatmul.msk.f32.gmra.mxu0 %vm58_vm1, %v8844_v63 }
 0x210   :  { %v9584_v2 = vpop.f32.mrf.mxu1 }
 0x211   :  { %6929 = vmatmul.msk.f32.gmra.mxu3 %vm58_vm1, %v8297_v57  ;;  %6941 = vmatmul.msk.f32.gmra.mxu1 %vm58_vm1, %v8844_v63 }
 0x212   :  { %v566_v63 = vpop.f32.mrf.mxu2 }
 0x213   :  { %v590_v51 = vadd.f32 %v589_v59, %v566_v63  ;;  %v633_v63 = vadd.f32 %v9581_v0, %v9578_v60 }
 0x216   :  { %v659_v3 = vpop.f32.mrf.mxu0  ;;  %v9586_v4 = vpop.f32.mrf.mxu3 }
 0x217   :  { %6947 = vmatmul.msk.f32.vlgmr.msrb.gmra.mxu2 %vm58_vm1, %v1472_v1  ;;  %v660_v34 = vadd.f32 %v659_v3, %v541_v27  ;;  %v636_v60 = vadd.f32 %v9586_v4, %v9584_v2 }
 0x219   :  { %6950 = vmatmul.msk.f32.vlgmr.msrb.gmra.mxu3 %vm58_vm1, %v1472_v1 }
 0x21a   :  { %v728_v7 = vpop.f32.mrf.mxu1 }
 0x21c   :  { %v682_v6 = vpop.f32.mrf.mxu2 }
 0x21d   :  { %v683_v38 = vadd.f32 %v682_v6, %v660_v34 }
 0x21f   :  { %6948 = vmatmul.msk.f32.gmra.mxu2 %vm58_vm1, %v1474_v39 }
 0x220   :  { %v662_v8 = vpop.f32.mrf.mxu0 }
 0x221   :  { %6951 = vmatmul.msk.f32.gmra.mxu3 %vm58_vm1, %v1474_v39  ;;  %v705_v33 = vpop.f32.mrf.mxu3  ;;  %v663_v46 = vadd.f32 %v662_v8, %v544_v44 }
 0x222   :  { %v706_v40 = vadd.f32 %v705_v33, %v587_v32 }
 0x224   :  { %v729_v47 = vadd.f32 %v728_v7, %v706_v40 }
 0x225   :  { %v685_v9 = vpop.f32.mrf.mxu2  ;;  %v731_v10 = vpop.f32.mrf.mxu1 }
 0x226   :  { %v686_v1 = vadd.f32 %v685_v9, %v663_v46 }
 0x22a   :  { %v708_v13 = vpop.f32.mrf.mxu3 }
 0x22b   :  { %v9588_v12 = vpop.f32.mrf.mxu0  ;;  %v709_v28 = vadd.f32 %v708_v13, %v590_v51 }
 0x22d   :  { %v732_v6 = vadd.f32 %v731_v10, %v709_v28 }
 0x230   :  { %v751_v14 = vpop.f32.mrf.mxu2  ;;  %v891_v15 = vpop.f32.mrf.mxu1 }
 0x235   :  { %v914_v17 = vpop.f32.mrf.mxu3 }
 0x236   :  { %v9590_v16 = vpop.f32.mrf.mxu0  ;;  %v915_v35 = vadd.f32 %v914_v17, %v891_v15  ;;  %v752_v15 = vadd.f32 %v751_v14, %v633_v63  ;;  %v9610_v14 = vperm.slane %v40_v37, 2  ;;  %v6998_v63 = vld [vmem:[%s14790_s3 + $0x3b0] sm:$0xff] }
 0x237   :  { %1762 = vmatpush.msra.mxu2 %v6998_v63 }
 0x238   :  { %v1012_v11 = vadd.f32 %v915_v35, %v683_v38 }
 0x239   :  { %v894_v19 = vpop.f32.mrf.mxu1 }
 0x23b   :  { %v9592_v18 = vpop.f32.mrf.mxu2 }
 0x240   :  { %v937_v20 = vpop.f32.mrf.mxu0  ;;  %v917_v21 = vpop.f32.mrf.mxu3 }
 0x241   :  { %v918_v5 = vadd.f32 %v917_v21, %v894_v19 }
 0x243   :  { %v1015_v58 = vadd.f32 %v918_v5, %v686_v1  ;;  %v6994_v1 = vld [vmem:[%s14790_s3 + $0x390] sm:$0xff] }
 0x244   :  { %v1006_v49 = vpop.f32.mrf.mxu1 }
 0x246   :  { %v960_v22 = vpop.f32.mrf.mxu2 }
 0x247   :  { %v961_v42 = vadd.f32 %v960_v22, %v937_v20  ;;  %v775_v22 = vadd.f32 %v9588_v12, %v752_v15  ;;  %v6995_v15 = vld [vmem:[%s14790_s3 + $0x398] sm:$0xff] }
 0x248   :  { %1763 = vmatpush.msra.mxu2 %v6995_v15 }
 0x249   :  { %v1013_v53 = vadd.f32 %v961_v42, %v729_v47 }
 0x24a   :  { %v940_v24 = vpop.f32.mrf.mxu0 }
 0x24e   :  { %v1009_v26 = vpop.f32.mrf.mxu1 }
 0x250   :  { %v963_v25 = vpop.f32.mrf.mxu2 }
 0x251   :  { %v964_v62 = vadd.f32 %v963_v25, %v940_v24 }
 0x253   :  { %v1016_v17 = vadd.f32 %v964_v62, %v732_v6  ;;  %v6991_v62 = vld [vmem:[%s14790_s3 + $0x378] sm:$0xff]  ;;  %v7018_v6 = vld [vmem:[%s14790_s3 + $0x450] sm:$0xff] }
 0x254   :  { %v1147_v30 = vpop.f32.mrf.mxu0 }
 0x259   :  { %v983_v23 = vpop.f32.mrf.mxu3 }
 0x25a   :  { %v1007_v20 = vadd.f32 %v1006_v49, %v983_v23 }
 0x25c   :  { %v1014_v0 = vadd.f32 %v1007_v20, %v775_v22  ;;  %v7012_v22 = vld [vmem:[%s14790_s3 + $0x420] sm:$0xff] }
 0x25d   :  { %v1150_v57 = vpop.f32.mrf.mxu0 }
 0x263   :  { %v986_v29 = vpop.f32.mrf.mxu3 }
 0x264   :  { %v1010_v49 = vadd.f32 %v1009_v26, %v986_v29 }
 0x266   :  { %v1170_v45 = vpop.f32.mrf.mxu1 }
 0x268   :  { %v1124_v41 = vpop.f32.mrf.mxu2 }
 0x269   :  { %v1148_v31 = vadd.f32 %v1147_v30, %v1124_v41  ;;  %v755_v30 = vadd.f32 %v9592_v18, %v636_v60 }
 0x26b   :  { %v1245_v48 = vadd.f32 %v1148_v31, %v1012_v11  ;;  %v778_v12 = vadd.f32 %v9590_v16, %v755_v30  ;;  %v6986_v30 = vld [vmem:[%s14790_s3 + $0x350] sm:$0xff] }
 0x26c   :  { %v1193_v52 = vpop.f32.mrf.mxu3 }
 0x26d   :  { %v1258_v54 = vadd.f32 %v9597_v43, %v1245_v48  ;;  %v1194_v55 = vadd.f32 %v1193_v52, %v1170_v45  ;;  %v1017_v38 = vadd.f32 %v1010_v49, %v778_v12  ;;  %v7022_v12 = vld [vmem:[%s14790_s3 + $0x470] sm:$0xff] }
 0x26e   :  { %v1173_v8 = vpop.f32.mrf.mxu1  ;;  %1793 = vmatpush.msra.mxu3 %v7022_v12  ;;  %v6953_v12 = vld [vmem:[%s14790_s3 + $0x248] sm:$0xff] }
 0x26f   :  { %1264 = vst [vmem:[#allocation3] sm:$0xff] %v1258_v54  ;;  %v1246_v39 = vadd.f32 %v1194_v55, %v1013_v53 }
 0x270   :  { %v1127_v61 = vpop.f32.mrf.mxu2 }
 0x271   :  { %v1259_v3 = vadd.f32 %v9600_v56, %v1246_v39  ;;  %v1151_v59 = vadd.f32 %v1150_v57, %v1127_v61  ;;  %v6997_v57 = vld [vmem:[%s14790_s3 + $0x3a8] sm:$0xff] }
 0x272   :  { %1716 = vmatpush.msrb.mxu0 %v6997_v57  ;;  %v6961_v57 = vld [vmem:[%s14790_s3 + $0x288] sm:$0xff] }
 0x273   :  { %1265 = vst [vmem:[#allocation3 + $0x8] sm:$0xff] %v1259_v3  ;;  %v1248_v7 = vadd.f32 %v1151_v59, %v1015_v58  ;;  %v7021_v3 = vld [vmem:[%s14790_s3 + $0x468] sm:$0xff] }
 0x274   :  { %v1196_v33 = vpop.f32.mrf.mxu3  ;;  %v1216_v19 = vpop.f32.mrf.mxu0  ;;  %1717 = vmatpush.msrb.mxu0 %v6994_v1  ;;  %1747 = vmatpush.msra.mxu1 %v7021_v3  ;;  %v6968_v1 = vld [vmem:[%s14790_s3 + $0x2c0] sm:$0xff] }
 0x275   :  { %v1261_v9 = vadd.f32 %v9597_v43, %v1248_v7  ;;  %v1197_v13 = vadd.f32 %v1196_v33, %v1173_v8  ;;  %v6988_v33 = vld [vmem:[%s14790_s3 + $0x360] sm:$0xff] }
 0x276   :  { %v1337_v2 = vpop.f32.mrf.mxu1  ;;  %1718 = vmatpush.msrb.mxu0 %v6991_v62  ;;  %1748 = vmatpush.msra.mxu1 %v7018_v6  ;;  %v6987_v6 = vld [vmem:[%s14790_s3 + $0x358] sm:$0xff] }
 0x277   :  { %1267 = vst [vmem:[#allocation3 + $0x18] sm:$0xf] %v1261_v9  ;;  %v1249_v21 = vadd.f32 %v1197_v13, %v1016_v17  ;;  %v7015_v17 = vld [vmem:[%s14790_s3 + $0x438] sm:$0xff]  ;;  %v6992_v13 = vld [vmem:[%s14790_s3 + $0x380] sm:$0xff] }
 0x278   :  { %1719 = vmatpush.msrb.mxu0 %v6988_v33  ;;  %1749 = vmatpush.msra.mxu1 %v7015_v17  ;;  %v6962_v33 = vld [vmem:[%s14790_s3 + $0x290] sm:$0xff] }
 0x279   :  { %v1262_v24 = vadd.f32 %v9600_v56, %v1249_v21  ;;  %v6985_v21 = vld [vmem:[%s14790_s3 + $0x348] sm:$0xff]  ;;  %1764 = vmatpush.msra.mxu2 %v6992_v13  ;;  %v6984_v13 = vld [vmem:[%s14790_s3 + $0x340] sm:$0xff] }
 0x27a   :  { %v1239_v25 = vpop.f32.mrf.mxu2  ;;  %1720 = vmatpush.msrb.mxu0 %v6985_v21  ;;  %1750 = vmatpush.msra.mxu1 %v7012_v22  ;;  %v1597_v21 = vld [vmem:[%s14790_s3 + $0x168] sm:$0xff]  ;;  %v6959_v22 = vld [vmem:[%s14790_s3 + $0x278] sm:$0xff] }
 0x27b   :  { %1268 = vst [vmem:[#allocation3 + $0x20] sm:$0xf] %v1262_v24  ;;  %v1240_v10 = vadd.f32 %v1239_v25, %v1216_v19  ;;  %v6989_v25 = vld [vmem:[%s14790_s3 + $0x368] sm:$0xff] }
 0x27c   :  { %v1314_v27 = vpop.f32.mrf.mxu3  ;;  %v1219_v34 = vpop.f32.mrf.mxu0  ;;  %1765 = vmatpush.msra.mxu2 %v6989_v25  ;;  %v1594_v25 = vld [vmem:[%s14790_s3 + $0x150] sm:$0xff] }
 0x27d   :  { %v1247_v32 = vadd.f32 %v1240_v10, %v1014_v0  ;;  %v6982_v10 = vld [vmem:[%s14790_s3 + $0x330] sm:$0xff] }
 0x27e   :  { %v1340_v26 = vpop.f32.mrf.mxu1  ;;  %1721 = vmatpush.msrb.mxu0 %v6982_v10  ;;  %1766 = vmatpush.msra.mxu2 %v6986_v30  ;;  %v1591_v10 = vld [vmem:[%s14790_s3 + $0x138] sm:$0xff]  ;;  %v1585_v30 = vld [vmem:[%s14790_s3 + $0x108] sm:$0xff] }
 0x27f   :  { %v1260_v23 = vadd.f32 %v9610_v14, %v1247_v32 }
 0x281   :  { %1266 = vst [vmem:[#allocation3 + $0x10] sm:$0xff] %v1260_v23  ;;  %v6979_v23 = vld [vmem:[%s14790_s3 + $0x318] sm:$0xff] }
 0x282   :  { %v1242_v35 = vpop.f32.mrf.mxu2  ;;  %1722 = vmatpush.msrb.mxu0 %v6979_v23  ;;  %v7001_v23 = vld [vmem:[%s14790_s3 + $0x3c8] sm:$0xff] }
 0x283   :  { %v1243_v40 = vadd.f32 %v1242_v35, %v1219_v34  ;;  %v7006_v34 = vld [vmem:[%s14790_s3 + $0x3f0] sm:$0xff]  ;;  %v6983_v35 = vld [vmem:[%s14790_s3 + $0x338] sm:$0xff] }
 0x284   :  { %v1317_v4 = vpop.f32.mrf.mxu3  ;;  %v1434_v31 = vpop.f32.mrf.mxu0  ;;  %1767 = vmatpush.msra.mxu2 %v6983_v35  ;;  %v7023_v35 = vld [vmem:[%s14790_s3 + $0x478] sm:$0xff] }
 0x285   :  { %v1250_v41 = vadd.f32 %v1243_v40, %v1017_v38  ;;  %v6976_v40 = vld [vmem:[%s14790_s3 + $0x300] sm:$0xff] }
 0x286   :  { %v1457_v16 = vpop.f32.mrf.mxu1  ;;  %1723 = vmatpush.msrb.mxu0 %v6976_v40  ;;  %v6975_v40 = vld [vmem:[%s14790_s3 + $0x2f8] sm:$0xff] }
 0x287   :  { %v1263_v37 = vadd.f32 %v9610_v14, %v1250_v41  ;;  %v6980_v41 = vld [vmem:[%s14790_s3 + $0x320] sm:$0xff] }
 0x288   :  { %v4947_v11 = vld [vmem:[#allocation3 + $0x1] ss:$8 sm:$0x7]  ;;  %1768 = vmatpush.msra.mxu2 %v6980_v41  ;;  %v7020_v41 = vld [vmem:[%s14790_s3 + $0x460] sm:$0xff] }
 0x289   :  { %5007 = vst [vmem:[#allocation1] ss:$9 sm:$0xff] %v4947_v11  ;;  %v7019_v11 = vld [vmem:[%s14790_s3 + $0x458] sm:$0xff] }
 0x28a   :  { %v1370_v42 = vpop.f32.mrf.mxu2  ;;  %1269 = vst [vmem:[#allocation3 + $0x28] sm:$0xf] %v1263_v37  ;;  %v6973_v37 = vld [vmem:[%s14790_s3 + $0x2e8] sm:$0xff]  ;;  %1794 = vmatpush.msra.mxu3 %v7019_v11 }
 0x28b   :  { %v1371_v45 = vadd.f32 %v1370_v42, %v1314_v27  ;;  %v7009_v27 = vld [vmem:[%s14790_s3 + $0x408] sm:$0xff]  ;;  %v7000_v42 = vld [vmem:[%s14790_s3 + $0x3c0] sm:$0xff]  ;;  %1724 = vmatpush.msrb.mxu0 %v6973_v37 }
 0x28c   :  { %v1393_v18 = vpop.f32.mrf.mxu3  ;;  %v1437_v28 = vpop.f32.mrf.mxu0  ;;  %1751 = vmatpush.msra.mxu1 %v7009_v27  ;;  %v1588_v27 = vld [vmem:[%s14790_s3 + $0x120] sm:$0xff]  ;;  %v1573_v11 = vld [vmem:[%s14790_s3 + $0xa8] sm:$0xff] }
 0x28d   :  { %v1394_v47 = vadd.f32 %v1393_v18, %v1337_v2  ;;  %v1463_v48 = vadd.f32 %v1434_v31, %v1371_v45  ;;  %v7003_v2 = vld [vmem:[%s14790_s3 + $0x3d8] sm:$0xff]  ;;  %v6977_v18 = vld [vmem:[%s14790_s3 + $0x308] sm:$0xff]  ;;  %v7016_v31 = vld [vmem:[%s14790_s3 + $0x440] sm:$0xff] }
 0x28e   :  { %v1460_v59 = vpop.f32.mrf.mxu1  ;;  %1752 = vmatpush.msra.mxu1 %v7006_v34  ;;  %v6996_v45 = vld [vmem:[%s14790_s3 + $0x3a0] sm:$0xff]  ;;  %1769 = vmatpush.msra.mxu2 %v6977_v18  ;;  %v6978_v34 = vld [vmem:[%s14790_s3 + $0x310] sm:$0xff]  ;;  %v7017_v18 = vld [vmem:[%s14790_s3 + $0x448] sm:$0xff] }
 0x28f   :  { %v1464_v46 = vadd.f32 %v1457_v16, %v1394_v47  ;;  %v6967_v16 = vld [vmem:[%s14790_s3 + $0x2b8] sm:$0xff]  ;;  %v7013_v47 = vld [vmem:[%s14790_s3 + $0x428] sm:$0xff]  ;;  %1795 = vmatpush.msra.mxu3 %v7016_v31  ;;  %v6972_v37 = vld [vmem:[%s14790_s3 + $0x2e0] sm:$0xff] }
 0x290   :  { %1753 = vmatpush.msra.mxu1 %v7003_v2  ;;  %v1621_v2 = vld [vmem:[%s14790_s3 + $0x228] sm:$0xff]  ;;  %v1615_v31 = vld [vmem:[%s14790_s3 + $0x1f8] sm:$0xff] }
 0x291   :  { %1796 = vmatpush.msra.mxu3 %v7013_v47  ;;  %v1612_v47 = vld [vmem:[%s14790_s3 + $0x1e0] sm:$0xff] }
 0x292   :  { %v1373_v29 = vpop.f32.mrf.mxu2  ;;  %1754 = vmatpush.msra.mxu1 %v7000_v42  ;;  %v1618_v42 = vld [vmem:[%s14790_s3 + $0x210] sm:$0xff] }
 0x293   :  { %v1374_v53 = vadd.f32 %v1373_v29, %v1317_v4  ;;  %v6970_v29 = vld [vmem:[%s14790_s3 + $0x2d0] sm:$0xff] }
 0x294   :  { %v1396_v44 = vpop.f32.mrf.mxu3  ;;  %1725 = vmatpush.msrb.mxu0 %v6970_v29  ;;  %v6969_v29 = vld [vmem:[%s14790_s3 + $0x2c8] sm:$0xff] }
 0x295   :  { %v1397_v39 = vadd.f32 %v1396_v44, %v1340_v26  ;;  %v1465_v7 = vadd.f32 %v1437_v28, %v1374_v53  ;;  %v6999_v26 = vld [vmem:[%s14790_s3 + $0x3b8] sm:$0xff]  ;;  %v6974_v44 = vld [vmem:[%s14790_s3 + $0x2f0] sm:$0xff] }
 0x296   :  { %1808 = vmatpush.msrb.mxu1 %v6999_v26  ;;  %1770 = vmatpush.msra.mxu2 %v6974_v44  ;;  %v6958_v28 = vld [vmem:[%s14790_s3 + $0x270] sm:$0xff] }
 0x297   :  { %v1466_v19 = vadd.f32 %v1460_v59, %v1397_v39  ;;  %1726 = vmatpush.msrb.mxu0 %v6967_v16  ;;  %v6990_v39 = vld [vmem:[%s14790_s3 + $0x370] sm:$0xff]  ;;  %v6965_v59 = vld [vmem:[%s14790_s3 + $0x2a8] sm:$0xff] }
 0x298   :  { %1809 = vmatpush.msrb.mxu1 %v6996_v45  ;;  %v1570_v26 = vld [vmem:[%s14790_s3 + $0x90] sm:$0xff]  ;;  %v1567_v45 = vld [vmem:[%s14790_s3 + $0x78] sm:$0xff] }
 0x299   :  { %v7014_v44 = vld [vmem:[%s14790_s3 + $0x430] sm:$0xff] }
 0x29a   :  { %v1502_v51 = vpop.f32.mrf.mxu2  ;;  %v6966_v16 = vld [vmem:[%s14790_s3 + $0x2b0] sm:$0xff] }
 0x29b   :  { %v1531_v5 = vadd.f32 %v1502_v51, %v1463_v48  ;;  %v6964_v48 = vld [vmem:[%s14790_s3 + $0x2a0] sm:$0xff]  ;;  %v6971_v51 = vld [vmem:[%s14790_s3 + $0x2d8] sm:$0xff] }
 0x29c   :  { %v1525_v52 = vpop.f32.mrf.mxu3  ;;  %1727 = vmatpush.msrb.mxu0 %v6964_v48  ;;  %1771 = vmatpush.msra.mxu2 %v6971_v51  ;;  %v7011_v48 = vld [vmem:[%s14790_s3 + $0x418] sm:$0xff]  ;;  %v1564_v51 = vld [vmem:[%s14790_s3 + $0x60] sm:$0xff] }
 0x29d   :  { %v1535_v54 = vadd.f32 %v1531_v5, %v8480_v36  ;;  %v1532_v55 = vadd.f32 %v1525_v52, %v1464_v46  ;;  %v6993_v46 = vld [vmem:[%s14790_s3 + $0x388] sm:$0xff] }
 0x29e   :  { %1810 = vmatpush.msrb.mxu1 %v6993_v46  ;;  %1728 = vmatpush.msrb.mxu0 %v6961_v57  ;;  %v6963_v46 = vld [vmem:[%s14790_s3 + $0x298] sm:$0xff]  ;;  %v1561_v57 = vld [vmem:[%s14790_s3 + $0x48] sm:$0xff] }
 0x29f   :  { %v9623_v61 = vmax.f32 %v1535_v54, 0.0  ;;  %v1536_v58 = vadd.f32 %v1532_v55, %v8489_v50  ;;  %1772 = vmatpush.msra.mxu2 %v6968_v1  ;;  %v6960_v1 = vld [vmem:[%s14790_s3 + $0x280] sm:$0xff] }
 0x2a0   :  { %1811 = vmatpush.msrb.mxu1 %v6990_v39  ;;  %1729 = vmatpush.msrb.mxu0 %v6958_v28  ;;  %v1606_v28 = vld [vmem:[%s14790_s3 + $0x1b0] sm:$0xff]  ;;  %v7005_v39 = vld [vmem:[%s14790_s3 + $0x3e8] sm:$0xff] }
 0x2a1   :  { %1544 = vst [vmem:[#allocation2 + $0x20] sm:$0xff] %v9623_v61  ;;  %v1540_v8 = vmax.f32 %v1536_v58, 0.0  ;;  %1700 = vrot.lane.b32.xlu0 %v9623_v61, %s8326_s2  ;;  %v7010_v58 = vld [vmem:[%s14790_s3 + $0x410] sm:$0xff]  ;;  %1773 = vmatpush.msra.mxu2 %v6965_v59 }
 0x2a2   :  { %v1505_v9 = vpop.f32.mrf.mxu2  ;;  %1797 = vmatpush.msra.mxu3 %v7010_v58  ;;  %1812 = vmatpush.msrb.mxu1 %v6987_v6  ;;  %v1558_v58 = vld [vmem:[%s14790_s3 + $0x30] sm:$0xff]  ;;  %v1555_v6 = vld [vmem:[%s14790_s3 + $0x18] sm:$0xff] }
 0x2a3   :  { %1545 = vst.msk [vmem:[#allocation2 + $0x28] sm:$0xff] %vm324_vm2, %v1540_v8  ;;  %v1533_v20 = vadd.f32 %v1505_v9, %v1465_v7  ;;  %v7007_v7 = vld [vmem:[%s14790_s3 + $0x3f8] sm:$0xff]  ;;  %v6952_v9 = vld [vmem:[%s14790_s3 + $0x240] sm:$0xff]  ;;  %1774 = vmatpush.msra.mxu2 %v6962_v33  ;;  %v7002_v59 = vld [vmem:[%s14790_s3 + $0x3d0] sm:$0xff] }
 0x2a4   :  { %v1528_v24 = vpop.f32.mrf.mxu3  ;;  %v6955_v8 = vld [vmem:[%s14790_s3 + $0x258] sm:$0xff]  ;;  %1798 = vmatpush.msra.mxu3 %v7007_v7  ;;  %1813 = vmatpush.msrb.mxu1 %v6984_v13  ;;  %v6954_v7 = vld [vmem:[%s14790_s3 + $0x250] sm:$0xff]  ;;  %v1552_v33 = vld [vmem:[%s14790_s3] sm:$0xff] }
 0x2a5   :  { %v1537_v60 = vadd.f32 %v1533_v20, %v8480_v36  ;;  %v1534_v0 = vadd.f32 %v1528_v24, %v1466_v19  ;;  %1730 = vmatpush.msrb.mxu0 %v6955_v8  ;;  %v7004_v24 = vld [vmem:[%s14790_s3 + $0x3e0] sm:$0xff]  ;;  %1775 = vmatpush.msra.mxu2 %v6959_v22  ;;  %v1598_v13 = vld [vmem:[%s14790_s3 + $0x170] sm:$0xff] }
 0x2a6   :  { %1799 = vmatpush.msra.mxu3 %v7004_v24  ;;  %v1600_v8 = vld [vmem:[%s14790_s3 + $0x180] sm:$0xff]  ;;  %v1622_v24 = vld [vmem:[%s14790_s3 + $0x230] sm:$0xff] }
 0x2a7   :  { %v1541_v32 = vmax.f32 %v1537_v60, 0.0  ;;  %v1538_v49 = vadd.f32 %v1534_v0, %v8489_v50  ;;  %1731 = vmatpush.msrb.mxu0 %v6952_v9  ;;  %v6981_v60 = vld [vmem:[%s14790_s3 + $0x328] sm:$0xff]  ;;  %v6956_v0 = vld [vmem:[%s14790_s3 + $0x260] sm:$0xff]  ;;  %v9964_v9 = vld [vmem:[%s14787_s0 + $0x19] sm:$0x1f] }
 0x2a8   :  { %v1996_v3 = vld [vmem:[#allocation2 + $0x20] sm:$0xfe]  ;;  %1814 = vmatpush.msrb.mxu1 %v6981_v60  ;;  %1776 = vmatpush.msra.mxu2 %v6956_v0  ;;  %v1599_v60 = vld [vmem:[%s14790_s3 + $0x178] sm:$0xff] }
 0x2a9   :  { %1546 = vst [vmem:[#allocation2 + $0x30] sm:$0x1f] %v1541_v32  ;;  %v1542_v38 = vmax.f32 %v1538_v49, 0.0  ;;  %v2076_v17 = vrot.slane %v1996_v3, 1  ;;  %1858 = vmatpush.msra.mxu0 %v1597_v21  ;;  %v1582_v32 = vld [vmem:[%s14790_s3 + $0xf0] sm:$0xff]  ;;  %v1579_v49 = vld [vmem:[%s14790_s3 + $0xd8] sm:$0xff]  ;;  %1800 = vmatpush.msra.mxu3 %v7001_v23 }
 0x2aa   :  { %v9692_v4 = vld [vmem:[#allocation2 + $0x28] sm:$0xff]  ;;  %1815 = vmatpush.msrb.mxu1 %v6978_v34  ;;  %1777 = vmatpush.msra.mxu2 %v6953_v12  ;;  %v1603_v3 = vld [vmem:[%s14790_s3 + $0x198] sm:$0xff]  ;;  %v1616_v23 = vld [vmem:[%s14790_s3 + $0x200] sm:$0xff] }
 0x2ab   :  { %1547 = vst.msk [vmem:[#allocation2 + $0x38] sm:$0x1f] %vm327_vm3, %v1542_v38  ;;  %1702 = vrot.lane.b32.xlu1 %v9692_v4, %s8326_s2  ;;  %v1997_v62 = vld [vmem:[#allocation2 + $0x28] sm:$0xfe]  ;;  %1859 = vmatpush.msra.mxu0 %v1594_v25  ;;  %v1576_v38 = vld [vmem:[%s14790_s3 + $0xc0] sm:$0xff]  ;;  %v1595_v0 = vld [vmem:[%s14790_s3 + $0x158] sm:$0xff] }
 0x2ac   :  { %v2079_v15 = vrot.slane %v1997_v62, 1  ;;  %1839 = vmatpush.msrb.mxu3 %v7023_v35  ;;  %1816 = vmatpush.msrb.mxu1 %v6975_v40  ;;  %v6957_v62 = vld [vmem:[%s14790_s3 + $0x268] sm:$0xff]  ;;  %v1590_v40 = vld [vmem:[%s14790_s3 + $0x130] sm:$0xff] }
 0x2ad   :  { %1860 = vmatpush.msra.mxu0 %v1591_v10  ;;  %1889 = vmatpush.msrb.mxu2 %v1621_v2  ;;  %v1623_v10 = vld [vmem:[%s14790_s3 + $0x238] sm:$0xff]  ;;  %v1593_v34 = vld [vmem:[%s14790_s3 + $0x148] sm:$0xff] }
 0x2ae   :  { %1840 = vmatpush.msrb.mxu3 %v7020_v41  ;;  %1817 = vmatpush.msrb.mxu1 %v6972_v37  ;;  %v1589_v12 = vld [vmem:[%s14790_s3 + $0x128] sm:$0xff]  ;;  %v1586_v37 = vld [vmem:[%s14790_s3 + $0x110] sm:$0xff] }
 0x2af   :  { %1861 = vmatpush.msra.mxu0 %v1588_v27  ;;  %1890 = vmatpush.msrb.mxu2 %v1618_v42  ;;  %v1619_v27 = vld [vmem:[%s14790_s3 + $0x218] sm:$0xff]  ;;  %v1617_v35 = vld [vmem:[%s14790_s3 + $0x208] sm:$0xff] }
 0x2b0   :  { %v9744_v52 = vld [vmem:[#allocation2 + $0x30] sm:$0xf]  ;;  %1841 = vmatpush.msrb.mxu3 %v7017_v18  ;;  %1818 = vmatpush.msrb.mxu1 %v6969_v29  ;;  %v1610_v18 = vld [vmem:[%s14790_s3 + $0x1d0] sm:$0xff] }
 0x2b1   :  { %v1998_v55 = vld [vmem:[#allocation2 + $0x30] sm:$0x1f]  ;;  %1862 = vmatpush.msra.mxu0 %v1585_v30  ;;  %1891 = vmatpush.msrb.mxu2 %v1615_v31  ;;  %v1596_v30 = vld [vmem:[%s14790_s3 + $0x160] sm:$0xff] }
 0x2b2   :  { %v9742_v5 = vld [vmem:[#allocation2 + $0x38] sm:$0xf]  ;;  %v9772_v63 = vrot.slane %v1998_v55, 1  ;;  %1842 = vmatpush.msrb.mxu3 %v7014_v44  ;;  %1819 = vmatpush.msrb.mxu1 %v6966_v16  ;;  %v1583_v29 = vld [vmem:[%s14790_s3 + $0xf8] sm:$0xff] }
 0x2b3   :  { %v1999_v53 = vld [vmem:[#allocation2 + $0x38] sm:$0x1f]  ;;  %1706 = vrot.lane.b32.xlu2 %v9742_v5, %s8326_s2  ;;  %1704 = vrot.lane.b32.xlu1 %v9744_v52, %s8326_s2  ;;  %v1611_v31 = vld [vmem:[%s14790_s3 + $0x1d8] sm:$0xff] }
 0x2b4   :  { %v9750_v54 = vrot.slane %v1999_v53, 1  ;;  %v9798_v20 = vsel %vm861_vm4, %v2076_v17, %v9772_v63  ;;  %1863 = vmatpush.msra.mxu0 %v1582_v32  ;;  %v1609_v53 = vld [vmem:[%s14790_s3 + $0x1c8] sm:$0xff]  ;;  %1892 = vmatpush.msrb.mxu2 %v1612_v47  ;;  %v7008_v55 = vld [vmem:[%s14790_s3 + $0x400] sm:$0xff]  ;;  %v9957_v17 = vld [vmem:[%s14787_s0 + $0x10] sm:$0xff] }
 0x2b5   :  { %1843 = vmatpush.msrb.mxu3 %v7011_v48  ;;  %1820 = vmatpush.msrb.mxu1 %v6963_v46  ;;  %v1592_v32 = vld [vmem:[%s14790_s3 + $0x140] sm:$0xff]  ;;  %v1607_v44 = vld [vmem:[%s14790_s3 + $0x1b8] sm:$0xff]  ;;  %v1577_v46 = vld [vmem:[%s14790_s3 + $0xc8] sm:$0xff] }
 0x2b6   :  { %2310 = vrot.lane.b32.xlu0 %v9750_v54, %s8326_s2  ;;  %v9794_v19 = vsel %vm861_vm4, %v2079_v15, %v9750_v54  ;;  %1864 = vmatpush.msra.mxu0 %v1579_v49  ;;  %v9950_v15 = vld [vmem:[%s14787_s0 + $0x18] sm:$0x1f]  ;;  %v1620_v49 = vld [vmem:[%s14790_s3 + $0x220] sm:$0xff] }
 0x2b7   :  { %1893 = vmatpush.msrb.mxu2 %v1609_v53  ;;  %1844 = vmatpush.msrb.mxu3 %v7008_v55  ;;  %v1580_v16 = vld [vmem:[%s14790_s3 + $0xe0] sm:$0xff]  ;;  %v1605_v53 = vld [vmem:[%s14790_s3 + $0x1a8] sm:$0xff] }
 0x2b8   :  { %1865 = vmatpush.msra.mxu0 %v1576_v38  ;;  %1821 = vmatpush.msrb.mxu1 %v6960_v1  ;;  %v1613_v38 = vld [vmem:[%s14790_s3 + $0x1e8] sm:$0xff]  ;;  %v1608_v47 = vld [vmem:[%s14790_s3 + $0x1c0] sm:$0xff]  ;;  %v1602_v1 = vld [vmem:[%s14790_s3 + $0x190] sm:$0xff] }
 0x2b9   :  { %1894 = vmatpush.msrb.mxu2 %v1606_v28  ;;  %1845 = vmatpush.msrb.mxu3 %v7005_v39  ;;  %v1604_v48 = vld [vmem:[%s14790_s3 + $0x1a0] sm:$0xff]  ;;  %v1601_v55 = vld [vmem:[%s14790_s3 + $0x188] sm:$0xff]  ;;  %v1574_v28 = vld [vmem:[%s14790_s3 + $0xb0] sm:$0xff] }
 0x2ba   :  { %1866 = vmatpush.msra.mxu0 %v1573_v11  ;;  %1822 = vmatpush.msrb.mxu1 %v6957_v62  ;;  %v1614_v11 = vld [vmem:[%s14790_s3 + $0x1f0] sm:$0xff]  ;;  %v7081_v39 = vld [vmem:[%s14790_s3 + $0x5e8] sm:$0xff] }
 0x2bb   :  { %2306 = vrot.lane.b32.xlu2 %v9794_v19, %s8326_s2  ;;  %2304 = vrot.lane.b32.xlu1 %v9798_v20, %s8326_s2  ;;  %v7082_v62 = vld [vmem:[%s14790_s3 + $0x5f0] sm:$0xff] }
 0x2bc   :  { %1867 = vmatpush.msra.mxu0 %v1570_v26  ;;  %1895 = vmatpush.msrb.mxu2 %v1603_v3  ;;  %v1587_v26 = vld [vmem:[%s14790_s3 + $0x118] sm:$0xff] }
 0x2bd   :  { %1846 = vmatpush.msrb.mxu3 %v7002_v59  ;;  %1823 = vmatpush.msrb.mxu1 %v6954_v7  ;;  %v1571_v3 = vld [vmem:[%s14790_s3 + $0x98] sm:$0xff]  ;;  %v7078_v59 = vld [vmem:[%s14790_s3 + $0x5d0] sm:$0xff] }
 0x2be   :  { %2308 = vrot.lane.b32.xlu0 %v9772_v63, %s8326_s2  ;;  %1868 = vmatpush.msra.mxu0 %v1567_v45  ;;  %v1584_v45 = vld [vmem:[%s14790_s3 + $0x100] sm:$0xff]  ;;  %v7079_v7 = vld [vmem:[%s14790_s3 + $0x5d8] sm:$0xff] }
 0x2bf   :  { %1896 = vmatpush.msrb.mxu2 %v1600_v8  ;;  %v1568_v8 = vld [vmem:[%s14790_s3 + $0x80] sm:$0xff] }
 0x2c0   :  { %1869 = vmatpush.msra.mxu0 %v1564_v51  ;;  %v1581_v51 = vld [vmem:[%s14790_s3 + $0xe8] sm:$0xff] }
 0x2c2   :  { %1870 = vmatpush.msra.mxu0 %v1561_v57  ;;  %v1578_v57 = vld [vmem:[%s14790_s3 + $0xd0] sm:$0xff] }
 0x2c3   :  { %2492 = vrot.lane.b32.xlu1 %v9950_v15, %s8325_s21  ;;  %2490 = vrot.lane.b32.xlu2 %v9957_v17, %s8325_s21 }
 0x2c4   :  { %1871 = vmatpush.msra.mxu0 %v1558_v58  ;;  %v1575_v58 = vld [vmem:[%s14790_s3 + $0xb8] sm:$0xff] }
 0x2c6   :  { %1872 = vmatpush.msra.mxu0 %v1555_v6  ;;  %2680 = vrot.lane.b32.xlu0 %v9964_v9, %s8325_s21  ;;  %v1572_v6 = vld [vmem:[%s14790_s3 + $0xa0] sm:$0xff] }
 0x2c8   :  { %1873 = vmatpush.msra.mxu0 %v1552_v33  ;;  %v7075_v33 = vld [vmem:[%s14790_s3 + $0x5b8] sm:$0xff] }
 0x30d   :  { %v10025_v2 = vpop.permute.xlu2 %1706 }
 0x313   :  { %v1701_v21 = vpop.permute.xlu0 %1700 }
 0x31d   :  { %v9971_v22 = vpop.permute.xlu1 %1702 }
 0x31e   :  { %7024 = vmatmul.msk.f32.vlgmr.msra.gmra.mxu1 %vm495_vm5, %v9971_v22  ;;  %7026 = vmatmul.msk.f32.vlgmr.msra.gmra.mxu3 %vm495_vm5, %v9971_v22  ;;  %v9982_v25 = vsel %vm490_vm6, %v1701_v21, %v9971_v22  ;;  %v7076_v21 = vld [vmem:[%s14790_s3 + $0x5c0] sm:$0xff] }
 0x31f   :  { %1904 = vmatpush.msra.mxu3 %v1598_v13  ;;  %1732 = vmatmul.f32.vlgmr.msrb.gmra.mxu0 %v9982_v25  ;;  %v1569_v13 = vld [vmem:[%s14790_s3 + $0x88] sm:$0xff] }
 0x320   :  { %1778 = vmatmul.f32.vlgmr.msra.gmra.mxu2 %v9982_v25  ;;  %1935 = vmatpush.msra.mxu1 %v1622_v24  ;;  %v7072_v24 = vld [vmem:[%s14790_s3 + $0x5a0] sm:$0xff] }
 0x321   :  { %1950 = vmatpush.msra.mxu2 %v1599_v60  ;;  %1905 = vmatpush.msra.mxu3 %v1595_v0  ;;  %v7073_v60 = vld [vmem:[%s14790_s3 + $0x5a8] sm:$0xff]  ;;  %v1562_v0 = vld [vmem:[%s14790_s3 + $0x50] sm:$0xff] }
 0x322   :  { %1981 = vmatpush.msrb.mxu0 %v1623_v10  ;;  %1936 = vmatpush.msra.mxu1 %v1619_v27  ;;  %v7069_v10 = vld [vmem:[%s14790_s3 + $0x588] sm:$0xff]  ;;  %v1563_v27 = vld [vmem:[%s14790_s3 + $0x58] sm:$0xff] }
 0x323   :  { %1951 = vmatpush.msra.mxu2 %v1596_v30  ;;  %1906 = vmatpush.msra.mxu3 %v1592_v32  ;;  %v7070_v30 = vld [vmem:[%s14790_s3 + $0x590] sm:$0xff]  ;;  %v1559_v32 = vld [vmem:[%s14790_s3 + $0x38] sm:$0xff] }
 0x324   :  { %1982 = vmatpush.msrb.mxu0 %v1620_v49  ;;  %1937 = vmatpush.msra.mxu1 %v1616_v23  ;;  %v7066_v49 = vld [vmem:[%s14790_s3 + $0x570] sm:$0xff]  ;;  %v1560_v23 = vld [vmem:[%s14790_s3 + $0x40] sm:$0xff] }
 0x325   :  { %1952 = vmatpush.msra.mxu2 %v1593_v34  ;;  %1907 = vmatpush.msra.mxu3 %v1589_v12  ;;  %v1705_v41 = vpop.permute.xlu1 %1704  ;;  %v7067_v34 = vld [vmem:[%s14790_s3 + $0x578] sm:$0xff]  ;;  %v1556_v12 = vld [vmem:[%s14790_s3 + $0x20] sm:$0xff] }
 0x326   :  { %1983 = vmatpush.msrb.mxu0 %v1617_v35  ;;  %1938 = vmatpush.msra.mxu1 %v1613_v38  ;;  %v10035_v42 = vsel %vm490_vm6, %v1705_v41, %v10025_v2  ;;  %v7063_v35 = vld [vmem:[%s14790_s3 + $0x558] sm:$0xff]  ;;  %v1557_v38 = vld [vmem:[%s14790_s3 + $0x28] sm:$0xff]  ;;  %v7060_v41 = vld [vmem:[%s14790_s3 + $0x540] sm:$0xff] }
 0x327   :  { %1953 = vmatpush.msra.mxu2 %v1590_v40  ;;  %7025 = vmatmul.msk.f32.gmra.mxu1 %vm495_vm5, %v10025_v2  ;;  %v7064_v40 = vld [vmem:[%s14790_s3 + $0x560] sm:$0xff] }
 0x328   :  { %7027 = vmatmul.msk.f32.gmra.mxu3 %vm495_vm5, %v10025_v2  ;;  %1984 = vmatpush.msrb.mxu0 %v1614_v11  ;;  %v1554_v11 = vld [vmem:[%s14790_s3 + $0x10] sm:$0xff] }
 0x329   :  { %1908 = vmatpush.msra.mxu3 %v1586_v37  ;;  %1735 = vmatmul.f32.gmra.mxu0 %v10035_v42  ;;  %v7105_v37 = vld [vmem:[%s14790_s3 + $0x6a8] sm:$0xff] }
 0x32a   :  { %1781 = vmatmul.f32.gmra.mxu2 %v10035_v42  ;;  %1939 = vmatpush.msra.mxu1 %v1610_v18  ;;  %v7106_v18 = vld [vmem:[%s14790_s3 + $0x6b0] sm:$0xff] }
 0x32b   :  { %1954 = vmatpush.msra.mxu2 %v1587_v26  ;;  %1909 = vmatpush.msra.mxu3 %v1583_v29  ;;  %v7057_v26 = vld [vmem:[%s14790_s3 + $0x528] sm:$0xff]  ;;  %v7102_v29 = vld [vmem:[%s14790_s3 + $0x690] sm:$0xff] }
 0x32c   :  { %1985 = vmatpush.msrb.mxu0 %v1611_v31  ;;  %1940 = vmatpush.msra.mxu1 %v1607_v44  ;;  %v7058_v31 = vld [vmem:[%s14790_s3 + $0x530] sm:$0xff] }
 0x32d   :  { %1955 = vmatpush.msra.mxu2 %v1584_v45  ;;  %1910 = vmatpush.msra.mxu3 %v1580_v16  ;;  %v7054_v44 = vld [vmem:[%s14790_s3 + $0x510] sm:$0xff]  ;;  %v7103_v45 = vld [vmem:[%s14790_s3 + $0x698] sm:$0xff] }
 0x32e   :  { %1986 = vmatpush.msrb.mxu0 %v1608_v47  ;;  %1941 = vmatpush.msra.mxu1 %v1604_v48  ;;  %v10224_v16 = vld [vmem:[%s14787_s0 + $0x11] sm:$0xff] }
 0x32f   :  { %1956 = vmatpush.msra.mxu2 %v1581_v51  ;;  %1911 = vmatpush.msra.mxu3 %v1577_v46  ;;  %v7099_v47 = vld [vmem:[%s14790_s3 + $0x678] sm:$0xff]  ;;  %v7100_v51 = vld [vmem:[%s14790_s3 + $0x680] sm:$0xff] }
 0x330   :  { %1987 = vmatpush.msrb.mxu0 %v1605_v53  ;;  %1942 = vmatpush.msra.mxu1 %v1601_v55  ;;  %v7051_v48 = vld [vmem:[%s14790_s3 + $0x4f8] sm:$0xff]  ;;  %v7052_v46 = vld [vmem:[%s14790_s3 + $0x500] sm:$0xff]  ;;  %v7097_v55 = vld [vmem:[%s14790_s3 + $0x668] sm:$0xff] }
 0x331   :  { %1957 = vmatpush.msra.mxu2 %v1578_v57  ;;  %1824 = vmatmul.f32.vlgmr.msrb.gmra.mxu1 %v9982_v25  ;;  %v1566_v25 = vld [vmem:[%s14790_s3 + $0x70] sm:$0xff]  ;;  %v7048_v53 = vld [vmem:[%s14790_s3 + $0x4e0] sm:$0xff]  ;;  %v7093_v57 = vld [vmem:[%s14790_s3 + $0x648] sm:$0xff] }
 0x332   :  { %7028 = vmatmul.msk.f32.vlgmr.msrb.gmra.mxu3 %vm495_vm5, %v9971_v22  ;;  %1988 = vmatpush.msrb.mxu0 %v1602_v1  ;;  %v1565_v22 = vld [vmem:[%s14790_s3 + $0x68] sm:$0xff] }
 0x333   :  { %1912 = vmatpush.msra.mxu3 %v1574_v28  ;;  %2088 = vmatpush.msrb.mxu1 %v7081_v39  ;;  %v7049_v1 = vld [vmem:[%s14790_s3 + $0x4e8] sm:$0xff]  ;;  %v7094_v39 = vld [vmem:[%s14790_s3 + $0x650] sm:$0xff] }
 0x334   :  { %1958 = vmatpush.msra.mxu2 %v1575_v58  ;;  %1874 = vmatmul.f32.vlgmr.msra.gmra.mxu0 %v9623_v61  ;;  %v7045_v28 = vld [vmem:[%s14790_s3 + $0x4c8] sm:$0xff]  ;;  %v7090_v58 = vld [vmem:[%s14790_s3 + $0x630] sm:$0xff] }
 0x335   :  { %7030 = vmatmul.msk.f32.vlgmr.msrb.gmra.mxu2 %vm495_vm5, %v9692_v4  ;;  %2134 = vmatpush.msra.mxu0 %v7082_v62  ;;  %v7046_v62 = vld [vmem:[%s14790_s3 + $0x4d0] sm:$0xff] }
 0x336   :  { %1913 = vmatpush.msra.mxu3 %v1571_v3  ;;  %2089 = vmatpush.msrb.mxu1 %v7078_v59  ;;  %v7042_v3 = vld [vmem:[%s14790_s3 + $0x4b0] sm:$0xff]  ;;  %v7091_v59 = vld [vmem:[%s14790_s3 + $0x638] sm:$0xff] }
 0x337   :  { %1959 = vmatpush.msra.mxu2 %v1572_v6  ;;  %2135 = vmatpush.msra.mxu0 %v7079_v7  ;;  %v7087_v6 = vld [vmem:[%s14790_s3 + $0x618] sm:$0xff] }
 0x338   :  { %1914 = vmatpush.msra.mxu3 %v1568_v8  ;;  %2090 = vmatpush.msrb.mxu1 %v7075_v33  ;;  %v7043_v7 = vld [vmem:[%s14790_s3 + $0x4b8] sm:$0xff]  ;;  %v7040_v33 = vld [vmem:[%s14790_s3 + $0x4a0] sm:$0xff] }
 0x339   :  { %1960 = vmatpush.msra.mxu2 %v1569_v13  ;;  %2136 = vmatpush.msra.mxu0 %v7076_v21  ;;  %v7039_v8 = vld [vmem:[%s14790_s3 + $0x498] sm:$0xff]  ;;  %v7036_v13 = vld [vmem:[%s14790_s3 + $0x480] sm:$0xff]  ;;  %v7085_v21 = vld [vmem:[%s14790_s3 + $0x608] sm:$0xff] }
 0x33a   :  { %1915 = vmatpush.msra.mxu3 %v1565_v22  ;;  %2091 = vmatpush.msrb.mxu1 %v7072_v24  ;;  %v7083_v22 = vld [vmem:[%s14790_s3 + $0x5f8] sm:$0xff]  ;;  %v7037_v24 = vld [vmem:[%s14790_s3 + $0x488] sm:$0xff] }
 0x33b   :  { %1961 = vmatpush.msra.mxu2 %v1566_v25  ;;  %2137 = vmatpush.msra.mxu0 %v7073_v60  ;;  %v7107_v25 = vld [vmem:[%s14790_s3 + $0x6b8] sm:$0xff]  ;;  %v7159_v60 = vld [vmem:[%s14790_s3 + $0x828] sm:$0xff] }
 0x33c   :  { %1827 = vmatmul.f32.gmra.mxu1 %v10035_v42  ;;  %7029 = vmatmul.msk.f32.gmra.mxu3 %vm495_vm5, %v10025_v2  ;;  %v1553_v2 = vld [vmem:[%s14790_s3 + $0x8] sm:$0xff] }
 0x33d   :  { %1916 = vmatpush.msra.mxu3 %v1562_v0  ;;  %2092 = vmatpush.msrb.mxu1 %v7069_v10  ;;  %v7061_v42 = vld [vmem:[%s14790_s3 + $0x548] sm:$0xff]  ;;  %v7080_v0 = vld [vmem:[%s14790_s3 + $0x5e0] sm:$0xff] }
 0x33e   :  { %1877 = vmatmul.f32.gmra.mxu0 %v9744_v52  ;;  %7031 = vmatmul.msk.f32.gmra.mxu2 %vm495_vm5, %v9742_v5  ;;  %v7183_v10 = vld [vmem:[%s14790_s3 + $0x8e8] sm:$0xff] }
 0x33f   :  { %1962 = vmatpush.msra.mxu2 %v1563_v27  ;;  %2138 = vmatpush.msra.mxu0 %v7070_v30  ;;  %v7104_v27 = vld [vmem:[%s14790_s3 + $0x6a0] sm:$0xff]  ;;  %v7156_v30 = vld [vmem:[%s14790_s3 + $0x810] sm:$0xff] }
 0x340   :  { %1917 = vmatpush.msra.mxu3 %v1559_v32  ;;  %2093 = vmatpush.msrb.mxu1 %v7066_v49  ;;  %v7077_v32 = vld [vmem:[%s14790_s3 + $0x5c8] sm:$0xff]  ;;  %v7180_v49 = vld [vmem:[%s14790_s3 + $0x8d0] sm:$0xff] }
 0x341   :  { %1963 = vmatpush.msra.mxu2 %v1560_v23  ;;  %2139 = vmatpush.msra.mxu0 %v7067_v34  ;;  %v7101_v23 = vld [vmem:[%s14790_s3 + $0x688] sm:$0xff]  ;;  %v7153_v34 = vld [vmem:[%s14790_s3 + $0x7f8] sm:$0xff] }
 0x342   :  { %1918 = vmatpush.msra.mxu3 %v1556_v12  ;;  %2094 = vmatpush.msrb.mxu1 %v7063_v35  ;;  %v7074_v12 = vld [vmem:[%s14790_s3 + $0x5b0] sm:$0xff]  ;;  %v7177_v35 = vld [vmem:[%s14790_s3 + $0x8b8] sm:$0xff] }
 0x343   :  { %1964 = vmatpush.msra.mxu2 %v1557_v38  ;;  %2140 = vmatpush.msra.mxu0 %v7064_v40  ;;  %v7098_v38 = vld [vmem:[%s14790_s3 + $0x670] sm:$0xff]  ;;  %v7150_v40 = vld [vmem:[%s14790_s3 + $0x7e0] sm:$0xff] }
 0x344   :  { %1919 = vmatpush.msra.mxu3 %v1553_v2  ;;  %2095 = vmatpush.msrb.mxu1 %v7060_v41  ;;  %v7071_v2 = vld [vmem:[%s14790_s3 + $0x598] sm:$0xff]  ;;  %v7174_v41 = vld [vmem:[%s14790_s3 + $0x8a0] sm:$0xff] }
 0x345   :  { %1965 = vmatpush.msra.mxu2 %v1554_v11  ;;  %2141 = vmatpush.msra.mxu0 %v7061_v42  ;;  %v7095_v11 = vld [vmem:[%s14790_s3 + $0x658] sm:$0xff]  ;;  %v7068_v42 = vld [vmem:[%s14790_s3 + $0x580] sm:$0xff] }
 0x346   :  { %2119 = vmatpush.msrb.mxu3 %v7105_v37  ;;  %7032 = vmatmul.msk.f32.vlgmr.msra.gmra.mxu1 %vm495_vm5, %v9692_v4  ;;  %v7147_v37 = vld [vmem:[%s14790_s3 + $0x7c8] sm:$0xff] }
 0x347   :  { %1920 = vmatmul.f32.vlgmr.msra.gmra.mxu3 %v9623_v61  ;;  %2165 = vmatpush.msrb.mxu2 %v7106_v18  ;;  %v7171_v18 = vld [vmem:[%s14790_s3 + $0x888] sm:$0xff] }
 0x348   :  { %2096 = vmatpush.msrb.mxu1 %v7057_v26  ;;  %1966 = vmatmul.f32.vlgmr.msra.gmra.mxu2 %v9623_v61  ;;  %v7055_v61 = vld [vmem:[%s14790_s3 + $0x518] sm:$0xff]  ;;  %v7092_v26 = vld [vmem:[%s14790_s3 + $0x640] sm:$0xff] }
 0x349   :  { %7034 = vmatmul.msk.f32.vlgmr.msrb.gmra.mxu0 %vm495_vm5, %v9692_v4  ;;  %2120 = vmatpush.msrb.mxu3 %v7102_v29  ;;  %v7096_v4 = vld [vmem:[%s14790_s3 + $0x660] sm:$0xff]  ;;  %v7144_v29 = vld [vmem:[%s14790_s3 + $0x7b0] sm:$0xff] }
 0x34a   :  { %2142 = vmatpush.msra.mxu0 %v7058_v31  ;;  %2097 = vmatpush.msrb.mxu1 %v7054_v44  ;;  %v7065_v31 = vld [vmem:[%s14790_s3 + $0x568] sm:$0xff]  ;;  %v7168_v44 = vld [vmem:[%s14790_s3 + $0x870] sm:$0xff] }
 0x34b   :  { %2166 = vmatpush.msrb.mxu2 %v7103_v45  ;;  %2678 = vrot.lane.b32.xlu2 %v10224_v16, %s8325_s21  ;;  %v7089_v45 = vld [vmem:[%s14790_s3 + $0x628] sm:$0xff] }
 0x34c   :  { %2121 = vmatpush.msrb.mxu3 %v7099_v47  ;;  %2143 = vmatpush.msra.mxu0 %v7055_v61  ;;  %v7141_v47 = vld [vmem:[%s14790_s3 + $0x798] sm:$0xff]  ;;  %v7062_v61 = vld [vmem:[%s14790_s3 + $0x550] sm:$0xff] }
 0x34d   :  { %2098 = vmatpush.msrb.mxu1 %v7051_v48  ;;  %2167 = vmatpush.msrb.mxu2 %v7100_v51  ;;  %v7165_v48 = vld [vmem:[%s14790_s3 + $0x858] sm:$0xff]  ;;  %v7086_v51 = vld [vmem:[%s14790_s3 + $0x610] sm:$0xff] }
 0x34e   :  { %2122 = vmatpush.msrb.mxu3 %v7096_v4  ;;  %2144 = vmatpush.msra.mxu0 %v7052_v46  ;;  %v7138_v4 = vld [vmem:[%s14790_s3 + $0x780] sm:$0xff]  ;;  %v7059_v46 = vld [vmem:[%s14790_s3 + $0x538] sm:$0xff] }
 0x34f   :  { %2099 = vmatpush.msrb.mxu1 %v7048_v53  ;;  %2168 = vmatpush.msrb.mxu2 %v7097_v55  ;;  %v7162_v53 = vld [vmem:[%s14790_s3 + $0x840] sm:$0xff]  ;;  %v7160_v55 = vld [vmem:[%s14790_s3 + $0x830] sm:$0xff] }
 0x350   :  { %2123 = vmatpush.msrb.mxu3 %v7093_v57  ;;  %2145 = vmatpush.msra.mxu0 %v7049_v1  ;;  %v7135_v57 = vld [vmem:[%s14790_s3 + $0x768] sm:$0xff]  ;;  %v7161_v1 = vld [vmem:[%s14790_s3 + $0x838] sm:$0xff] }
 0x351   :  { %1923 = vmatmul.f32.gmra.mxu3 %v9744_v52  ;;  %7033 = vmatmul.msk.f32.gmra.mxu1 %vm495_vm5, %v9742_v5 }
 0x352   :  { %2100 = vmatpush.msrb.mxu1 %v7045_v28  ;;  %2169 = vmatpush.msrb.mxu2 %v7094_v39  ;;  %v7056_v28 = vld [vmem:[%s14790_s3 + $0x520] sm:$0xff]  ;;  %v7132_v39 = vld [vmem:[%s14790_s3 + $0x750] sm:$0xff] }
 0x353   :  { %1969 = vmatmul.f32.gmra.mxu2 %v9744_v52  ;;  %7035 = vmatmul.msk.f32.gmra.mxu0 %vm495_vm5, %v9742_v5  ;;  %v7088_v52 = vld [vmem:[%s14790_s3 + $0x620] sm:$0xff] }
 0x354   :  { %2124 = vmatpush.msrb.mxu3 %v7090_v58  ;;  %2146 = vmatpush.msra.mxu0 %v7046_v62  ;;  %v7084_v5 = vld [vmem:[%s14790_s3 + $0x600] sm:$0xff]  ;;  %v7157_v58 = vld [vmem:[%s14790_s3 + $0x818] sm:$0xff] }
 0x355   :  { %2101 = vmatpush.msrb.mxu1 %v7042_v3  ;;  %2170 = vmatpush.msrb.mxu2 %v7091_v59  ;;  %v7158_v62 = vld [vmem:[%s14790_s3 + $0x820] sm:$0xff]  ;;  %v7053_v3 = vld [vmem:[%s14790_s3 + $0x508] sm:$0xff]  ;;  %v10446_v59 = vpop.permute.xlu2 %2306 }
 0x356   :  { %2125 = vmatpush.msrb.mxu3 %v7087_v6  ;;  %2147 = vmatpush.msra.mxu0 %v7043_v7  ;;  %v7154_v6 = vld [vmem:[%s14790_s3 + $0x800] sm:$0xff]  ;;  %v7129_v7 = vld [vmem:[%s14790_s3 + $0x738] sm:$0xff] }
 0x357   :  { %2102 = vmatpush.msrb.mxu1 %v7039_v8  ;;  %2171 = vmatpush.msrb.mxu2 %v7088_v52  ;;  %v7155_v8 = vld [vmem:[%s14790_s3 + $0x808] sm:$0xff] }
 0x358   :  { %2126 = vmatpush.msrb.mxu3 %v7084_v5  ;;  %2148 = vmatpush.msra.mxu0 %v7040_v33  ;;  %v7151_v52 = vld [vmem:[%s14790_s3 + $0x7e8] sm:$0xff]  ;;  %v7126_v5 = vld [vmem:[%s14790_s3 + $0x720] sm:$0xff]  ;;  %v7152_v33 = vld [vmem:[%s14790_s3 + $0x7f0] sm:$0xff] }
 0x359   :  { %2103 = vmatpush.msrb.mxu1 %v7036_v13  ;;  %2172 = vmatpush.msrb.mxu2 %v7085_v21  ;;  %v7047_v13 = vld [vmem:[%s14790_s3 + $0x4d8] sm:$0xff]  ;;  %v7148_v21 = vld [vmem:[%s14790_s3 + $0x7d0] sm:$0xff] }
 0x35a   :  { %2180 = vmatpush.msra.mxu3 %v7083_v22  ;;  %2149 = vmatpush.msra.mxu0 %v7037_v24  ;;  %v7123_v22 = vld [vmem:[%s14790_s3 + $0x708] sm:$0xff]  ;;  %v7149_v24 = vld [vmem:[%s14790_s3 + $0x7d8] sm:$0xff] }
 0x35b   :  { %2211 = vmatpush.msra.mxu1 %v7107_v25  ;;  %2320 = vmatpush.msra.mxu2 %v7159_v60  ;;  %v7044_v25 = vld [vmem:[%s14790_s3 + $0x4c0] sm:$0xff]  ;;  %v7120_v60 = vld [vmem:[%s14790_s3 + $0x6f0] sm:$0xff] }
 0x35c   :  { %2104 = vmatmul.f32.vlgmr.msrb.gmra.mxu1 %v9798_v20  ;;  %7108 = vmatmul.msk.f32.vlgmr.msrb.gmra.mxu3 %vm495_vm5, %v9794_v19 }
 0x35d   :  { %2181 = vmatpush.msra.mxu3 %v7080_v0  ;;  %2351 = vmatpush.msrb.mxu0 %v7183_v10  ;;  %v7145_v0 = vld [vmem:[%s14790_s3 + $0x7b8] sm:$0xff]  ;;  %v7146_v10 = vld [vmem:[%s14790_s3 + $0x7c0] sm:$0xff] }
 0x35e   :  { %2150 = vmatmul.f32.vlgmr.msra.gmra.mxu0 %v9798_v20  ;;  %7110 = vmatmul.msk.f32.vlgmr.msrb.gmra.mxu2 %vm495_vm5, %v9794_v19 }
 0x35f   :  { %2212 = vmatpush.msra.mxu1 %v7104_v27  ;;  %2321 = vmatpush.msra.mxu2 %v7156_v30  ;;  %v7041_v27 = vld [vmem:[%s14790_s3 + $0x4a8] sm:$0xff]  ;;  %v10500_v30 = vpop.permute.xlu0 %2310 }
 0x360   :  { %2182 = vmatpush.msra.mxu3 %v7077_v32  ;;  %2352 = vmatpush.msrb.mxu0 %v7180_v49  ;;  %v7142_v32 = vld [vmem:[%s14790_s3 + $0x7a0] sm:$0xff]  ;;  %v7117_v49 = vld [vmem:[%s14790_s3 + $0x6d8] sm:$0xff] }
 0x361   :  { %2213 = vmatpush.msra.mxu1 %v7101_v23  ;;  %2322 = vmatpush.msra.mxu2 %v7153_v34  ;;  %v7143_v23 = vld [vmem:[%s14790_s3 + $0x7a8] sm:$0xff] }
 0x362   :  { %2183 = vmatpush.msra.mxu3 %v7074_v12  ;;  %2353 = vmatpush.msrb.mxu0 %v7177_v35  ;;  %v7139_v34 = vld [vmem:[%s14790_s3 + $0x788] sm:$0xff]  ;;  %v2305_v12 = vpop.permute.xlu1 %2304  ;;  %v7114_v35 = vld [vmem:[%s14790_s3 + $0x6c0] sm:$0xff] }
 0x363   :  { %2214 = vmatpush.msra.mxu1 %v7098_v38  ;;  %2323 = vmatpush.msra.mxu2 %v7150_v40  ;;  %v7140_v38 = vld [vmem:[%s14790_s3 + $0x790] sm:$0xff] }
 0x364   :  { %2184 = vmatpush.msra.mxu3 %v7071_v2  ;;  %2354 = vmatpush.msrb.mxu0 %v7174_v41  ;;  %v7136_v40 = vld [vmem:[%s14790_s3 + $0x770] sm:$0xff]  ;;  %v7137_v41 = vld [vmem:[%s14790_s3 + $0x778] sm:$0xff] }
 0x365   :  { %2215 = vmatpush.msra.mxu1 %v7095_v11  ;;  %2324 = vmatpush.msra.mxu2 %v7147_v37  ;;  %v7184_v2 = vld [vmem:[%s14790_s3 + $0x8f0] sm:$0xff]  ;;  %v10539_v11 = vsel %vm490_vm6, %v2305_v12, %v10446_v59  ;;  %v7185_v37 = vld [vmem:[%s14790_s3 + $0x8f8] sm:$0xff]  ;;  %v7223_v12 = vld [vmem:[%s14788_s1 + $0x68] sm:$0xff] }
 0x366   :  { %2107 = vmatmul.f32.gmra.mxu1 %v9772_v63  ;;  %7109 = vmatmul.msk.f32.gmra.mxu3 %vm495_vm5, %v9750_v54 }
 0x367   :  { %2185 = vmatpush.msra.mxu3 %v7068_v42  ;;  %2355 = vmatpush.msrb.mxu0 %v7171_v18  ;;  %v7181_v42 = vld [vmem:[%s14790_s3 + $0x8d8] sm:$0xff]  ;;  %v7134_v18 = vld [vmem:[%s14790_s3 + $0x760] sm:$0xff] }
 0x368   :  { %2153 = vmatmul.f32.gmra.mxu0 %v9772_v63  ;;  %7111 = vmatmul.msk.f32.gmra.mxu2 %vm495_vm5, %v9750_v54 }
 0x369   :  { %2216 = vmatpush.msra.mxu1 %v7092_v26  ;;  %2325 = vmatpush.msra.mxu2 %v7144_v29  ;;  %v7182_v26 = vld [vmem:[%s14790_s3 + $0x8e0] sm:$0xff] }
 0x36a   :  { %2186 = vmatpush.msra.mxu3 %v7065_v31  ;;  %2356 = vmatpush.msrb.mxu0 %v7168_v44  ;;  %v7130_v29 = vld [vmem:[%s14790_s3 + $0x740] sm:$0xff]  ;;  %v7131_v44 = vld [vmem:[%s14790_s3 + $0x748] sm:$0xff] }
 0x36b   :  { %2217 = vmatpush.msra.mxu1 %v7089_v45  ;;  %2326 = vmatpush.msra.mxu2 %v7141_v47  ;;  %v7178_v31 = vld [vmem:[%s14790_s3 + $0x8c0] sm:$0xff]  ;;  %v7179_v45 = vld [vmem:[%s14790_s3 + $0x8c8] sm:$0xff] }
 0x36c   :  { %2187 = vmatpush.msra.mxu3 %v7062_v61  ;;  %2357 = vmatpush.msrb.mxu0 %v7165_v48  ;;  %v7127_v47 = vld [vmem:[%s14790_s3 + $0x728] sm:$0xff]  ;;  %v7128_v48 = vld [vmem:[%s14790_s3 + $0x730] sm:$0xff] }
 0x36d   :  { %2218 = vmatpush.msra.mxu1 %v7086_v51  ;;  %2327 = vmatpush.msra.mxu2 %v7138_v4  ;;  %v7175_v61 = vld [vmem:[%s14790_s3 + $0x8a8] sm:$0xff]  ;;  %v2309_v51 = vpop.permute.xlu0 %2308  ;;  %v7176_v4 = vld [vmem:[%s14790_s3 + $0x8b0] sm:$0xff] }
 0x36e   :  { %2188 = vmatpush.msra.mxu3 %v7059_v46  ;;  %2358 = vmatpush.msrb.mxu0 %v7162_v53  ;;  %v7124_v46 = vld [vmem:[%s14790_s3 + $0x710] sm:$0xff] }
 0x36f   :  { %2366 = vmatpush.msrb.mxu1 %v7160_v55  ;;  %2328 = vmatpush.msra.mxu2 %v7135_v57  ;;  %v7172_v53 = vld [vmem:[%s14790_s3 + $0x890] sm:$0xff]  ;;  %v7125_v55 = vld [vmem:[%s14790_s3 + $0x718] sm:$0xff]  ;;  %v2313_v57 = vsel %vm490_vm6, %v2309_v51, %v10500_v30 }
 0x370   :  { %2412 = vmatpush.msra.mxu0 %v7161_v1  ;;  %2189 = vmatpush.msra.mxu3 %v7056_v28  ;;  %v7173_v1 = vld [vmem:[%s14790_s3 + $0x898] sm:$0xff] }
 0x371   :  { %7112 = vmatmul.msk.f32.vlgmr.msra.gmra.mxu1 %vm495_vm5, %v9794_v19  ;;  %2329 = vmatpush.msra.mxu2 %v7132_v39  ;;  %v7050_v19 = vld [vmem:[%s14790_s3 + $0x4f0] sm:$0xff]  ;;  %v7121_v28 = vld [vmem:[%s14790_s3 + $0x6f8] sm:$0xff] }
 0x372   :  { %2367 = vmatpush.msrb.mxu1 %v7157_v58  ;;  %7186 = vmatmul.msk.f32.vlgmr.msrb.gmra.mxu0 %vm495_vm5, %v10446_v59  ;;  %v7169_v39 = vld [vmem:[%s14790_s3 + $0x878] sm:$0xff]  ;;  %v7170_v58 = vld [vmem:[%s14790_s3 + $0x880] sm:$0xff] }
 0x373   :  { %2413 = vmatpush.msra.mxu0 %v7158_v62  ;;  %2190 = vmatpush.msra.mxu3 %v7053_v3  ;;  %v7118_v62 = vld [vmem:[%s14790_s3 + $0x6e0] sm:$0xff] }
 0x374   :  { %2368 = vmatpush.msrb.mxu1 %v7154_v6  ;;  %2330 = vmatpush.msra.mxu2 %v7129_v7  ;;  %v7166_v3 = vld [vmem:[%s14790_s3 + $0x860] sm:$0xff]  ;;  %v7119_v6 = vld [vmem:[%s14790_s3 + $0x6e8] sm:$0xff] }
 0x375   :  { %2414 = vmatpush.msra.mxu0 %v7155_v8  ;;  %2191 = vmatpush.msra.mxu3 %v7050_v19  ;;  %v7167_v7 = vld [vmem:[%s14790_s3 + $0x868] sm:$0xff] }
 0x376   :  { %2369 = vmatpush.msrb.mxu1 %v7151_v52  ;;  %2331 = vmatpush.msra.mxu2 %v7126_v5  ;;  %v7115_v8 = vld [vmem:[%s14790_s3 + $0x6c8] sm:$0xff]  ;;  %v7116_v52 = vld [vmem:[%s14790_s3 + $0x6d0] sm:$0xff] }
 0x377   :  { %2415 = vmatpush.msra.mxu0 %v7152_v33  ;;  %2192 = vmatpush.msra.mxu3 %v7047_v13  ;;  %v7163_v19 = vld [vmem:[%s14790_s3 + $0x848] sm:$0xff]  ;;  %v7164_v5 = vld [vmem:[%s14790_s3 + $0x850] sm:$0xff]  ;;  %v7197_v13 = vld [vmem:[%s14788_s1 + $0x38] sm:$0x1f] }
 0x378   :  { %2370 = vmatpush.msrb.mxu1 %v7148_v21  ;;  %2332 = vmatpush.msra.mxu2 %v7123_v22  ;;  %v7196_v33 = vld [vmem:[%s14788_s1 + $0x30] sm:$0x1f]  ;;  %v7194_v22 = vld [vmem:[%s14788_s1 + $0x20] sm:$0xff] }
 0x379   :  { %2416 = vmatpush.msra.mxu0 %v7149_v24  ;;  %2193 = vmatpush.msra.mxu3 %v7044_v25  ;;  %v2482_v21 = vld [vmem:[%s14788_s1 + $0x10] sm:$0x1f]  ;;  %v7195_v25 = vld [vmem:[%s14788_s1 + $0x28] sm:$0xff] }
 0x37a   :  { %7113 = vmatmul.msk.f32.gmra.mxu1 %vm495_vm5, %v9750_v54  ;;  %2333 = vmatpush.msra.mxu2 %v7120_v60  ;;  %v7038_v54 = vld [vmem:[%s14790_s3 + $0x490] sm:$0xff]  ;;  %v2480_v60 = vld [vmem:[%s14788_s1] sm:$0xff] }
 0x37b   :  { %2371 = vmatpush.msrb.mxu1 %v7145_v0  ;;  %7187 = vmatmul.msk.f32.gmra.mxu0 %vm495_vm5, %v10500_v30  ;;  %v7214_v24 = vld [vmem:[%s14788_s1 + $0x50] sm:$0x1f]  ;;  %v7212_v0 = vld [vmem:[%s14788_s1 + $0x40] sm:$0xff] }
 0x37c   :  { %2417 = vmatpush.msra.mxu0 %v7146_v10  ;;  %2194 = vmatpush.msra.mxu3 %v7041_v27  ;;  %v7224_v10 = vld [vmem:[%s14788_s1 + $0x70] sm:$0x1f]  ;;  %v7215_v27 = vld [vmem:[%s14788_s1 + $0x58] sm:$0x1f] }
 0x37d   :  { %2372 = vmatpush.msrb.mxu1 %v7142_v32  ;;  %2334 = vmatpush.msra.mxu2 %v7117_v49  ;;  %v2481_v32 = vld [vmem:[%s14788_s1 + $0x8] sm:$0xff] }
 0x37e   :  { %2418 = vmatpush.msra.mxu0 %v7143_v23  ;;  %2195 = vmatpush.msra.mxu3 %v7038_v54  ;;  %v7213_v49 = vld [vmem:[%s14788_s1 + $0x48] sm:$0xff]  ;;  %v7222_v23 = vld [vmem:[%s14788_s1 + $0x60] sm:$0xff]  ;;  %v2491_v54 = vpop.permute.xlu2 %2490 }
 0x37f   :  { %2373 = vmatpush.msrb.mxu1 %v7139_v34  ;;  %2196 = vmatmul.f32.vlgmr.msra.gmra.mxu3 %v9798_v20  ;;  %v7133_v20 = vld [vmem:[%s14790_s3 + $0x758] sm:$0xff] }
 0x380   :  { %2335 = vmatpush.msra.mxu2 %v7114_v35  ;;  %2419 = vmatpush.msra.mxu0 %v7140_v38  ;;  %v7225_v34 = vld [vmem:[%s14788_s1 + $0x78] sm:$0x1f] }
 0x381   :  { %2336 = vmatmul.f32.vlgmr.msra.gmra.mxu2 %v10539_v11  ;;  %2374 = vmatpush.msrb.mxu1 %v7136_v40 }
 0x382   :  { %2397 = vmatpush.msrb.mxu3 %v7184_v2  ;;  %2420 = vmatpush.msra.mxu0 %v7137_v41 }
 0x383   :  { %2443 = vmatpush.msrb.mxu2 %v7185_v37  ;;  %2375 = vmatpush.msrb.mxu1 %v7133_v20 }
 0x384   :  { %2398 = vmatpush.msrb.mxu3 %v7181_v42  ;;  %2421 = vmatpush.msra.mxu0 %v7134_v18 }
 0x385   :  { %2444 = vmatpush.msrb.mxu2 %v7182_v26  ;;  %2376 = vmatpush.msrb.mxu1 %v7130_v29 }
 0x386   :  { %2399 = vmatpush.msrb.mxu3 %v7178_v31  ;;  %2422 = vmatpush.msra.mxu0 %v7131_v44 }
 0x387   :  { %2445 = vmatpush.msrb.mxu2 %v7179_v45  ;;  %2377 = vmatpush.msrb.mxu1 %v7127_v47 }
 0x388   :  { %2400 = vmatpush.msrb.mxu3 %v7175_v61  ;;  %2423 = vmatpush.msra.mxu0 %v7128_v48 }
 0x389   :  { %2199 = vmatmul.f32.gmra.mxu3 %v9772_v63  ;;  %2446 = vmatpush.msrb.mxu2 %v7176_v4  ;;  %v7122_v63 = vld [vmem:[%s14790_s3 + $0x700] sm:$0xff] }
 0x38a   :  { %2339 = vmatmul.f32.gmra.mxu2 %v2313_v57  ;;  %2378 = vmatpush.msrb.mxu1 %v7124_v46 }
 0x38b   :  { %2401 = vmatpush.msrb.mxu3 %v7172_v53  ;;  %2424 = vmatpush.msra.mxu0 %v7125_v55 }
 0x38c   :  { %2447 = vmatpush.msrb.mxu2 %v7173_v1  ;;  %2379 = vmatpush.msrb.mxu1 %v7121_v28 }
 0x38d   :  { %2402 = vmatpush.msrb.mxu3 %v7169_v39  ;;  %2425 = vmatpush.msra.mxu0 %v7122_v63 }
 0x38e   :  { %2448 = vmatpush.msrb.mxu2 %v7170_v58  ;;  %2380 = vmatpush.msrb.mxu1 %v7118_v62 }
 0x38f   :  { %2403 = vmatpush.msrb.mxu3 %v7166_v3  ;;  %2426 = vmatpush.msra.mxu0 %v7119_v6 }
 0x390   :  { %2449 = vmatpush.msrb.mxu2 %v7167_v7  ;;  %2381 = vmatpush.msrb.mxu1 %v7115_v8 }
 0x391   :  { %2404 = vmatpush.msrb.mxu3 %v7163_v19  ;;  %2382 = vmatmul.f32.vlgmr.msrb.gmra.mxu1 %v10539_v11 }
 0x392   :  { %7188 = vmatmul.msk.f32.vlgmr.msrb.gmra.mxu3 %vm495_vm5, %v10446_v59  ;;  %2427 = vmatpush.msra.mxu0 %v7116_v52 }
 0x393   :  { %2450 = vmatpush.msrb.mxu2 %v7164_v5  ;;  %2428 = vmatmul.f32.vlgmr.msra.gmra.mxu0 %v10539_v11  ;;  %v2681_v11 = vpop.permute.xlu0 %2680 }
 0x394   :  { %7190 = vmatmul.msk.f32.vlgmr.msrb.gmra.mxu2 %vm495_vm5, %v10446_v59  ;;  %7198 = vmatpush.msk.msra.mxu3 %vm63_vm0, %v7196_v33  ;;  %v2483_v59 = vld [vmem:[%s14788_s1 + $0x18] sm:$0x1f] }
 0x395   :  { %7201 = vmatpush.msk.msra.mxu1 %vm63_vm0, %v7197_v13  ;;  %7204 = vmatpush.msk.msra.mxu2 %vm63_vm0, %v2482_v21 }
 0x396   :  { %2519 = vmatpush.msra.mxu3 %v7194_v22  ;;  %7216 = vmatpush.msk.msrb.mxu0 %vm63_vm0, %v7214_v24 }
 0x397   :  { %2542 = vmatpush.msra.mxu1 %v7195_v25  ;;  %2575 = vmatpush.msra.mxu2 %v2480_v60 }
 0x398   :  { %2639 = vmatpush.msrb.mxu0 %v7212_v0  ;;  %7207 = vmatpush.msk.msrb.mxu3 %vm63_vm0, %v2483_v59 }
 0x399   :  { %2385 = vmatmul.f32.gmra.mxu1 %v2313_v57  ;;  %7226 = vmatpush.msk.msrb.mxu2 %vm63_vm0, %v7224_v10 }
 0x39a   :  { %7189 = vmatmul.msk.f32.gmra.mxu3 %vm495_vm5, %v10500_v30  ;;  %7219 = vmatpush.msk.msrb.mxu1 %vm63_vm0, %v7215_v27 }
 0x39b   :  { %2431 = vmatmul.f32.gmra.mxu0 %v2313_v57  ;;  %2598 = vmatpush.msrb.mxu3 %v2481_v32  ;;  %v1756_v38 = vpop.f32.mrf.mxu1 }
 0x39c   :  { %7191 = vmatmul.msk.f32.gmra.mxu2 %vm495_vm5, %v10500_v30  ;;  %2662 = vmatpush.msrb.mxu1 %v7213_v49  ;;  %v2493_v30 = vpop.permute.xlu1 %2492  ;;  %v1733_v40 = vpop.f32.mrf.mxu0 }
 0x39d   :  { %2707 = vmatpush.msrb.mxu2 %v7222_v23  ;;  %v1757_v3 = vadd.f32 %v1756_v38, %v1733_v40 }
 0x3a1   :  { %7202 = vmatmul.msk.f32.vlgmr.msra.gmra.mxu1 %vm58_vm1, %v2491_v54  ;;  %v1802_v2 = vpop.f32.mrf.mxu3 }
 0x3a2   :  { %7199 = vmatmul.msk.f32.vlgmr.msra.gmra.mxu3 %vm58_vm1, %v2491_v54 }
 0x3a3   :  { %7217 = vmatmul.msk.f32.vlgmr.msrb.gmra.mxu0 %vm58_vm1, %v10224_v16  ;;  %7229 = vmatpush.msk.msra.mxu3 %vm63_vm0, %v7225_v34  ;;  %v1779_v41 = vpop.f32.mrf.mxu2 }
 0x3a4   :  { %7205 = vmatmul.msk.f32.vlgmr.msra.gmra.mxu2 %vm58_vm1, %v9957_v17  ;;  %v1759_v37 = vpop.f32.mrf.mxu1  ;;  %v1803_v23 = vadd.f32 %v1802_v2, %v1779_v41 }
 0x3a5   :  { %2730 = vmatpush.msra.mxu3 %v7223_v12  ;;  %v2679_v35 = vpop.permute.xlu2 %2678 }
 0x3a6   :  { %v1736_v20 = vpop.f32.mrf.mxu0 }
 0x3a7   :  { %v1760_v24 = vadd.f32 %v1759_v37, %v1736_v20 }
 0x3a9   :  { %7203 = vmatmul.msk.f32.gmra.mxu1 %vm58_vm1, %v2493_v30 }
 0x3aa   :  { %7200 = vmatmul.msk.f32.gmra.mxu3 %vm58_vm1, %v2493_v30 }
 0x3ab   :  { %7218 = vmatmul.msk.f32.gmra.mxu0 %vm58_vm1, %v9964_v9 }
 0x3ac   :  { %7206 = vmatmul.msk.f32.gmra.mxu2 %vm58_vm1, %v9950_v15 }
 0x3ad   :  { %v10722_v42 = vpop.f32.mrf.mxu2 }
 0x3b1   :  { %7220 = vmatmul.msk.f32.vlgmr.msrb.gmra.mxu1 %vm58_vm1, %v10224_v16  ;;  %v10720_v16 = vpop.f32.mrf.mxu3  ;;  %v1875_v18 = vpop.f32.mrf.mxu0 }
 0x3b2   :  { %7208 = vmatmul.msk.f32.vlgmr.msrb.gmra.mxu3 %vm58_vm1, %v9957_v17  ;;  %v1825_v17 = vpop.f32.mrf.mxu1  ;;  %v1876_v6 = vadd.f32 %v1875_v18, %v1757_v3 }
 0x3b4   :  { %7227 = vmatmul.msk.f32.vlgmr.msrb.gmra.mxu2 %vm58_vm1, %v2679_v35 }
 0x3b8   :  { %v1898_v29 = vpop.f32.mrf.mxu2 }
 0x3b9   :  { %7221 = vmatmul.msk.f32.gmra.mxu1 %vm58_vm1, %v9964_v9  ;;  %v1848_v26 = vpop.f32.mrf.mxu3  ;;  %v1899_v52 = vadd.f32 %v1898_v29, %v1876_v6 }
 0x3ba   :  { %7209 = vmatmul.msk.f32.gmra.mxu3 %vm58_vm1, %v9950_v15  ;;  %v1828_v9 = vpop.f32.mrf.mxu1  ;;  %v1849_v12 = vadd.f32 %v1848_v26, %v1825_v17 }
 0x3bb   :  { %v1878_v31 = vpop.f32.mrf.mxu0 }
 0x3bc   :  { %7228 = vmatmul.msk.f32.gmra.mxu2 %vm58_vm1, %v2681_v11  ;;  %v1879_v60 = vadd.f32 %v1878_v31, %v1760_v24 }
 0x3c1   :  { %v1851_v44 = vpop.f32.mrf.mxu3  ;;  %v1901_v15 = vpop.f32.mrf.mxu2 }
 0x3c2   :  { %7230 = vmatmul.msk.f32.vlgmr.msra.gmra.mxu3 %vm58_vm1, %v2679_v35  ;;  %v1902_v10 = vadd.f32 %v1901_v15, %v1879_v60  ;;  %v1806_v15 = vadd.f32 %v10720_v16, %v10722_v42 }
 0x3c3   :  { %v1944_v45 = vpop.f32.mrf.mxu1 }
 0x3c6   :  { %v1990_v47 = vpop.f32.mrf.mxu0 }
 0x3ca   :  { %7231 = vmatmul.msk.f32.gmra.mxu3 %vm58_vm1, %v2681_v11  ;;  %v1921_v61 = vpop.f32.mrf.mxu3 }
 0x3cb   :  { %v1967_v48 = vpop.f32.mrf.mxu2  ;;  %v1922_v30 = vadd.f32 %v1921_v61, %v1803_v23 }
 0x3cc   :  { %v1968_v38 = vadd.f32 %v1967_v48, %v1849_v12 }
 0x3cd   :  { %v1945_v20 = vadd.f32 %v1944_v45, %v1922_v30 }
 0x3ce   :  { %v1947_v51 = vpop.f32.mrf.mxu1 }
 0x3d0   :  { %v10726_v4 = vpop.f32.mrf.mxu0 }
 0x3d4   :  { %v1924_v46 = vpop.f32.mrf.mxu3 }
 0x3d5   :  { %v1925_v26 = vadd.f32 %v1924_v46, %v1806_v15 }
 0x3d6   :  { %v1970_v53 = vpop.f32.mrf.mxu2 }
 0x3d7   :  { %v1948_v3 = vadd.f32 %v1947_v51, %v1925_v26 }
 0x3d9   :  { %v2105_v55 = vpop.f32.mrf.mxu1 }
 0x3db   :  { %v2151_v57 = vpop.f32.mrf.mxu0 }
 0x3df   :  { %v2128_v1 = vpop.f32.mrf.mxu3 }
 0x3e0   :  { %v2129_v7 = vadd.f32 %v2128_v1, %v2105_v55  ;;  %v1991_v55 = vadd.f32 %v1990_v47, %v1968_v38  ;;  %v1852_v1 = vadd.f32 %v1851_v44, %v1828_v9 }
 0x3e1   :  { %v2174_v28 = vpop.f32.mrf.mxu2 }
 0x3e2   :  { %v2226_v13 = vadd.f32 %v2129_v7, %v1899_v52  ;;  %v2175_v40 = vadd.f32 %v2174_v28, %v2151_v57  ;;  %v1971_v28 = vadd.f32 %v1970_v53, %v1852_v1  ;;  %v7277_v1 = vld [vmem:[%s14790_s3 + $0x3a8] sm:$0xff] }
 0x3e3   :  { %v2108_v39 = vpop.f32.mrf.mxu1  ;;  %2923 = vmatpush.msra.mxu0 %v7277_v1  ;;  %v7290_v1 = vld [vmem:[%s14790_s3 + $0x410] sm:$0xff] }
 0x3e4   :  { %v2227_v2 = vadd.f32 %v2175_v40, %v1945_v20  ;;  %v1994_v47 = vadd.f32 %v10726_v4, %v1971_v28  ;;  %v7278_v28 = vld [vmem:[%s14790_s3 + $0x3b0] sm:$0xff] }
 0x3e5   :  { %v2154_v63 = vpop.f32.mrf.mxu0  ;;  %2969 = vmatpush.msra.mxu2 %v7278_v28  ;;  %v7242_v28 = vld [vmem:[%s14790_s3 + $0x290] sm:$0xff] }
 0x3e9   :  { %v2131_v58 = vpop.f32.mrf.mxu3 }
 0x3ea   :  { %v2132_v0 = vadd.f32 %v2131_v58, %v2108_v39 }
 0x3eb   :  { %v2177_v62 = vpop.f32.mrf.mxu2 }
 0x3ec   :  { %v2229_v54 = vadd.f32 %v2132_v0, %v1902_v10  ;;  %v2178_v39 = vadd.f32 %v2177_v62, %v2154_v63 }
 0x3ee   :  { %v2220_v8 = vpop.f32.mrf.mxu1  ;;  %v2230_v9 = vadd.f32 %v2178_v39, %v1948_v3  ;;  %v7275_v3 = vld [vmem:[%s14790_s3 + $0x398] sm:$0xff] }
 0x3ef   :  { %v2360_v5 = vpop.f32.mrf.mxu0  ;;  %2970 = vmatpush.msra.mxu2 %v7275_v3  ;;  %v2801_v3 = vld [vmem:[%s14790_s3 + $0x150] sm:$0xff] }
 0x3f7   :  { %v2223_v59 = vpop.f32.mrf.mxu1 }
 0x3f8   :  { %v2363_v32 = vpop.f32.mrf.mxu0 }
 0x402   :  { %v2197_v19 = vpop.f32.mrf.mxu3 }
 0x403   :  { %v2221_v18 = vadd.f32 %v2220_v8, %v2197_v19 }
 0x404   :  { %v2337_v33 = vpop.f32.mrf.mxu2 }
 0x405   :  { %v2361_v21 = vadd.f32 %v2360_v5, %v2337_v33  ;;  %v2228_v61 = vadd.f32 %v2221_v18, %v1991_v55 }
 0x407   :  { %v2458_v22 = vadd.f32 %v2361_v21, %v2226_v13 }
 0x409   :  { %v2464_v25 = vadd.f32 %v2458_v22, %v9597_v43 }
 0x40b   :  { %2471 = vst [vmem:[#allocation3 + $0x30] sm:$0xff] %v2464_v25 }
 0x40c   :  { %v2200_v27 = vpop.f32.mrf.mxu3 }
 0x40d   :  { %v2340_v49 = vpop.f32.mrf.mxu2  ;;  %v2224_v6 = vadd.f32 %v2223_v59, %v2200_v27 }
 0x40e   :  { %v2364_v34 = vadd.f32 %v2363_v32, %v2340_v49  ;;  %v2383_v37 = vpop.f32.mrf.mxu1 }
 0x40f   :  { %v2231_v19 = vadd.f32 %v2224_v6, %v1994_v47  ;;  %v7295_v6 = vld [vmem:[%s14790_s3 + $0x438] sm:$0xff] }
 0x410   :  { %v2461_v35 = vadd.f32 %v2364_v34, %v2229_v54  ;;  %v2429_v29 = vpop.f32.mrf.mxu0 }
 0x412   :  { %v2467_v11 = vadd.f32 %v2461_v35, %v9597_v43 }
 0x414   :  { %2474 = vst [vmem:[#allocation3 + $0x48] sm:$0xf] %v2467_v11 }
 0x415   :  { %v2406_v31 = vpop.f32.mrf.mxu3 }
 0x416   :  { %v2407_v41 = vadd.f32 %v2406_v31, %v2383_v37  ;;  %v2386_v16 = vpop.f32.mrf.mxu1 }
 0x417   :  { %v2452_v17 = vpop.f32.mrf.mxu2 }
 0x418   :  { %v2459_v48 = vadd.f32 %v2407_v41, %v2227_v2  ;;  %v2453_v57 = vadd.f32 %v2452_v17, %v2429_v29  ;;  %v2432_v46 = vpop.f32.mrf.mxu0  ;;  %v7274_v17 = vld [vmem:[%s14790_s3 + $0x390] sm:$0xff] }
 0x419   :  { %2924 = vmatpush.msra.mxu0 %v7274_v17  ;;  %v7235_v17 = vld [vmem:[%s14790_s3 + $0x258] sm:$0xff] }
 0x41a   :  { %v2465_v45 = vadd.f32 %v2459_v48, %v9600_v56  ;;  %v2460_v58 = vadd.f32 %v2453_v57, %v2228_v61  ;;  %v7271_v48 = vld [vmem:[%s14790_s3 + $0x378] sm:$0xff]  ;;  %v7301_v57 = vld [vmem:[%s14790_s3 + $0x468] sm:$0xff] }
 0x41b   :  { %2954 = vmatpush.msra.mxu1 %v7301_v57  ;;  %2925 = vmatpush.msra.mxu0 %v7271_v48  ;;  %v7287_v48 = vld [vmem:[%s14790_s3 + $0x3f8] sm:$0xff]  ;;  %v7232_v57 = vld [vmem:[%s14790_s3 + $0x240] sm:$0xff] }
 0x41c   :  { %2472 = vst [vmem:[#allocation3 + $0x38] sm:$0xff] %v2465_v45  ;;  %v2466_v7 = vadd.f32 %v2460_v58, %v9610_v14  ;;  %v7268_v45 = vld [vmem:[%s14790_s3 + $0x360] sm:$0xff]  ;;  %v7298_v58 = vld [vmem:[%s14790_s3 + $0x450] sm:$0xff] }
 0x41d   :  { %v2409_v42 = vpop.f32.mrf.mxu3  ;;  %2955 = vmatpush.msra.mxu1 %v7298_v58  ;;  %2926 = vmatpush.msra.mxu0 %v7268_v45  ;;  %v7264_v45 = vld [vmem:[%s14790_s3 + $0x340] sm:$0xff]  ;;  %v7239_v58 = vld [vmem:[%s14790_s3 + $0x278] sm:$0xff] }
 0x41e   :  { %2473 = vst [vmem:[#allocation3 + $0x40] sm:$0xff] %v2466_v7  ;;  %v2410_v44 = vadd.f32 %v2409_v42, %v2386_v16  ;;  %v2544_v4 = vpop.f32.mrf.mxu1  ;;  %v7265_v16 = vld [vmem:[%s14790_s3 + $0x348] sm:$0xff]  ;;  %v7272_v42 = vld [vmem:[%s14790_s3 + $0x380] sm:$0xff] }
 0x41f   :  { %v2455_v8 = vpop.f32.mrf.mxu2  ;;  %2956 = vmatpush.msra.mxu1 %v7295_v6  ;;  %2927 = vmatpush.msra.mxu0 %v7265_v16  ;;  %v7284_v6 = vld [vmem:[%s14790_s3 + $0x3e0] sm:$0xff] }
 0x420   :  { %v2462_v53 = vadd.f32 %v2410_v44, %v2230_v9  ;;  %v2456_v63 = vadd.f32 %v2455_v8, %v2432_v46  ;;  %v2641_v24 = vpop.f32.mrf.mxu0  ;;  %v7292_v9 = vld [vmem:[%s14790_s3 + $0x420] sm:$0xff]  ;;  %v7262_v44 = vld [vmem:[%s14790_s3 + $0x330] sm:$0xff]  ;;  %v7269_v46 = vld [vmem:[%s14790_s3 + $0x368] sm:$0xff]  ;;  %2971 = vmatpush.msra.mxu2 %v7272_v42 }
 0x421   :  { %v7289_v8 = vld [vmem:[%s14790_s3 + $0x408] sm:$0xff]  ;;  %2957 = vmatpush.msra.mxu1 %v7292_v9  ;;  %2928 = vmatpush.msra.mxu0 %v7262_v44  ;;  %v7236_v16 = vld [vmem:[%s14790_s3 + $0x260] sm:$0xff]  ;;  %v2798_v42 = vld [vmem:[%s14790_s3 + $0x138] sm:$0xff] }
 0x422   :  { %v2468_v62 = vadd.f32 %v2462_v53, %v9600_v56  ;;  %v2463_v52 = vadd.f32 %v2456_v63, %v2231_v19  ;;  %v7259_v19 = vld [vmem:[%s14790_s3 + $0x318] sm:$0xff]  ;;  %v7266_v53 = vld [vmem:[%s14790_s3 + $0x350] sm:$0xff]  ;;  %2972 = vmatpush.msra.mxu2 %v7269_v46  ;;  %v2795_v9 = vld [vmem:[%s14790_s3 + $0x120] sm:$0xff] }
 0x423   :  { %v7286_v63 = vld [vmem:[%s14790_s3 + $0x3f0] sm:$0xff]  ;;  %2958 = vmatpush.msra.mxu1 %v7289_v8  ;;  %2929 = vmatpush.msra.mxu0 %v7259_v19  ;;  %v2792_v44 = vld [vmem:[%s14790_s3 + $0x108] sm:$0xff]  ;;  %v2786_v8 = vld [vmem:[%s14790_s3 + $0xd8] sm:$0xff] }
 0x424   :  { %2475 = vst [vmem:[#allocation3 + $0x50] sm:$0xf] %v2468_v62  ;;  %v2469_v5 = vadd.f32 %v2463_v52, %v9610_v14  ;;  %v7256_v62 = vld [vmem:[%s14790_s3 + $0x300] sm:$0xff]  ;;  %v7263_v52 = vld [vmem:[%s14790_s3 + $0x338] sm:$0xff]  ;;  %2973 = vmatpush.msra.mxu2 %v7266_v53  ;;  %v2789_v46 = vld [vmem:[%s14790_s3 + $0xf0] sm:$0xff] }
 0x425   :  { %v4949_v51 = vld [vmem:[#allocation3 + $0x31] ss:$8 sm:$0x7]  ;;  %v2521_v33 = vpop.f32.mrf.mxu3  ;;  %2959 = vmatpush.msra.mxu1 %v7286_v63  ;;  %2930 = vmatpush.msra.mxu0 %v7256_v62  ;;  %v7258_v53 = vld [vmem:[%s14790_s3 + $0x310] sm:$0xff] }
 0x426   :  { %5009 = vst [vmem:[#allocation1 + $0x1] ss:$9 sm:$0xff] %v4949_v51  ;;  %v2547_v59 = vpop.f32.mrf.mxu1  ;;  %v7302_v51 = vld [vmem:[%s14790_s3 + $0x470] sm:$0xff]  ;;  %2974 = vmatpush.msra.mxu2 %v7263_v52  ;;  %v7281_v19 = vld [vmem:[%s14790_s3 + $0x3c8] sm:$0xff]  ;;  %v7303_v62 = vld [vmem:[%s14790_s3 + $0x478] sm:$0xff] }
 0x427   :  { %v2577_v13 = vpop.f32.mrf.mxu2  ;;  %2476 = vst [vmem:[#allocation3 + $0x58] sm:$0xf] %v2469_v5  ;;  %3000 = vmatpush.msrb.mxu3 %v7302_v51  ;;  %v7233_v63 = vld [vmem:[%s14790_s3 + $0x248] sm:$0xff]  ;;  %v2783_v52 = vld [vmem:[%s14790_s3 + $0xc0] sm:$0xff]  ;;  %v7255_v51 = vld [vmem:[%s14790_s3 + $0x2f8] sm:$0xff] }
 0x428   :  { %v2578_v25 = vadd.f32 %v2577_v13, %v2521_v33  ;;  %v2644_v23 = vpop.f32.mrf.mxu0  ;;  %v7253_v13 = vld [vmem:[%s14790_s3 + $0x2e8] sm:$0xff] }
 0x429   :  { %2931 = vmatpush.msra.mxu0 %v7253_v13  ;;  %v7300_v13 = vld [vmem:[%s14790_s3 + $0x460] sm:$0xff] }
 0x42a   :  { %v2670_v0 = vadd.f32 %v2641_v24, %v2578_v25  ;;  %v7299_v25 = vld [vmem:[%s14790_s3 + $0x458] sm:$0xff] }
 0x42b   :  { %3001 = vmatpush.msrb.mxu3 %v7299_v25  ;;  %v7297_v25 = vld [vmem:[%s14790_s3 + $0x448] sm:$0xff] }
 0x42d   :  { %v2524_v21 = vpop.f32.mrf.mxu3 }
 0x42e   :  { %v2664_v30 = vpop.f32.mrf.mxu1 }
 0x42f   :  { %v2580_v22 = vpop.f32.mrf.mxu2 }
 0x430   :  { %v2581_v32 = vadd.f32 %v2580_v22, %v2524_v21  ;;  %v7260_v21 = vld [vmem:[%s14790_s3 + $0x320] sm:$0xff] }
 0x431   :  { %2975 = vmatpush.msra.mxu2 %v7260_v21  ;;  %v7252_v21 = vld [vmem:[%s14790_s3 + $0x2e0] sm:$0xff] }
 0x432   :  { %v2672_v12 = vadd.f32 %v2644_v23, %v2581_v32  ;;  %v7257_v32 = vld [vmem:[%s14790_s3 + $0x308] sm:$0xff] }
 0x433   :  { %2976 = vmatpush.msra.mxu2 %v7257_v32  ;;  %v2774_v32 = vld [vmem:[%s14790_s3 + $0x78] sm:$0xff] }
 0x435   :  { %v2600_v60 = vpop.f32.mrf.mxu3 }
 0x436   :  { %v2601_v38 = vadd.f32 %v2600_v60, %v2544_v4  ;;  %v2667_v55 = vpop.f32.mrf.mxu1  ;;  %v7283_v4 = vld [vmem:[%s14790_s3 + $0x3d8] sm:$0xff] }
 0x437   :  { %v2709_v10 = vpop.f32.mrf.mxu2  ;;  %2960 = vmatpush.msra.mxu1 %v7283_v4  ;;  %v2780_v4 = vld [vmem:[%s14790_s3 + $0xa8] sm:$0xff] }
 0x438   :  { %v2738_v27 = vadd.f32 %v2709_v10, %v2670_v0  ;;  %v2671_v37 = vadd.f32 %v2664_v30, %v2601_v38  ;;  %v7250_v10 = vld [vmem:[%s14790_s3 + $0x2d0] sm:$0xff]  ;;  %v7296_v38 = vld [vmem:[%s14790_s3 + $0x440] sm:$0xff] }
 0x439   :  { %2932 = vmatpush.msra.mxu0 %v7250_v10  ;;  %3002 = vmatpush.msrb.mxu3 %v7296_v38  ;;  %v2822_v10 = vld [vmem:[%s14790_s3 + $0x1f8] sm:$0xff] }
 0x43a   :  { %v2742_v49 = vadd.f32 %v2738_v27, %v8480_v36  ;;  %v7280_v27 = vld [vmem:[%s14790_s3 + $0x3c0] sm:$0xff]  ;;  %v7243_v38 = vld [vmem:[%s14790_s3 + $0x298] sm:$0xff] }
 0x43b   :  { %2961 = vmatpush.msra.mxu1 %v7280_v27  ;;  %v7294_v27 = vld [vmem:[%s14790_s3 + $0x430] sm:$0xff] }
 0x43c   :  { %v10738_v54 = vmax.f32 %v2742_v49, 0.0 }
 0x43d   :  { %v2603_v34 = vpop.f32.mrf.mxu3 }
 0x43e   :  { %2751 = vst [vmem:[#allocation2 + $0x40] sm:$0xff] %v10738_v54  ;;  %2907 = vrot.lane.b32.xlu0 %v10738_v54, %s8326_s2  ;;  %v2604_v31 = vadd.f32 %v2603_v34, %v2547_v59  ;;  %v7247_v34 = vld [vmem:[%s14790_s3 + $0x2b8] sm:$0xff] }
 0x43f   :  { %v2712_v35 = vpop.f32.mrf.mxu2  ;;  %2933 = vmatpush.msra.mxu0 %v7247_v34  ;;  %v2819_v34 = vld [vmem:[%s14790_s3 + $0x1e0] sm:$0xff] }
 0x440   :  { %v2740_v40 = vadd.f32 %v2712_v35, %v2672_v12  ;;  %v2673_v41 = vadd.f32 %v2667_v55, %v2604_v31  ;;  %v7279_v12 = vld [vmem:[%s14790_s3 + $0x3b8] sm:$0xff]  ;;  %v7254_v35 = vld [vmem:[%s14790_s3 + $0x2f0] sm:$0xff]  ;;  %v7273_v31 = vld [vmem:[%s14790_s3 + $0x388] sm:$0xff] }
 0x441   :  { %3015 = vmatpush.msrb.mxu1 %v7279_v12  ;;  %2977 = vmatpush.msra.mxu2 %v7254_v35  ;;  %v7238_v55 = vld [vmem:[%s14790_s3 + $0x270] sm:$0xff]  ;;  %v7291_v12 = vld [vmem:[%s14790_s3 + $0x418] sm:$0xff]  ;;  %v2771_v35 = vld [vmem:[%s14790_s3 + $0x60] sm:$0xff] }
 0x442   :  { %v2744_v11 = vadd.f32 %v2740_v40, %v8480_v36  ;;  %v7244_v40 = vld [vmem:[%s14790_s3 + $0x2a0] sm:$0xff] }
 0x443   :  { %2934 = vmatpush.msra.mxu0 %v7244_v40  ;;  %v2816_v40 = vld [vmem:[%s14790_s3 + $0x1c8] sm:$0xff] }
 0x444   :  { %v2748_v20 = vmax.f32 %v2744_v11, 0.0  ;;  %v7276_v11 = vld [vmem:[%s14790_s3 + $0x3a0] sm:$0xff] }
 0x445   :  { %v2732_v18 = vpop.f32.mrf.mxu3  ;;  %v3203_v23 = vld [vmem:[#allocation2 + $0x40] sm:$0xfe]  ;;  %3016 = vmatpush.msrb.mxu1 %v7276_v11  ;;  %v7472_v11 = vld [vmem:[%s14787_s0 + $0x30] sm:$0xff] }
 0x446   :  { %2753 = vst [vmem:[#allocation2 + $0x50] sm:$0x1f] %v2748_v20  ;;  %v2739_v29 = vadd.f32 %v2732_v18, %v2671_v37  ;;  %v3283_v37 = vrot.slane %v3203_v23, 1  ;;  %v7241_v20 = vld [vmem:[%s14790_s3 + $0x288] sm:$0xff]  ;;  %v7251_v18 = vld [vmem:[%s14790_s3 + $0x2d8] sm:$0xff]  ;;  %v7246_v23 = vld [vmem:[%s14790_s3 + $0x2b0] sm:$0xff] }
 0x447   :  { %2935 = vmatpush.msra.mxu0 %v7241_v20  ;;  %2978 = vmatpush.msra.mxu2 %v7251_v18  ;;  %v2768_v20 = vld [vmem:[%s14790_s3 + $0x48] sm:$0xff]  ;;  %v7240_v18 = vld [vmem:[%s14790_s3 + $0x280] sm:$0xff] }
 0x448   :  { %v2743_v15 = vadd.f32 %v2739_v29, %v8489_v50  ;;  %3017 = vmatpush.msrb.mxu1 %v7273_v31  ;;  %v2813_v31 = vld [vmem:[%s14790_s3 + $0x1b0] sm:$0xff] }
 0x449   :  { %2936 = vmatpush.msra.mxu0 %v7238_v55  ;;  %v2765_v55 = vld [vmem:[%s14790_s3 + $0x30] sm:$0xff] }
 0x44a   :  { %v2747_v2 = vmax.f32 %v2743_v15, 0.0  ;;  %v7293_v15 = vld [vmem:[%s14790_s3 + $0x428] sm:$0xff] }
 0x44b   :  { %3003 = vmatpush.msrb.mxu3 %v7293_v15  ;;  %2937 = vmatpush.msra.mxu0 %v7235_v17  ;;  %v7285_v15 = vld [vmem:[%s14790_s3 + $0x3e8] sm:$0xff]  ;;  %v2762_v17 = vld [vmem:[%s14790_s3 + $0x18] sm:$0xff] }
 0x44c   :  { %2752 = vst.msk [vmem:[#allocation2 + $0x48] sm:$0xff] %vm324_vm2, %v2747_v2  ;;  %v7248_v2 = vld [vmem:[%s14790_s3 + $0x2c0] sm:$0xff] }
 0x44d   :  { %v2735_v26 = vpop.f32.mrf.mxu3  ;;  %v10815_v5 = vld [vmem:[#allocation2 + $0x50] sm:$0xf]  ;;  %2979 = vmatpush.msra.mxu2 %v7248_v2  ;;  %3004 = vmatpush.msrb.mxu3 %v7290_v1  ;;  %v7237_v2 = vld [vmem:[%s14790_s3 + $0x268] sm:$0xff]  ;;  %v7282_v1 = vld [vmem:[%s14790_s3 + $0x3d0] sm:$0xff] }
 0x44e   :  { %v2741_v61 = vadd.f32 %v2735_v26, %v2673_v41  ;;  %v3205_v59 = vld [vmem:[#allocation2 + $0x50] sm:$0x1f]  ;;  %v7270_v41 = vld [vmem:[%s14790_s3 + $0x370] sm:$0xff]  ;;  %v7245_v26 = vld [vmem:[%s14790_s3 + $0x2a8] sm:$0xff]  ;;  %2938 = vmatpush.msra.mxu0 %v7232_v57 }
 0x44f   :  { %v10858_v30 = vrot.slane %v3205_v59, 1  ;;  %3018 = vmatpush.msrb.mxu1 %v7270_v41  ;;  %2980 = vmatpush.msra.mxu2 %v7245_v26  ;;  %v7249_v59 = vld [vmem:[%s14790_s3 + $0x2c8] sm:$0xff]  ;;  %v2810_v41 = vld [vmem:[%s14790_s3 + $0x198] sm:$0xff]  ;;  %v7234_v26 = vld [vmem:[%s14790_s3 + $0x250] sm:$0xff] }
 0x450   :  { %v2745_v39 = vadd.f32 %v2741_v61, %v8489_v50  ;;  %v7267_v61 = vld [vmem:[%s14790_s3 + $0x358] sm:$0xff]  ;;  %3005 = vmatpush.msrb.mxu3 %v7287_v48  ;;  %v2759_v48 = vld [vmem:[%s14790_s3] sm:$0xff] }
 0x451   :  { %v10880_v29 = vsel %vm861_vm4, %v3283_v37, %v10858_v30  ;;  %3019 = vmatpush.msrb.mxu1 %v7267_v61  ;;  %2981 = vmatpush.msra.mxu2 %v7242_v28  ;;  %v7288_v37 = vld [vmem:[%s14790_s3 + $0x400] sm:$0xff]  ;;  %v11075_v57 = vld [vmem:[%s14787_s0 + $0x38] sm:$0x1f] }
 0x452   :  { %v2749_v7 = vmax.f32 %v2745_v39, 0.0  ;;  %v2804_v39 = vld [vmem:[%s14790_s3 + $0x168] sm:$0xff]  ;;  %3006 = vmatpush.msrb.mxu3 %v7284_v6  ;;  %v2807_v61 = vld [vmem:[%s14790_s3 + $0x180] sm:$0xff]  ;;  %v11082_v28 = vld [vmem:[%s14787_s0 + $0x39] sm:$0x1f] }
 0x453   :  { %v10780_v47 = vld [vmem:[#allocation2 + $0x48] sm:$0xff]  ;;  %3065 = vmatpush.msrb.mxu0 %v2804_v39  ;;  %3020 = vmatpush.msrb.mxu1 %v7264_v45 }
 0x454   :  { %2754 = vst.msk [vmem:[#allocation2 + $0x58] sm:$0x1f] %vm327_vm3, %v2749_v7  ;;  %2909 = vrot.lane.b32.xlu1 %v10780_v47, %s8326_s2  ;;  %v3204_v33 = vld [vmem:[#allocation2 + $0x48] sm:$0xfe]  ;;  %v7261_v7 = vld [vmem:[%s14790_s3 + $0x328] sm:$0xff]  ;;  %2982 = vmatpush.msra.mxu2 %v7239_v58 }
 0x455   :  { %v3286_v60 = vrot.slane %v3204_v33, 1  ;;  %3066 = vmatpush.msrb.mxu0 %v2801_v3  ;;  %3021 = vmatpush.msrb.mxu1 %v7261_v7  ;;  %v2828_v33 = vld [vmem:[%s14790_s3 + $0x228] sm:$0xff]  ;;  %v2805_v39 = vld [vmem:[%s14790_s3 + $0x170] sm:$0xff]  ;;  %v2806_v7 = vld [vmem:[%s14790_s3 + $0x178] sm:$0xff] }
 0x456   :  { %2983 = vmatpush.msra.mxu2 %v7236_v16  ;;  %3007 = vmatpush.msrb.mxu3 %v7281_v19  ;;  %v2829_v3 = vld [vmem:[%s14790_s3 + $0x230] sm:$0xff]  ;;  %v2802_v16 = vld [vmem:[%s14790_s3 + $0x158] sm:$0xff]  ;;  %v2823_v19 = vld [vmem:[%s14790_s3 + $0x200] sm:$0xff] }
 0x457   :  { %3067 = vmatpush.msrb.mxu0 %v2798_v42  ;;  %3022 = vmatpush.msrb.mxu1 %v7258_v53  ;;  %v2830_v42 = vld [vmem:[%s14790_s3 + $0x238] sm:$0xff]  ;;  %v2800_v53 = vld [vmem:[%s14790_s3 + $0x148] sm:$0xff] }
 0x458   :  { %2984 = vmatpush.msra.mxu2 %v7233_v63  ;;  %3046 = vmatpush.msra.mxu3 %v7303_v62  ;;  %v2796_v63 = vld [vmem:[%s14790_s3 + $0x128] sm:$0xff] }
 0x459   :  { %3068 = vmatpush.msrb.mxu0 %v2795_v9  ;;  %3023 = vmatpush.msrb.mxu1 %v7255_v51  ;;  %v2826_v9 = vld [vmem:[%s14790_s3 + $0x218] sm:$0xff]  ;;  %v2824_v62 = vld [vmem:[%s14790_s3 + $0x208] sm:$0xff]  ;;  %v2797_v51 = vld [vmem:[%s14790_s3 + $0x130] sm:$0xff] }
 0x45a   :  { %3096 = vmatpush.msrb.mxu2 %v2828_v33  ;;  %3047 = vmatpush.msra.mxu3 %v7300_v13 }
 0x45b   :  { %v10826_v22 = vld [vmem:[#allocation2 + $0x58] sm:$0xf]  ;;  %3069 = vmatpush.msrb.mxu0 %v2792_v44  ;;  %3024 = vmatpush.msrb.mxu1 %v7252_v21  ;;  %v2793_v21 = vld [vmem:[%s14790_s3 + $0x110] sm:$0xff] }
 0x45c   :  { %v3206_v24 = vld [vmem:[#allocation2 + $0x58] sm:$0x1f]  ;;  %2913 = vrot.lane.b32.xlu2 %v10826_v22, %s8326_s2  ;;  %2911 = vrot.lane.b32.xlu1 %v10815_v5, %s8326_s2 }
 0x45d   :  { %v10835_v0 = vrot.slane %v3206_v24, 1  ;;  %3070 = vmatpush.msrb.mxu0 %v2789_v46  ;;  %v2825_v24 = vld [vmem:[%s14790_s3 + $0x210] sm:$0xff]  ;;  %3048 = vmatpush.msra.mxu3 %v7297_v25  ;;  %v2803_v44 = vld [vmem:[%s14790_s3 + $0x160] sm:$0xff] }
 0x45e   :  { %3097 = vmatpush.msrb.mxu2 %v2825_v24  ;;  %3025 = vmatpush.msrb.mxu1 %v7249_v59  ;;  %v2799_v46 = vld [vmem:[%s14790_s3 + $0x140] sm:$0xff]  ;;  %v2817_v25 = vld [vmem:[%s14790_s3 + $0x1d0] sm:$0xff]  ;;  %v2790_v59 = vld [vmem:[%s14790_s3 + $0xf8] sm:$0xff] }
 0x45f   :  { %v10848_v49 = vsel %vm861_vm4, %v3286_v60, %v10835_v0  ;;  %3071 = vmatpush.msrb.mxu0 %v2786_v8  ;;  %v2777_v60 = vld [vmem:[%s14790_s3 + $0x90] sm:$0xff]  ;;  %3049 = vmatpush.msra.mxu3 %v7294_v27  ;;  %v2827_v8 = vld [vmem:[%s14790_s3 + $0x220] sm:$0xff]  ;;  %v2814_v27 = vld [vmem:[%s14790_s3 + $0x1b8] sm:$0xff] }
 0x460   :  { %3513 = vrot.lane.b32.xlu0 %v10848_v49, %s8326_s2  ;;  %3098 = vmatpush.msrb.mxu2 %v2822_v10  ;;  %v2818_v10 = vld [vmem:[%s14790_s3 + $0x1d8] sm:$0xff] }
 0x461   :  { %3072 = vmatpush.msrb.mxu0 %v2783_v52  ;;  %3026 = vmatpush.msrb.mxu1 %v7246_v23  ;;  %v2820_v52 = vld [vmem:[%s14790_s3 + $0x1e8] sm:$0xff]  ;;  %v2787_v23 = vld [vmem:[%s14790_s3 + $0xe0] sm:$0xff] }
 0x462   :  { %3099 = vmatpush.msrb.mxu2 %v2819_v34  ;;  %3050 = vmatpush.msra.mxu3 %v7291_v12  ;;  %v2815_v34 = vld [vmem:[%s14790_s3 + $0x1c0] sm:$0xff] }
 0x463   :  { %3073 = vmatpush.msrb.mxu0 %v2780_v4  ;;  %3027 = vmatpush.msrb.mxu1 %v7243_v38  ;;  %v2821_v4 = vld [vmem:[%s14790_s3 + $0x1f0] sm:$0xff]  ;;  %v2811_v12 = vld [vmem:[%s14790_s3 + $0x1a0] sm:$0xff]  ;;  %v2784_v38 = vld [vmem:[%s14790_s3 + $0xc8] sm:$0xff] }
 0x464   :  { %3511 = vrot.lane.b32.xlu2 %v10880_v29, %s8326_s2  ;;  %3515 = vrot.lane.b32.xlu1 %v10858_v30, %s8326_s2 }
 0x465   :  { %3074 = vmatpush.msrb.mxu0 %v2777_v60  ;;  %3100 = vmatpush.msrb.mxu2 %v2816_v40  ;;  %v2794_v60 = vld [vmem:[%s14790_s3 + $0x118] sm:$0xff]  ;;  %v2812_v40 = vld [vmem:[%s14790_s3 + $0x1a8] sm:$0xff] }
 0x466   :  { %3051 = vmatpush.msra.mxu3 %v7288_v37  ;;  %3028 = vmatpush.msrb.mxu1 %v7240_v18  ;;  %v2785_v37 = vld [vmem:[%s14790_s3 + $0xd0] sm:$0xff] }
 0x467   :  { %3075 = vmatpush.msrb.mxu0 %v2774_v32  ;;  %3101 = vmatpush.msrb.mxu2 %v2813_v31  ;;  %v2791_v32 = vld [vmem:[%s14790_s3 + $0x100] sm:$0xff]  ;;  %v2781_v18 = vld [vmem:[%s14790_s3 + $0xb0] sm:$0xff]  ;;  %v7361_v31 = vld [vmem:[%s14790_s3 + $0x5e8] sm:$0xff] }
 0x468   :  { %3697 = vrot.lane.b32.xlu0 %v7472_v11, %s8325_s21  ;;  %3052 = vmatpush.msra.mxu3 %v7285_v15  ;;  %v2808_v11 = vld [vmem:[%s14790_s3 + $0x188] sm:$0xff]  ;;  %v2782_v15 = vld [vmem:[%s14790_s3 + $0xb8] sm:$0xff] }
 0x469   :  { %3076 = vmatpush.msrb.mxu0 %v2771_v35  ;;  %3029 = vmatpush.msrb.mxu1 %v7237_v2  ;;  %v2788_v35 = vld [vmem:[%s14790_s3 + $0xe8] sm:$0xff]  ;;  %v2778_v2 = vld [vmem:[%s14790_s3 + $0x98] sm:$0xff] }
 0x46a   :  { %3102 = vmatpush.msrb.mxu2 %v2810_v41  ;;  %3053 = vmatpush.msra.mxu3 %v7282_v1  ;;  %v7358_v41 = vld [vmem:[%s14790_s3 + $0x5d0] sm:$0xff]  ;;  %v2779_v1 = vld [vmem:[%s14790_s3 + $0xa0] sm:$0xff] }
 0x46b   :  { %3077 = vmatpush.msrb.mxu0 %v2768_v20  ;;  %3030 = vmatpush.msrb.mxu1 %v7234_v26  ;;  %v2809_v20 = vld [vmem:[%s14790_s3 + $0x190] sm:$0xff]  ;;  %v2775_v26 = vld [vmem:[%s14790_s3 + $0x80] sm:$0xff] }
 0x46c   :  { %3517 = vrot.lane.b32.xlu2 %v10835_v0, %s8326_s2  ;;  %3103 = vmatpush.msrb.mxu2 %v2807_v61  ;;  %v7355_v61 = vld [vmem:[%s14790_s3 + $0x5b8] sm:$0xff] }
 0x46d   :  { %3078 = vmatpush.msrb.mxu0 %v2765_v55  ;;  %3699 = vrot.lane.b32.xlu1 %v11075_v57, %s8325_s21  ;;  %v7362_v55 = vld [vmem:[%s14790_s3 + $0x5f0] sm:$0xff] }
 0x46f   :  { %3079 = vmatpush.msrb.mxu0 %v2762_v17  ;;  %v7359_v17 = vld [vmem:[%s14790_s3 + $0x5d8] sm:$0xff] }
 0x470   :  { %3887 = vrot.lane.b32.xlu0 %v11082_v28, %s8325_s21 }
 0x471   :  { %3080 = vmatpush.msrb.mxu0 %v2759_v48  ;;  %v2776_v48 = vld [vmem:[%s14790_s3 + $0x88] sm:$0xff] }
 0x4b0   :  { %v2908_v45 = vpop.permute.xlu0 %2907 }
 0x4b6   :  { %v11143_v33 = vpop.permute.xlu2 %2913 }
 0x4c6   :  { %v11089_v58 = vpop.permute.xlu1 %2909 }
 0x4c7   :  { %7304 = vmatmul.msk.f32.vlgmr.msra.gmra.mxu1 %vm495_vm5, %v11089_v58  ;;  %7306 = vmatmul.msk.f32.vlgmr.msrb.gmra.mxu3 %vm495_vm5, %v11089_v58  ;;  %v11100_v6 = vsel %vm490_vm6, %v2908_v45, %v11089_v58  ;;  %v2772_v45 = vld [vmem:[%s14790_s3 + $0x68] sm:$0xff] }
 0x4c8   :  { %3111 = vmatpush.msrb.mxu3 %v2805_v39  ;;  %2939 = vmatmul.f32.vlgmr.msra.gmra.mxu0 %v11100_v6  ;;  %v7356_v39 = vld [vmem:[%s14790_s3 + $0x5c0] sm:$0xff] }
 0x4c9   :  { %2985 = vmatmul.f32.vlgmr.msra.gmra.mxu2 %v11100_v6  ;;  %3142 = vmatpush.msra.mxu1 %v2829_v3  ;;  %v2773_v3 = vld [vmem:[%s14790_s3 + $0x70] sm:$0xff] }
 0x4ca   :  { %3157 = vmatpush.msra.mxu2 %v2806_v7  ;;  %3112 = vmatpush.msrb.mxu3 %v2802_v16  ;;  %v2769_v7 = vld [vmem:[%s14790_s3 + $0x50] sm:$0xff]  ;;  %v7349_v16 = vld [vmem:[%s14790_s3 + $0x588] sm:$0xff] }
 0x4cb   :  { %3188 = vmatpush.msra.mxu0 %v2830_v42  ;;  %3143 = vmatpush.msra.mxu1 %v2826_v9  ;;  %v2770_v42 = vld [vmem:[%s14790_s3 + $0x58] sm:$0xff]  ;;  %v7350_v9 = vld [vmem:[%s14790_s3 + $0x590] sm:$0xff] }
 0x4cc   :  { %3158 = vmatpush.msra.mxu2 %v2803_v44  ;;  %3113 = vmatpush.msrb.mxu3 %v2799_v46  ;;  %v2766_v44 = vld [vmem:[%s14790_s3 + $0x38] sm:$0xff]  ;;  %v7346_v46 = vld [vmem:[%s14790_s3 + $0x570] sm:$0xff] }
 0x4cd   :  { %3189 = vmatpush.msra.mxu0 %v2827_v8  ;;  %3144 = vmatpush.msra.mxu1 %v2823_v19  ;;  %v2767_v8 = vld [vmem:[%s14790_s3 + $0x40] sm:$0xff]  ;;  %v7347_v19 = vld [vmem:[%s14790_s3 + $0x578] sm:$0xff] }
 0x4ce   :  { %3159 = vmatpush.msra.mxu2 %v2800_v53  ;;  %3114 = vmatpush.msrb.mxu3 %v2796_v63  ;;  %v2912_v13 = vpop.permute.xlu1 %2911  ;;  %v2763_v53 = vld [vmem:[%s14790_s3 + $0x20] sm:$0xff]  ;;  %v7343_v63 = vld [vmem:[%s14790_s3 + $0x558] sm:$0xff] }
 0x4cf   :  { %3190 = vmatpush.msra.mxu0 %v2824_v62  ;;  %3145 = vmatpush.msra.mxu1 %v2820_v52  ;;  %v11153_v24 = vsel %vm490_vm6, %v2912_v13, %v11143_v33  ;;  %v2764_v62 = vld [vmem:[%s14790_s3 + $0x28] sm:$0xff]  ;;  %v7344_v52 = vld [vmem:[%s14790_s3 + $0x560] sm:$0xff]  ;;  %v2761_v13 = vld [vmem:[%s14790_s3 + $0x10] sm:$0xff] }
 0x4d0   :  { %3160 = vmatpush.msra.mxu2 %v2797_v51  ;;  %7305 = vmatmul.msk.f32.gmra.mxu1 %vm495_vm5, %v11143_v33  ;;  %v2760_v51 = vld [vmem:[%s14790_s3 + $0x8] sm:$0xff] }
 0x4d1   :  { %7307 = vmatmul.msk.f32.gmra.mxu3 %vm495_vm5, %v11143_v33  ;;  %3191 = vmatpush.msra.mxu0 %v2821_v4  ;;  %v7385_v4 = vld [vmem:[%s14790_s3 + $0x6a8] sm:$0xff] }
 0x4d2   :  { %3115 = vmatpush.msrb.mxu3 %v2793_v21  ;;  %2942 = vmatmul.f32.gmra.mxu0 %v11153_v24  ;;  %v7341_v21 = vld [vmem:[%s14790_s3 + $0x548] sm:$0xff] }
 0x4d3   :  { %2988 = vmatmul.f32.gmra.mxu2 %v11153_v24  ;;  %3146 = vmatpush.msra.mxu1 %v2817_v25  ;;  %v7337_v25 = vld [vmem:[%s14790_s3 + $0x528] sm:$0xff] }
 0x4d4   :  { %3161 = vmatpush.msra.mxu2 %v2794_v60  ;;  %3116 = vmatpush.msrb.mxu3 %v2790_v59  ;;  %v7382_v60 = vld [vmem:[%s14790_s3 + $0x690] sm:$0xff] }
 0x4d5   :  { %3192 = vmatpush.msra.mxu0 %v2818_v10  ;;  %3147 = vmatpush.msra.mxu1 %v2814_v27  ;;  %v7338_v59 = vld [vmem:[%s14790_s3 + $0x530] sm:$0xff]  ;;  %v7383_v27 = vld [vmem:[%s14790_s3 + $0x698] sm:$0xff] }
 0x4d6   :  { %3162 = vmatpush.msra.mxu2 %v2791_v32  ;;  %3117 = vmatpush.msrb.mxu3 %v2787_v23  ;;  %v7334_v10 = vld [vmem:[%s14790_s3 + $0x510] sm:$0xff]  ;;  %v7379_v32 = vld [vmem:[%s14790_s3 + $0x678] sm:$0xff] }
 0x4d7   :  { %3193 = vmatpush.msra.mxu0 %v2815_v34  ;;  %3148 = vmatpush.msra.mxu1 %v2811_v12  ;;  %v11347_v23 = vld [vmem:[%s14787_s0 + $0x31] sm:$0xff]  ;;  %v7376_v12 = vld [vmem:[%s14790_s3 + $0x660] sm:$0xff] }
 0x4d8   :  { %3163 = vmatpush.msra.mxu2 %v2788_v35  ;;  %3118 = vmatpush.msrb.mxu3 %v2784_v38  ;;  %v7331_v34 = vld [vmem:[%s14790_s3 + $0x4f8] sm:$0xff]  ;;  %v7332_v35 = vld [vmem:[%s14790_s3 + $0x500] sm:$0xff] }
 0x4d9   :  { %3194 = vmatpush.msra.mxu0 %v2812_v40  ;;  %3149 = vmatpush.msra.mxu1 %v2808_v11  ;;  %v7328_v38 = vld [vmem:[%s14790_s3 + $0x4e0] sm:$0xff]  ;;  %v7377_v40 = vld [vmem:[%s14790_s3 + $0x668] sm:$0xff] }
 0x4da   :  { %3164 = vmatpush.msra.mxu2 %v2785_v37  ;;  %3031 = vmatmul.f32.vlgmr.msrb.gmra.mxu1 %v11100_v6  ;;  %v7353_v6 = vld [vmem:[%s14790_s3 + $0x5a8] sm:$0xff] }
 0x4db   :  { %7308 = vmatmul.msk.f32.vlgmr.msra.gmra.mxu3 %vm495_vm5, %v11089_v58  ;;  %3195 = vmatpush.msra.mxu0 %v2809_v20  ;;  %v7352_v58 = vld [vmem:[%s14790_s3 + $0x5a0] sm:$0xff]  ;;  %v7373_v11 = vld [vmem:[%s14790_s3 + $0x648] sm:$0xff] }
 0x4dc   :  { %3119 = vmatpush.msrb.mxu3 %v2781_v18  ;;  %3295 = vmatpush.msrb.mxu1 %v7361_v31  ;;  %v7329_v37 = vld [vmem:[%s14790_s3 + $0x4e8] sm:$0xff]  ;;  %v7374_v18 = vld [vmem:[%s14790_s3 + $0x650] sm:$0xff] }
 0x4dd   :  { %3081 = vmatmul.f32.vlgmr.msrb.gmra.mxu0 %v10738_v54  ;;  %7310 = vmatmul.msk.f32.vlgmr.msrb.gmra.mxu2 %vm495_vm5, %v10780_v47  ;;  %v7325_v20 = vld [vmem:[%s14790_s3 + $0x4c8] sm:$0xff]  ;;  %v7370_v31 = vld [vmem:[%s14790_s3 + $0x630] sm:$0xff] }
 0x4de   :  { %3165 = vmatpush.msra.mxu2 %v2782_v15  ;;  %3341 = vmatpush.msrb.mxu0 %v7362_v55  ;;  %v7326_v15 = vld [vmem:[%s14790_s3 + $0x4d0] sm:$0xff] }
 0x4df   :  { %3120 = vmatpush.msrb.mxu3 %v2778_v2  ;;  %3296 = vmatpush.msrb.mxu1 %v7358_v41  ;;  %v7322_v55 = vld [vmem:[%s14790_s3 + $0x4b0] sm:$0xff]  ;;  %v7371_v2 = vld [vmem:[%s14790_s3 + $0x638] sm:$0xff] }
 0x4e0   :  { %3166 = vmatpush.msra.mxu2 %v2779_v1  ;;  %3342 = vmatpush.msrb.mxu0 %v7359_v17  ;;  %v7367_v41 = vld [vmem:[%s14790_s3 + $0x618] sm:$0xff] }
 0x4e1   :  { %3121 = vmatpush.msrb.mxu3 %v2775_v26  ;;  %3297 = vmatpush.msrb.mxu1 %v7355_v61  ;;  %v7323_v1 = vld [vmem:[%s14790_s3 + $0x4b8] sm:$0xff]  ;;  %v7320_v26 = vld [vmem:[%s14790_s3 + $0x4a0] sm:$0xff] }
 0x4e2   :  { %3167 = vmatpush.msra.mxu2 %v2776_v48  ;;  %3343 = vmatpush.msrb.mxu0 %v7356_v39  ;;  %v7319_v17 = vld [vmem:[%s14790_s3 + $0x498] sm:$0xff]  ;;  %v7316_v61 = vld [vmem:[%s14790_s3 + $0x480] sm:$0xff]  ;;  %v7365_v48 = vld [vmem:[%s14790_s3 + $0x608] sm:$0xff] }
 0x4e3   :  { %3122 = vmatpush.msrb.mxu3 %v2772_v45  ;;  %3298 = vmatpush.msrb.mxu1 %v7352_v58  ;;  %v7363_v39 = vld [vmem:[%s14790_s3 + $0x5f8] sm:$0xff]  ;;  %v7317_v45 = vld [vmem:[%s14790_s3 + $0x488] sm:$0xff] }
 0x4e4   :  { %3168 = vmatpush.msra.mxu2 %v2773_v3  ;;  %3344 = vmatpush.msrb.mxu0 %v7353_v6  ;;  %v7387_v58 = vld [vmem:[%s14790_s3 + $0x6b8] sm:$0xff]  ;;  %v7439_v3 = vld [vmem:[%s14790_s3 + $0x828] sm:$0xff]  ;;  %v7360_v6 = vld [vmem:[%s14790_s3 + $0x5e0] sm:$0xff] }
 0x4e5   :  { %3034 = vmatmul.f32.gmra.mxu1 %v11153_v24  ;;  %7309 = vmatmul.msk.f32.gmra.mxu3 %vm495_vm5, %v11143_v33  ;;  %v7340_v33 = vld [vmem:[%s14790_s3 + $0x540] sm:$0xff]  ;;  %v7386_v24 = vld [vmem:[%s14790_s3 + $0x6b0] sm:$0xff] }
 0x4e6   :  { %3123 = vmatpush.msrb.mxu3 %v2769_v7  ;;  %3299 = vmatpush.msrb.mxu1 %v7349_v16  ;;  %v7463_v7 = vld [vmem:[%s14790_s3 + $0x8e8] sm:$0xff]  ;;  %v7384_v16 = vld [vmem:[%s14790_s3 + $0x6a0] sm:$0xff] }
 0x4e7   :  { %3084 = vmatmul.f32.gmra.mxu0 %v10815_v5  ;;  %7311 = vmatmul.msk.f32.gmra.mxu2 %vm495_vm5, %v10826_v22 }
 0x4e8   :  { %3169 = vmatpush.msra.mxu2 %v2770_v42  ;;  %3345 = vmatpush.msrb.mxu0 %v7350_v9  ;;  %v7436_v42 = vld [vmem:[%s14790_s3 + $0x810] sm:$0xff]  ;;  %v7357_v9 = vld [vmem:[%s14790_s3 + $0x5c8] sm:$0xff] }
 0x4e9   :  { %3124 = vmatpush.msrb.mxu3 %v2766_v44  ;;  %3300 = vmatpush.msrb.mxu1 %v7346_v46  ;;  %v7460_v44 = vld [vmem:[%s14790_s3 + $0x8d0] sm:$0xff]  ;;  %v7381_v46 = vld [vmem:[%s14790_s3 + $0x688] sm:$0xff] }
 0x4ea   :  { %3170 = vmatpush.msra.mxu2 %v2767_v8  ;;  %3346 = vmatpush.msrb.mxu0 %v7347_v19  ;;  %v7433_v8 = vld [vmem:[%s14790_s3 + $0x7f8] sm:$0xff]  ;;  %v7354_v19 = vld [vmem:[%s14790_s3 + $0x5b0] sm:$0xff] }
 0x4eb   :  { %3125 = vmatpush.msrb.mxu3 %v2763_v53  ;;  %3301 = vmatpush.msrb.mxu1 %v7343_v63  ;;  %v7457_v53 = vld [vmem:[%s14790_s3 + $0x8b8] sm:$0xff]  ;;  %v7378_v63 = vld [vmem:[%s14790_s3 + $0x670] sm:$0xff] }
 0x4ec   :  { %3171 = vmatpush.msra.mxu2 %v2764_v62  ;;  %3347 = vmatpush.msrb.mxu0 %v7344_v52  ;;  %v7430_v62 = vld [vmem:[%s14790_s3 + $0x7e0] sm:$0xff]  ;;  %v7351_v52 = vld [vmem:[%s14790_s3 + $0x598] sm:$0xff] }
 0x4ed   :  { %3126 = vmatpush.msrb.mxu3 %v2760_v51  ;;  %3302 = vmatpush.msrb.mxu1 %v7340_v33  ;;  %v7454_v51 = vld [vmem:[%s14790_s3 + $0x8a0] sm:$0xff]  ;;  %v7375_v33 = vld [vmem:[%s14790_s3 + $0x658] sm:$0xff] }
 0x4ee   :  { %3172 = vmatpush.msra.mxu2 %v2761_v13  ;;  %3348 = vmatpush.msrb.mxu0 %v7341_v21  ;;  %v7427_v13 = vld [vmem:[%s14790_s3 + $0x7c8] sm:$0xff] }
 0x4ef   :  { %3326 = vmatpush.msra.mxu3 %v7385_v4  ;;  %7312 = vmatmul.msk.f32.vlgmr.msra.gmra.mxu1 %vm495_vm5, %v10780_v47  ;;  %v7348_v4 = vld [vmem:[%s14790_s3 + $0x580] sm:$0xff]  ;;  %v7451_v21 = vld [vmem:[%s14790_s3 + $0x888] sm:$0xff] }
 0x4f0   :  { %3127 = vmatmul.f32.vlgmr.msrb.gmra.mxu3 %v10738_v54  ;;  %3372 = vmatpush.msrb.mxu2 %v7386_v24  ;;  %v7372_v24 = vld [vmem:[%s14790_s3 + $0x640] sm:$0xff] }
 0x4f1   :  { %3303 = vmatpush.msrb.mxu1 %v7337_v25  ;;  %3173 = vmatmul.f32.vlgmr.msra.gmra.mxu2 %v10738_v54  ;;  %v7335_v54 = vld [vmem:[%s14790_s3 + $0x518] sm:$0xff]  ;;  %v7424_v25 = vld [vmem:[%s14790_s3 + $0x7b0] sm:$0xff] }
 0x4f2   :  { %7314 = vmatmul.msk.f32.vlgmr.msra.gmra.mxu0 %vm495_vm5, %v10780_v47  ;;  %3327 = vmatpush.msra.mxu3 %v7382_v60  ;;  %v7380_v47 = vld [vmem:[%s14790_s3 + $0x680] sm:$0xff]  ;;  %v7345_v60 = vld [vmem:[%s14790_s3 + $0x568] sm:$0xff] }
 0x4f3   :  { %3349 = vmatpush.msrb.mxu0 %v7338_v59  ;;  %3304 = vmatpush.msrb.mxu1 %v7334_v10  ;;  %v7448_v59 = vld [vmem:[%s14790_s3 + $0x870] sm:$0xff]  ;;  %v7369_v10 = vld [vmem:[%s14790_s3 + $0x628] sm:$0xff] }
 0x4f4   :  { %3373 = vmatpush.msrb.mxu2 %v7383_v27  ;;  %3328 = vmatpush.msra.mxu3 %v7379_v32  ;;  %v7421_v27 = vld [vmem:[%s14790_s3 + $0x798] sm:$0xff]  ;;  %v7342_v32 = vld [vmem:[%s14790_s3 + $0x550] sm:$0xff] }
 0x4f5   :  { %3885 = vrot.lane.b32.xlu2 %v11347_v23, %s8325_s21  ;;  %3350 = vmatpush.msrb.mxu0 %v7335_v54  ;;  %v7445_v54 = vld [vmem:[%s14790_s3 + $0x858] sm:$0xff] }
 0x4f6   :  { %3305 = vmatpush.msrb.mxu1 %v7331_v34  ;;  %3374 = vmatpush.msrb.mxu2 %v7380_v47  ;;  %v7366_v34 = vld [vmem:[%s14790_s3 + $0x610] sm:$0xff]  ;;  %v7418_v47 = vld [vmem:[%s14790_s3 + $0x780] sm:$0xff] }
 0x4f7   :  { %3329 = vmatpush.msra.mxu3 %v7376_v12  ;;  %3351 = vmatpush.msrb.mxu0 %v7332_v35  ;;  %v7339_v12 = vld [vmem:[%s14790_s3 + $0x538] sm:$0xff]  ;;  %v7442_v35 = vld [vmem:[%s14790_s3 + $0x840] sm:$0xff] }
 0x4f8   :  { %3306 = vmatpush.msrb.mxu1 %v7328_v38  ;;  %3375 = vmatpush.msrb.mxu2 %v7377_v40  ;;  %v7440_v38 = vld [vmem:[%s14790_s3 + $0x830] sm:$0xff]  ;;  %v7415_v40 = vld [vmem:[%s14790_s3 + $0x768] sm:$0xff] }
 0x4f9   :  { %3330 = vmatpush.msra.mxu3 %v7373_v11  ;;  %3352 = vmatpush.msrb.mxu0 %v7329_v37  ;;  %v7441_v11 = vld [vmem:[%s14790_s3 + $0x838] sm:$0xff]  ;;  %v7336_v37 = vld [vmem:[%s14790_s3 + $0x520] sm:$0xff] }
 0x4fa   :  { %3130 = vmatmul.f32.gmra.mxu3 %v10815_v5  ;;  %7313 = vmatmul.msk.f32.gmra.mxu1 %vm495_vm5, %v10826_v22 }
 0x4fb   :  { %3307 = vmatpush.msrb.mxu1 %v7325_v20  ;;  %3376 = vmatpush.msrb.mxu2 %v7374_v18  ;;  %v7412_v20 = vld [vmem:[%s14790_s3 + $0x750] sm:$0xff]  ;;  %v7437_v18 = vld [vmem:[%s14790_s3 + $0x818] sm:$0xff] }
 0x4fc   :  { %3176 = vmatmul.f32.gmra.mxu2 %v10815_v5  ;;  %7315 = vmatmul.msk.f32.gmra.mxu0 %vm495_vm5, %v10826_v22  ;;  %v7368_v5 = vld [vmem:[%s14790_s3 + $0x620] sm:$0xff] }
 0x4fd   :  { %3331 = vmatpush.msra.mxu3 %v7370_v31  ;;  %3353 = vmatpush.msrb.mxu0 %v7326_v15  ;;  %v7364_v22 = vld [vmem:[%s14790_s3 + $0x600] sm:$0xff]  ;;  %v11558_v31 = vpop.permute.xlu2 %3511 }
 0x4fe   :  { %3308 = vmatpush.msrb.mxu1 %v7322_v55  ;;  %3377 = vmatpush.msrb.mxu2 %v7371_v2  ;;  %v7438_v15 = vld [vmem:[%s14790_s3 + $0x820] sm:$0xff]  ;;  %v7333_v55 = vld [vmem:[%s14790_s3 + $0x508] sm:$0xff]  ;;  %v11566_v2 = vpop.permute.xlu0 %3513 }
 0x4ff   :  { %3332 = vmatpush.msra.mxu3 %v7367_v41  ;;  %3354 = vmatpush.msrb.mxu0 %v7323_v1  ;;  %v7434_v41 = vld [vmem:[%s14790_s3 + $0x800] sm:$0xff]  ;;  %v7409_v1 = vld [vmem:[%s14790_s3 + $0x738] sm:$0xff] }
 0x500   :  { %3309 = vmatpush.msrb.mxu1 %v7319_v17  ;;  %3378 = vmatpush.msrb.mxu2 %v7368_v5  ;;  %v7435_v17 = vld [vmem:[%s14790_s3 + $0x808] sm:$0xff] }
 0x501   :  { %3333 = vmatpush.msra.mxu3 %v7364_v22  ;;  %3355 = vmatpush.msrb.mxu0 %v7320_v26  ;;  %v7431_v5 = vld [vmem:[%s14790_s3 + $0x7e8] sm:$0xff]  ;;  %v7406_v22 = vld [vmem:[%s14790_s3 + $0x720] sm:$0xff]  ;;  %v7432_v26 = vld [vmem:[%s14790_s3 + $0x7f0] sm:$0xff] }
 0x502   :  { %3310 = vmatpush.msrb.mxu1 %v7316_v61  ;;  %3379 = vmatpush.msrb.mxu2 %v7365_v48  ;;  %v7327_v61 = vld [vmem:[%s14790_s3 + $0x4d8] sm:$0xff]  ;;  %v7428_v48 = vld [vmem:[%s14790_s3 + $0x7d0] sm:$0xff] }
 0x503   :  { %3387 = vmatpush.msrb.mxu3 %v7363_v39  ;;  %3356 = vmatpush.msrb.mxu0 %v7317_v45  ;;  %v7403_v39 = vld [vmem:[%s14790_s3 + $0x708] sm:$0xff]  ;;  %v7429_v45 = vld [vmem:[%s14790_s3 + $0x7d8] sm:$0xff] }
 0x504   :  { %3418 = vmatpush.msra.mxu1 %v7387_v58  ;;  %3527 = vmatpush.msra.mxu2 %v7439_v3  ;;  %v7324_v58 = vld [vmem:[%s14790_s3 + $0x4c0] sm:$0xff]  ;;  %v7400_v3 = vld [vmem:[%s14790_s3 + $0x6f0] sm:$0xff] }
 0x505   :  { %3311 = vmatmul.f32.vlgmr.msrb.gmra.mxu1 %v10880_v29  ;;  %7388 = vmatmul.msk.f32.vlgmr.msra.gmra.mxu3 %vm495_vm5, %v10848_v49 }
 0x506   :  { %3388 = vmatpush.msrb.mxu3 %v7360_v6  ;;  %3558 = vmatpush.msra.mxu0 %v7463_v7  ;;  %v7425_v6 = vld [vmem:[%s14790_s3 + $0x7b8] sm:$0xff]  ;;  %v7426_v7 = vld [vmem:[%s14790_s3 + $0x7c0] sm:$0xff] }
 0x507   :  { %3357 = vmatmul.f32.vlgmr.msrb.gmra.mxu0 %v10880_v29  ;;  %7390 = vmatmul.msk.f32.vlgmr.msrb.gmra.mxu2 %vm495_vm5, %v10848_v49 }
 0x508   :  { %3419 = vmatpush.msra.mxu1 %v7384_v16  ;;  %3528 = vmatpush.msra.mxu2 %v7436_v42  ;;  %v7321_v16 = vld [vmem:[%s14790_s3 + $0x4a8] sm:$0xff]  ;;  %v11620_v42 = vpop.permute.xlu2 %3517 }
 0x509   :  { %3389 = vmatpush.msrb.mxu3 %v7357_v9  ;;  %3559 = vmatpush.msra.mxu0 %v7460_v44  ;;  %v7422_v9 = vld [vmem:[%s14790_s3 + $0x7a0] sm:$0xff]  ;;  %v7397_v44 = vld [vmem:[%s14790_s3 + $0x6d8] sm:$0xff] }
 0x50a   :  { %3420 = vmatpush.msra.mxu1 %v7381_v46  ;;  %3529 = vmatpush.msra.mxu2 %v7433_v8  ;;  %v7423_v46 = vld [vmem:[%s14790_s3 + $0x7a8] sm:$0xff] }
 0x50b   :  { %3390 = vmatpush.msrb.mxu3 %v7354_v19  ;;  %3560 = vmatpush.msra.mxu0 %v7457_v53  ;;  %v7419_v8 = vld [vmem:[%s14790_s3 + $0x788] sm:$0xff]  ;;  %v7394_v19 = vld [vmem:[%s14790_s3 + $0x6c0] sm:$0xff]  ;;  %v7420_v53 = vld [vmem:[%s14790_s3 + $0x790] sm:$0xff] }
 0x50c   :  { %3421 = vmatpush.msra.mxu1 %v7378_v63  ;;  %3530 = vmatpush.msra.mxu2 %v7430_v62  ;;  %v7416_v63 = vld [vmem:[%s14790_s3 + $0x770] sm:$0xff] }
 0x50d   :  { %3391 = vmatpush.msrb.mxu3 %v7351_v52  ;;  %3561 = vmatpush.msra.mxu0 %v7454_v51  ;;  %v7464_v62 = vld [vmem:[%s14790_s3 + $0x8f0] sm:$0xff]  ;;  %v7417_v52 = vld [vmem:[%s14790_s3 + $0x778] sm:$0xff]  ;;  %v11660_v51 = vsel %vm490_vm6, %v11558_v31, %v11566_v2  ;;  %v7446_v31 = vld [vmem:[%s14790_s3 + $0x860] sm:$0xff] }
 0x50e   :  { %3422 = vmatpush.msra.mxu1 %v7375_v33  ;;  %3531 = vmatpush.msra.mxu2 %v7427_v13  ;;  %v7465_v33 = vld [vmem:[%s14790_s3 + $0x8f8] sm:$0xff] }
 0x50f   :  { %3314 = vmatmul.f32.gmra.mxu1 %v10858_v30  ;;  %7389 = vmatmul.msk.f32.gmra.mxu3 %vm495_vm5, %v10835_v0  ;;  %v7461_v13 = vld [vmem:[%s14790_s3 + $0x8d8] sm:$0xff] }
 0x510   :  { %3392 = vmatpush.msrb.mxu3 %v7348_v4  ;;  %3562 = vmatpush.msra.mxu0 %v7451_v21  ;;  %v7414_v4 = vld [vmem:[%s14790_s3 + $0x760] sm:$0xff] }
 0x511   :  { %3360 = vmatmul.f32.gmra.mxu0 %v10858_v30  ;;  %7391 = vmatmul.msk.f32.gmra.mxu2 %vm495_vm5, %v10835_v0  ;;  %v7462_v21 = vld [vmem:[%s14790_s3 + $0x8e0] sm:$0xff] }
 0x512   :  { %3423 = vmatpush.msra.mxu1 %v7372_v24  ;;  %3532 = vmatpush.msra.mxu2 %v7424_v25  ;;  %v7410_v24 = vld [vmem:[%s14790_s3 + $0x740] sm:$0xff] }
 0x513   :  { %3393 = vmatpush.msrb.mxu3 %v7345_v60  ;;  %3563 = vmatpush.msra.mxu0 %v7448_v59  ;;  %v7458_v25 = vld [vmem:[%s14790_s3 + $0x8c0] sm:$0xff]  ;;  %v7411_v60 = vld [vmem:[%s14790_s3 + $0x748] sm:$0xff] }
 0x514   :  { %3424 = vmatpush.msra.mxu1 %v7369_v10  ;;  %3533 = vmatpush.msra.mxu2 %v7421_v27  ;;  %v7459_v59 = vld [vmem:[%s14790_s3 + $0x8c8] sm:$0xff] }
 0x515   :  { %3394 = vmatpush.msrb.mxu3 %v7342_v32  ;;  %3564 = vmatpush.msra.mxu0 %v7445_v54  ;;  %v7407_v10 = vld [vmem:[%s14790_s3 + $0x728] sm:$0xff]  ;;  %v7408_v32 = vld [vmem:[%s14790_s3 + $0x730] sm:$0xff]  ;;  %v3516_v54 = vpop.permute.xlu1 %3515 }
 0x516   :  { %3425 = vmatpush.msra.mxu1 %v7366_v34  ;;  %3534 = vmatpush.msra.mxu2 %v7418_v47  ;;  %v7455_v27 = vld [vmem:[%s14790_s3 + $0x8a8] sm:$0xff]  ;;  %v7456_v34 = vld [vmem:[%s14790_s3 + $0x8b0] sm:$0xff] }
 0x517   :  { %3395 = vmatpush.msrb.mxu3 %v7339_v12  ;;  %3565 = vmatpush.msra.mxu0 %v7442_v35  ;;  %v7404_v47 = vld [vmem:[%s14790_s3 + $0x710] sm:$0xff]  ;;  %v7405_v35 = vld [vmem:[%s14790_s3 + $0x718] sm:$0xff] }
 0x518   :  { %3573 = vmatpush.msrb.mxu1 %v7440_v38  ;;  %3535 = vmatpush.msra.mxu2 %v7415_v40  ;;  %v7452_v12 = vld [vmem:[%s14790_s3 + $0x890] sm:$0xff]  ;;  %v3520_v38 = vsel %vm490_vm6, %v3516_v54, %v11620_v42  ;;  %v7453_v40 = vld [vmem:[%s14790_s3 + $0x898] sm:$0xff] }
 0x519   :  { %3619 = vmatpush.msrb.mxu0 %v7441_v11  ;;  %3396 = vmatpush.msrb.mxu3 %v7336_v37  ;;  %v7401_v11 = vld [vmem:[%s14790_s3 + $0x6f8] sm:$0xff] }
 0x51a   :  { %7392 = vmatmul.msk.f32.vlgmr.msra.gmra.mxu1 %vm495_vm5, %v10848_v49  ;;  %3536 = vmatpush.msra.mxu2 %v7412_v20  ;;  %v7330_v49 = vld [vmem:[%s14790_s3 + $0x4f0] sm:$0xff]  ;;  %v7449_v37 = vld [vmem:[%s14790_s3 + $0x878] sm:$0xff]  ;;  %v7450_v20 = vld [vmem:[%s14790_s3 + $0x880] sm:$0xff] }
 0x51b   :  { %3574 = vmatpush.msrb.mxu1 %v7437_v18  ;;  %7466 = vmatmul.msk.f32.vlgmr.msra.gmra.mxu0 %vm495_vm5, %v11566_v2  ;;  %v7398_v18 = vld [vmem:[%s14790_s3 + $0x6e0] sm:$0xff] }
 0x51c   :  { %3620 = vmatpush.msrb.mxu0 %v7438_v15  ;;  %3397 = vmatpush.msrb.mxu3 %v7333_v55  ;;  %v7399_v15 = vld [vmem:[%s14790_s3 + $0x6e8] sm:$0xff] }
 0x51d   :  { %3575 = vmatpush.msrb.mxu1 %v7434_v41  ;;  %3537 = vmatpush.msra.mxu2 %v7409_v1  ;;  %v7447_v55 = vld [vmem:[%s14790_s3 + $0x868] sm:$0xff] }
 0x51e   :  { %3621 = vmatpush.msrb.mxu0 %v7435_v17  ;;  %3398 = vmatpush.msrb.mxu3 %v7330_v49  ;;  %v7395_v41 = vld [vmem:[%s14790_s3 + $0x6c8] sm:$0xff]  ;;  %v7396_v17 = vld [vmem:[%s14790_s3 + $0x6d0] sm:$0xff] }
 0x51f   :  { %3576 = vmatpush.msrb.mxu1 %v7431_v5  ;;  %3538 = vmatpush.msra.mxu2 %v7406_v22  ;;  %v7443_v1 = vld [vmem:[%s14790_s3 + $0x848] sm:$0xff]  ;;  %v7444_v49 = vld [vmem:[%s14790_s3 + $0x850] sm:$0xff]  ;;  %v7477_v22 = vld [vmem:[%s14788_s1 + $0x38] sm:$0x1f] }
 0x520   :  { %3622 = vmatpush.msrb.mxu0 %v7432_v26  ;;  %3399 = vmatpush.msrb.mxu3 %v7327_v61  ;;  %v7476_v5 = vld [vmem:[%s14788_s1 + $0x30] sm:$0x1f]  ;;  %v7474_v61 = vld [vmem:[%s14788_s1 + $0x20] sm:$0xff] }
 0x521   :  { %3577 = vmatpush.msrb.mxu1 %v7428_v48  ;;  %3539 = vmatpush.msra.mxu2 %v7403_v39  ;;  %v3689_v26 = vld [vmem:[%s14788_s1 + $0x10] sm:$0x1f]  ;;  %v7475_v39 = vld [vmem:[%s14788_s1 + $0x28] sm:$0xff] }
 0x522   :  { %3623 = vmatpush.msrb.mxu0 %v7429_v45  ;;  %3400 = vmatpush.msrb.mxu3 %v7324_v58  ;;  %v7494_v48 = vld [vmem:[%s14788_s1 + $0x50] sm:$0x1f]  ;;  %v3687_v45 = vld [vmem:[%s14788_s1] sm:$0xff] }
 0x523   :  { %7393 = vmatmul.msk.f32.gmra.mxu1 %vm495_vm5, %v10835_v0  ;;  %3540 = vmatpush.msra.mxu2 %v7400_v3  ;;  %v7318_v0 = vld [vmem:[%s14790_s3 + $0x490] sm:$0xff]  ;;  %v7492_v58 = vld [vmem:[%s14788_s1 + $0x40] sm:$0xff] }
 0x524   :  { %3578 = vmatpush.msrb.mxu1 %v7425_v6  ;;  %7467 = vmatmul.msk.f32.gmra.mxu0 %vm495_vm5, %v11620_v42  ;;  %v7504_v3 = vld [vmem:[%s14788_s1 + $0x70] sm:$0x1f]  ;;  %v7495_v6 = vld [vmem:[%s14788_s1 + $0x58] sm:$0x1f] }
 0x525   :  { %3624 = vmatpush.msrb.mxu0 %v7426_v7  ;;  %3401 = vmatpush.msrb.mxu3 %v7321_v16  ;;  %v3688_v7 = vld [vmem:[%s14788_s1 + $0x8] sm:$0xff] }
 0x526   :  { %3579 = vmatpush.msrb.mxu1 %v7422_v9  ;;  %3541 = vmatpush.msra.mxu2 %v7397_v44  ;;  %v7493_v16 = vld [vmem:[%s14788_s1 + $0x48] sm:$0xff]  ;;  %v7502_v9 = vld [vmem:[%s14788_s1 + $0x60] sm:$0xff]  ;;  %v3698_v44 = vpop.permute.xlu0 %3697 }
 0x527   :  { %3625 = vmatpush.msrb.mxu0 %v7423_v46  ;;  %3402 = vmatpush.msrb.mxu3 %v7318_v0  ;;  %v7505_v46 = vld [vmem:[%s14788_s1 + $0x78] sm:$0x1f]  ;;  %v7503_v0 = vld [vmem:[%s14788_s1 + $0x68] sm:$0xff] }
 0x528   :  { %3580 = vmatpush.msrb.mxu1 %v7419_v8  ;;  %3403 = vmatmul.f32.vlgmr.msrb.gmra.mxu3 %v10880_v29  ;;  %v7413_v29 = vld [vmem:[%s14790_s3 + $0x758] sm:$0xff]  ;;  %v3700_v8 = vpop.permute.xlu1 %3699 }
 0x529   :  { %3542 = vmatpush.msra.mxu2 %v7394_v19  ;;  %3626 = vmatpush.msrb.mxu0 %v7420_v53 }
 0x52a   :  { %3543 = vmatmul.f32.vlgmr.msra.gmra.mxu2 %v11660_v51  ;;  %3581 = vmatpush.msrb.mxu1 %v7416_v63 }
 0x52b   :  { %3604 = vmatpush.msra.mxu3 %v7464_v62  ;;  %3627 = vmatpush.msrb.mxu0 %v7417_v52 }
 0x52c   :  { %3650 = vmatpush.msrb.mxu2 %v7465_v33  ;;  %3582 = vmatpush.msrb.mxu1 %v7413_v29 }
 0x52d   :  { %3605 = vmatpush.msra.mxu3 %v7461_v13  ;;  %3628 = vmatpush.msrb.mxu0 %v7414_v4 }
 0x52e   :  { %3651 = vmatpush.msrb.mxu2 %v7462_v21  ;;  %3583 = vmatpush.msrb.mxu1 %v7410_v24 }
 0x52f   :  { %3606 = vmatpush.msra.mxu3 %v7458_v25  ;;  %3629 = vmatpush.msrb.mxu0 %v7411_v60 }
 0x530   :  { %3652 = vmatpush.msrb.mxu2 %v7459_v59  ;;  %3584 = vmatpush.msrb.mxu1 %v7407_v10 }
 0x531   :  { %3607 = vmatpush.msra.mxu3 %v7455_v27  ;;  %3630 = vmatpush.msrb.mxu0 %v7408_v32 }
 0x532   :  { %3406 = vmatmul.f32.gmra.mxu3 %v10858_v30  ;;  %3653 = vmatpush.msrb.mxu2 %v7456_v34  ;;  %v7402_v30 = vld [vmem:[%s14790_s3 + $0x700] sm:$0xff] }
 0x533   :  { %3546 = vmatmul.f32.gmra.mxu2 %v3520_v38  ;;  %3585 = vmatpush.msrb.mxu1 %v7404_v47 }
 0x534   :  { %3608 = vmatpush.msra.mxu3 %v7452_v12  ;;  %3631 = vmatpush.msrb.mxu0 %v7405_v35 }
 0x535   :  { %3654 = vmatpush.msrb.mxu2 %v7453_v40  ;;  %3586 = vmatpush.msrb.mxu1 %v7401_v11 }
 0x536   :  { %3609 = vmatpush.msra.mxu3 %v7449_v37  ;;  %3632 = vmatpush.msrb.mxu0 %v7402_v30 }
 0x537   :  { %3655 = vmatpush.msrb.mxu2 %v7450_v20  ;;  %3587 = vmatpush.msrb.mxu1 %v7398_v18 }
 0x538   :  { %3610 = vmatpush.msra.mxu3 %v7446_v31  ;;  %3633 = vmatpush.msrb.mxu0 %v7399_v15 }
 0x539   :  { %3656 = vmatpush.msrb.mxu2 %v7447_v55  ;;  %3588 = vmatpush.msrb.mxu1 %v7395_v41 }
 0x53a   :  { %3611 = vmatpush.msra.mxu3 %v7443_v1  ;;  %3589 = vmatmul.f32.vlgmr.msrb.gmra.mxu1 %v11660_v51 }
 0x53b   :  { %7468 = vmatmul.msk.f32.vlgmr.msra.gmra.mxu3 %vm495_vm5, %v11566_v2  ;;  %3634 = vmatpush.msrb.mxu0 %v7396_v17 }
 0x53c   :  { %3657 = vmatpush.msrb.mxu2 %v7444_v49  ;;  %3635 = vmatmul.f32.vlgmr.msrb.gmra.mxu0 %v11660_v51  ;;  %v3888_v51 = vpop.permute.xlu0 %3887 }
 0x53d   :  { %7470 = vmatmul.msk.f32.vlgmr.msrb.gmra.mxu2 %vm495_vm5, %v11566_v2  ;;  %7478 = vmatpush.msk.msrb.mxu3 %vm63_vm0, %v7476_v5  ;;  %v3690_v2 = vld [vmem:[%s14788_s1 + $0x18] sm:$0x1f] }
 0x53e   :  { %7481 = vmatpush.msk.msra.mxu1 %vm63_vm0, %v7477_v22  ;;  %7484 = vmatpush.msk.msra.mxu2 %vm63_vm0, %v3689_v26 }
 0x53f   :  { %3726 = vmatpush.msrb.mxu3 %v7474_v61  ;;  %7496 = vmatpush.msk.msra.mxu0 %vm63_vm0, %v7494_v48 }
 0x540   :  { %3749 = vmatpush.msra.mxu1 %v7475_v39  ;;  %3782 = vmatpush.msra.mxu2 %v3687_v45 }
 0x541   :  { %3846 = vmatpush.msra.mxu0 %v7492_v58  ;;  %7487 = vmatpush.msk.msra.mxu3 %vm63_vm0, %v3690_v2 }
 0x542   :  { %3592 = vmatmul.f32.gmra.mxu1 %v3520_v38  ;;  %7506 = vmatpush.msk.msrb.mxu2 %vm63_vm0, %v7504_v3 }
 0x543   :  { %7469 = vmatmul.msk.f32.gmra.mxu3 %vm495_vm5, %v11620_v42  ;;  %7499 = vmatpush.msk.msrb.mxu1 %vm63_vm0, %v7495_v6 }
 0x544   :  { %3638 = vmatmul.f32.gmra.mxu0 %v3520_v38  ;;  %3805 = vmatpush.msra.mxu3 %v3688_v7  ;;  %v2963_v19 = vpop.f32.mrf.mxu1 }
 0x545   :  { %7471 = vmatmul.msk.f32.gmra.mxu2 %vm495_vm5, %v11620_v42  ;;  %3869 = vmatpush.msrb.mxu1 %v7493_v16  ;;  %v8298_v42 = vld [vmem:[%s14787_s0 + $0x30] sm:$0xff]  ;;  %v2940_v63 = vpop.f32.mrf.mxu0 }
 0x546   :  { %3914 = vmatpush.msrb.mxu2 %v7502_v9  ;;  %v2964_v15 = vadd.f32 %v2963_v19, %v2940_v63 }
 0x54a   :  { %7482 = vmatmul.msk.f32.vlgmr.msra.gmra.mxu1 %vm58_vm1, %v3698_v44  ;;  %v3009_v62 = vpop.f32.mrf.mxu3 }
 0x54b   :  { %7479 = vmatmul.msk.f32.vlgmr.msrb.gmra.mxu3 %vm58_vm1, %v3698_v44 }
 0x54c   :  { %7497 = vmatmul.msk.f32.vlgmr.msra.gmra.mxu0 %vm58_vm1, %v11347_v23  ;;  %7509 = vmatpush.msk.msrb.mxu3 %vm63_vm0, %v7505_v46  ;;  %v2986_v52 = vpop.f32.mrf.mxu2 }
 0x54d   :  { %7485 = vmatmul.msk.f32.vlgmr.msra.gmra.mxu2 %vm58_vm1, %v8298_v42  ;;  %v2966_v33 = vpop.f32.mrf.mxu1  ;;  %v3010_v44 = vadd.f32 %v3009_v62, %v2986_v52 }
 0x54e   :  { %3937 = vmatpush.msrb.mxu3 %v7503_v0 }
 0x54f   :  { %v3886_v53 = vpop.permute.xlu2 %3885  ;;  %v2943_v29 = vpop.f32.mrf.mxu0 }
 0x550   :  { %v2967_v39 = vadd.f32 %v2966_v33, %v2943_v29 }
 0x552   :  { %7483 = vmatmul.msk.f32.gmra.mxu1 %vm58_vm1, %v3700_v8 }
 0x553   :  { %7480 = vmatmul.msk.f32.gmra.mxu3 %vm58_vm1, %v3700_v8 }
 0x554   :  { %7498 = vmatmul.msk.f32.gmra.mxu0 %vm58_vm1, %v11082_v28  ;;  %v11842_v13 = vpop.f32.mrf.mxu3 }
 0x555   :  { %7486 = vmatmul.msk.f32.gmra.mxu2 %vm58_vm1, %v11075_v57 }
 0x557   :  { %v3032_v4 = vpop.f32.mrf.mxu1 }
 0x55a   :  { %7500 = vmatmul.msk.f32.vlgmr.msrb.gmra.mxu1 %vm58_vm1, %v11347_v23  ;;  %v11844_v23 = vpop.f32.mrf.mxu2  ;;  %v3082_v21 = vpop.f32.mrf.mxu0 }
 0x55b   :  { %7488 = vmatmul.msk.f32.vlgmr.msra.gmra.mxu3 %vm58_vm1, %v8298_v42  ;;  %v3083_v55 = vadd.f32 %v3082_v21, %v2964_v15 }
 0x55d   :  { %7507 = vmatmul.msk.f32.vlgmr.msrb.gmra.mxu2 %vm58_vm1, %v3886_v53 }
 0x55e   :  { %v3055_v24 = vpop.f32.mrf.mxu3 }
 0x55f   :  { %v3056_v42 = vadd.f32 %v3055_v24, %v3032_v4 }
 0x562   :  { %7501 = vmatmul.msk.f32.gmra.mxu1 %vm58_vm1, %v11082_v28  ;;  %v3105_v25 = vpop.f32.mrf.mxu2  ;;  %v3035_v28 = vpop.f32.mrf.mxu1 }
 0x563   :  { %7489 = vmatmul.msk.f32.gmra.mxu3 %vm58_vm1, %v11075_v57  ;;  %v3106_v49 = vadd.f32 %v3105_v25, %v3083_v55 }
 0x564   :  { %v3085_v60 = vpop.f32.mrf.mxu0 }
 0x565   :  { %7508 = vmatmul.msk.f32.gmra.mxu2 %vm58_vm1, %v3888_v51  ;;  %v3086_v58 = vadd.f32 %v3085_v60, %v2967_v39 }
 0x568   :  { %v3058_v59 = vpop.f32.mrf.mxu3 }
 0x56a   :  { %v3108_v57 = vpop.f32.mrf.mxu2 }
 0x56b   :  { %7510 = vmatmul.msk.f32.vlgmr.msrb.gmra.mxu3 %vm58_vm1, %v3886_v53  ;;  %v3109_v6 = vadd.f32 %v3108_v57, %v3086_v58  ;;  %v3013_v57 = vadd.f32 %v11842_v13, %v11844_v23 }
 0x56c   :  { %v3151_v10 = vpop.f32.mrf.mxu1 }
 0x56f   :  { %v3197_v27 = vpop.f32.mrf.mxu0 }
 0x573   :  { %7511 = vmatmul.msk.f32.gmra.mxu3 %vm58_vm1, %v3888_v51  ;;  %v3128_v32 = vpop.f32.mrf.mxu3 }
 0x574   :  { %v3174_v54 = vpop.f32.mrf.mxu2  ;;  %v3129_v8 = vadd.f32 %v3128_v32, %v3010_v44 }
 0x575   :  { %v3175_v53 = vadd.f32 %v3174_v54, %v3056_v42 }
 0x576   :  { %v3152_v29 = vadd.f32 %v3151_v10, %v3129_v8 }
 0x577   :  { %v3154_v34 = vpop.f32.mrf.mxu1 }
 0x579   :  { %v11848_v47 = vpop.f32.mrf.mxu0 }
 0x57d   :  { %v3131_v12 = vpop.f32.mrf.mxu3 }
 0x57e   :  { %v3132_v24 = vadd.f32 %v3131_v12, %v3013_v57 }
 0x57f   :  { %v3177_v35 = vpop.f32.mrf.mxu2 }
 0x580   :  { %v3155_v15 = vadd.f32 %v3154_v34, %v3132_v24  ;;  %v7548_v24 = vld [vmem:[%s14790_s3 + $0x360] sm:$0xff] }
 0x582   :  { %v3312_v38 = vpop.f32.mrf.mxu1 }
 0x584   :  { %v3358_v40 = vpop.f32.mrf.mxu0 }
 0x588   :  { %v3335_v11 = vpop.f32.mrf.mxu3 }
 0x589   :  { %v3336_v41 = vadd.f32 %v3335_v11, %v3312_v38  ;;  %v3198_v38 = vadd.f32 %v3197_v27, %v3175_v53  ;;  %v3059_v11 = vadd.f32 %v3058_v59, %v3035_v28 }
 0x58a   :  { %v3381_v37 = vpop.f32.mrf.mxu2 }
 0x58b   :  { %v3433_v26 = vadd.f32 %v3336_v41, %v3106_v49  ;;  %v3382_v63 = vadd.f32 %v3381_v37, %v3358_v40  ;;  %v3178_v37 = vadd.f32 %v3177_v35, %v3059_v11 }
 0x58c   :  { %v3315_v30 = vpop.f32.mrf.mxu1 }
 0x58d   :  { %v3434_v62 = vadd.f32 %v3382_v63, %v3152_v29  ;;  %v3201_v27 = vadd.f32 %v11848_v47, %v3178_v37  ;;  %v7581_v37 = vld [vmem:[%s14790_s3 + $0x468] sm:$0xff] }
 0x58e   :  { %v3361_v20 = vpop.f32.mrf.mxu0  ;;  %4161 = vmatpush.msra.mxu1 %v7581_v37  ;;  %v7512_v37 = vld [vmem:[%s14790_s3 + $0x240] sm:$0xff] }
 0x592   :  { %v3338_v18 = vpop.f32.mrf.mxu3 }
 0x593   :  { %v3339_v2 = vadd.f32 %v3338_v18, %v3315_v30 }
 0x594   :  { %v3384_v31 = vpop.f32.mrf.mxu2 }
 0x595   :  { %v3436_v46 = vadd.f32 %v3339_v2, %v3109_v6  ;;  %v3385_v30 = vadd.f32 %v3384_v31, %v3361_v20 }
 0x597   :  { %v3427_v1 = vpop.f32.mrf.mxu1  ;;  %v3437_v28 = vadd.f32 %v3385_v30, %v3155_v15  ;;  %v7582_v15 = vld [vmem:[%s14790_s3 + $0x470] sm:$0xff] }
 0x598   :  { %v3567_v5 = vpop.f32.mrf.mxu0  ;;  %4207 = vmatpush.msra.mxu3 %v7582_v15  ;;  %v4035_v15 = vld [vmem:[%s14790_s3 + $0x228] sm:$0xff] }
 0x5a0   :  { %v3430_v3 = vpop.f32.mrf.mxu1 }
 0x5a1   :  { %v3570_v16 = vpop.f32.mrf.mxu0 }
 0x5ab   :  { %v3404_v17 = vpop.f32.mrf.mxu3 }
 0x5ac   :  { %v3428_v21 = vadd.f32 %v3427_v1, %v3404_v17 }
 0x5ad   :  { %v3544_v22 = vpop.f32.mrf.mxu2 }
 0x5ae   :  { %v3568_v61 = vadd.f32 %v3567_v5, %v3544_v22  ;;  %v3435_v32 = vadd.f32 %v3428_v21, %v3198_v38  ;;  %v7557_v21 = vld [vmem:[%s14790_s3 + $0x3a8] sm:$0xff] }
 0x5af   :  { %4130 = vmatpush.msrb.mxu0 %v7557_v21 }
 0x5b0   :  { %v3665_v48 = vadd.f32 %v3568_v61, %v3433_v26 }
 0x5b2   :  { %v3671_v45 = vadd.f32 %v3665_v48, %v9597_v43 }
 0x5b4   :  { %3678 = vst [vmem:[#allocation3 + $0x60] sm:$0xff] %v3671_v45 }
 0x5b5   :  { %v3407_v7 = vpop.f32.mrf.mxu3 }
 0x5b6   :  { %v3547_v9 = vpop.f32.mrf.mxu2  ;;  %v3431_v55 = vadd.f32 %v3430_v3, %v3407_v7 }
 0x5b7   :  { %v3571_v0 = vadd.f32 %v3570_v16, %v3547_v9  ;;  %v3590_v33 = vpop.f32.mrf.mxu1 }
 0x5b8   :  { %v3438_v17 = vadd.f32 %v3431_v55, %v3201_v27  ;;  %v7575_v55 = vld [vmem:[%s14790_s3 + $0x438] sm:$0xff] }
 0x5b9   :  { %v3668_v19 = vadd.f32 %v3571_v0, %v3436_v46  ;;  %v3636_v25 = vpop.f32.mrf.mxu0 }
 0x5bb   :  { %v3674_v51 = vadd.f32 %v3668_v19, %v9597_v43 }
 0x5bd   :  { %3681 = vst [vmem:[#allocation3 + $0x78] sm:$0xf] %v3674_v51 }
 0x5be   :  { %v3613_v60 = vpop.f32.mrf.mxu3 }
 0x5bf   :  { %v3614_v52 = vadd.f32 %v3613_v60, %v3590_v33  ;;  %v3593_v13 = vpop.f32.mrf.mxu1  ;;  %v7558_v60 = vld [vmem:[%s14790_s3 + $0x3b0] sm:$0xff] }
 0x5c0   :  { %v3659_v4 = vpop.f32.mrf.mxu2  ;;  %4176 = vmatpush.msra.mxu2 %v7558_v60 }
 0x5c1   :  { %v3666_v54 = vadd.f32 %v3614_v52, %v3434_v62  ;;  %v3660_v40 = vadd.f32 %v3659_v4, %v3636_v25  ;;  %v3639_v12 = vpop.f32.mrf.mxu0  ;;  %v7554_v25 = vld [vmem:[%s14790_s3 + $0x390] sm:$0xff]  ;;  %v7551_v62 = vld [vmem:[%s14790_s3 + $0x378] sm:$0xff]  ;;  %v7552_v52 = vld [vmem:[%s14790_s3 + $0x380] sm:$0xff] }
 0x5c2   :  { %4131 = vmatpush.msrb.mxu0 %v7554_v25 }
 0x5c3   :  { %v3672_v10 = vadd.f32 %v3666_v54, %v9600_v56  ;;  %v3667_v18 = vadd.f32 %v3660_v40, %v3435_v32  ;;  %v7549_v32 = vld [vmem:[%s14790_s3 + $0x368] sm:$0xff] }
 0x5c4   :  { %4132 = vmatpush.msrb.mxu0 %v7551_v62  ;;  %v7545_v40 = vld [vmem:[%s14790_s3 + $0x348] sm:$0xff]  ;;  %v7518_v62 = vld [vmem:[%s14790_s3 + $0x270] sm:$0xff] }
 0x5c5   :  { %3679 = vst [vmem:[#allocation3 + $0x68] sm:$0xff] %v3672_v10  ;;  %v3673_v41 = vadd.f32 %v3667_v18, %v9610_v14  ;;  %v7546_v10 = vld [vmem:[%s14790_s3 + $0x350] sm:$0xff] }
 0x5c6   :  { %v3616_v23 = vpop.f32.mrf.mxu3  ;;  %v7578_v18 = vld [vmem:[%s14790_s3 + $0x450] sm:$0xff]  ;;  %4133 = vmatpush.msrb.mxu0 %v7548_v24  ;;  %v7515_v24 = vld [vmem:[%s14790_s3 + $0x258] sm:$0xff] }
 0x5c7   :  { %3680 = vst [vmem:[#allocation3 + $0x70] sm:$0xff] %v3673_v41  ;;  %v3617_v59 = vadd.f32 %v3616_v23, %v3593_v13  ;;  %v3751_v47 = vpop.f32.mrf.mxu1  ;;  %v7542_v13 = vld [vmem:[%s14790_s3 + $0x330] sm:$0xff]  ;;  %v7543_v23 = vld [vmem:[%s14790_s3 + $0x338] sm:$0xff]  ;;  %4162 = vmatpush.msra.mxu1 %v7578_v18  ;;  %v7513_v18 = vld [vmem:[%s14790_s3 + $0x248] sm:$0xff] }
 0x5c8   :  { %v3662_v1 = vpop.f32.mrf.mxu2  ;;  %4134 = vmatpush.msrb.mxu0 %v7545_v40  ;;  %v7553_v40 = vld [vmem:[%s14790_s3 + $0x388] sm:$0xff] }
 0x5c9   :  { %v3669_v35 = vadd.f32 %v3617_v59, %v3437_v28  ;;  %v3663_v20 = vadd.f32 %v3662_v1, %v3639_v12  ;;  %v3848_v39 = vpop.f32.mrf.mxu0  ;;  %v7579_v59 = vld [vmem:[%s14790_s3 + $0x458] sm:$0xff]  ;;  %v7572_v12 = vld [vmem:[%s14790_s3 + $0x420] sm:$0xff]  ;;  %4163 = vmatpush.msra.mxu1 %v7575_v55  ;;  %v4008_v55 = vld [vmem:[%s14790_s3 + $0x150] sm:$0xff] }
 0x5ca   :  { %4135 = vmatpush.msrb.mxu0 %v7542_v13  ;;  %4208 = vmatpush.msra.mxu3 %v7579_v59  ;;  %v4005_v13 = vld [vmem:[%s14790_s3 + $0x138] sm:$0xff]  ;;  %v4002_v59 = vld [vmem:[%s14790_s3 + $0x120] sm:$0xff] }
 0x5cb   :  { %v3675_v31 = vadd.f32 %v3669_v35, %v9600_v56  ;;  %v3670_v49 = vadd.f32 %v3663_v20, %v3438_v17  ;;  %v7539_v17 = vld [vmem:[%s14790_s3 + $0x318] sm:$0xff]  ;;  %v7540_v35 = vld [vmem:[%s14790_s3 + $0x320] sm:$0xff]  ;;  %4164 = vmatpush.msra.mxu1 %v7572_v12 }
 0x5cc   :  { %v7576_v20 = vld [vmem:[%s14790_s3 + $0x440] sm:$0xff]  ;;  %4136 = vmatpush.msrb.mxu0 %v7539_v17  ;;  %v4029_v12 = vld [vmem:[%s14790_s3 + $0x1f8] sm:$0xff]  ;;  %v7574_v17 = vld [vmem:[%s14790_s3 + $0x430] sm:$0xff] }
 0x5cd   :  { %3682 = vst [vmem:[#allocation3 + $0x80] sm:$0xf] %v3675_v31  ;;  %v3676_v5 = vadd.f32 %v3670_v49, %v9610_v14  ;;  %v7569_v31 = vld [vmem:[%s14790_s3 + $0x408] sm:$0xff]  ;;  %4209 = vmatpush.msra.mxu3 %v7576_v20  ;;  %v4026_v20 = vld [vmem:[%s14790_s3 + $0x1e0] sm:$0xff] }
 0x5ce   :  { %v4951_v34 = vld [vmem:[#allocation3 + $0x61] ss:$8 sm:$0x7]  ;;  %v3728_v22 = vpop.f32.mrf.mxu3  ;;  %4165 = vmatpush.msra.mxu1 %v7569_v31  ;;  %v7544_v31 = vld [vmem:[%s14790_s3 + $0x340] sm:$0xff] }
 0x5cf   :  { %5011 = vst [vmem:[#allocation1 + $0x2] ss:$9 sm:$0xff] %v4951_v34  ;;  %v3754_v3 = vpop.f32.mrf.mxu1  ;;  %v7536_v34 = vld [vmem:[%s14790_s3 + $0x300] sm:$0xff] }
 0x5d0   :  { %v3784_v26 = vpop.f32.mrf.mxu2  ;;  %3683 = vst [vmem:[#allocation3 + $0x88] sm:$0xf] %v3676_v5  ;;  %v7537_v5 = vld [vmem:[%s14790_s3 + $0x308] sm:$0xff]  ;;  %4137 = vmatpush.msrb.mxu0 %v7536_v34  ;;  %v3996_v34 = vld [vmem:[%s14790_s3 + $0xf0] sm:$0xff] }
 0x5d1   :  { %v3785_v45 = vadd.f32 %v3784_v26, %v3728_v22  ;;  %v3851_v44 = vpop.f32.mrf.mxu0  ;;  %v7573_v22 = vld [vmem:[%s14790_s3 + $0x428] sm:$0xff] }
 0x5d2   :  { %4210 = vmatpush.msra.mxu3 %v7573_v22  ;;  %v7541_v22 = vld [vmem:[%s14790_s3 + $0x328] sm:$0xff] }
 0x5d3   :  { %v3877_v2 = vadd.f32 %v3848_v39, %v3785_v45  ;;  %v7570_v39 = vld [vmem:[%s14790_s3 + $0x410] sm:$0xff] }
 0x5d4   :  { %4211 = vmatpush.msra.mxu3 %v7570_v39  ;;  %v7565_v39 = vld [vmem:[%s14790_s3 + $0x3e8] sm:$0xff] }
 0x5d6   :  { %v3731_v61 = vpop.f32.mrf.mxu3 }
 0x5d7   :  { %v3871_v8 = vpop.f32.mrf.mxu1 }
 0x5d8   :  { %v3787_v48 = vpop.f32.mrf.mxu2 }
 0x5d9   :  { %v3788_v16 = vadd.f32 %v3787_v48, %v3731_v61  ;;  %v7566_v48 = vld [vmem:[%s14790_s3 + $0x3f0] sm:$0xff] }
 0x5da   :  { %4166 = vmatpush.msra.mxu1 %v7566_v48  ;;  %v7538_v48 = vld [vmem:[%s14790_s3 + $0x310] sm:$0xff] }
 0x5db   :  { %v3879_v42 = vadd.f32 %v3851_v44, %v3788_v16  ;;  %v7527_v16 = vld [vmem:[%s14790_s3 + $0x2b8] sm:$0xff] }
 0x5de   :  { %v3807_v58 = vpop.f32.mrf.mxu3 }
 0x5df   :  { %v3808_v53 = vadd.f32 %v3807_v58, %v3751_v47  ;;  %v3874_v54 = vpop.f32.mrf.mxu1  ;;  %v7534_v47 = vld [vmem:[%s14790_s3 + $0x2f0] sm:$0xff] }
 0x5e0   :  { %v3916_v6 = vpop.f32.mrf.mxu2  ;;  %v7530_v58 = vld [vmem:[%s14790_s3 + $0x2d0] sm:$0xff] }
 0x5e1   :  { %v3945_v7 = vadd.f32 %v3916_v6, %v3877_v2  ;;  %v3878_v33 = vadd.f32 %v3871_v8, %v3808_v53  ;;  %v7531_v2 = vld [vmem:[%s14790_s3 + $0x2d8] sm:$0xff]  ;;  %v7524_v8 = vld [vmem:[%s14790_s3 + $0x2a0] sm:$0xff] }
 0x5e2   :  { %v7567_v6 = vld [vmem:[%s14790_s3 + $0x3f8] sm:$0xff] }
 0x5e3   :  { %v3949_v9 = vadd.f32 %v3945_v7, %v8480_v36  ;;  %4212 = vmatpush.msra.mxu3 %v7567_v6  ;;  %v3987_v6 = vld [vmem:[%s14790_s3 + $0xa8] sm:$0xff] }
 0x5e5   :  { %v11860_v46 = vmax.f32 %v3949_v9, 0.0  ;;  %v7528_v9 = vld [vmem:[%s14790_s3 + $0x2c0] sm:$0xff] }
 0x5e6   :  { %v3810_v0 = vpop.f32.mrf.mxu3 }
 0x5e7   :  { %3958 = vst [vmem:[#allocation2 + $0x60] sm:$0xff] %v11860_v46  ;;  %4114 = vrot.lane.b32.xlu1 %v11860_v46, %s8326_s2  ;;  %v3811_v11 = vadd.f32 %v3810_v0, %v3754_v3  ;;  %v7563_v3 = vld [vmem:[%s14790_s3 + $0x3d8] sm:$0xff]  ;;  %v7560_v0 = vld [vmem:[%s14790_s3 + $0x3c0] sm:$0xff] }
 0x5e8   :  { %v3919_v19 = vpop.f32.mrf.mxu2  ;;  %4167 = vmatpush.msra.mxu1 %v7563_v3  ;;  %v7562_v3 = vld [vmem:[%s14790_s3 + $0x3d0] sm:$0xff] }
 0x5e9   :  { %v3947_v63 = vadd.f32 %v3919_v19, %v3879_v42  ;;  %v3880_v41 = vadd.f32 %v3874_v54, %v3811_v11  ;;  %v7564_v42 = vld [vmem:[%s14790_s3 + $0x3e0] sm:$0xff]  ;;  %v7525_v19 = vld [vmem:[%s14790_s3 + $0x2a8] sm:$0xff] }
 0x5ea   :  { %4168 = vmatpush.msra.mxu1 %v7560_v0  ;;  %4213 = vmatpush.msra.mxu3 %v7564_v42  ;;  %v7556_v11 = vld [vmem:[%s14790_s3 + $0x3a0] sm:$0xff]  ;;  %v7529_v0 = vld [vmem:[%s14790_s3 + $0x2c8] sm:$0xff]  ;;  %v3981_v42 = vld [vmem:[%s14790_s3 + $0x78] sm:$0xff] }
 0x5eb   :  { %v3951_v51 = vadd.f32 %v3947_v63, %v8480_v36  ;;  %v7555_v36 = vld [vmem:[%s14790_s3 + $0x398] sm:$0xff]  ;;  %v7516_v54 = vld [vmem:[%s14790_s3 + $0x260] sm:$0xff] }
 0x5ec   :  { %4177 = vmatpush.msra.mxu2 %v7555_v36 }
 0x5ed   :  { %v3955_v29 = vmax.f32 %v3951_v51, 0.0  ;;  %v7521_v51 = vld [vmem:[%s14790_s3 + $0x288] sm:$0xff] }
 0x5ee   :  { %v3939_v57 = vpop.f32.mrf.mxu3  ;;  %4178 = vmatpush.msra.mxu2 %v7552_v52  ;;  %v4410_v7 = vld [vmem:[#allocation2 + $0x60] sm:$0xfe]  ;;  %v7519_v52 = vld [vmem:[%s14790_s3 + $0x278] sm:$0xff] }
 0x5ef   :  { %3960 = vst [vmem:[#allocation2 + $0x70] sm:$0x1f] %v3955_v29  ;;  %v3946_v38 = vadd.f32 %v3939_v57, %v3878_v33  ;;  %v4490_v53 = vrot.slane %v4410_v7, 1  ;;  %v7522_v33 = vld [vmem:[%s14790_s3 + $0x290] sm:$0xff]  ;;  %v7559_v29 = vld [vmem:[%s14790_s3 + $0x3b8] sm:$0xff]  ;;  %v7561_v57 = vld [vmem:[%s14790_s3 + $0x3c8] sm:$0xff] }
 0x5f0   :  { %4179 = vmatpush.msra.mxu2 %v7549_v32  ;;  %4222 = vmatpush.msrb.mxu1 %v7559_v29  ;;  %v7583_v32 = vld [vmem:[%s14790_s3 + $0x478] sm:$0xff]  ;;  %v4014_v7 = vld [vmem:[%s14790_s3 + $0x180] sm:$0xff]  ;;  %v7517_v29 = vld [vmem:[%s14790_s3 + $0x268] sm:$0xff] }
 0x5f1   :  { %v3950_v4 = vadd.f32 %v3946_v38, %v8489_v50  ;;  %4214 = vmatpush.msra.mxu3 %v7561_v57  ;;  %v7514_v57 = vld [vmem:[%s14790_s3 + $0x250] sm:$0xff] }
 0x5f2   :  { %4180 = vmatpush.msra.mxu2 %v7546_v10  ;;  %4223 = vmatpush.msrb.mxu1 %v7556_v11  ;;  %v4011_v10 = vld [vmem:[%s14790_s3 + $0x168] sm:$0xff] }
 0x5f3   :  { %v3954_v30 = vmax.f32 %v3950_v4, 0.0  ;;  %4253 = vmatpush.msrb.mxu3 %v7583_v32  ;;  %v4013_v32 = vld [vmem:[%s14790_s3 + $0x178] sm:$0xff] }
 0x5f4   :  { %4181 = vmatpush.msra.mxu2 %v7543_v23  ;;  %4224 = vmatpush.msrb.mxu1 %v7553_v40  ;;  %v7550_v23 = vld [vmem:[%s14790_s3 + $0x370] sm:$0xff] }
 0x5f5   :  { %3959 = vst.msk [vmem:[#allocation2 + $0x68] sm:$0xff] %vm324_vm2, %v3954_v30  ;;  %v7580_v30 = vld [vmem:[%s14790_s3 + $0x460] sm:$0xff] }
 0x5f6   :  { %v3942_v27 = vpop.f32.mrf.mxu3  ;;  %v11916_v28 = vld [vmem:[#allocation2 + $0x70] sm:$0xf]  ;;  %4182 = vmatpush.msra.mxu2 %v7540_v35  ;;  %4254 = vmatpush.msrb.mxu3 %v7580_v30  ;;  %v3999_v35 = vld [vmem:[%s14790_s3 + $0x108] sm:$0xff] }
 0x5f7   :  { %v3948_v1 = vadd.f32 %v3942_v27, %v3880_v41  ;;  %4118 = vrot.lane.b32.xlu0 %v11916_v28, %s8326_s2  ;;  %v4412_v45 = vld [vmem:[#allocation2 + $0x70] sm:$0x1f]  ;;  %v4032_v41 = vld [vmem:[%s14790_s3 + $0x210] sm:$0xff]  ;;  %v7577_v27 = vld [vmem:[%s14790_s3 + $0x448] sm:$0xff]  ;;  %4225 = vmatpush.msrb.mxu1 %v7550_v23 }
 0x5f8   :  { %4183 = vmatpush.msra.mxu2 %v7537_v5  ;;  %v11983_v44 = vrot.slane %v4412_v45, 1  ;;  %4255 = vmatpush.msrb.mxu3 %v7577_v27  ;;  %v4023_v5 = vld [vmem:[%s14790_s3 + $0x1c8] sm:$0xff]  ;;  %v3990_v45 = vld [vmem:[%s14790_s3 + $0xc0] sm:$0xff]  ;;  %v4033_v30 = vld [vmem:[%s14790_s3 + $0x218] sm:$0xff] }
 0x5f9   :  { %v3952_v49 = vadd.f32 %v3948_v1, %v8489_v50  ;;  %v7533_v50 = vld [vmem:[%s14790_s3 + $0x2e8] sm:$0xff]  ;;  %v7547_v1 = vld [vmem:[%s14790_s3 + $0x358] sm:$0xff] }
 0x5fa   :  { %4138 = vmatpush.msrb.mxu0 %v7533_v50  ;;  %4184 = vmatpush.msra.mxu2 %v7534_v47  ;;  %v12010_v25 = vsel %vm861_vm4, %v4490_v53, %v11983_v44  ;;  %v3993_v50 = vld [vmem:[%s14790_s3 + $0xd8] sm:$0xff]  ;;  %v4020_v47 = vld [vmem:[%s14790_s3 + $0x1b0] sm:$0xff]  ;;  %v4031_v23 = vld [vmem:[%s14790_s3 + $0x208] sm:$0xff] }
 0x5fb   :  { %v3956_v26 = vmax.f32 %v3952_v49, 0.0  ;;  %4226 = vmatpush.msrb.mxu1 %v7547_v1  ;;  %4256 = vmatpush.msrb.mxu3 %v7574_v17  ;;  %v7571_v49 = vld [vmem:[%s14790_s3 + $0x418] sm:$0xff]  ;;  %v4027_v27 = vld [vmem:[%s14790_s3 + $0x1e8] sm:$0xff]  ;;  %v4028_v1 = vld [vmem:[%s14790_s3 + $0x1f0] sm:$0xff] }
 0x5fc   :  { %v11954_v61 = vld [vmem:[#allocation2 + $0x68] sm:$0xff]  ;;  %4139 = vmatpush.msrb.mxu0 %v7530_v58  ;;  %4185 = vmatpush.msra.mxu2 %v7531_v2  ;;  %v4017_v58 = vld [vmem:[%s14790_s3 + $0x198] sm:$0xff] }
 0x5fd   :  { %3961 = vst.msk [vmem:[#allocation2 + $0x78] sm:$0x1f] %vm327_vm3, %v3956_v26  ;;  %4116 = vrot.lane.b32.xlu2 %v11954_v61, %s8326_s2  ;;  %v4411_v63 = vld [vmem:[#allocation2 + $0x68] sm:$0xfe]  ;;  %v7568_v26 = vld [vmem:[%s14790_s3 + $0x400] sm:$0xff]  ;;  %4227 = vmatpush.msrb.mxu1 %v7544_v31  ;;  %v7535_v2 = vld [vmem:[%s14790_s3 + $0x2f8] sm:$0xff] }
 0x5fe   :  { %4140 = vmatpush.msrb.mxu0 %v7527_v16  ;;  %4186 = vmatpush.msra.mxu2 %v7528_v9  ;;  %v4493_v36 = vrot.slane %v4411_v63, 1  ;;  %v7532_v16 = vld [vmem:[%s14790_s3 + $0x2e0] sm:$0xff]  ;;  %v3984_v9 = vld [vmem:[%s14790_s3 + $0x90] sm:$0xff]  ;;  %v7523_v53 = vld [vmem:[%s14790_s3 + $0x298] sm:$0xff] }
 0x5ff   :  { %4257 = vmatpush.msrb.mxu3 %v7571_v49  ;;  %4228 = vmatpush.msrb.mxu1 %v7541_v22  ;;  %v3975_v63 = vld [vmem:[%s14790_s3 + $0x48] sm:$0xff]  ;;  %v4024_v17 = vld [vmem:[%s14790_s3 + $0x1d0] sm:$0xff]  ;;  %v4025_v31 = vld [vmem:[%s14790_s3 + $0x1d8] sm:$0xff] }
 0x600   :  { %4141 = vmatpush.msrb.mxu0 %v7524_v8  ;;  %4187 = vmatpush.msra.mxu2 %v7525_v19  ;;  %v7526_v8 = vld [vmem:[%s14790_s3 + $0x2b0] sm:$0xff]  ;;  %v3978_v19 = vld [vmem:[%s14790_s3 + $0x60] sm:$0xff]  ;;  %v4021_v49 = vld [vmem:[%s14790_s3 + $0x1b8] sm:$0xff] }
 0x601   :  { %4258 = vmatpush.msrb.mxu3 %v7568_v26  ;;  %4229 = vmatpush.msrb.mxu1 %v7538_v48  ;;  %v4022_v22 = vld [vmem:[%s14790_s3 + $0x1c0] sm:$0xff]  ;;  %v4019_v48 = vld [vmem:[%s14790_s3 + $0x1a8] sm:$0xff] }
 0x602   :  { %4142 = vmatpush.msrb.mxu0 %v7521_v51  ;;  %4188 = vmatpush.msra.mxu2 %v7522_v33  ;;  %v7520_v51 = vld [vmem:[%s14790_s3 + $0x280] sm:$0xff]  ;;  %v3972_v33 = vld [vmem:[%s14790_s3 + $0x30] sm:$0xff] }
 0x603   :  { %4259 = vmatpush.msrb.mxu3 %v7565_v39  ;;  %4230 = vmatpush.msrb.mxu1 %v7535_v2  ;;  %v4018_v26 = vld [vmem:[%s14790_s3 + $0x1a0] sm:$0xff]  ;;  %v4015_v39 = vld [vmem:[%s14790_s3 + $0x188] sm:$0xff]  ;;  %v4016_v2 = vld [vmem:[%s14790_s3 + $0x190] sm:$0xff] }
 0x604   :  { %v12006_v21 = vld [vmem:[#allocation2 + $0x78] sm:$0xf]  ;;  %4143 = vmatpush.msrb.mxu0 %v7518_v62  ;;  %4189 = vmatpush.msra.mxu2 %v7519_v52  ;;  %v4012_v62 = vld [vmem:[%s14790_s3 + $0x170] sm:$0xff] }
 0x605   :  { %v4413_v60 = vld [vmem:[#allocation2 + $0x78] sm:$0x1f]  ;;  %4120 = vrot.lane.b32.xlu1 %v12006_v21, %s8326_s2  ;;  %4718 = vrot.lane.b32.xlu2 %v12010_v25, %s8326_s2  ;;  %v4036_v52 = vld [vmem:[%s14790_s3 + $0x230] sm:$0xff] }
 0x606   :  { %v12019_v38 = vrot.slane %v4413_v60, 1  ;;  %4144 = vmatpush.msrb.mxu0 %v7515_v24  ;;  %4190 = vmatpush.msra.mxu2 %v7516_v54  ;;  %v3969_v60 = vld [vmem:[%s14790_s3 + $0x18] sm:$0xff] }
 0x607   :  { %4260 = vmatpush.msrb.mxu3 %v7562_v3  ;;  %4231 = vmatpush.msrb.mxu1 %v7532_v16  ;;  %v4009_v54 = vld [vmem:[%s14790_s3 + $0x158] sm:$0xff]  ;;  %v3982_v16 = vld [vmem:[%s14790_s3 + $0x80] sm:$0xff] }
 0x608   :  { %v12032_v4 = vsel %vm861_vm4, %v4493_v36, %v12019_v38  ;;  %4145 = vmatpush.msrb.mxu0 %v7512_v37  ;;  %4191 = vmatpush.msra.mxu2 %v7513_v18  ;;  %v3966_v36 = vld [vmem:[%s14790_s3] sm:$0xff]  ;;  %v4037_v37 = vld [vmem:[%s14790_s3 + $0x238] sm:$0xff] }
 0x609   :  { %4720 = vrot.lane.b32.xlu0 %v12032_v4, %s8326_s2  ;;  %4232 = vmatpush.msrb.mxu1 %v7529_v0  ;;  %v4006_v18 = vld [vmem:[%s14790_s3 + $0x140] sm:$0xff]  ;;  %v3989_v3 = vld [vmem:[%s14790_s3 + $0xb8] sm:$0xff]  ;;  %v3979_v0 = vld [vmem:[%s14790_s3 + $0x68] sm:$0xff] }
 0x60a   :  { %4272 = vmatpush.msra.mxu0 %v4011_v10  ;;  %4303 = vmatpush.msrb.mxu2 %v4035_v15  ;;  %v4010_v10 = vld [vmem:[%s14790_s3 + $0x160] sm:$0xff] }
 0x60b   :  { %4233 = vmatpush.msrb.mxu1 %v7526_v8  ;;  %v4034_v15 = vld [vmem:[%s14790_s3 + $0x220] sm:$0xff]  ;;  %v3976_v8 = vld [vmem:[%s14790_s3 + $0x50] sm:$0xff] }
 0x60c   :  { %4273 = vmatpush.msra.mxu0 %v4008_v55  ;;  %4304 = vmatpush.msrb.mxu2 %v4032_v41  ;;  %v4030_v55 = vld [vmem:[%s14790_s3 + $0x200] sm:$0xff]  ;;  %v4007_v41 = vld [vmem:[%s14790_s3 + $0x148] sm:$0xff] }
 0x60d   :  { %4722 = vrot.lane.b32.xlu1 %v11983_v44, %s8326_s2  ;;  %4724 = vrot.lane.b32.xlu2 %v12019_v38, %s8326_s2  ;;  %s6627_s2 = sshll.u32 %s14798_s11, 4  ;;  %s6628_s2 = int_to_ptr.hbm [resolvable:$true] %s6627_s2 }
 0x60e   :  { %4274 = vmatpush.msra.mxu0 %v4005_v13  ;;  %4305 = vmatpush.msrb.mxu2 %v4029_v12  ;;  %v4003_v13 = vld [vmem:[%s14790_s3 + $0x128] sm:$0xff]  ;;  %v4000_v12 = vld [vmem:[%s14790_s3 + $0x110] sm:$0xff] }
 0x60f   :  { %4234 = vmatpush.msrb.mxu1 %v7523_v53  ;;  %v3973_v53 = vld [vmem:[%s14790_s3 + $0x38] sm:$0xff] }
 0x610   :  { %4275 = vmatpush.msra.mxu0 %v4002_v59  ;;  %4306 = vmatpush.msrb.mxu2 %v4026_v20  ;;  %v4004_v59 = vld [vmem:[%s14790_s3 + $0x130] sm:$0xff]  ;;  %v3997_v20 = vld [vmem:[%s14790_s3 + $0xf8] sm:$0xff] }
 0x611   :  { %4235 = vmatpush.msrb.mxu1 %v7520_v51  ;;  %v3970_v51 = vld [vmem:[%s14790_s3 + $0x20] sm:$0xff] }
 0x612   :  { %4276 = vmatpush.msra.mxu0 %v3999_v35  ;;  %4307 = vmatpush.msrb.mxu2 %v4023_v5  ;;  %v4001_v35 = vld [vmem:[%s14790_s3 + $0x118] sm:$0xff]  ;;  %v3994_v5 = vld [vmem:[%s14790_s3 + $0xe0] sm:$0xff] }
 0x613   :  { %4236 = vmatpush.msrb.mxu1 %v7517_v29 }
 0x614   :  { %4277 = vmatpush.msra.mxu0 %v3996_v34  ;;  %4308 = vmatpush.msrb.mxu2 %v4020_v47  ;;  %v3998_v34 = vld [vmem:[%s14790_s3 + $0x100] sm:$0xff]  ;;  %v3991_v47 = vld [vmem:[%s14790_s3 + $0xc8] sm:$0xff] }
 0x615   :  { %4237 = vmatpush.msrb.mxu1 %v7514_v57  ;;  %v3967_v57 = vld [vmem:[%s14790_s3 + $0x8] sm:$0xff] }
 0x616   :  { %4278 = vmatpush.msra.mxu0 %v3993_v50  ;;  %4309 = vmatpush.msrb.mxu2 %v4017_v58  ;;  %v3995_v50 = vld [vmem:[%s14790_s3 + $0xe8] sm:$0xff]  ;;  %v3988_v58 = vld [vmem:[%s14790_s3 + $0xb0] sm:$0xff] }
 0x618   :  { %4279 = vmatpush.msra.mxu0 %v3990_v45  ;;  %4310 = vmatpush.msrb.mxu2 %v4014_v7  ;;  %v3992_v45 = vld [vmem:[%s14790_s3 + $0xd0] sm:$0xff]  ;;  %v3986_v7 = vld [vmem:[%s14790_s3 + $0xa0] sm:$0xff] }
 0x61a   :  { %4280 = vmatpush.msra.mxu0 %v3987_v6  ;;  %v3985_v6 = vld [vmem:[%s14790_s3 + $0x98] sm:$0xff] }
 0x61c   :  { %4281 = vmatpush.msra.mxu0 %v3984_v9  ;;  %v3983_v9 = vld [vmem:[%s14790_s3 + $0x88] sm:$0xff] }
 0x61e   :  { %4282 = vmatpush.msra.mxu0 %v3981_v42  ;;  %v3980_v42 = vld [vmem:[%s14790_s3 + $0x70] sm:$0xff] }
 0x620   :  { %4283 = vmatpush.msra.mxu0 %v3978_v19  ;;  %v3977_v19 = vld [vmem:[%s14790_s3 + $0x58] sm:$0xff] }
 0x622   :  { %4284 = vmatpush.msra.mxu0 %v3975_v63  ;;  %v3974_v63 = vld [vmem:[%s14790_s3 + $0x40] sm:$0xff] }
 0x624   :  { %4285 = vmatpush.msra.mxu0 %v3972_v33 }
 0x626   :  { %4286 = vmatpush.msra.mxu0 %v3969_v60  ;;  %v3971_v60 = vld [vmem:[%s14790_s3 + $0x28] sm:$0xff] }
 0x628   :  { %4287 = vmatpush.msra.mxu0 %v3966_v36 }
 0x657   :  { %v12196_v11 = vpop.permute.xlu2 %4116 }
 0x658   :  { %7584 = vmatmul.msk.f32.vlgmr.msra.gmra.mxu1 %vm495_vm5, %v12196_v11  ;;  %7586 = vmatmul.msk.f32.vlgmr.msra.gmra.mxu3 %vm495_vm5, %v12196_v11 }
 0x659   :  { %v4115_v24 = vpop.permute.xlu1 %4114  ;;  %4318 = vmatpush.msra.mxu3 %v4012_v62  ;;  %4349 = vmatpush.msra.mxu1 %v4036_v52  ;;  %v3968_v62 = vld [vmem:[%s14790_s3 + $0x10] sm:$0xff]  ;;  %v7641_v52 = vld [vmem:[%s14790_s3 + $0x5e8] sm:$0xff] }
 0x65a   :  { %v12210_v40 = vsel %vm490_vm6, %v4115_v24, %v12196_v11  ;;  %v7642_v24 = vld [vmem:[%s14790_s3 + $0x5f0] sm:$0xff] }
 0x65b   :  { %4146 = vmatmul.f32.vlgmr.msrb.gmra.mxu0 %v12210_v40  ;;  %4192 = vmatmul.f32.vlgmr.msra.gmra.mxu2 %v12210_v40 }
 0x65c   :  { %4364 = vmatpush.msra.mxu2 %v4013_v32  ;;  %4319 = vmatpush.msra.mxu3 %v4009_v54  ;;  %v7638_v32 = vld [vmem:[%s14790_s3 + $0x5d0] sm:$0xff]  ;;  %v7665_v54 = vld [vmem:[%s14790_s3 + $0x6a8] sm:$0xff] }
 0x65d   :  { %4395 = vmatpush.msrb.mxu0 %v4037_v37  ;;  %4350 = vmatpush.msra.mxu1 %v4033_v30  ;;  %v7639_v37 = vld [vmem:[%s14790_s3 + $0x5d8] sm:$0xff]  ;;  %v7662_v30 = vld [vmem:[%s14790_s3 + $0x690] sm:$0xff] }
 0x65e   :  { %4365 = vmatpush.msra.mxu2 %v4010_v10  ;;  %4320 = vmatpush.msra.mxu3 %v4006_v18  ;;  %v7636_v10 = vld [vmem:[%s14790_s3 + $0x5c0] sm:$0xff]  ;;  %v7663_v18 = vld [vmem:[%s14790_s3 + $0x698] sm:$0xff] }
 0x65f   :  { %4396 = vmatpush.msrb.mxu0 %v4034_v15  ;;  %4351 = vmatpush.msra.mxu1 %v4030_v55  ;;  %v7632_v15 = vld [vmem:[%s14790_s3 + $0x5a0] sm:$0xff]  ;;  %v7659_v55 = vld [vmem:[%s14790_s3 + $0x678] sm:$0xff] }
 0x660   :  { %4366 = vmatpush.msra.mxu2 %v4007_v41  ;;  %4321 = vmatpush.msra.mxu3 %v4003_v13  ;;  %v7633_v41 = vld [vmem:[%s14790_s3 + $0x5a8] sm:$0xff]  ;;  %v7660_v13 = vld [vmem:[%s14790_s3 + $0x680] sm:$0xff] }
 0x661   :  { %4397 = vmatpush.msrb.mxu0 %v4031_v23  ;;  %4352 = vmatpush.msra.mxu1 %v4027_v27  ;;  %v7629_v23 = vld [vmem:[%s14790_s3 + $0x588] sm:$0xff]  ;;  %v7656_v27 = vld [vmem:[%s14790_s3 + $0x660] sm:$0xff] }
 0x662   :  { %4367 = vmatpush.msra.mxu2 %v4004_v59  ;;  %4322 = vmatpush.msra.mxu3 %v4000_v12  ;;  %v7630_v59 = vld [vmem:[%s14790_s3 + $0x590] sm:$0xff]  ;;  %v7657_v12 = vld [vmem:[%s14790_s3 + $0x668] sm:$0xff] }
 0x663   :  { %4398 = vmatpush.msrb.mxu0 %v4028_v1  ;;  %4353 = vmatpush.msra.mxu1 %v4024_v17  ;;  %v7626_v1 = vld [vmem:[%s14790_s3 + $0x570] sm:$0xff]  ;;  %v7653_v17 = vld [vmem:[%s14790_s3 + $0x648] sm:$0xff] }
 0x664   :  { %4368 = vmatpush.msra.mxu2 %v4001_v35  ;;  %4323 = vmatpush.msra.mxu3 %v3997_v20  ;;  %v7627_v35 = vld [vmem:[%s14790_s3 + $0x578] sm:$0xff]  ;;  %v7654_v20 = vld [vmem:[%s14790_s3 + $0x650] sm:$0xff] }
 0x665   :  { %4399 = vmatpush.msrb.mxu0 %v4025_v31  ;;  %4354 = vmatpush.msra.mxu1 %v4021_v49  ;;  %v7623_v31 = vld [vmem:[%s14790_s3 + $0x558] sm:$0xff]  ;;  %v7650_v49 = vld [vmem:[%s14790_s3 + $0x630] sm:$0xff] }
 0x666   :  { %4369 = vmatpush.msra.mxu2 %v3998_v34  ;;  %4324 = vmatpush.msra.mxu3 %v3994_v5  ;;  %v7624_v34 = vld [vmem:[%s14790_s3 + $0x560] sm:$0xff]  ;;  %v7651_v5 = vld [vmem:[%s14790_s3 + $0x638] sm:$0xff] }
 0x667   :  { %4400 = vmatpush.msrb.mxu0 %v4022_v22  ;;  %4355 = vmatpush.msra.mxu1 %v4018_v26  ;;  %v7620_v22 = vld [vmem:[%s14790_s3 + $0x540] sm:$0xff]  ;;  %v7647_v26 = vld [vmem:[%s14790_s3 + $0x618] sm:$0xff] }
 0x668   :  { %4370 = vmatpush.msra.mxu2 %v3995_v50  ;;  %4325 = vmatpush.msra.mxu3 %v3991_v47  ;;  %v7621_v50 = vld [vmem:[%s14790_s3 + $0x548] sm:$0xff]  ;;  %v7648_v47 = vld [vmem:[%s14790_s3 + $0x620] sm:$0xff] }
 0x669   :  { %4401 = vmatpush.msrb.mxu0 %v4019_v48  ;;  %4356 = vmatpush.msra.mxu1 %v4015_v39  ;;  %v4119_v33 = vpop.permute.xlu0 %4118  ;;  %v7617_v48 = vld [vmem:[%s14790_s3 + $0x528] sm:$0xff]  ;;  %v7644_v39 = vld [vmem:[%s14790_s3 + $0x600] sm:$0xff] }
 0x66a   :  { %4371 = vmatpush.msra.mxu2 %v3992_v45  ;;  %4326 = vmatpush.msra.mxu3 %v3988_v58  ;;  %v7618_v45 = vld [vmem:[%s14790_s3 + $0x530] sm:$0xff]  ;;  %v7645_v58 = vld [vmem:[%s14790_s3 + $0x608] sm:$0xff] }
 0x66b   :  { %4402 = vmatpush.msrb.mxu0 %v4016_v2  ;;  %v7643_v2 = vld [vmem:[%s14790_s3 + $0x5f8] sm:$0xff] }
 0x66c   :  { %4372 = vmatpush.msra.mxu2 %v3989_v3  ;;  %4327 = vmatpush.msra.mxu3 %v3985_v6  ;;  %v7614_v3 = vld [vmem:[%s14790_s3 + $0x510] sm:$0xff]  ;;  %v7719_v6 = vld [vmem:[%s14790_s3 + $0x828] sm:$0xff] }
 0x66e   :  { %4373 = vmatpush.msra.mxu2 %v3986_v7  ;;  %4328 = vmatpush.msra.mxu3 %v3982_v16  ;;  %v7615_v7 = vld [vmem:[%s14790_s3 + $0x518] sm:$0xff]  ;;  %v7640_v16 = vld [vmem:[%s14790_s3 + $0x5e0] sm:$0xff] }
 0x670   :  { %4374 = vmatpush.msra.mxu2 %v3983_v9  ;;  %4329 = vmatpush.msra.mxu3 %v3979_v0  ;;  %v7612_v9 = vld [vmem:[%s14790_s3 + $0x500] sm:$0xff]  ;;  %v7637_v0 = vld [vmem:[%s14790_s3 + $0x5c8] sm:$0xff] }
 0x672   :  { %4375 = vmatpush.msra.mxu2 %v3980_v42  ;;  %4330 = vmatpush.msra.mxu3 %v3976_v8  ;;  %v7608_v42 = vld [vmem:[%s14790_s3 + $0x4e0] sm:$0xff]  ;;  %v7713_v8 = vld [vmem:[%s14790_s3 + $0x7f8] sm:$0xff] }
 0x674   :  { %4376 = vmatpush.msra.mxu2 %v3977_v19  ;;  %4331 = vmatpush.msra.mxu3 %v3973_v53  ;;  %v7609_v19 = vld [vmem:[%s14790_s3 + $0x4e8] sm:$0xff]  ;;  %v7634_v53 = vld [vmem:[%s14790_s3 + $0x5b0] sm:$0xff] }
 0x676   :  { %4377 = vmatpush.msra.mxu2 %v3974_v63  ;;  %4332 = vmatpush.msra.mxu3 %v3970_v51  ;;  %v7605_v63 = vld [vmem:[%s14790_s3 + $0x4c8] sm:$0xff]  ;;  %v7710_v51 = vld [vmem:[%s14790_s3 + $0x7e0] sm:$0xff] }
 0x677   :  { %v4121_v29 = vpop.permute.xlu1 %4120 }
 0x678   :  { %7585 = vmatmul.msk.f32.gmra.mxu1 %vm495_vm5, %v4121_v29  ;;  %7587 = vmatmul.msk.f32.gmra.mxu3 %vm495_vm5, %v4121_v29  ;;  %v4123_v36 = vsel %vm490_vm6, %v4119_v33, %v4121_v29  ;;  %v7606_v33 = vld [vmem:[%s14790_s3 + $0x4d0] sm:$0xff] }
 0x679   :  { %4149 = vmatmul.f32.gmra.mxu0 %v4123_v36  ;;  %4195 = vmatmul.f32.gmra.mxu2 %v4123_v36 }
 0x67a   :  { %4378 = vmatpush.msra.mxu2 %v3971_v60  ;;  %4333 = vmatpush.msra.mxu3 %v3967_v57  ;;  %v7602_v60 = vld [vmem:[%s14790_s3 + $0x4b0] sm:$0xff]  ;;  %v7707_v57 = vld [vmem:[%s14790_s3 + $0x7c8] sm:$0xff] }
 0x67c   :  { %4379 = vmatpush.msra.mxu2 %v3968_v62  ;;  %v7628_v62 = vld [vmem:[%s14790_s3 + $0x580] sm:$0xff] }
 0x680   :  { %4238 = vmatmul.f32.vlgmr.msrb.gmra.mxu1 %v12210_v40  ;;  %7588 = vmatmul.msk.f32.vlgmr.msrb.gmra.mxu3 %vm495_vm5, %v12196_v11  ;;  %v7666_v40 = vld [vmem:[%s14790_s3 + $0x6b0] sm:$0xff]  ;;  %v7635_v11 = vld [vmem:[%s14790_s3 + $0x5b8] sm:$0xff] }
 0x681   :  { %4502 = vmatpush.msrb.mxu1 %v7641_v52  ;;  %4288 = vmatmul.f32.vlgmr.msra.gmra.mxu0 %v11860_v46  ;;  %v7599_v52 = vld [vmem:[%s14790_s3 + $0x498] sm:$0xff] }
 0x682   :  { %7590 = vmatmul.msk.f32.vlgmr.msrb.gmra.mxu2 %vm495_vm5, %v11954_v61  ;;  %4548 = vmatpush.msra.mxu0 %v7642_v24  ;;  %v7600_v24 = vld [vmem:[%s14790_s3 + $0x4a0] sm:$0xff] }
 0x683   :  { %4503 = vmatpush.msrb.mxu1 %v7638_v32  ;;  %4533 = vmatpush.msrb.mxu3 %v7665_v54  ;;  %v7596_v32 = vld [vmem:[%s14790_s3 + $0x480] sm:$0xff]  ;;  %v7701_v54 = vld [vmem:[%s14790_s3 + $0x798] sm:$0xff] }
 0x684   :  { %4549 = vmatpush.msra.mxu0 %v7639_v37  ;;  %4579 = vmatpush.msrb.mxu2 %v7666_v40  ;;  %v7597_v37 = vld [vmem:[%s14790_s3 + $0x488] sm:$0xff]  ;;  %v7622_v40 = vld [vmem:[%s14790_s3 + $0x550] sm:$0xff] }
 0x685   :  { %4504 = vmatpush.msrb.mxu1 %v7635_v11  ;;  %4534 = vmatpush.msrb.mxu3 %v7662_v30  ;;  %v7667_v11 = vld [vmem:[%s14790_s3 + $0x6b8] sm:$0xff]  ;;  %v7698_v30 = vld [vmem:[%s14790_s3 + $0x780] sm:$0xff] }
 0x686   :  { %4550 = vmatpush.msra.mxu0 %v7636_v10  ;;  %4580 = vmatpush.msrb.mxu2 %v7663_v18  ;;  %v7743_v10 = vld [vmem:[%s14790_s3 + $0x8e8] sm:$0xff]  ;;  %v7619_v18 = vld [vmem:[%s14790_s3 + $0x538] sm:$0xff] }
 0x687   :  { %4505 = vmatpush.msrb.mxu1 %v7632_v15  ;;  %4535 = vmatpush.msrb.mxu3 %v7659_v55  ;;  %v7664_v15 = vld [vmem:[%s14790_s3 + $0x6a0] sm:$0xff]  ;;  %v7695_v55 = vld [vmem:[%s14790_s3 + $0x768] sm:$0xff] }
 0x688   :  { %4551 = vmatpush.msra.mxu0 %v7633_v41  ;;  %4581 = vmatpush.msrb.mxu2 %v7660_v13  ;;  %v7740_v41 = vld [vmem:[%s14790_s3 + $0x8d0] sm:$0xff]  ;;  %v7616_v13 = vld [vmem:[%s14790_s3 + $0x520] sm:$0xff] }
 0x689   :  { %4241 = vmatmul.f32.gmra.mxu1 %v4123_v36  ;;  %7589 = vmatmul.msk.f32.gmra.mxu3 %vm495_vm5, %v4121_v29  ;;  %v7631_v29 = vld [vmem:[%s14790_s3 + $0x598] sm:$0xff] }
 0x68a   :  { %4506 = vmatpush.msrb.mxu1 %v7629_v23  ;;  %4536 = vmatpush.msrb.mxu3 %v7656_v27  ;;  %v7603_v36 = vld [vmem:[%s14790_s3 + $0x4b8] sm:$0xff]  ;;  %v7661_v23 = vld [vmem:[%s14790_s3 + $0x688] sm:$0xff]  ;;  %v7692_v27 = vld [vmem:[%s14790_s3 + $0x750] sm:$0xff] }
 0x68b   :  { %4291 = vmatmul.f32.gmra.mxu0 %v11916_v28  ;;  %7591 = vmatmul.msk.f32.gmra.mxu2 %vm495_vm5, %v12006_v21 }
 0x68c   :  { %4552 = vmatpush.msra.mxu0 %v7630_v59  ;;  %4582 = vmatpush.msrb.mxu2 %v7657_v12  ;;  %v7737_v59 = vld [vmem:[%s14790_s3 + $0x8b8] sm:$0xff]  ;;  %v7613_v12 = vld [vmem:[%s14790_s3 + $0x508] sm:$0xff] }
 0x68d   :  { %4507 = vmatpush.msrb.mxu1 %v7626_v1  ;;  %4537 = vmatpush.msrb.mxu3 %v7653_v17  ;;  %v7658_v1 = vld [vmem:[%s14790_s3 + $0x670] sm:$0xff]  ;;  %v7689_v17 = vld [vmem:[%s14790_s3 + $0x738] sm:$0xff] }
 0x68e   :  { %4553 = vmatpush.msra.mxu0 %v7627_v35  ;;  %4583 = vmatpush.msrb.mxu2 %v7654_v20  ;;  %v7734_v35 = vld [vmem:[%s14790_s3 + $0x8a0] sm:$0xff]  ;;  %v7610_v20 = vld [vmem:[%s14790_s3 + $0x4f0] sm:$0xff] }
 0x68f   :  { %4508 = vmatpush.msrb.mxu1 %v7623_v31  ;;  %4538 = vmatpush.msrb.mxu3 %v7650_v49  ;;  %v7655_v31 = vld [vmem:[%s14790_s3 + $0x658] sm:$0xff]  ;;  %v7686_v49 = vld [vmem:[%s14790_s3 + $0x720] sm:$0xff] }
 0x690   :  { %4554 = vmatpush.msra.mxu0 %v7624_v34  ;;  %4584 = vmatpush.msrb.mxu2 %v7651_v5  ;;  %v7731_v34 = vld [vmem:[%s14790_s3 + $0x888] sm:$0xff]  ;;  %v7607_v5 = vld [vmem:[%s14790_s3 + $0x4d8] sm:$0xff] }
 0x691   :  { %4509 = vmatpush.msrb.mxu1 %v7620_v22  ;;  %4539 = vmatpush.msrb.mxu3 %v7647_v26  ;;  %v7652_v22 = vld [vmem:[%s14790_s3 + $0x640] sm:$0xff]  ;;  %v7683_v26 = vld [vmem:[%s14790_s3 + $0x708] sm:$0xff] }
 0x692   :  { %4555 = vmatpush.msra.mxu0 %v7621_v50  ;;  %4585 = vmatpush.msrb.mxu2 %v7648_v47  ;;  %v7728_v50 = vld [vmem:[%s14790_s3 + $0x870] sm:$0xff]  ;;  %v7604_v47 = vld [vmem:[%s14790_s3 + $0x4c0] sm:$0xff] }
 0x693   :  { %4334 = vmatmul.f32.vlgmr.msra.gmra.mxu3 %v11860_v46  ;;  %7592 = vmatmul.msk.f32.vlgmr.msra.gmra.mxu1 %vm495_vm5, %v11954_v61 }
 0x694   :  { %4510 = vmatpush.msrb.mxu1 %v7617_v48  ;;  %4540 = vmatpush.msrb.mxu3 %v7644_v39  ;;  %v7649_v48 = vld [vmem:[%s14790_s3 + $0x628] sm:$0xff]  ;;  %v7680_v39 = vld [vmem:[%s14790_s3 + $0x6f0] sm:$0xff] }
 0x695   :  { %4380 = vmatmul.f32.vlgmr.msra.gmra.mxu2 %v11860_v46  ;;  %7594 = vmatmul.msk.f32.vlgmr.msrb.gmra.mxu0 %vm495_vm5, %v11954_v61  ;;  %v7611_v46 = vld [vmem:[%s14790_s3 + $0x4f8] sm:$0xff]  ;;  %v7716_v61 = vld [vmem:[%s14790_s3 + $0x810] sm:$0xff] }
 0x696   :  { %4556 = vmatpush.msra.mxu0 %v7618_v45  ;;  %4586 = vmatpush.msrb.mxu2 %v7645_v58  ;;  %v7725_v45 = vld [vmem:[%s14790_s3 + $0x858] sm:$0xff]  ;;  %v7601_v58 = vld [vmem:[%s14790_s3 + $0x4a8] sm:$0xff] }
 0x697   :  { %4594 = vmatpush.msra.mxu3 %v7643_v2  ;;  %4511 = vmatpush.msrb.mxu1 %v7614_v3  ;;  %v7646_v2 = vld [vmem:[%s14790_s3 + $0x610] sm:$0xff]  ;;  %v7677_v3 = vld [vmem:[%s14790_s3 + $0x6d8] sm:$0xff] }
 0x698   :  { %4734 = vmatpush.msra.mxu2 %v7719_v6  ;;  %4557 = vmatpush.msra.mxu0 %v7615_v7  ;;  %v7722_v6 = vld [vmem:[%s14790_s3 + $0x840] sm:$0xff]  ;;  %v7720_v7 = vld [vmem:[%s14790_s3 + $0x830] sm:$0xff] }
 0x699   :  { %4595 = vmatpush.msra.mxu3 %v7640_v16  ;;  %4512 = vmatpush.msrb.mxu1 %v7611_v46  ;;  %v7598_v16 = vld [vmem:[%s14790_s3 + $0x490] sm:$0xff]  ;;  %v7721_v46 = vld [vmem:[%s14790_s3 + $0x838] sm:$0xff] }
 0x69a   :  { %4735 = vmatpush.msra.mxu2 %v7716_v61  ;;  %4558 = vmatpush.msra.mxu0 %v7612_v9  ;;  %v12674_v61 = vpop.permute.xlu0 %4720  ;;  %v7674_v9 = vld [vmem:[%s14790_s3 + $0x6c0] sm:$0xff] }
 0x69b   :  { %4596 = vmatpush.msra.mxu3 %v7637_v0  ;;  %4513 = vmatpush.msrb.mxu1 %v7608_v42  ;;  %v7717_v0 = vld [vmem:[%s14790_s3 + $0x818] sm:$0xff]  ;;  %v4719_v42 = vpop.permute.xlu2 %4718 }
 0x69c   :  { %4736 = vmatpush.msra.mxu2 %v7713_v8  ;;  %4559 = vmatpush.msra.mxu0 %v7609_v19  ;;  %v7744_v8 = vld [vmem:[%s14790_s3 + $0x8f0] sm:$0xff]  ;;  %v12690_v19 = vsel %vm490_vm6, %v4719_v42, %v12674_v61 }
 0x69d   :  { %4597 = vmatpush.msra.mxu3 %v7634_v53  ;;  %7593 = vmatmul.msk.f32.gmra.mxu1 %vm495_vm5, %v12006_v21  ;;  %v7718_v53 = vld [vmem:[%s14790_s3 + $0x820] sm:$0xff] }
 0x69e   :  { %4337 = vmatmul.f32.gmra.mxu3 %v11916_v28  ;;  %4514 = vmatpush.msrb.mxu1 %v7605_v63  ;;  %v7741_v63 = vld [vmem:[%s14790_s3 + $0x8d8] sm:$0xff] }
 0x69f   :  { %4737 = vmatpush.msra.mxu2 %v7710_v51  ;;  %7595 = vmatmul.msk.f32.gmra.mxu0 %vm495_vm5, %v12006_v21  ;;  %v7704_v21 = vld [vmem:[%s14790_s3 + $0x7b0] sm:$0xff]  ;;  %v7715_v51 = vld [vmem:[%s14790_s3 + $0x808] sm:$0xff] }
 0x6a0   :  { %4383 = vmatmul.f32.gmra.mxu2 %v11916_v28  ;;  %4560 = vmatpush.msra.mxu0 %v7606_v33  ;;  %v7625_v28 = vld [vmem:[%s14790_s3 + $0x568] sm:$0xff] }
 0x6a1   :  { %4598 = vmatpush.msra.mxu3 %v7631_v29  ;;  %4515 = vmatpush.msrb.mxu1 %v7602_v60  ;;  %v7711_v33 = vld [vmem:[%s14790_s3 + $0x7e8] sm:$0xff]  ;;  %v7742_v29 = vld [vmem:[%s14790_s3 + $0x8e0] sm:$0xff] }
 0x6a2   :  { %4738 = vmatpush.msra.mxu2 %v7707_v57  ;;  %4561 = vmatpush.msra.mxu0 %v7603_v36  ;;  %v7738_v60 = vld [vmem:[%s14790_s3 + $0x8c0] sm:$0xff]  ;;  %v7712_v57 = vld [vmem:[%s14790_s3 + $0x7f0] sm:$0xff] }
 0x6a3   :  { %4599 = vmatpush.msra.mxu3 %v7628_v62  ;;  %4516 = vmatpush.msrb.mxu1 %v7599_v52  ;;  %v7708_v36 = vld [vmem:[%s14790_s3 + $0x7d0] sm:$0xff]  ;;  %v7739_v62 = vld [vmem:[%s14790_s3 + $0x8c8] sm:$0xff] }
 0x6a4   :  { %4739 = vmatpush.msra.mxu2 %v7704_v21  ;;  %4562 = vmatpush.msra.mxu0 %v7600_v24  ;;  %v7735_v52 = vld [vmem:[%s14790_s3 + $0x8a8] sm:$0xff]  ;;  %v7709_v21 = vld [vmem:[%s14790_s3 + $0x7d8] sm:$0xff]  ;;  %v4723_v24 = vpop.permute.xlu1 %4722 }
 0x6a5   :  { %4600 = vmatpush.msra.mxu3 %v7625_v28  ;;  %4517 = vmatpush.msrb.mxu1 %v7596_v32  ;;  %v7736_v28 = vld [vmem:[%s14790_s3 + $0x8b0] sm:$0xff]  ;;  %v7705_v32 = vld [vmem:[%s14790_s3 + $0x7b8] sm:$0xff] }
 0x6a6   :  { %4740 = vmatpush.msra.mxu2 %v7701_v54  ;;  %4563 = vmatpush.msra.mxu0 %v7597_v37  ;;  %v12740_v54 = vpop.permute.xlu2 %4724  ;;  %v7732_v37 = vld [vmem:[%s14790_s3 + $0x890] sm:$0xff] }
 0x6a7   :  { %4601 = vmatpush.msra.mxu3 %v7622_v40  ;;  %4625 = vmatpush.msra.mxu1 %v7667_v11  ;;  %v12750_v40 = vsel %vm490_vm6, %v4723_v24, %v12740_v54  ;;  %v7706_v11 = vld [vmem:[%s14790_s3 + $0x7c0] sm:$0xff] }
 0x6a8   :  { %4518 = vmatmul.f32.vlgmr.msrb.gmra.mxu1 %v12010_v25  ;;  %7668 = vmatmul.msk.f32.vlgmr.msrb.gmra.mxu3 %vm495_vm5, %v12032_v4  ;;  %v7780_v24 = vld [vmem:[%s14792_s5 + $0x260] sm:$0xff] }
 0x6a9   :  { %4741 = vmatpush.msra.mxu2 %v7698_v30  ;;  %4765 = vmatpush.msrb.mxu0 %v7743_v10  ;;  %v7729_v30 = vld [vmem:[%s14790_s3 + $0x878] sm:$0xff]  ;;  %v7703_v10 = vld [vmem:[%s14790_s3 + $0x7a8] sm:$0xff] }
 0x6aa   :  { %4564 = vmatmul.f32.vlgmr.msra.gmra.mxu0 %v12010_v25  ;;  %7670 = vmatmul.msk.f32.vlgmr.msrb.gmra.mxu2 %vm495_vm5, %v12032_v4 }
 0x6ab   :  { %4602 = vmatpush.msra.mxu3 %v7619_v18  ;;  %4626 = vmatpush.msra.mxu1 %v7664_v15  ;;  %v7699_v18 = vld [vmem:[%s14790_s3 + $0x788] sm:$0xff]  ;;  %v7730_v15 = vld [vmem:[%s14790_s3 + $0x880] sm:$0xff] }
 0x6ac   :  { %4742 = vmatpush.msra.mxu2 %v7695_v55  ;;  %4766 = vmatpush.msrb.mxu0 %v7740_v41  ;;  %v7726_v55 = vld [vmem:[%s14790_s3 + $0x860] sm:$0xff]  ;;  %v7700_v41 = vld [vmem:[%s14790_s3 + $0x790] sm:$0xff] }
 0x6ad   :  { %4603 = vmatpush.msra.mxu3 %v7616_v13  ;;  %4627 = vmatpush.msra.mxu1 %v7661_v23  ;;  %v7696_v13 = vld [vmem:[%s14790_s3 + $0x770] sm:$0xff]  ;;  %v7727_v23 = vld [vmem:[%s14790_s3 + $0x868] sm:$0xff] }
 0x6ae   :  { %4743 = vmatpush.msra.mxu2 %v7692_v27  ;;  %4767 = vmatpush.msrb.mxu0 %v7737_v59  ;;  %v7723_v27 = vld [vmem:[%s14790_s3 + $0x848] sm:$0xff]  ;;  %v7697_v59 = vld [vmem:[%s14790_s3 + $0x778] sm:$0xff] }
 0x6af   :  { %4604 = vmatpush.msra.mxu3 %v7613_v12  ;;  %4628 = vmatpush.msra.mxu1 %v7658_v1  ;;  %v7693_v12 = vld [vmem:[%s14790_s3 + $0x758] sm:$0xff]  ;;  %v7724_v1 = vld [vmem:[%s14790_s3 + $0x850] sm:$0xff] }
 0x6b0   :  { %4744 = vmatpush.msra.mxu2 %v7689_v17  ;;  %4768 = vmatpush.msrb.mxu0 %v7734_v35  ;;  %v7694_v17 = vld [vmem:[%s14790_s3 + $0x760] sm:$0xff] }
 0x6b1   :  { %4605 = vmatpush.msra.mxu3 %v7610_v20  ;;  %4629 = vmatpush.msra.mxu1 %v7655_v31  ;;  %v7690_v35 = vld [vmem:[%s14790_s3 + $0x740] sm:$0xff]  ;;  %v7691_v20 = vld [vmem:[%s14790_s3 + $0x748] sm:$0xff] }
 0x6b2   :  { %4521 = vmatmul.f32.gmra.mxu1 %v11983_v44  ;;  %7669 = vmatmul.msk.f32.gmra.mxu3 %vm495_vm5, %v12019_v38  ;;  %v7687_v31 = vld [vmem:[%s14790_s3 + $0x728] sm:$0xff] }
 0x6b3   :  { %4745 = vmatpush.msra.mxu2 %v7686_v49  ;;  %4769 = vmatpush.msrb.mxu0 %v7731_v34  ;;  %v7688_v49 = vld [vmem:[%s14790_s3 + $0x730] sm:$0xff] }
 0x6b4   :  { %4567 = vmatmul.f32.gmra.mxu0 %v11983_v44  ;;  %7671 = vmatmul.msk.f32.gmra.mxu2 %vm495_vm5, %v12019_v38  ;;  %v7684_v34 = vld [vmem:[%s14790_s3 + $0x710] sm:$0xff] }
 0x6b5   :  { %4606 = vmatpush.msra.mxu3 %v7607_v5  ;;  %4630 = vmatpush.msra.mxu1 %v7652_v22  ;;  %v7685_v5 = vld [vmem:[%s14790_s3 + $0x718] sm:$0xff] }
 0x6b6   :  { %4746 = vmatpush.msra.mxu2 %v7683_v26  ;;  %4770 = vmatpush.msrb.mxu0 %v7728_v50  ;;  %v7681_v22 = vld [vmem:[%s14790_s3 + $0x6f8] sm:$0xff]  ;;  %v7682_v26 = vld [vmem:[%s14790_s3 + $0x700] sm:$0xff] }
 0x6b7   :  { %4607 = vmatpush.msra.mxu3 %v7604_v47  ;;  %4631 = vmatpush.msra.mxu1 %v7649_v48  ;;  %v7678_v50 = vld [vmem:[%s14790_s3 + $0x6e0] sm:$0xff]  ;;  %v7679_v47 = vld [vmem:[%s14790_s3 + $0x6e8] sm:$0xff] }
 0x6b8   :  { %4747 = vmatpush.msra.mxu2 %v7680_v39  ;;  %4771 = vmatpush.msrb.mxu0 %v7725_v45  ;;  %v7675_v48 = vld [vmem:[%s14790_s3 + $0x6c8] sm:$0xff]  ;;  %v7676_v39 = vld [vmem:[%s14790_s3 + $0x6d0] sm:$0xff] }
 0x6b9   :  { %4608 = vmatpush.msra.mxu3 %v7601_v58  ;;  %4632 = vmatpush.msra.mxu1 %v7646_v2 }
 0x6ba   :  { %4748 = vmatpush.msra.mxu2 %v7677_v3  ;;  %4772 = vmatpush.msrb.mxu0 %v7722_v6 }
 0x6bb   :  { %4780 = vmatpush.msrb.mxu1 %v7720_v7  ;;  %4609 = vmatpush.msra.mxu3 %v7598_v16 }
 0x6bc   :  { %4826 = vmatpush.msra.mxu0 %v7721_v46  ;;  %4610 = vmatmul.f32.vlgmr.msra.gmra.mxu3 %v12010_v25  ;;  %v7714_v25 = vld [vmem:[%s14790_s3 + $0x800] sm:$0xff] }
 0x6bd   :  { %7672 = vmatmul.msk.f32.vlgmr.msra.gmra.mxu1 %vm495_vm5, %v12032_v4  ;;  %4749 = vmatpush.msra.mxu2 %v7674_v9  ;;  %v7745_v4 = vld [vmem:[%s14790_s3 + $0x8f8] sm:$0xff] }
 0x6be   :  { %4781 = vmatpush.msrb.mxu1 %v7717_v0  ;;  %4750 = vmatmul.f32.vlgmr.msra.gmra.mxu2 %v12690_v19 }
 0x6bf   :  { %7746 = vmatmul.msk.f32.vlgmr.msrb.gmra.mxu0 %vm495_vm5, %v12674_v61  ;;  %4811 = vmatpush.msrb.mxu3 %v7744_v8 }
 0x6c0   :  { %4827 = vmatpush.msra.mxu0 %v7718_v53  ;;  %4782 = vmatpush.msrb.mxu1 %v7714_v25 }
 0x6c1   :  { %4857 = vmatpush.msrb.mxu2 %v7745_v4  ;;  %4812 = vmatpush.msrb.mxu3 %v7741_v63  ;;  %v7767_v4 = vld [vmem:[%s14792_s5 + $0x1f8] sm:$0xff] }
 0x6c2   :  { %4828 = vmatpush.msra.mxu0 %v7715_v51  ;;  %4783 = vmatpush.msrb.mxu1 %v7711_v33  ;;  %v7783_v63 = vld [vmem:[%s14792_s5 + $0x278] sm:$0xff]  ;;  %v7766_v33 = vld [vmem:[%s14792_s5 + $0x1f0] sm:$0xff] }
 0x6c3   :  { %4858 = vmatpush.msrb.mxu2 %v7742_v29  ;;  %4813 = vmatpush.msrb.mxu3 %v7738_v60  ;;  %v7799_v51 = vld [vmem:[%s14792_s5 + $0x2f8] sm:$0xff]  ;;  %v7782_v29 = vld [vmem:[%s14792_s5 + $0x270] sm:$0xff] }
 0x6c4   :  { %4829 = vmatpush.msra.mxu0 %v7712_v57  ;;  %4784 = vmatpush.msrb.mxu1 %v7708_v36  ;;  %v7798_v60 = vld [vmem:[%s14792_s5 + $0x2f0] sm:$0xff]  ;;  %v7765_v57 = vld [vmem:[%s14792_s5 + $0x1e8] sm:$0xff] }
 0x6c5   :  { %4859 = vmatpush.msrb.mxu2 %v7739_v62  ;;  %4814 = vmatpush.msrb.mxu3 %v7735_v52  ;;  %v7781_v36 = vld [vmem:[%s14792_s5 + $0x268] sm:$0xff] }
 0x6c6   :  { %4830 = vmatpush.msra.mxu0 %v7709_v21  ;;  %4613 = vmatmul.f32.gmra.mxu3 %v11983_v44  ;;  %v7702_v44 = vld [vmem:[%s14790_s3 + $0x7a0] sm:$0xff]  ;;  %v7797_v52 = vld [vmem:[%s14792_s5 + $0x2e8] sm:$0xff] }
 0x6c7   :  { %7673 = vmatmul.msk.f32.gmra.mxu1 %vm495_vm5, %v12019_v38  ;;  %4860 = vmatpush.msrb.mxu2 %v7736_v28  ;;  %v7733_v38 = vld [vmem:[%s14790_s3 + $0x898] sm:$0xff]  ;;  %v7764_v21 = vld [vmem:[%s14792_s5 + $0x1e0] sm:$0xff] }
 0x6c8   :  { %4785 = vmatpush.msrb.mxu1 %v7705_v32  ;;  %4753 = vmatmul.f32.gmra.mxu2 %v12750_v40  ;;  %v7796_v28 = vld [vmem:[%s14792_s5 + $0x2e0] sm:$0xff] }
 0x6c9   :  { %7747 = vmatmul.msk.f32.gmra.mxu0 %vm495_vm5, %v12740_v54  ;;  %4815 = vmatpush.msrb.mxu3 %v7732_v37 }
 0x6ca   :  { %4831 = vmatpush.msra.mxu0 %v7706_v11  ;;  %4786 = vmatpush.msrb.mxu1 %v7702_v44  ;;  %v7779_v11 = vld [vmem:[%s14792_s5 + $0x258] sm:$0xff] }
 0x6cb   :  { %4861 = vmatpush.msrb.mxu2 %v7733_v38  ;;  %4816 = vmatpush.msrb.mxu3 %v7729_v30  ;;  %v7795_v44 = vld [vmem:[%s14792_s5 + $0x2d8] sm:$0xff]  ;;  %v7762_v30 = vld [vmem:[%s14792_s5 + $0x1d0] sm:$0xff] }
 0x6cc   :  { %4832 = vmatpush.msra.mxu0 %v7703_v10  ;;  %4787 = vmatpush.msrb.mxu1 %v7699_v18  ;;  %v4913_v38 = vld [vmem:[%s14792_s5 + $0x78] sm:$0xff]  ;;  %v7778_v10 = vld [vmem:[%s14792_s5 + $0x250] sm:$0xff] }
 0x6cd   :  { %4862 = vmatpush.msrb.mxu2 %v7730_v15  ;;  %4817 = vmatpush.msrb.mxu3 %v7726_v55  ;;  %v7794_v18 = vld [vmem:[%s14792_s5 + $0x2d0] sm:$0xff] }
 0x6ce   :  { %4833 = vmatpush.msra.mxu0 %v7700_v41  ;;  %4788 = vmatpush.msrb.mxu1 %v7696_v13  ;;  %v4912_v55 = vld [vmem:[%s14792_s5 + $0x70] sm:$0xff]  ;;  %v7761_v41 = vld [vmem:[%s14792_s5 + $0x1c8] sm:$0xff] }
 0x6cf   :  { %4863 = vmatpush.msrb.mxu2 %v7727_v23  ;;  %4818 = vmatpush.msrb.mxu3 %v7723_v27  ;;  %v7777_v13 = vld [vmem:[%s14792_s5 + $0x248] sm:$0xff] }
 0x6d0   :  { %4834 = vmatpush.msra.mxu0 %v7697_v59  ;;  %4789 = vmatpush.msrb.mxu1 %v7693_v12  ;;  %v7793_v23 = vld [vmem:[%s14792_s5 + $0x2c8] sm:$0xff]  ;;  %v7760_v59 = vld [vmem:[%s14792_s5 + $0x1c0] sm:$0xff] }
 0x6d1   :  { %7748 = vmatmul.msk.f32.vlgmr.msrb.gmra.mxu3 %vm495_vm5, %v12674_v61  ;;  %4864 = vmatpush.msrb.mxu2 %v7724_v1  ;;  %v4911_v27 = vld [vmem:[%s14792_s5 + $0x68] sm:$0xff]  ;;  %v7776_v12 = vld [vmem:[%s14792_s5 + $0x240] sm:$0xff] }
 0x6d2   :  { %4835 = vmatpush.msra.mxu0 %v7694_v17  ;;  %7750 = vmatmul.msk.f32.vlgmr.msrb.gmra.mxu2 %vm495_vm5, %v12674_v61  ;;  %v7792_v1 = vld [vmem:[%s14792_s5 + $0x2c0] sm:$0xff] }
 0x6d3   :  { %4790 = vmatpush.msrb.mxu1 %v7690_v35  ;;  %5020 = vmatpush.msra.mxu3 %v7767_v4  ;;  %v4910_v17 = vld [vmem:[%s14792_s5 + $0x60] sm:$0xff] }
 0x6d4   :  { %4836 = vmatpush.msra.mxu0 %v7691_v20  ;;  %5060 = vmatpush.msra.mxu2 %v7799_v51  ;;  %v7756_v4 = vld [vmem:[%s14792_s5 + $0x1a0] sm:$0xff] }
 0x6d5   :  { %4791 = vmatpush.msrb.mxu1 %v7687_v31  ;;  %v12855_v6 = vpop.f32.mrf.mxu1  ;;  %5021 = vmatpush.msra.mxu3 %v7766_v33  ;;  %v7788_v51 = vld [vmem:[%s14792_s5 + $0x2a0] sm:$0xff] }
 0x6d6   :  { %4837 = vmatpush.msra.mxu0 %v7688_v49  ;;  %5061 = vmatpush.msra.mxu2 %v7798_v60  ;;  %v7759_v49 = vld [vmem:[%s14792_s5 + $0x1b8] sm:$0xff]  ;;  %v4906_v33 = vld [vmem:[%s14792_s5 + $0x40] sm:$0xff] }
 0x6d7   :  { %4792 = vmatpush.msrb.mxu1 %v7684_v34  ;;  %5022 = vmatpush.msra.mxu3 %v7765_v57  ;;  %v7775_v34 = vld [vmem:[%s14792_s5 + $0x238] sm:$0xff] }
 0x6d8   :  { %4838 = vmatpush.msra.mxu0 %v7685_v5  ;;  %v12853_v3 = vpop.f32.mrf.mxu0  ;;  %5062 = vmatpush.msra.mxu2 %v7797_v52  ;;  %v7791_v5 = vld [vmem:[%s14792_s5 + $0x2b8] sm:$0xff] }
 0x6d9   :  { %4793 = vmatpush.msrb.mxu1 %v7681_v22  ;;  %7749 = vmatmul.msk.f32.gmra.mxu3 %vm495_vm5, %v12740_v54  ;;  %v4909_v22 = vld [vmem:[%s14792_s5 + $0x58] sm:$0xff] }
 0x6da   :  { %4839 = vmatpush.msra.mxu0 %v7682_v26  ;;  %7751 = vmatmul.msk.f32.gmra.mxu2 %vm495_vm5, %v12740_v54  ;;  %v7758_v26 = vld [vmem:[%s14792_s5 + $0x1b0] sm:$0xff]  ;;  %v7755_v60 = vld [vmem:[%s14792_s5 + $0x198] sm:$0xff] }
 0x6db   :  { %4794 = vmatpush.msrb.mxu1 %v7678_v50  ;;  %v4216_v45 = vpop.f32.mrf.mxu3  ;;  %5023 = vmatpush.msra.mxu3 %v7764_v21  ;;  %v7774_v50 = vld [vmem:[%s14792_s5 + $0x230] sm:$0xff]  ;;  %v7771_v57 = vld [vmem:[%s14792_s5 + $0x218] sm:$0xff] }
 0x6dc   :  { %4840 = vmatpush.msra.mxu0 %v7679_v47  ;;  %5063 = vmatpush.msra.mxu2 %v7796_v28  ;;  %v7790_v47 = vld [vmem:[%s14792_s5 + $0x2b0] sm:$0xff] }
 0x6dd   :  { %4795 = vmatpush.msrb.mxu1 %v7675_v48  ;;  %v7754_v28 = vld [vmem:[%s14792_s5 + $0x190] sm:$0xff] }
 0x6de   :  { %4796 = vmatmul.f32.vlgmr.msrb.gmra.mxu1 %v12690_v19  ;;  %4841 = vmatpush.msra.mxu0 %v7676_v39  ;;  %v4193_v58 = vpop.f32.mrf.mxu2  ;;  %v4908_v39 = vld [vmem:[%s14792_s5 + $0x50] sm:$0xff] }
 0x6df   :  { %4842 = vmatmul.f32.vlgmr.msra.gmra.mxu0 %v12690_v19  ;;  %v12849_v2 = vadd.f32 %v4216_v45, %v4193_v58  ;;  %5040 = vmatpush.msra.mxu1 %v7783_v63  ;;  %v7757_v45 = vld [vmem:[%s14792_s5 + $0x1a8] sm:$0xff]  ;;  %v7772_v63 = vld [vmem:[%s14792_s5 + $0x220] sm:$0xff] }
 0x6e0   :  { %5064 = vmatpush.msra.mxu2 %v7795_v44  ;;  %5097 = vmatpush.msrb.mxu0 %v4913_v38  ;;  %v7773_v58 = vld [vmem:[%s14792_s5 + $0x228] sm:$0xff]  ;;  %v4904_v44 = vld [vmem:[%s14792_s5 + $0x30] sm:$0xff] }
 0x6e1   :  { %5041 = vmatpush.msra.mxu1 %v7782_v29  ;;  %v7753_v38 = vld [vmem:[%s14792_s5 + $0x188] sm:$0xff] }
 0x6e2   :  { %5065 = vmatpush.msra.mxu2 %v7794_v18  ;;  %5098 = vmatpush.msrb.mxu0 %v4912_v55  ;;  %v4903_v55 = vld [vmem:[%s14792_s5 + $0x28] sm:$0xff] }
 0x6e3   :  { %5042 = vmatpush.msra.mxu1 %v7781_v36  ;;  %v7787_v36 = vld [vmem:[%s14792_s5 + $0x298] sm:$0xff] }
 0x6e4   :  { %5066 = vmatpush.msra.mxu2 %v7793_v23  ;;  %5099 = vmatpush.msrb.mxu0 %v4911_v27  ;;  %v7784_v23 = vld [vmem:[%s14792_s5 + $0x280] sm:$0xff] }
 0x6e5   :  { %5043 = vmatpush.msra.mxu1 %v7780_v24  ;;  %v4905_v24 = vld [vmem:[%s14792_s5 + $0x38] sm:$0xff]  ;;  %v4902_v27 = vld [vmem:[%s14792_s5 + $0x20] sm:$0xff] }
 0x6e6   :  { %4799 = vmatmul.f32.gmra.mxu1 %v12750_v40  ;;  %5067 = vmatpush.msra.mxu2 %v7792_v1  ;;  %v7815_v1 = vld [vmem:[%s14792_s5 + $0x378] sm:$0xff] }
 0x6e7   :  { %4845 = vmatmul.f32.gmra.mxu0 %v12750_v40  ;;  %v7763_v40 = vld [vmem:[%s14792_s5 + $0x1d8] sm:$0xff]  ;;  %5044 = vmatpush.msra.mxu1 %v7779_v11  ;;  %v7786_v11 = vld [vmem:[%s14792_s5 + $0x290] sm:$0xff] }
 0x6e8   :  { %5024 = vmatpush.msra.mxu3 %v7763_v40  ;;  %5100 = vmatpush.msrb.mxu0 %v4910_v17  ;;  %v7770_v40 = vld [vmem:[%s14792_s5 + $0x210] sm:$0xff]  ;;  %v4901_v17 = vld [vmem:[%s14792_s5 + $0x18] sm:$0xff] }
 0x6e9   :  { %5045 = vmatpush.msra.mxu1 %v7778_v10  ;;  %5068 = vmatpush.msra.mxu2 %v7791_v5  ;;  %v7785_v10 = vld [vmem:[%s14792_s5 + $0x288] sm:$0xff]  ;;  %v4944_v5 = vld [vmem:[%s14792_s5 + $0x170] sm:$0xff] }
 0x6ea   :  { %5025 = vmatpush.msra.mxu3 %v7762_v30  ;;  %5101 = vmatpush.msrb.mxu0 %v4909_v22  ;;  %v7769_v30 = vld [vmem:[%s14792_s5 + $0x208] sm:$0xff]  ;;  %v7814_v22 = vld [vmem:[%s14792_s5 + $0x370] sm:$0xff] }
 0x6eb   :  { %5046 = vmatpush.msra.mxu1 %v7777_v13  ;;  %5069 = vmatpush.msra.mxu2 %v7790_v47  ;;  %v7768_v13 = vld [vmem:[%s14792_s5 + $0x200] sm:$0xff]  ;;  %v4943_v47 = vld [vmem:[%s14792_s5 + $0x168] sm:$0xff] }
 0x6ec   :  { %5026 = vmatpush.msra.mxu3 %v7761_v41  ;;  %5102 = vmatpush.msrb.mxu0 %v4908_v39  ;;  %v7752_v41 = vld [vmem:[%s14792_s5 + $0x180] sm:$0xff] }
 0x6ed   :  { %5047 = vmatpush.msra.mxu1 %v7776_v12  ;;  %v4945_v12 = vld [vmem:[%s14792_s5 + $0x178] sm:$0xff] }
 0x6ee   :  { %5027 = vmatpush.msra.mxu3 %v7760_v59  ;;  %v4929_v59 = vld [vmem:[%s14792_s5 + $0xf8] sm:$0xff] }
 0x6ef   :  { %5048 = vmatpush.msra.mxu1 %v7775_v34  ;;  %v4928_v34 = vld [vmem:[%s14792_s5 + $0xf0] sm:$0xff] }
 0x6f0   :  { %5028 = vmatpush.msra.mxu3 %v7759_v49 }
 0x6f1   :  { %5049 = vmatpush.msra.mxu1 %v7774_v50  ;;  %v4927_v50 = vld [vmem:[%s14792_s5 + $0xe8] sm:$0xff] }
 0x6f2   :  { %5029 = vmatpush.msra.mxu3 %v7758_v26  ;;  %v4900_v26 = vld [vmem:[%s14792_s5 + $0x10] sm:$0xff] }
 0x6f3   :  { %5050 = vmatpush.msra.mxu1 %v7773_v58  ;;  %v7813_v58 = vld [vmem:[%s14792_s5 + $0x368] sm:$0xff] }
 0x6f4   :  { %5030 = vmatpush.msra.mxu3 %v7757_v45 }
 0x6f5   :  { %v12861_v9 = vpop.f32.mrf.mxu1  ;;  %5051 = vmatpush.msra.mxu1 %v7772_v63  ;;  %v7812_v63 = vld [vmem:[%s14792_s5 + $0x360] sm:$0xff] }
 0x6f6   :  { %v12857_v7 = vpop.f32.mrf.mxu0  ;;  %5031 = vmatpush.msra.mxu3 %v7756_v4  ;;  %v4942_v4 = vld [vmem:[%s14792_s5 + $0x160] sm:$0xff] }
 0x6f7   :  { %5052 = vmatpush.msra.mxu1 %v7771_v57 }
 0x6f8   :  { %5032 = vmatpush.msra.mxu3 %v7755_v60  ;;  %v4171_v60 = vadd.f32 %v12855_v6, %v12853_v3 }
 0x6f9   :  { %5053 = vmatpush.msra.mxu1 %v7770_v40 }
 0x6fa   :  { %5033 = vmatpush.msra.mxu3 %v7754_v28 }
 0x6fb   :  { %v4219_v16 = vpop.f32.mrf.mxu3  ;;  %5054 = vmatpush.msra.mxu1 %v7769_v30 }
 0x6fc   :  { %v4196_v46 = vpop.f32.mrf.mxu2  ;;  %5034 = vmatpush.msra.mxu3 %v7753_v38 }
 0x6fd   :  { %v12859_v61 = vadd.f32 %v4219_v16, %v4196_v46  ;;  %v12869_v19 = vpop.f32.mrf.mxu1  ;;  %v7789_v16 = vld [vmem:[%s14792_s5 + $0x2a8] sm:$0xff]  ;;  %5055 = vmatpush.msra.mxu1 %v7768_v13 }
 0x6fe   :  { %v12863_v0 = vpop.f32.mrf.mxu0  ;;  %v4907_v46 = vld [vmem:[%s14792_s5 + $0x48] sm:$0xff]  ;;  %5070 = vmatpush.msra.mxu2 %v7789_v16  ;;  %5035 = vmatpush.msra.mxu3 %v7752_v41 }
 0x6ff   :  { %5103 = vmatpush.msrb.mxu0 %v4907_v46  ;;  %5137 = vmatpush.msrb.mxu1 %v4945_v12  ;;  %v4899_v16 = vld [vmem:[%s14792_s5 + $0x8] sm:$0xff]  ;;  %v4926_v46 = vld [vmem:[%s14792_s5 + $0xe0] sm:$0xff]  ;;  %v4290_v57 = vadd.f32 %v12863_v0, %v4171_v60  ;;  %v7807_v60 = vld [vmem:[%s14792_s5 + $0x338] sm:$0xff] }
 0x700   :  { %5071 = vmatpush.msra.mxu2 %v7788_v51  ;;  %5117 = vmatpush.msrb.mxu3 %v4929_v59  ;;  %v4898_v51 = vld [vmem:[%s14792_s5] sm:$0xff]  ;;  %v4925_v59 = vld [vmem:[%s14792_s5 + $0xd8] sm:$0xff] }
 0x701   :  { %5104 = vmatpush.msrb.mxu0 %v4906_v33  ;;  %5138 = vmatpush.msrb.mxu1 %v4944_v5  ;;  %v7830_v5 = vld [vmem:[%s14792_s5 + $0x3f0] sm:$0xff] }
 0x702   :  { %5072 = vmatpush.msra.mxu2 %v7787_v36  ;;  %5118 = vmatpush.msrb.mxu3 %v4928_v34 }
 0x703   :  { %v12867_v8 = vpop.f32.mrf.mxu3  ;;  %5105 = vmatpush.msrb.mxu0 %v4905_v24  ;;  %5139 = vmatpush.msrb.mxu1 %v4943_v47 }
 0x704   :  { %5073 = vmatpush.msra.mxu2 %v7786_v11  ;;  %5119 = vmatpush.msrb.mxu3 %v4927_v50  ;;  %v7829_v50 = vld [vmem:[%s14792_s5 + $0x3e8] sm:$0xff] }
 0x705   :  { %v12865_v42 = vpop.f32.mrf.mxu2  ;;  %5106 = vmatpush.msrb.mxu0 %v4904_v44  ;;  %5140 = vmatpush.msrb.mxu1 %v4942_v4  ;;  %v7828_v4 = vld [vmem:[%s14792_s5 + $0x3e0] sm:$0xff] }
 0x706   :  { %v12913_v32 = vpop.f32.mrf.mxu1  ;;  %5074 = vmatpush.msra.mxu2 %v7785_v10  ;;  %5120 = vmatpush.msrb.mxu3 %v4926_v46  ;;  %v4313_v28 = vadd.f32 %v12865_v42, %v4290_v57  ;;  %v7808_v46 = vld [vmem:[%s14792_s5 + $0x340] sm:$0xff] }
 0x707   :  { %5107 = vmatpush.msrb.mxu0 %v4903_v55  ;;  %v4174_v55 = vadd.f32 %v12861_v9, %v12857_v7  ;;  %v4941_v7 = vld [vmem:[%s14792_s5 + $0x158] sm:$0xff] }
 0x708   :  { %v12871_v53 = vpop.f32.mrf.mxu0  ;;  %5075 = vmatpush.msra.mxu2 %v7784_v23  ;;  %v7811_v9 = vld [vmem:[%s14792_s5 + $0x358] sm:$0xff]  ;;  %5121 = vmatpush.msrb.mxu3 %v4925_v59 }
 0x709   :  { %5108 = vmatpush.msrb.mxu0 %v4902_v27  ;;  %v4293_v6 = vadd.f32 %v12871_v53, %v4174_v55  ;;  %5141 = vmatpush.msrb.mxu1 %v4941_v7  ;;  %v4933_v59 = vld [vmem:[%s14792_s5 + $0x118] sm:$0xff] }
 0x70a   :  { %5231 = vmatpush.msrb.mxu2 %v7815_v1  ;;  %v4924_v1 = vld [vmem:[%s14792_s5 + $0xd0] sm:$0xff]  ;;  %v7803_v7 = vld [vmem:[%s14792_s5 + $0x318] sm:$0xff] }
 0x70b   :  { %5109 = vmatpush.msrb.mxu0 %v4901_v17  ;;  %v4940_v17 = vld [vmem:[%s14792_s5 + $0x150] sm:$0xff]  ;;  %5122 = vmatpush.msrb.mxu3 %v4924_v1 }
 0x70c   :  { %v12899_v62 = vpop.f32.mrf.mxu3  ;;  %5232 = vmatpush.msrb.mxu2 %v7814_v22  ;;  %5142 = vmatpush.msrb.mxu1 %v4940_v17  ;;  %v4923_v22 = vld [vmem:[%s14792_s5 + $0xc8] sm:$0xff]  ;;  %v4916_v1 = vld [vmem:[%s14792_s5 + $0x90] sm:$0xff] }
 0x70d   :  { %5110 = vmatpush.msrb.mxu0 %v4900_v26  ;;  %v4939_v26 = vld [vmem:[%s14792_s5 + $0x148] sm:$0xff]  ;;  %5123 = vmatpush.msrb.mxu3 %v4923_v22 }
 0x70e   :  { %v12873_v25 = vpop.f32.mrf.mxu2  ;;  %5233 = vmatpush.msrb.mxu2 %v7813_v58  ;;  %5143 = vmatpush.msrb.mxu1 %v4939_v26  ;;  %v4922_v58 = vld [vmem:[%s14792_s5 + $0xc0] sm:$0xff]  ;;  %v4915_v22 = vld [vmem:[%s14792_s5 + $0x88] sm:$0xff] }
 0x70f   :  { %5111 = vmatpush.msrb.mxu0 %v4899_v16  ;;  %v4938_v16 = vld [vmem:[%s14792_s5 + $0x140] sm:$0xff]  ;;  %5124 = vmatpush.msrb.mxu3 %v4922_v58 }
 0x710   :  { %v12969_v35 = vpop.f32.mrf.mxu1  ;;  %5234 = vmatpush.msrb.mxu2 %v7812_v63  ;;  %5144 = vmatpush.msrb.mxu1 %v4938_v16  ;;  %v4263_v63 = vadd.f32 %v12867_v8, %v12869_v19  ;;  %v7827_v8 = vld [vmem:[%s14792_s5 + $0x3d8] sm:$0xff]  ;;  %v4914_v58 = vld [vmem:[%s14792_s5 + $0x80] sm:$0xff] }
 0x711   :  { %5112 = vmatpush.msrb.mxu0 %v4898_v51  ;;  %v4921_v51 = vld [vmem:[%s14792_s5 + $0xb8] sm:$0xff]  ;;  %v7800_v16 = vld [vmem:[%s14792_s5 + $0x300] sm:$0xff] }
 0x712   :  { %v12915_v54 = vpop.f32.mrf.mxu0  ;;  %5235 = vmatpush.msrb.mxu2 %v7811_v9  ;;  %5125 = vmatpush.msrb.mxu3 %v4921_v51  ;;  %v7820_v51 = vld [vmem:[%s14792_s5 + $0x3a0] sm:$0xff] }
 0x716   :  { %v12940_v15 = vpop.f32.mrf.mxu3 }
 0x717   :  { %v4336_v57 = vadd.f32 %v12940_v15, %v12849_v2  ;;  %v7806_v2 = vld [vmem:[%s14792_s5 + $0x330] sm:$0xff] }
 0x718   :  { %v12917_v37 = vpop.f32.mrf.mxu2 }
 0x719   :  { %v4382_v19 = vadd.f32 %v12917_v37, %v4263_v63  ;;  %v7826_v37 = vld [vmem:[%s14792_s5 + $0x3d0] sm:$0xff] }
 0x71a   :  { %v13025_v29 = vpop.f32.mrf.mxu1 }
 0x71c   :  { %v12971_v20 = vpop.f32.mrf.mxu0 }
 0x721   :  { %v12996_v48 = vpop.f32.mrf.mxu3 }
 0x722   :  { %v4339_v9 = vadd.f32 %v12996_v48, %v12859_v61  ;;  %v4932_v61 = vld [vmem:[%s14792_s5 + $0x110] sm:$0xff] }
 0x723   :  { %v12973_v31 = vpop.f32.mrf.mxu2  ;;  %v7802_v48 = vld [vmem:[%s14792_s5 + $0x310] sm:$0xff] }
 0x724   :  { %v4362_v26 = vadd.f32 %v13025_v29, %v4339_v9  ;;  %v4930_v29 = vld [vmem:[%s14792_s5 + $0x100] sm:$0xff]  ;;  %v7895_v9 = vld [vmem:[%s14792_s5 + $0x5f8] sm:$0xff] }
 0x725   :  { %v4519_v49 = vpop.f32.mrf.mxu1 }
 0x727   :  { %v13036_v52 = vpop.f32.mrf.mxu0 }
 0x72b   :  { %v4542_v18 = vpop.f32.mrf.mxu3 }
 0x72c   :  { %v4543_v36 = vadd.f32 %v4542_v18, %v4519_v49  ;;  %v4316_v18 = vadd.f32 %v12873_v25, %v4293_v6  ;;  %v7831_v25 = vld [vmem:[%s14792_s5 + $0x3f8] sm:$0xff]  ;;  %v7810_v49 = vld [vmem:[%s14792_s5 + $0x350] sm:$0xff]  ;;  %v7804_v6 = vld [vmem:[%s14792_s5 + $0x320] sm:$0xff] }
 0x72d   :  { %v13038_v21 = vpop.f32.mrf.mxu2  ;;  %5251 = vmatpush.msra.mxu0 %v7831_v25  ;;  %5236 = vmatpush.msrb.mxu2 %v7810_v49  ;;  %v7822_v49 = vld [vmem:[%s14792_s5 + $0x3b0] sm:$0xff] }
 0x72e   :  { %v4640_v44 = vadd.f32 %v4543_v36, %v4313_v28  ;;  %v4920_v36 = vld [vmem:[%s14792_s5 + $0xb0] sm:$0xff]  ;;  %v4589_v15 = vadd.f32 %v13038_v21, %v13036_v52  ;;  %v7805_v52 = vld [vmem:[%s14792_s5 + $0x328] sm:$0xff]  ;;  %v4359_v21 = vadd.f32 %v12969_v35, %v4336_v57  ;;  %v4934_v35 = vld [vmem:[%s14792_s5 + $0x120] sm:$0xff] }
 0x72f   :  { %v4522_v24 = vpop.f32.mrf.mxu1  ;;  %5252 = vmatpush.msra.mxu0 %v7830_v5  ;;  %5126 = vmatpush.msrb.mxu3 %v4920_v36  ;;  %v7819_v57 = vld [vmem:[%s14792_s5 + $0x398] sm:$0xff]  ;;  %v7818_v36 = vld [vmem:[%s14792_s5 + $0x390] sm:$0xff] }
 0x731   :  { %v13109_v39 = vpop.f32.mrf.mxu0  ;;  %5253 = vmatpush.msra.mxu0 %v7829_v50 }
 0x733   :  { %5254 = vmatpush.msra.mxu0 %v7828_v4 }
 0x735   :  { %v4545_v33 = vpop.f32.mrf.mxu3  ;;  %5255 = vmatpush.msra.mxu0 %v7827_v8 }
 0x736   :  { %v4546_v41 = vadd.f32 %v4545_v33, %v4522_v24  ;;  %v4937_v33 = vld [vmem:[%s14792_s5 + $0x138] sm:$0xff]  ;;  %v4936_v24 = vld [vmem:[%s14792_s5 + $0x130] sm:$0xff] }
 0x737   :  { %v13111_v45 = vpop.f32.mrf.mxu2  ;;  %5145 = vmatpush.msrb.mxu1 %v4937_v33  ;;  %5256 = vmatpush.msra.mxu0 %v7826_v37 }
 0x738   :  { %v4643_v23 = vadd.f32 %v4546_v41, %v4316_v18  ;;  %v4641_v41 = vadd.f32 %v4589_v15, %v4359_v21  ;;  %v4592_v17 = vadd.f32 %v13111_v45, %v13109_v39  ;;  %v4931_v39 = vld [vmem:[%s14792_s5 + $0x108] sm:$0xff] }
 0x739   :  { %5146 = vmatpush.msrb.mxu1 %v4936_v24  ;;  %v7801_v45 = vld [vmem:[%s14792_s5 + $0x308] sm:$0xff] }
 0x73a   :  { %v4634_v0 = vpop.f32.mrf.mxu1  ;;  %v7817_v24 = vld [vmem:[%s14792_s5 + $0x388] sm:$0xff] }
 0x73c   :  { %v4774_v40 = vpop.f32.mrf.mxu0 }
 0x73f   :  { %v13135_v10 = vpop.f32.mrf.mxu3 }
 0x740   :  { %v4635_v28 = vadd.f32 %v4634_v0, %v13135_v10  ;;  %v4405_v10 = vadd.f32 %v12915_v54, %v4382_v19  ;;  %v7824_v54 = vld [vmem:[%s14792_s5 + $0x3c0] sm:$0xff] }
 0x741   :  { %v4751_v11 = vpop.f32.mrf.mxu2 }
 0x742   :  { %v4775_v38 = vadd.f32 %v4774_v40, %v4751_v11  ;;  %v4919_v11 = vld [vmem:[%s14792_s5 + $0xa8] sm:$0xff] }
 0x743   :  { %5127 = vmatpush.msrb.mxu3 %v4919_v11  ;;  %v4893_v11 = vld [vmem:[#allocation3 + $0x30] ss:$8 sm:$0x7] }
 0x744   :  { %v4872_v30 = vadd.f32 %v4775_v38, %v4640_v44  ;;  %v13181_v47 = vpop.f32.mrf.mxu1  ;;  %v4935_v44 = vld [vmem:[%s14792_s5 + $0x128] sm:$0xff] }
 0x745   :  { %5147 = vmatpush.msrb.mxu1 %v4935_v44  ;;  %v7847_v44 = vld [vmem:[%s14792_s5 + $0x478] sm:$0xff] }
 0x746   :  { %v4878_v3 = vadd.f32 %v4872_v30, %v9597_v43  ;;  %v4777_v42 = vpop.f32.mrf.mxu0  ;;  %v7825_v30 = vld [vmem:[%s14792_s5 + $0x3c8] sm:$0xff] }
 0x747   :  { %5257 = vmatpush.msra.mxu0 %v7825_v30  ;;  %5148 = vmatpush.msrb.mxu1 %v4934_v35  ;;  %v4895_v30 = vld [vmem:[#allocation3 + $0x60] ss:$8 sm:$0x7] }
 0x748   :  { %4885 = vst [vmem:[#allocation3 + $0x90] sm:$0xff] %v4878_v3  ;;  %v4918_v3 = vld [vmem:[%s14792_s5 + $0xa0] sm:$0xff] }
 0x749   :  { %v13154_v12 = vpop.f32.mrf.mxu3  ;;  %5128 = vmatpush.msrb.mxu3 %v4918_v3  ;;  %5258 = vmatpush.msra.mxu0 %v7824_v54  ;;  %v7878_v3 = vld [vmem:[%s14792_s5 + $0x570] sm:$0xff]  ;;  %v7860_v54 = vld [vmem:[%s14792_s5 + $0x4e0] sm:$0xff] }
 0x74a   :  { %5149 = vmatpush.msrb.mxu1 %v4933_v59  ;;  %v5158_v59 = vld [vmem:[#allocation3 + $0x2] ss:$8 sm:$0x7] }
 0x74b   :  { %v4754_v13 = vpop.f32.mrf.mxu2 }
 0x74c   :  { %v4778_v27 = vadd.f32 %v4777_v42, %v4754_v13  ;;  %v4266_v42 = vadd.f32 %v12899_v62, %v12913_v32  ;;  %v4642_v13 = vadd.f32 %v4635_v28, %v4405_v10  ;;  %v7823_v32 = vld [vmem:[%s14792_s5 + $0x3b8] sm:$0xff]  ;;  %5150 = vmatpush.msrb.mxu1 %v4932_v61  ;;  %v7816_v28 = vld [vmem:[%s14792_s5 + $0x380] sm:$0xff]  ;;  %v7846_v10 = vld [vmem:[%s14792_s5 + $0x470] sm:$0xff] }
 0x74d   :  { %5259 = vmatpush.msra.mxu0 %v7823_v32  ;;  %v7858_v32 = vld [vmem:[%s14792_s5 + $0x4d0] sm:$0xff] }
 0x74e   :  { %v4875_v53 = vadd.f32 %v4778_v27, %v4643_v23  ;;  %v4917_v27 = vld [vmem:[%s14792_s5 + $0x98] sm:$0xff]  ;;  %5151 = vmatpush.msrb.mxu1 %v4931_v39  ;;  %v7840_v39 = vld [vmem:[%s14792_s5 + $0x440] sm:$0xff] }
 0x74f   :  { %5129 = vmatpush.msrb.mxu3 %v4917_v27  ;;  %5260 = vmatpush.msra.mxu0 %v7822_v49  ;;  %v7875_v27 = vld [vmem:[%s14792_s5 + $0x558] sm:$0xff]  ;;  %v7841_v49 = vld [vmem:[%s14792_s5 + $0x448] sm:$0xff] }
 0x750   :  { %v4881_v34 = vadd.f32 %v4875_v53, %v9597_v43  ;;  %v7809_v43 = vld [vmem:[%s14792_s5 + $0x348] sm:$0xff]  ;;  %v4385_v53 = vadd.f32 %v12973_v31, %v4266_v42  ;;  %5152 = vmatpush.msrb.mxu1 %v4930_v29  ;;  %v7876_v42 = vld [vmem:[%s14792_s5 + $0x560] sm:$0xff]  ;;  %v7838_v29 = vld [vmem:[%s14792_s5 + $0x430] sm:$0xff] }
 0x751   :  { %5237 = vmatpush.msrb.mxu2 %v7809_v43  ;;  %5130 = vmatpush.msrb.mxu3 %v4916_v1 }
 0x752   :  { %4888 = vst [vmem:[#allocation3 + $0xa8] sm:$0xf] %v4881_v34  ;;  %v4638_v34 = vadd.f32 %v13181_v47, %v13154_v12  ;;  %v7821_v12 = vld [vmem:[%s14792_s5 + $0x3a8] sm:$0xff]  ;;  %v4408_v43 = vadd.f32 %v12971_v20, %v4385_v53 }
 0x753   :  { %5238 = vmatpush.msrb.mxu2 %v7808_v46  ;;  %5131 = vmatpush.msrb.mxu3 %v4915_v22  ;;  %v4644_v46 = vadd.f32 %v4592_v17, %v4362_v26  ;;  %v5162_v53 = vld [vmem:[#allocation3 + $0x62] ss:$8 sm:$0x7]  ;;  %v7872_v26 = vld [vmem:[%s14792_s5 + $0x540] sm:$0xff] }
 0x754   :  { %v4820_v40 = vpop.f32.mrf.mxu3  ;;  %5261 = vmatpush.msra.mxu0 %v7821_v12  ;;  %v4645_v33 = vadd.f32 %v4638_v34, %v4408_v43  ;;  %v7874_v17 = vld [vmem:[%s14792_s5 + $0x550] sm:$0xff]  ;;  %v7857_v34 = vld [vmem:[%s14792_s5 + $0x4c8] sm:$0xff]  ;;  %v7892_v12 = vld [vmem:[%s14792_s5 + $0x5e0] sm:$0xff] }
 0x755   :  { %5239 = vmatpush.msrb.mxu2 %v7807_v60  ;;  %v4866_v38 = vpop.f32.mrf.mxu2  ;;  %5132 = vmatpush.msrb.mxu3 %v4914_v58  ;;  %v7893_v22 = vld [vmem:[%s14792_s5 + $0x5e8] sm:$0xff]  ;;  %v7839_v43 = vld [vmem:[%s14792_s5 + $0x438] sm:$0xff] }
 0x756   :  { %5262 = vmatpush.msra.mxu0 %v7820_v51  ;;  %v7891_v58 = vld [vmem:[%s14792_s5 + $0x5d8] sm:$0xff]  ;;  %v7837_v51 = vld [vmem:[%s14792_s5 + $0x428] sm:$0xff] }
 0x757   :  { %5240 = vmatpush.msrb.mxu2 %v7806_v2 }
 0x758   :  { %5263 = vmatpush.msra.mxu0 %v7819_v57 }
 0x759   :  { %5241 = vmatpush.msrb.mxu2 %v7805_v52 }
 0x75a   :  { %5264 = vmatpush.msra.mxu0 %v7818_v36 }
 0x75b   :  { %v4797_v55 = vpop.f32.mrf.mxu1  ;;  %5242 = vmatpush.msrb.mxu2 %v7804_v6  ;;  %v7845_v6 = vld [vmem:[%s14792_s5 + $0x468] sm:$0xff] }
 0x75c   :  { %v4821_v0 = vadd.f32 %v4820_v40, %v4797_v55  ;;  %v4843_v18 = vpop.f32.mrf.mxu0  ;;  %v4823_v50 = vpop.f32.mrf.mxu3  ;;  %5265 = vmatpush.msra.mxu0 %v7817_v24  ;;  %v4891_v40 = vld [vmem:[#allocation3] ss:$8 sm:$0x7] }
 0x75d   :  { %v4867_v23 = vadd.f32 %v4866_v38, %v4843_v18  ;;  %5243 = vmatpush.msrb.mxu2 %v7803_v7  ;;  %v4869_v4 = vpop.f32.mrf.mxu2  ;;  %v7862_v55 = vld [vmem:[%s14792_s5 + $0x4f0] sm:$0xff]  ;;  %v7844_v18 = vld [vmem:[%s14792_s5 + $0x460] sm:$0xff]  ;;  %v7869_v24 = vld [vmem:[%s14792_s5 + $0x528] sm:$0xff] }
 0x75e   :  { %v4873_v62 = vadd.f32 %v4821_v0, %v4641_v41  ;;  %5266 = vmatpush.msra.mxu0 %v7816_v28  ;;  %v7861_v41 = vld [vmem:[%s14792_s5 + $0x4e8] sm:$0xff]  ;;  %v7868_v28 = vld [vmem:[%s14792_s5 + $0x520] sm:$0xff] }
 0x75f   :  { %v4874_v25 = vadd.f32 %v4867_v23, %v4642_v13  ;;  %5244 = vmatpush.msrb.mxu2 %v7802_v48  ;;  %v7877_v0 = vld [vmem:[%s14792_s5 + $0x568] sm:$0xff]  ;;  %v7843_v13 = vld [vmem:[%s14792_s5 + $0x458] sm:$0xff] }
 0x760   :  { %v4879_v31 = vadd.f32 %v4873_v62, %v9600_v56  ;;  %v7859_v23 = vld [vmem:[%s14792_s5 + $0x4d8] sm:$0xff]  ;;  %v7842_v62 = vld [vmem:[%s14792_s5 + $0x450] sm:$0xff] }
 0x761   :  { %v4880_v5 = vadd.f32 %v4874_v25, %v9610_v14  ;;  %5245 = vmatpush.msrb.mxu2 %v7801_v45  ;;  %v5160_v7 = vld [vmem:[#allocation3 + $0x32] ss:$8 sm:$0x7] }
 0x762   :  { %4886 = vst [vmem:[#allocation3 + $0x98] sm:$0xff] %v4879_v31  ;;  %v7894_v31 = vld [vmem:[%s14792_s5 + $0x5f0] sm:$0xff]  ;;  %v7856_v45 = vld [vmem:[%s14792_s5 + $0x4c0] sm:$0xff] }
 0x763   :  { %4887 = vst [vmem:[#allocation3 + $0xa0] sm:$0xff] %v4880_v5  ;;  %v4800_v47 = vpop.f32.mrf.mxu1  ;;  %5246 = vmatpush.msrb.mxu2 %v7800_v16  ;;  %v7873_v5 = vld [vmem:[%s14792_s5 + $0x548] sm:$0xff]  ;;  %v7854_v16 = vld [vmem:[%s14792_s5 + $0x4b0] sm:$0xff] }
 0x764   :  { %v4824_v20 = vadd.f32 %v4823_v50, %v4800_v47  ;;  %v4846_v63 = vpop.f32.mrf.mxu0  ;;  %v7855_v50 = vld [vmem:[%s14792_s5 + $0x4b8] sm:$0xff] }
 0x765   :  { %v4870_v60 = vadd.f32 %v4869_v4, %v4846_v63  ;;  %v7871_v47 = vld [vmem:[%s14792_s5 + $0x538] sm:$0xff]  ;;  %v7870_v4 = vld [vmem:[%s14792_s5 + $0x530] sm:$0xff] }
 0x766   :  { %v4876_v8 = vadd.f32 %v4824_v20, %v4644_v46  ;;  %v5293_v46 = vld [vmem:[#allocation3 + $0x3] ss:$8 sm:$0x7] }
 0x767   :  { %v4877_v19 = vadd.f32 %v4870_v60, %v4645_v33  ;;  %v5295_v20 = vld [vmem:[#allocation3 + $0x33] ss:$8 sm:$0x7]  ;;  %v7890_v63 = vld [vmem:[%s14792_s5 + $0x5d0] sm:$0xff] }
 0x768   :  { %v4882_v15 = vadd.f32 %v4876_v8, %v9600_v56  ;;  %v7863_v56 = vld [vmem:[%s14792_s5 + $0x4f8] sm:$0xff]  ;;  %v7853_v33 = vld [vmem:[%s14792_s5 + $0x4a8] sm:$0xff] }
 0x769   :  { %v4883_v37 = vadd.f32 %v4877_v19, %v9610_v14  ;;  %v7879_v14 = vld [vmem:[%s14792_s5 + $0x578] sm:$0xff] }
 0x76a   :  { %v4953_v2 = vld [vmem:[#allocation3 + $0x91] ss:$8 sm:$0x7]  ;;  %4889 = vst [vmem:[#allocation3 + $0xb0] sm:$0xf] %v4882_v15 }
 0x76b   :  { %5013 = vst [vmem:[#allocation1 + $0x3] ss:$9 sm:$0xff] %v4953_v2  ;;  %v4897_v35 = vld [vmem:[#allocation3 + $0x90] ss:$8 sm:$0x7] }
 0x76c   :  { %4890 = vst [vmem:[#allocation3 + $0xb8] sm:$0xf] %v4883_v37  ;;  %v5164_v48 = vld [vmem:[#allocation3 + $0x92] ss:$8 sm:$0x7] }
 0x76d   :  { %v5297_v60 = vld [vmem:[#allocation3 + $0x63] ss:$8 sm:$0x7]  ;;  %v7836_v15 = vld [vmem:[%s14792_s5 + $0x420] sm:$0xff] }
 0x76e   :  { %v5299_v36 = vld [vmem:[#allocation3 + $0x93] ss:$8 sm:$0x7] }
 0x76f   :  { %v7889_v2 = vld [vmem:[%s14792_s5 + $0x5c8] sm:$0xff]  ;;  %v7852_v37 = vld [vmem:[%s14792_s5 + $0x4a0] sm:$0xff] }
 0x772   :  { %v5014_v52 = vld [vmem:[#allocation1] sm:$0xff]  ;;  %v5015_v21 = vld [vmem:[#allocation1 + $0x9] sm:$0xff]  ;;  %v5016_v38 = vld [vmem:[#allocation1 + $0x12] sm:$0xff] }
 0x773   :  { %5084 = vst [vmem:[#allocation1] ss:$9 sm:$0xff] %v4891_v40  ;;  %5036 = vmatmul.f32.vlgmr.msra.gmra.mxu3 %v5014_v52  ;;  %5056 = vmatmul.f32.vlgmr.msra.gmra.mxu1 %v5015_v21  ;;  %v7888_v40 = vld [vmem:[%s14792_s5 + $0x5c0] sm:$0xff]  ;;  %v7834_v52 = vld [vmem:[%s14792_s5 + $0x410] sm:$0xff] }
 0x774   :  { %5086 = vst [vmem:[#allocation1 + $0x1] ss:$9 sm:$0xff] %v4893_v11  ;;  %5076 = vmatmul.f32.vlgmr.msra.gmra.mxu2 %v5016_v38  ;;  %5271 = vmatpush.msra.mxu3 %v7847_v44  ;;  %v7835_v11 = vld [vmem:[%s14792_s5 + $0x418] sm:$0xff]  ;;  %v7850_v21 = vld [vmem:[%s14792_s5 + $0x490] sm:$0xff] }
 0x775   :  { %5088 = vst [vmem:[#allocation1 + $0x2] ss:$9 sm:$0xff] %v4895_v30  ;;  %5366 = vmatpush.msra.mxu1 %v7863_v56  ;;  %5386 = vmatpush.msra.mxu2 %v7879_v14  ;;  %v7851_v44 = vld [vmem:[%s14792_s5 + $0x498] sm:$0xff]  ;;  %v7866_v38 = vld [vmem:[%s14792_s5 + $0x510] sm:$0xff] }
 0x776   :  { %5090 = vst [vmem:[#allocation1 + $0x3] ss:$9 sm:$0xff] %v4897_v35  ;;  %5272 = vmatpush.msra.mxu3 %v7846_v10  ;;  %v7867_v56 = vld [vmem:[%s14792_s5 + $0x518] sm:$0xff]  ;;  %v7886_v30 = vld [vmem:[%s14792_s5 + $0x5b0] sm:$0xff]  ;;  %v7833_v10 = vld [vmem:[%s14792_s5 + $0x408] sm:$0xff] }
 0x777   :  { %5367 = vmatpush.msra.mxu1 %v7862_v55  ;;  %5387 = vmatpush.msra.mxu2 %v7878_v3  ;;  %v7887_v14 = vld [vmem:[%s14792_s5 + $0x5b8] sm:$0xff]  ;;  %v7849_v55 = vld [vmem:[%s14792_s5 + $0x488] sm:$0xff] }
 0x778   :  { %5273 = vmatpush.msra.mxu3 %v7845_v6  ;;  %v5428_v3 = vld [vmem:[#allocation3 + $0x4] ss:$8 sm:$0x7] }
 0x779   :  { %5368 = vmatpush.msra.mxu1 %v7861_v41  ;;  %5388 = vmatpush.msra.mxu2 %v7877_v0  ;;  %v7865_v35 = vld [vmem:[%s14792_s5 + $0x508] sm:$0xff]  ;;  %v7832_v41 = vld [vmem:[%s14792_s5 + $0x400] sm:$0xff] }
 0x77a   :  { %5274 = vmatpush.msra.mxu3 %v7844_v18  ;;  %v7885_v6 = vld [vmem:[%s14792_s5 + $0x5a8] sm:$0xff]  ;;  %v7848_v18 = vld [vmem:[%s14792_s5 + $0x480] sm:$0xff] }
 0x77b   :  { %5369 = vmatpush.msra.mxu1 %v7860_v54  ;;  %5389 = vmatpush.msra.mxu2 %v7876_v42  ;;  %v5430_v0 = vld [vmem:[#allocation3 + $0x34] ss:$8 sm:$0x7] }
 0x77c   :  { %5275 = vmatpush.msra.mxu3 %v7843_v13  ;;  %v7864_v54 = vld [vmem:[%s14792_s5 + $0x500] sm:$0xff] }
 0x77d   :  { %v5091_v25 = vld [vmem:[#allocation1] sm:$0xff]  ;;  %v5092_v1 = vld [vmem:[#allocation1 + $0x9] sm:$0xff]  ;;  %v5093_v61 = vld [vmem:[#allocation1 + $0x12] sm:$0xff]  ;;  %5370 = vmatpush.msra.mxu1 %v7859_v23  ;;  %5390 = vmatpush.msra.mxu2 %v7875_v27 }
 0x77e   :  { %5218 = vst [vmem:[#allocation1] ss:$9 sm:$0xff] %v5158_v59  ;;  %5113 = vmatmul.f32.vlgmr.msrb.gmra.mxu0 %v5091_v25  ;;  %5133 = vmatmul.f32.vlgmr.msrb.gmra.mxu3 %v5092_v1  ;;  %v7884_v42 = vld [vmem:[%s14792_s5 + $0x5a0] sm:$0xff]  ;;  %v5432_v59 = vld [vmem:[#allocation3 + $0x64] ss:$8 sm:$0x7] }
 0x77f   :  { %5220 = vst [vmem:[#allocation1 + $0x1] ss:$9 sm:$0xff] %v5160_v7  ;;  %5153 = vmatmul.f32.vlgmr.msrb.gmra.mxu1 %v5093_v61  ;;  %5406 = vmatpush.msrb.mxu0 %v7895_v9  ;;  %v5434_v7 = vld [vmem:[#allocation3 + $0x94] ss:$8 sm:$0x7]  ;;  %v7910_v25 = vld [vmem:[%s14792_s5 + $0x670] sm:$0xff] }
 0x780   :  { %5222 = vst [vmem:[#allocation1 + $0x2] ss:$9 sm:$0xff] %v5162_v53  ;;  %5276 = vmatpush.msra.mxu3 %v7842_v62  ;;  %5371 = vmatpush.msra.mxu1 %v7858_v32  ;;  %v7911_v9 = vld [vmem:[%s14792_s5 + $0x678] sm:$0xff]  ;;  %v7926_v1 = vld [vmem:[%s14792_s5 + $0x6f0] sm:$0xff] }
 0x781   :  { %5224 = vst [vmem:[#allocation1 + $0x3] ss:$9 sm:$0xff] %v5164_v48  ;;  %5391 = vmatpush.msra.mxu2 %v7874_v17  ;;  %5407 = vmatpush.msrb.mxu0 %v7894_v31  ;;  %v7927_v62 = vld [vmem:[%s14792_s5 + $0x6f8] sm:$0xff]  ;;  %v7942_v61 = vld [vmem:[%s14792_s5 + $0x770] sm:$0xff]  ;;  %v7909_v17 = vld [vmem:[%s14792_s5 + $0x668] sm:$0xff] }
 0x782   :  { %5277 = vmatpush.msra.mxu3 %v7841_v49  ;;  %5372 = vmatpush.msra.mxu1 %v7857_v34  ;;  %v7943_v32 = vld [vmem:[%s14792_s5 + $0x778] sm:$0xff]  ;;  %v7882_v48 = vld [vmem:[%s14792_s5 + $0x590] sm:$0xff]  ;;  %v7925_v31 = vld [vmem:[%s14792_s5 + $0x6e8] sm:$0xff] }
 0x783   :  { %5392 = vmatpush.msra.mxu2 %v7873_v5  ;;  %5408 = vmatpush.msrb.mxu0 %v7893_v22  ;;  %v7883_v53 = vld [vmem:[%s14792_s5 + $0x598] sm:$0xff]  ;;  %v7941_v49 = vld [vmem:[%s14792_s5 + $0x768] sm:$0xff]  ;;  %v7908_v5 = vld [vmem:[%s14792_s5 + $0x660] sm:$0xff] }
 0x784   :  { %5278 = vmatpush.msra.mxu3 %v7840_v39  ;;  %5373 = vmatpush.msra.mxu1 %v7856_v45  ;;  %v7881_v34 = vld [vmem:[%s14792_s5 + $0x588] sm:$0xff]  ;;  %v7924_v39 = vld [vmem:[%s14792_s5 + $0x6e0] sm:$0xff] }
 0x785   :  { %5393 = vmatpush.msra.mxu2 %v7872_v26  ;;  %5409 = vmatpush.msrb.mxu0 %v7892_v12  ;;  %v5563_v22 = vld [vmem:[#allocation3 + $0x5] ss:$8 sm:$0x7]  ;;  %v7940_v45 = vld [vmem:[%s14792_s5 + $0x760] sm:$0xff] }
 0x786   :  { %5279 = vmatpush.msra.mxu3 %v7839_v43  ;;  %5374 = vmatpush.msra.mxu1 %v7855_v50  ;;  %v5565_v26 = vld [vmem:[#allocation3 + $0x35] ss:$8 sm:$0x7] }
 0x787   :  { %5394 = vmatpush.msra.mxu2 %v7871_v47  ;;  %5410 = vmatpush.msrb.mxu0 %v7891_v58  ;;  %v7880_v12 = vld [vmem:[%s14792_s5 + $0x580] sm:$0xff]  ;;  %v7907_v43 = vld [vmem:[%s14792_s5 + $0x658] sm:$0xff] }
 0x788   :  { %v5225_v57 = vld [vmem:[#allocation1] sm:$0xff]  ;;  %v5226_v8 = vld [vmem:[#allocation1 + $0x9] sm:$0xff]  ;;  %v13442_v19 = vld [vmem:[#allocation1 + $0x12] sm:$0xff]  ;;  %5280 = vmatpush.msra.mxu3 %v7838_v29  ;;  %5375 = vmatpush.msra.mxu1 %v7854_v16 }
 0x789   :  { %5353 = vst [vmem:[#allocation1] ss:$9 sm:$0xff] %v5293_v46  ;;  %5247 = vmatmul.f32.vlgmr.msrb.gmra.mxu2 %v5225_v57  ;;  %5267 = vmatmul.f32.vlgmr.msra.gmra.mxu0 %v5226_v8  ;;  %v7923_v50 = vld [vmem:[%s14792_s5 + $0x6d8] sm:$0xff]  ;;  %v7905_v57 = vld [vmem:[%s14792_s5 + $0x648] sm:$0xff] }
 0x78a   :  { %5355 = vst [vmem:[#allocation1 + $0x1] ss:$9 sm:$0xff] %v5295_v20  ;;  %5395 = vmatpush.msra.mxu2 %v7870_v4  ;;  %5411 = vmatpush.msrb.mxu0 %v7890_v63  ;;  %v5567_v47 = vld [vmem:[#allocation3 + $0x65] ss:$8 sm:$0x7] }
 0x78b   :  { %5357 = vst [vmem:[#allocation1 + $0x2] ss:$9 sm:$0xff] %v5297_v60  ;;  %5281 = vmatpush.msra.mxu3 %v7837_v51  ;;  %5376 = vmatpush.msra.mxu1 %v7853_v33  ;;  %v5569_v46 = vld [vmem:[#allocation3 + $0x95] ss:$8 sm:$0x7]  ;;  %v7906_v63 = vld [vmem:[%s14792_s5 + $0x650] sm:$0xff] }
 0x78c   :  { %5359 = vst [vmem:[#allocation1 + $0x3] ss:$9 sm:$0xff] %v5299_v36  ;;  %5396 = vmatpush.msra.mxu2 %v7869_v24  ;;  %5412 = vmatpush.msrb.mxu0 %v7889_v2  ;;  %v7939_v4 = vld [vmem:[%s14792_s5 + $0x758] sm:$0xff]  ;;  %v7922_v51 = vld [vmem:[%s14792_s5 + $0x6d0] sm:$0xff]  ;;  %v7921_v8 = vld [vmem:[%s14792_s5 + $0x6c8] sm:$0xff] }
 0x78d   :  { %5282 = vmatpush.msra.mxu3 %v7836_v15  ;;  %5377 = vmatpush.msra.mxu1 %v7852_v37  ;;  %v7959_v20 = vld [vmem:[%s14792_s5 + $0x7f8] sm:$0xff]  ;;  %v7938_v33 = vld [vmem:[%s14792_s5 + $0x750] sm:$0xff]  ;;  %v7957_v36 = vld [vmem:[%s14792_s5 + $0x7e8] sm:$0xff] }
 0x78e   :  { %5397 = vmatpush.msra.mxu2 %v7868_v28  ;;  %5413 = vmatpush.msrb.mxu0 %v7888_v40  ;;  %v7958_v60 = vld [vmem:[%s14792_s5 + $0x7f0] sm:$0xff]  ;;  %v7904_v24 = vld [vmem:[%s14792_s5 + $0x640] sm:$0xff]  ;;  %v7903_v28 = vld [vmem:[%s14792_s5 + $0x638] sm:$0xff] }
 0x78f   :  { %5283 = vmatpush.msra.mxu3 %v7835_v11  ;;  %5378 = vmatpush.msra.mxu1 %v7851_v44  ;;  %v7920_v2 = vld [vmem:[%s14792_s5 + $0x6c0] sm:$0xff]  ;;  %v7919_v40 = vld [vmem:[%s14792_s5 + $0x6b8] sm:$0xff] }
 0x790   :  { %5398 = vmatpush.msra.mxu2 %v7867_v56  ;;  %5414 = vmatpush.msrb.mxu0 %v7887_v14  ;;  %v7936_v15 = vld [vmem:[%s14792_s5 + $0x740] sm:$0xff]  ;;  %v7935_v44 = vld [vmem:[%s14792_s5 + $0x738] sm:$0xff]  ;;  %v7902_v14 = vld [vmem:[%s14792_s5 + $0x630] sm:$0xff] }
 0x791   :  { %5284 = vmatpush.msra.mxu3 %v7834_v52  ;;  %5379 = vmatpush.msra.mxu1 %v7850_v21  ;;  %v7956_v37 = vld [vmem:[%s14792_s5 + $0x7e0] sm:$0xff]  ;;  %v7955_v56 = vld [vmem:[%s14792_s5 + $0x7d8] sm:$0xff]  ;;  %v7918_v21 = vld [vmem:[%s14792_s5 + $0x6b0] sm:$0xff] }
 0x792   :  { %5399 = vmatpush.msra.mxu2 %v7866_v38  ;;  %5415 = vmatpush.msrb.mxu0 %v7886_v30  ;;  %v5704_v11 = vld [vmem:[#allocation3 + $0x96] ss:$8 sm:$0x7]  ;;  %v7934_v38 = vld [vmem:[%s14792_s5 + $0x730] sm:$0xff] }
 0x793   :  { %v5360_v13 = vld [vmem:[#allocation1] sm:$0xff]  ;;  %v5361_v23 = vld [vmem:[#allocation1 + $0x9] sm:$0xff]  ;;  %v13510_v27 = vld [vmem:[#allocation1 + $0x12] sm:$0xff]  ;;  %5285 = vmatpush.msra.mxu3 %v7833_v10  ;;  %5380 = vmatpush.msra.mxu1 %v7849_v55 }
 0x794   :  { %5488 = vst [vmem:[#allocation1] ss:$9 sm:$0xff] %v5428_v3  ;;  %5400 = vmatpush.msra.mxu2 %v7865_v35  ;;  %5416 = vmatpush.msrb.mxu0 %v7885_v6  ;;  %v5698_v52 = vld [vmem:[#allocation3 + $0x6] ss:$8 sm:$0x7] }
 0x795   :  { %5490 = vst [vmem:[#allocation1 + $0x1] ss:$9 sm:$0xff] %v5430_v0  ;;  %5286 = vmatpush.msra.mxu3 %v7832_v41  ;;  %5381 = vmatpush.msra.mxu1 %v7848_v18  ;;  %v7954_v30 = vld [vmem:[%s14792_s5 + $0x7d0] sm:$0xff]  ;;  %v5700_v10 = vld [vmem:[#allocation3 + $0x36] ss:$8 sm:$0x7] }
 0x796   :  { %5492 = vst [vmem:[#allocation1 + $0x2] ss:$9 sm:$0xff] %v5432_v59  ;;  %5401 = vmatpush.msra.mxu2 %v7864_v54  ;;  %5417 = vmatpush.msrb.mxu0 %v7884_v42  ;;  %v5702_v6 = vld [vmem:[#allocation3 + $0x66] ss:$8 sm:$0x7]  ;;  %v7900_v42 = vld [vmem:[%s14792_s5 + $0x620] sm:$0xff] }
 0x797   :  { %5494 = vst [vmem:[#allocation1 + $0x3] ss:$9 sm:$0xff] %v5434_v7  ;;  %5287 = vmatmul.f32.vlgmr.msra.gmra.mxu3 %v13442_v19  ;;  %5382 = vmatmul.f32.vlgmr.msra.gmra.mxu1 %v5360_v13  ;;  %v7937_v19 = vld [vmem:[%s14792_s5 + $0x748] sm:$0xff]  ;;  %v7916_v13 = vld [vmem:[%s14792_s5 + $0x6a0] sm:$0xff]  ;;  %v7899_v59 = vld [vmem:[%s14792_s5 + $0x618] sm:$0xff] }
 0x798   :  { %5402 = vmatmul.f32.vlgmr.msra.gmra.mxu2 %v5361_v23  ;;  %5501 = vmatpush.msrb.mxu3 %v7911_v9  ;;  %v7901_v41 = vld [vmem:[%s14792_s5 + $0x628] sm:$0xff]  ;;  %v7932_v23 = vld [vmem:[%s14792_s5 + $0x720] sm:$0xff]  ;;  %v7915_v7 = vld [vmem:[%s14792_s5 + $0x698] sm:$0xff] }
 0x799   :  { %5521 = vmatpush.msrb.mxu1 %v7927_v62  ;;  %5541 = vmatpush.msrb.mxu2 %v7943_v32  ;;  %v7917_v0 = vld [vmem:[%s14792_s5 + $0x6a8] sm:$0xff]  ;;  %v7931_v9 = vld [vmem:[%s14792_s5 + $0x718] sm:$0xff]  ;;  %v7898_v32 = vld [vmem:[%s14792_s5 + $0x610] sm:$0xff] }
 0x79a   :  { %5418 = vmatpush.msrb.mxu0 %v7883_v53  ;;  %5502 = vmatpush.msrb.mxu3 %v7910_v25  ;;  %v7933_v18 = vld [vmem:[%s14792_s5 + $0x728] sm:$0xff]  ;;  %v7951_v62 = vld [vmem:[%s14792_s5 + $0x7b8] sm:$0xff]  ;;  %v7914_v53 = vld [vmem:[%s14792_s5 + $0x690] sm:$0xff] }
 0x79b   :  { %5522 = vmatpush.msrb.mxu1 %v7926_v1  ;;  %5542 = vmatpush.msrb.mxu2 %v7942_v61  ;;  %v7953_v54 = vld [vmem:[%s14792_s5 + $0x7c8] sm:$0xff]  ;;  %v7930_v25 = vld [vmem:[%s14792_s5 + $0x710] sm:$0xff] }
 0x79c   :  { %5419 = vmatpush.msrb.mxu0 %v7882_v48  ;;  %5503 = vmatpush.msrb.mxu3 %v7909_v17  ;;  %v7950_v1 = vld [vmem:[%s14792_s5 + $0x7b0] sm:$0xff]  ;;  %v7897_v61 = vld [vmem:[%s14792_s5 + $0x608] sm:$0xff] }
 0x79d   :  { %5523 = vmatpush.msrb.mxu1 %v7925_v31  ;;  %5543 = vmatpush.msrb.mxu2 %v7941_v49  ;;  %v7913_v48 = vld [vmem:[%s14792_s5 + $0x688] sm:$0xff] }
 0x79e   :  { %v13567_v58 = vld [vmem:[#allocation1] sm:$0xff]  ;;  %v13569_v29 = vld [vmem:[#allocation1 + $0x9] sm:$0xff]  ;;  %v13571_v16 = vld [vmem:[#allocation1 + $0x12] sm:$0xff]  ;;  %5420 = vmatpush.msrb.mxu0 %v7881_v34  ;;  %5504 = vmatpush.msrb.mxu3 %v7908_v5 }
 0x79f   :  { %5623 = vst [vmem:[#allocation1] ss:$9 sm:$0xff] %v5563_v22  ;;  %5524 = vmatpush.msrb.mxu1 %v7924_v39  ;;  %5544 = vmatpush.msrb.mxu2 %v7940_v45  ;;  %v7929_v17 = vld [vmem:[%s14792_s5 + $0x708] sm:$0xff]  ;;  %v7896_v34 = vld [vmem:[%s14792_s5 + $0x600] sm:$0xff] }
 0x7a0   :  { %5625 = vst [vmem:[#allocation1 + $0x1] ss:$9 sm:$0xff] %v5565_v26  ;;  %5421 = vmatpush.msrb.mxu0 %v7880_v12  ;;  %5505 = vmatpush.msrb.mxu3 %v7907_v43  ;;  %v7949_v31 = vld [vmem:[%s14792_s5 + $0x7a8] sm:$0xff]  ;;  %v7912_v5 = vld [vmem:[%s14792_s5 + $0x680] sm:$0xff] }
 0x7a1   :  { %5627 = vst [vmem:[#allocation1 + $0x2] ss:$9 sm:$0xff] %v5567_v47  ;;  %5422 = vmatmul.f32.vlgmr.msrb.gmra.mxu0 %v13510_v27  ;;  %5525 = vmatpush.msrb.mxu1 %v7923_v50  ;;  %v7952_v27 = vld [vmem:[%s14792_s5 + $0x7c0] sm:$0xff]  ;;  %v5833_v49 = vld [vmem:[#allocation3 + $0x7] ss:$8 sm:$0x7] }
 0x7a2   :  { %5629 = vst [vmem:[#allocation1 + $0x3] ss:$9 sm:$0xff] %v5569_v46  ;;  %5545 = vmatpush.msrb.mxu2 %v7939_v4  ;;  %5636 = vmatpush.msra.mxu0 %v7959_v20  ;;  %v5835_v39 = vld [vmem:[#allocation3 + $0x37] ss:$8 sm:$0x7] }
 0x7a3   :  { %5506 = vmatpush.msrb.mxu3 %v7906_v63  ;;  %5526 = vmatpush.msrb.mxu1 %v7922_v51  ;;  %v7928_v45 = vld [vmem:[%s14792_s5 + $0x700] sm:$0xff]  ;;  %v5837_v43 = vld [vmem:[#allocation3 + $0x67] ss:$8 sm:$0x7] }
 0x7a4   :  { %5546 = vmatpush.msrb.mxu2 %v7938_v33  ;;  %5637 = vmatpush.msra.mxu0 %v7958_v60  ;;  %v7948_v26 = vld [vmem:[%s14792_s5 + $0x7a0] sm:$0xff]  ;;  %v7975_v46 = vld [vmem:[%s14792_s5 + $0x878] sm:$0xff]  ;;  %v7974_v51 = vld [vmem:[%s14792_s5 + $0x870] sm:$0xff] }
 0x7a5   :  { %5507 = vmatpush.msrb.mxu3 %v7905_v57  ;;  %5527 = vmatpush.msrb.mxu1 %v7921_v8  ;;  %v5839_v47 = vld [vmem:[#allocation3 + $0x97] ss:$8 sm:$0x7]  ;;  %v7990_v33 = vld [vmem:[%s14792_s5 + $0x8f0] sm:$0xff] }
 0x7a6   :  { %5547 = vmatpush.msrb.mxu2 %v7937_v19  ;;  %5638 = vmatpush.msra.mxu0 %v7957_v36  ;;  %v7991_v4 = vld [vmem:[%s14792_s5 + $0x8f8] sm:$0xff]  ;;  %v7989_v60 = vld [vmem:[%s14792_s5 + $0x8e8] sm:$0xff]  ;;  %v7972_v19 = vld [vmem:[%s14792_s5 + $0x860] sm:$0xff] }
 0x7a7   :  { %5508 = vmatpush.msrb.mxu3 %v7904_v24  ;;  %5528 = vmatpush.msrb.mxu1 %v7920_v2  ;;  %v8007_v20 = vld [vmem:[%s14792_s5 + $0x978] sm:$0xff]  ;;  %v8005_v57 = vld [vmem:[%s14792_s5 + $0x968] sm:$0xff]  ;;  %v7988_v36 = vld [vmem:[%s14792_s5 + $0x8e0] sm:$0xff] }
 0x7a8   :  { %5548 = vmatpush.msrb.mxu2 %v7936_v15  ;;  %5639 = vmatpush.msra.mxu0 %v7956_v37  ;;  %v7947_v63 = vld [vmem:[%s14792_s5 + $0x798] sm:$0xff]  ;;  %v7945_v8 = vld [vmem:[%s14792_s5 + $0x788] sm:$0xff]  ;;  %v8004_v24 = vld [vmem:[%s14792_s5 + $0x960] sm:$0xff] }
 0x7a9   :  { %v13640_v55 = vld [vmem:[#allocation1] sm:$0xff]  ;;  %v13642_v3 = vld [vmem:[#allocation1 + $0x9] sm:$0xff]  ;;  %v13644_v35 = vld [vmem:[#allocation1 + $0x12] sm:$0xff]  ;;  %5509 = vmatpush.msrb.mxu3 %v7903_v28  ;;  %5529 = vmatpush.msrb.mxu1 %v7919_v40 }
 0x7aa   :  { %5764 = vst [vmem:[#allocation1 + $0x3] ss:$9 sm:$0xff] %v5704_v11  ;;  %5549 = vmatpush.msrb.mxu2 %v7935_v44  ;;  %5640 = vmatpush.msra.mxu0 %v7955_v56  ;;  %v7944_v2 = vld [vmem:[%s14792_s5 + $0x780] sm:$0xff]  ;;  %v7971_v15 = vld [vmem:[%s14792_s5 + $0x858] sm:$0xff] }
 0x7ab   :  { %5758 = vst [vmem:[#allocation1] ss:$9 sm:$0xff] %v5698_v52  ;;  %5510 = vmatpush.msrb.mxu3 %v7902_v14  ;;  %5530 = vmatpush.msrb.mxu1 %v7918_v21  ;;  %v7987_v37 = vld [vmem:[%s14792_s5 + $0x8d8] sm:$0xff]  ;;  %v5968_v28 = vld [vmem:[#allocation3 + $0x18] ss:$8 sm:$0x7] }
 0x7ac   :  { %5760 = vst [vmem:[#allocation1 + $0x1] ss:$9 sm:$0xff] %v5700_v10  ;;  %5550 = vmatpush.msrb.mxu2 %v7934_v38  ;;  %5641 = vmatpush.msra.mxu0 %v7954_v30  ;;  %v8003_v40 = vld [vmem:[%s14792_s5 + $0x958] sm:$0xff]  ;;  %v7970_v14 = vld [vmem:[%s14792_s5 + $0x850] sm:$0xff] }
 0x7ad   :  { %5762 = vst [vmem:[#allocation1 + $0x2] ss:$9 sm:$0xff] %v5702_v6  ;;  %5511 = vmatpush.msrb.mxu3 %v7901_v41  ;;  %5531 = vmatpush.msrb.mxu1 %v7917_v0  ;;  %v8023_v11 = vld [vmem:[%s14792_s5 + $0x9f8] sm:$0xff]  ;;  %v7986_v52 = vld [vmem:[%s14792_s5 + $0x8d0] sm:$0xff]  ;;  %v7969_v0 = vld [vmem:[%s14792_s5 + $0x848] sm:$0xff] }
 0x7ae   :  { %5551 = vmatpush.msrb.mxu2 %v7933_v18  ;;  %5642 = vmatpush.msra.mxu0 %v7953_v54  ;;  %v5970_v56 = vld [vmem:[#allocation3 + $0x48] ss:$8 sm:$0x7]  ;;  %v8001_v18 = vld [vmem:[%s14792_s5 + $0x948] sm:$0xff] }
 0x7af   :  { %5512 = vmatpush.msrb.mxu3 %v7900_v42  ;;  %5532 = vmatpush.msrb.mxu1 %v7916_v13  ;;  %v5972_v38 = vld [vmem:[#allocation3 + $0x78] ss:$8 sm:$0x7] }
 0x7b0   :  { %5552 = vmatpush.msrb.mxu2 %v7932_v23  ;;  %5643 = vmatpush.msra.mxu0 %v7952_v27  ;;  %v8002_v30 = vld [vmem:[%s14792_s5 + $0x950] sm:$0xff]  ;;  %v8021_v54 = vld [vmem:[%s14792_s5 + $0x9e8] sm:$0xff]  ;;  %v7968_v42 = vld [vmem:[%s14792_s5 + $0x840] sm:$0xff] }
 0x7b1   :  { %5513 = vmatpush.msrb.mxu3 %v7899_v59  ;;  %5533 = vmatpush.msrb.mxu1 %v7915_v7  ;;  %v8022_v10 = vld [vmem:[%s14792_s5 + $0x9f0] sm:$0xff]  ;;  %v7984_v13 = vld [vmem:[%s14792_s5 + $0x8c0] sm:$0xff]  ;;  %v7967_v59 = vld [vmem:[%s14792_s5 + $0x838] sm:$0xff] }
 0x7b2   :  { %5553 = vmatpush.msrb.mxu2 %v7931_v9  ;;  %5644 = vmatpush.msra.mxu0 %v7951_v62  ;;  %v5974_v41 = vld [vmem:[#allocation3 + $0xa8] ss:$8 sm:$0x7] }
 0x7b3   :  { %5514 = vmatpush.msrb.mxu3 %v7898_v32  ;;  %5534 = vmatpush.msrb.mxu1 %v7914_v53  ;;  %v8000_v23 = vld [vmem:[%s14792_s5 + $0x940] sm:$0xff]  ;;  %v7983_v7 = vld [vmem:[%s14792_s5 + $0x8b8] sm:$0xff]  ;;  %v7966_v32 = vld [vmem:[%s14792_s5 + $0x830] sm:$0xff] }
 0x7b4   :  { %5554 = vmatpush.msrb.mxu2 %v7930_v25  ;;  %5645 = vmatpush.msra.mxu0 %v7950_v1  ;;  %v13712_v22 = vld [vmem:[#allocation1] sm:$0xff]  ;;  %v13720_v12 = vld [vmem:[#allocation1 + $0x9] sm:$0xff]  ;;  %v13722_v50 = vld [vmem:[#allocation1 + $0x12] sm:$0xff] }
 0x7b5   :  { %5515 = vmatpush.msrb.mxu3 %v7897_v61  ;;  %5535 = vmatpush.msrb.mxu1 %v7913_v48  ;;  %5893 = vst [vmem:[#allocation1] ss:$9 sm:$0xff] %v5833_v49  ;;  %v8020_v27 = vld [vmem:[%s14792_s5 + $0x9e0] sm:$0xff]  ;;  %v7999_v9 = vld [vmem:[%s14792_s5 + $0x938] sm:$0xff]  ;;  %v7982_v53 = vld [vmem:[%s14792_s5 + $0x8b0] sm:$0xff] }
 0x7b6   :  { %5555 = vmatpush.msrb.mxu2 %v7929_v17  ;;  %5646 = vmatpush.msra.mxu0 %v7949_v31  ;;  %5895 = vst [vmem:[#allocation1 + $0x1] ss:$9 sm:$0xff] %v5835_v39  ;;  %v8019_v62 = vld [vmem:[%s14792_s5 + $0x9d8] sm:$0xff]  ;;  %v7998_v25 = vld [vmem:[%s14792_s5 + $0x930] sm:$0xff]  ;;  %v7965_v61 = vld [vmem:[%s14792_s5 + $0x828] sm:$0xff] }
 0x7b7   :  { %5516 = vmatpush.msrb.mxu3 %v7896_v34  ;;  %5536 = vmatpush.msrb.mxu1 %v7912_v5  ;;  %5897 = vst [vmem:[#allocation1 + $0x2] ss:$9 sm:$0xff] %v5837_v43  ;;  %v8018_v1 = vld [vmem:[%s14792_s5 + $0x9d0] sm:$0xff]  ;;  %v7981_v48 = vld [vmem:[%s14792_s5 + $0x8a8] sm:$0xff]  ;;  %v7964_v34 = vld [vmem:[%s14792_s5 + $0x820] sm:$0xff] }
 0x7b8   :  { %5556 = vmatpush.msrb.mxu2 %v7928_v45  ;;  %5647 = vmatpush.msra.mxu0 %v7948_v26  ;;  %5899 = vst [vmem:[#allocation1 + $0x3] ss:$9 sm:$0xff] %v5839_v47  ;;  %v7997_v17 = vld [vmem:[%s14792_s5 + $0x928] sm:$0xff]  ;;  %v7980_v5 = vld [vmem:[%s14792_s5 + $0x8a0] sm:$0xff] }
 0x7b9   :  { %5517 = vmatmul.f32.vlgmr.msrb.gmra.mxu3 %v13567_v58  ;;  %5537 = vmatmul.f32.vlgmr.msrb.gmra.mxu1 %v13569_v29  ;;  %v8006_v58 = vld [vmem:[%s14792_s5 + $0x970] sm:$0xff]  ;;  %v8017_v31 = vld [vmem:[%s14792_s5 + $0x9c8] sm:$0xff]  ;;  %v7996_v26 = vld [vmem:[%s14792_s5 + $0x920] sm:$0xff] }
 0x7ba   :  { %5557 = vmatmul.f32.vlgmr.msrb.gmra.mxu2 %v13571_v16  ;;  %5656 = vmatpush.msra.mxu3 %v7975_v46  ;;  %v7946_v29 = vld [vmem:[%s14792_s5 + $0x790] sm:$0xff]  ;;  %v7973_v16 = vld [vmem:[%s14792_s5 + $0x868] sm:$0xff]  ;;  %v8016_v43 = vld [vmem:[%s14792_s5 + $0x9c0] sm:$0xff] }
 0x7bb   :  { %5676 = vmatpush.msra.mxu1 %v7991_v4  ;;  %5771 = vmatpush.msra.mxu2 %v8007_v20  ;;  %v6103_v49 = vld [vmem:[#allocation3 + $0x19] ss:$8 sm:$0x7]  ;;  %v7963_v4 = vld [vmem:[%s14792_s5 + $0x818] sm:$0xff] }
 0x7bc   :  { %5648 = vmatpush.msra.mxu0 %v7947_v63  ;;  %5657 = vmatpush.msra.mxu3 %v7974_v51  ;;  %v6105_v45 = vld [vmem:[#allocation3 + $0x49] ss:$8 sm:$0x7] }
 0x7bd   :  { %5677 = vmatpush.msra.mxu1 %v7990_v33  ;;  %5772 = vmatpush.msra.mxu2 %v8006_v58  ;;  %v6107_v46 = vld [vmem:[#allocation3 + $0x79] ss:$8 sm:$0x7]  ;;  %v7979_v20 = vld [vmem:[%s14792_s5 + $0x898] sm:$0xff] }
 0x7be   :  { %5649 = vmatpush.msra.mxu0 %v7946_v29  ;;  %5658 = vmatpush.msra.mxu3 %v7973_v16  ;;  %v6109_v51 = vld [vmem:[#allocation3 + $0xa9] ss:$8 sm:$0x7] }
 0x7bf   :  { %5678 = vmatpush.msra.mxu1 %v7989_v60  ;;  %5773 = vmatpush.msra.mxu2 %v8005_v57  ;;  %v13787_v44 = vld [vmem:[#allocation1] sm:$0xff]  ;;  %v13795_v21 = vld [vmem:[#allocation1 + $0x9] sm:$0xff]  ;;  %v13804_v6 = vld [vmem:[#allocation1 + $0x12] sm:$0xff] }
 0x7c0   :  { %5650 = vmatpush.msra.mxu0 %v7945_v8  ;;  %5659 = vmatpush.msra.mxu3 %v7972_v19  ;;  %6028 = vst [vmem:[#allocation1] ss:$9 sm:$0xff] %v5968_v28  ;;  %v7995_v33 = vld [vmem:[%s14792_s5 + $0x918] sm:$0xff]  ;;  %v7962_v29 = vld [vmem:[%s14792_s5 + $0x810] sm:$0xff]  ;;  %v7961_v8 = vld [vmem:[%s14792_s5 + $0x808] sm:$0xff] }
 0x7c1   :  { %5679 = vmatpush.msra.mxu1 %v7988_v36  ;;  %5774 = vmatpush.msra.mxu2 %v8004_v24  ;;  %6030 = vst [vmem:[#allocation1 + $0x1] ss:$9 sm:$0xff] %v5970_v56  ;;  %v8015_v58 = vld [vmem:[%s14792_s5 + $0x9b8] sm:$0xff]  ;;  %v7978_v16 = vld [vmem:[%s14792_s5 + $0x890] sm:$0xff]  ;;  %v7977_v19 = vld [vmem:[%s14792_s5 + $0x888] sm:$0xff] }
 0x7c2   :  { %5651 = vmatpush.msra.mxu0 %v7944_v2  ;;  %5660 = vmatpush.msra.mxu3 %v7971_v15  ;;  %6032 = vst [vmem:[#allocation1 + $0x2] ss:$9 sm:$0xff] %v5972_v38  ;;  %v7994_v60 = vld [vmem:[%s14792_s5 + $0x910] sm:$0xff]  ;;  %v7993_v36 = vld [vmem:[%s14792_s5 + $0x908] sm:$0xff]  ;;  %v7960_v2 = vld [vmem:[%s14792_s5 + $0x800] sm:$0xff] }
 0x7c3   :  { %5652 = vmatmul.f32.vlgmr.msra.gmra.mxu0 %v13640_v55  ;;  %5680 = vmatpush.msra.mxu1 %v7987_v37  ;;  %v7985_v55 = vld [vmem:[%s14792_s5 + $0x8c8] sm:$0xff]  ;;  %6034 = vst [vmem:[#allocation1 + $0x3] ss:$9 sm:$0xff] %v5974_v41  ;;  %v8014_v57 = vld [vmem:[%s14792_s5 + $0x9b0] sm:$0xff]  ;;  %v7976_v15 = vld [vmem:[%s14792_s5 + $0x880] sm:$0xff] }
 0x7c4   :  { %5775 = vmatpush.msra.mxu2 %v8003_v40  ;;  %5791 = vmatpush.msrb.mxu0 %v8023_v11  ;;  %v8013_v24 = vld [vmem:[%s14792_s5 + $0x9a8] sm:$0xff]  ;;  %v7992_v37 = vld [vmem:[%s14792_s5 + $0x900] sm:$0xff]  ;;  %v8039_v40 = vld [vmem:[%s14792_s5 + $0xa78] sm:$0xff] }
 0x7c5   :  { %5661 = vmatpush.msra.mxu3 %v7970_v14  ;;  %5681 = vmatpush.msra.mxu1 %v7986_v52  ;;  %v8012_v28 = vld [vmem:[%s14792_s5 + $0x9a0] sm:$0xff]  ;;  %v8055_v56 = vld [vmem:[%s14792_s5 + $0xaf8] sm:$0xff] }
 0x7c6   :  { %5776 = vmatpush.msra.mxu2 %v8002_v30  ;;  %5792 = vmatpush.msrb.mxu0 %v8022_v10  ;;  %v6238_v11 = vld [vmem:[#allocation3 + $0x1a] ss:$8 sm:$0x7]  ;;  %v8071_v14 = vld [vmem:[%s14792_s5 + $0xb78] sm:$0xff] }
 0x7c7   :  { %5662 = vmatpush.msra.mxu3 %v7969_v0  ;;  %5682 = vmatpush.msra.mxu1 %v7985_v55  ;;  %v8011_v52 = vld [vmem:[%s14792_s5 + $0x998] sm:$0xff]  ;;  %v8038_v30 = vld [vmem:[%s14792_s5 + $0xa70] sm:$0xff] }
 0x7c8   :  { %5777 = vmatpush.msra.mxu2 %v8001_v18  ;;  %5793 = vmatpush.msrb.mxu0 %v8021_v54  ;;  %v6240_v38 = vld [vmem:[#allocation3 + $0x4a] ss:$8 sm:$0x7] }
 0x7c9   :  { %5663 = vmatpush.msra.mxu3 %v7968_v42  ;;  %5683 = vmatpush.msra.mxu1 %v7984_v13  ;;  %v8054_v10 = vld [vmem:[%s14792_s5 + $0xaf0] sm:$0xff]  ;;  %v8053_v42 = vld [vmem:[%s14792_s5 + $0xae8] sm:$0xff] }
 0x7ca   :  { %5778 = vmatpush.msra.mxu2 %v8000_v23  ;;  %5794 = vmatpush.msrb.mxu0 %v8020_v27  ;;  %v13872_v39 = vld [vmem:[#allocation1] sm:$0xff]  ;;  %v13880_v47 = vld [vmem:[#allocation1 + $0x9] sm:$0xff]  ;;  %v13888_v63 = vld [vmem:[#allocation1 + $0x12] sm:$0xff] }
 0x7cb   :  { %5664 = vmatpush.msra.mxu3 %v7967_v59  ;;  %5684 = vmatpush.msra.mxu1 %v7983_v7  ;;  %6163 = vst [vmem:[#allocation1] ss:$9 sm:$0xff] %v6103_v49  ;;  %v6242_v0 = vld [vmem:[#allocation3 + $0x7a] ss:$8 sm:$0x7] }
 0x7cc   :  { %5779 = vmatpush.msra.mxu2 %v7999_v9  ;;  %5795 = vmatpush.msrb.mxu0 %v8019_v62  ;;  %6165 = vst [vmem:[#allocation1 + $0x1] ss:$9 sm:$0xff] %v6105_v45  ;;  %v6244_v18 = vld [vmem:[#allocation3 + $0xaa] ss:$8 sm:$0x7]  ;;  %v8069_v13 = vld [vmem:[%s14792_s5 + $0xb68] sm:$0xff] }
 0x7cd   :  { %5665 = vmatpush.msra.mxu3 %v7966_v32  ;;  %5685 = vmatpush.msra.mxu1 %v7982_v53  ;;  %6167 = vst [vmem:[#allocation1 + $0x2] ss:$9 sm:$0xff] %v6107_v46  ;;  %v8010_v54 = vld [vmem:[%s14792_s5 + $0x990] sm:$0xff]  ;;  %v8009_v23 = vld [vmem:[%s14792_s5 + $0x988] sm:$0xff]  ;;  %v8036_v27 = vld [vmem:[%s14792_s5 + $0xa60] sm:$0xff] }
 0x7ce   :  { %5780 = vmatpush.msra.mxu2 %v7998_v25  ;;  %5796 = vmatpush.msrb.mxu0 %v8018_v1  ;;  %6169 = vst [vmem:[#allocation1 + $0x3] ss:$9 sm:$0xff] %v6109_v51  ;;  %v8052_v59 = vld [vmem:[%s14792_s5 + $0xae0] sm:$0xff]  ;;  %v8035_v62 = vld [vmem:[%s14792_s5 + $0xa58] sm:$0xff]  ;;  %v8034_v1 = vld [vmem:[%s14792_s5 + $0xa50] sm:$0xff] }
 0x7cf   :  { %5666 = vmatpush.msra.mxu3 %v7965_v61  ;;  %5686 = vmatpush.msra.mxu1 %v7981_v48  ;;  %v8068_v7 = vld [vmem:[%s14792_s5 + $0xb60] sm:$0xff]  ;;  %v8051_v32 = vld [vmem:[%s14792_s5 + $0xad8] sm:$0xff]  ;;  %v8050_v61 = vld [vmem:[%s14792_s5 + $0xad0] sm:$0xff] }
 0x7d0   :  { %5781 = vmatpush.msra.mxu2 %v7997_v17  ;;  %5797 = vmatpush.msrb.mxu0 %v8017_v31  ;;  %v8008_v9 = vld [vmem:[%s14792_s5 + $0x980] sm:$0xff]  ;;  %v8067_v53 = vld [vmem:[%s14792_s5 + $0xb58] sm:$0xff]  ;;  %v8066_v48 = vld [vmem:[%s14792_s5 + $0xb50] sm:$0xff] }
 0x7d1   :  { %5667 = vmatpush.msra.mxu3 %v7964_v34  ;;  %5687 = vmatpush.msra.mxu1 %v7980_v5  ;;  %v8087_v25 = vld [vmem:[%s14792_s5 + $0xbf8] sm:$0xff]  ;;  %v8086_v17 = vld [vmem:[%s14792_s5 + $0xbf0] sm:$0xff]  ;;  %v8033_v31 = vld [vmem:[%s14792_s5 + $0xa48] sm:$0xff] }
 0x7d2   :  { %5782 = vmatpush.msra.mxu2 %v7996_v26  ;;  %5798 = vmatpush.msrb.mxu0 %v8016_v43  ;;  %v8049_v49 = vld [vmem:[%s14792_s5 + $0xac8] sm:$0xff]  ;;  %v8032_v45 = vld [vmem:[%s14792_s5 + $0xa40] sm:$0xff] }
 0x7d3   :  { %5668 = vmatpush.msra.mxu3 %v7963_v4  ;;  %5688 = vmatpush.msra.mxu1 %v7979_v20  ;;  %v8085_v34 = vld [vmem:[%s14792_s5 + $0xbe8] sm:$0xff]  ;;  %v8048_v26 = vld [vmem:[%s14792_s5 + $0xac0] sm:$0xff] }
 0x7d4   :  { %5783 = vmatpush.msra.mxu2 %v7995_v33  ;;  %5799 = vmatpush.msrb.mxu0 %v8015_v58  ;;  %v6373_v5 = vld [vmem:[#allocation3 + $0x1b] ss:$8 sm:$0x7]  ;;  %v8031_v58 = vld [vmem:[%s14792_s5 + $0xa38] sm:$0xff] }
 0x7d5   :  { %5669 = vmatpush.msra.mxu3 %v7962_v29  ;;  %5689 = vmatpush.msra.mxu1 %v7978_v16  ;;  %v13952_v41 = vld [vmem:[#allocation1] sm:$0xff]  ;;  %v13958_v55 = vld [vmem:[#allocation1 + $0x9] sm:$0xff]  ;;  %v8047_v29 = vld [vmem:[%s14792_s5 + $0xab8] sm:$0xff] }
 0x7d6   :  { %5784 = vmatpush.msra.mxu2 %v7994_v60  ;;  %5800 = vmatpush.msrb.mxu0 %v8014_v57  ;;  %v6375_v46 = vld [vmem:[#allocation3 + $0x4b] ss:$8 sm:$0x7] }
 0x7d7   :  { %5670 = vmatpush.msra.mxu3 %v7961_v8  ;;  %5690 = vmatpush.msra.mxu1 %v7977_v19  ;;  %v8064_v4 = vld [vmem:[%s14792_s5 + $0xb40] sm:$0xff]  ;;  %v8063_v57 = vld [vmem:[%s14792_s5 + $0xb38] sm:$0xff]  ;;  %v8030_v19 = vld [vmem:[%s14792_s5 + $0xa30] sm:$0xff] }
 0x7d8   :  { %5785 = vmatpush.msra.mxu2 %v7993_v36  ;;  %5801 = vmatpush.msrb.mxu0 %v8013_v24  ;;  %v8084_v20 = vld [vmem:[%s14792_s5 + $0xbe0] sm:$0xff]  ;;  %v8083_v8 = vld [vmem:[%s14792_s5 + $0xbd8] sm:$0xff]  ;;  %v8046_v36 = vld [vmem:[%s14792_s5 + $0xab0] sm:$0xff] }
 0x7d9   :  { %5671 = vmatpush.msra.mxu3 %v7960_v2  ;;  %5691 = vmatpush.msra.mxu1 %v7976_v15  ;;  %v6377_v33 = vld [vmem:[#allocation3 + $0x7b] ss:$8 sm:$0x7] }
 0x7da   :  { %5786 = vmatpush.msra.mxu2 %v7992_v37  ;;  %5802 = vmatpush.msrb.mxu0 %v8012_v28  ;;  %v6379_v60 = vld [vmem:[#allocation3 + $0xab] ss:$8 sm:$0x7]  ;;  %v8029_v15 = vld [vmem:[%s14792_s5 + $0xa28] sm:$0xff] }
 0x7db   :  { %5672 = vmatmul.f32.vlgmr.msra.gmra.mxu3 %v13642_v3  ;;  %5692 = vmatmul.f32.vlgmr.msra.gmra.mxu1 %v13644_v35  ;;  %v8070_v3 = vld [vmem:[%s14792_s5 + $0xb70] sm:$0xff]  ;;  %v8045_v37 = vld [vmem:[%s14792_s5 + $0xaa8] sm:$0xff] }
 0x7dc   :  { %5787 = vmatmul.f32.vlgmr.msra.gmra.mxu2 %v13712_v22  ;;  %5811 = vmatpush.msrb.mxu3 %v8039_v40  ;;  %v13960_v35 = vld [vmem:[#allocation1 + $0x12] sm:$0xff]  ;;  %v8037_v22 = vld [vmem:[%s14792_s5 + $0xa68] sm:$0xff] }
 0x7dd   :  { %5906 = vmatpush.msrb.mxu1 %v8055_v56  ;;  %5926 = vmatpush.msrb.mxu2 %v8071_v14  ;;  %6298 = vst [vmem:[#allocation1] ss:$9 sm:$0xff] %v6238_v11  ;;  %v8062_v24 = vld [vmem:[%s14792_s5 + $0xb30] sm:$0xff]  ;;  %v8061_v28 = vld [vmem:[%s14792_s5 + $0xb28] sm:$0xff]  ;;  %v8028_v11 = vld [vmem:[%s14792_s5 + $0xa20] sm:$0xff] }
 0x7de   :  { %5803 = vmatpush.msrb.mxu0 %v8011_v52  ;;  %5812 = vmatpush.msrb.mxu3 %v8038_v30  ;;  %6300 = vst [vmem:[#allocation1 + $0x1] ss:$9 sm:$0xff] %v6240_v38  ;;  %v8082_v2 = vld [vmem:[%s14792_s5 + $0xbd0] sm:$0xff]  ;;  %v8081_v40 = vld [vmem:[%s14792_s5 + $0xbc8] sm:$0xff]  ;;  %v8044_v56 = vld [vmem:[%s14792_s5 + $0xaa0] sm:$0xff] }
 0x7df   :  { %5907 = vmatpush.msrb.mxu1 %v8054_v10  ;;  %5927 = vmatpush.msrb.mxu2 %v8070_v3  ;;  %6302 = vst [vmem:[#allocation1 + $0x2] ss:$9 sm:$0xff] %v6242_v0  ;;  %v8060_v14 = vld [vmem:[%s14792_s5 + $0xb20] sm:$0xff]  ;;  %v8027_v38 = vld [vmem:[%s14792_s5 + $0xa18] sm:$0xff]  ;;  %v8026_v3 = vld [vmem:[%s14792_s5 + $0xa10] sm:$0xff] }
 0x7e0   :  { %5804 = vmatpush.msrb.mxu0 %v8010_v54  ;;  %5813 = vmatpush.msrb.mxu3 %v8037_v22  ;;  %6304 = vst [vmem:[#allocation1 + $0x3] ss:$9 sm:$0xff] %v6244_v18  ;;  %v8080_v52 = vld [vmem:[%s14792_s5 + $0xbc0] sm:$0xff]  ;;  %v8043_v30 = vld [vmem:[%s14792_s5 + $0xa98] sm:$0xff]  ;;  %v8042_v18 = vld [vmem:[%s14792_s5 + $0xa90] sm:$0xff] }
 0x7e1   :  { %5908 = vmatpush.msrb.mxu1 %v8053_v42  ;;  %5928 = vmatpush.msrb.mxu2 %v8069_v13  ;;  %v8059_v10 = vld [vmem:[%s14792_s5 + $0xb18] sm:$0xff]  ;;  %v8058_v54 = vld [vmem:[%s14792_s5 + $0xb10] sm:$0xff]  ;;  %v8025_v42 = vld [vmem:[%s14792_s5 + $0xa08] sm:$0xff] }
 0x7e2   :  { %5805 = vmatpush.msrb.mxu0 %v8009_v23  ;;  %5814 = vmatpush.msrb.mxu3 %v8036_v27  ;;  %v8079_v0 = vld [vmem:[%s14792_s5 + $0xbb8] sm:$0xff]  ;;  %v8078_v22 = vld [vmem:[%s14792_s5 + $0xbb0] sm:$0xff]  ;;  %v8041_v13 = vld [vmem:[%s14792_s5 + $0xa88] sm:$0xff] }
 0x7e3   :  { %5909 = vmatpush.msrb.mxu1 %v8052_v59  ;;  %5929 = vmatpush.msrb.mxu2 %v8068_v7  ;;  %v8057_v23 = vld [vmem:[%s14792_s5 + $0xb08] sm:$0xff]  ;;  %v8024_v59 = vld [vmem:[%s14792_s5 + $0xa00] sm:$0xff] }
 0x7e4   :  { %5806 = vmatpush.msrb.mxu0 %v8008_v9  ;;  %5815 = vmatpush.msrb.mxu3 %v8035_v62  ;;  %v8077_v27 = vld [vmem:[%s14792_s5 + $0xba8] sm:$0xff]  ;;  %v8040_v7 = vld [vmem:[%s14792_s5 + $0xa80] sm:$0xff] }
 0x7e5   :  { %5807 = vmatmul.f32.vlgmr.msrb.gmra.mxu0 %v13720_v12  ;;  %5910 = vmatpush.msrb.mxu1 %v8051_v32  ;;  %v8065_v12 = vld [vmem:[%s14792_s5 + $0xb48] sm:$0xff]  ;;  %v8056_v9 = vld [vmem:[%s14792_s5 + $0xb00] sm:$0xff]  ;;  %v8103_v32 = vld [vmem:[%s14792_s5 + $0xc78] sm:$0xff] }
 0x7e6   :  { %5930 = vmatpush.msrb.mxu2 %v8067_v53  ;;  %5946 = vmatpush.msra.mxu0 %v8087_v25  ;;  %v8076_v62 = vld [vmem:[%s14792_s5 + $0xba0] sm:$0xff]  ;;  %v8119_v53 = vld [vmem:[%s14792_s5 + $0xcf8] sm:$0xff] }
 0x7e7   :  { %5816 = vmatpush.msrb.mxu3 %v8034_v1  ;;  %5911 = vmatpush.msrb.mxu1 %v8050_v61  ;;  %v14032_v43 = vld [vmem:[#allocation1] sm:$0xff]  ;;  %v14040_v51 = vld [vmem:[#allocation1 + $0x9] sm:$0xff]  ;;  %v14048_v16 = vld [vmem:[#allocation1 + $0x12] sm:$0xff] }
 0x7e8   :  { %5931 = vmatpush.msrb.mxu2 %v8066_v48  ;;  %5947 = vmatpush.msra.mxu0 %v8086_v17  ;;  %6433 = vst [vmem:[#allocation1] ss:$9 sm:$0xff] %v6373_v5  ;;  %v8135_v25 = vld [vmem:[%s14792_s5 + $0xd78] sm:$0xff]  ;;  %v8102_v61 = vld [vmem:[%s14792_s5 + $0xc70] sm:$0xff]  ;;  %v8101_v17 = vld [vmem:[%s14792_s5 + $0xc68] sm:$0xff] }
 0x7e9   :  { %5817 = vmatpush.msrb.mxu3 %v8033_v31  ;;  %5912 = vmatpush.msrb.mxu1 %v8049_v49  ;;  %6435 = vst [vmem:[#allocation1 + $0x1] ss:$9 sm:$0xff] %v6375_v46  ;;  %v8075_v1 = vld [vmem:[%s14792_s5 + $0xb98] sm:$0xff]  ;;  %v8118_v48 = vld [vmem:[%s14792_s5 + $0xcf0] sm:$0xff]  ;;  %v8133_v31 = vld [vmem:[%s14792_s5 + $0xd68] sm:$0xff] }
 0x7ea   :  { %5932 = vmatpush.msrb.mxu2 %v8065_v12  ;;  %5948 = vmatpush.msra.mxu0 %v8085_v34  ;;  %6437 = vst [vmem:[#allocation1 + $0x2] ss:$9 sm:$0xff] %v6377_v33  ;;  %v8073_v49 = vld [vmem:[%s14792_s5 + $0xb88] sm:$0xff]  ;;  %v8100_v12 = vld [vmem:[%s14792_s5 + $0xc60] sm:$0xff]  ;;  %v8115_v46 = vld [vmem:[%s14792_s5 + $0xcd8] sm:$0xff] }
 0x7eb   :  { %5818 = vmatpush.msrb.mxu3 %v8032_v45  ;;  %5913 = vmatpush.msrb.mxu1 %v8048_v26  ;;  %6439 = vst [vmem:[#allocation1 + $0x3] ss:$9 sm:$0xff] %v6379_v60  ;;  %v8116_v34 = vld [vmem:[%s14792_s5 + $0xce0] sm:$0xff]  ;;  %v8099_v26 = vld [vmem:[%s14792_s5 + $0xc58] sm:$0xff]  ;;  %v8098_v33 = vld [vmem:[%s14792_s5 + $0xc50] sm:$0xff] }
 0x7ec   :  { %5933 = vmatpush.msrb.mxu2 %v8064_v4  ;;  %5949 = vmatpush.msra.mxu0 %v8084_v20  ;;  %v8132_v5 = vld [vmem:[%s14792_s5 + $0xd60] sm:$0xff]  ;;  %v8131_v4 = vld [vmem:[%s14792_s5 + $0xd58] sm:$0xff]  ;;  %v8150_v60 = vld [vmem:[%s14792_s5 + $0xdf0] sm:$0xff] }
 0x7ed   :  { %5819 = vmatpush.msrb.mxu3 %v8031_v58  ;;  %5914 = vmatpush.msrb.mxu1 %v8047_v29  ;;  %v8072_v45 = vld [vmem:[%s14792_s5 + $0xb80] sm:$0xff]  ;;  %v8151_v20 = vld [vmem:[%s14792_s5 + $0xdf8] sm:$0xff]  ;;  %v8114_v58 = vld [vmem:[%s14792_s5 + $0xcd0] sm:$0xff] }
 0x7ee   :  { %5934 = vmatpush.msrb.mxu2 %v8063_v57  ;;  %5950 = vmatpush.msra.mxu0 %v8083_v8  ;;  %v8130_v29 = vld [vmem:[%s14792_s5 + $0xd50] sm:$0xff]  ;;  %v8097_v57 = vld [vmem:[%s14792_s5 + $0xc48] sm:$0xff] }
 0x7ef   :  { %5820 = vmatpush.msrb.mxu3 %v8030_v19  ;;  %5915 = vmatpush.msrb.mxu1 %v8046_v36  ;;  %v8113_v8 = vld [vmem:[%s14792_s5 + $0xcc8] sm:$0xff]  ;;  %v8096_v36 = vld [vmem:[%s14792_s5 + $0xc40] sm:$0xff] }
 0x7f0   :  { %5935 = vmatpush.msrb.mxu2 %v8062_v24  ;;  %5951 = vmatpush.msra.mxu0 %v8082_v2  ;;  %v8149_v19 = vld [vmem:[%s14792_s5 + $0xde8] sm:$0xff]  ;;  %v8112_v24 = vld [vmem:[%s14792_s5 + $0xcc0] sm:$0xff] }
 0x7f1   :  { %5821 = vmatpush.msrb.mxu3 %v8029_v15  ;;  %5916 = vmatpush.msrb.mxu1 %v8045_v37  ;;  %v8128_v2 = vld [vmem:[%s14792_s5 + $0xd40] sm:$0xff]  ;;  %v8095_v37 = vld [vmem:[%s14792_s5 + $0xc38] sm:$0xff] }
 0x7f2   :  { %5936 = vmatpush.msrb.mxu2 %v8061_v28  ;;  %5952 = vmatpush.msra.mxu0 %v8081_v40  ;;  %v8148_v15 = vld [vmem:[%s14792_s5 + $0xde0] sm:$0xff]  ;;  %v8111_v28 = vld [vmem:[%s14792_s5 + $0xcb8] sm:$0xff] }
 0x7f3   :  { %5822 = vmatpush.msrb.mxu3 %v8028_v11  ;;  %5917 = vmatpush.msrb.mxu1 %v8044_v56  ;;  %v8127_v40 = vld [vmem:[%s14792_s5 + $0xd38] sm:$0xff]  ;;  %v8094_v56 = vld [vmem:[%s14792_s5 + $0xc30] sm:$0xff] }
 0x7f4   :  { %5937 = vmatpush.msrb.mxu2 %v8060_v14  ;;  %5953 = vmatpush.msra.mxu0 %v8080_v52  ;;  %v8147_v11 = vld [vmem:[%s14792_s5 + $0xdd8] sm:$0xff]  ;;  %v8110_v14 = vld [vmem:[%s14792_s5 + $0xcb0] sm:$0xff] }
 0x7f5   :  { %5823 = vmatpush.msrb.mxu3 %v8027_v38  ;;  %5918 = vmatpush.msrb.mxu1 %v8043_v30  ;;  %v8126_v52 = vld [vmem:[%s14792_s5 + $0xd30] sm:$0xff]  ;;  %v8093_v30 = vld [vmem:[%s14792_s5 + $0xc28] sm:$0xff] }
 0x7f6   :  { %5938 = vmatpush.msrb.mxu2 %v8059_v10  ;;  %5954 = vmatpush.msra.mxu0 %v8079_v0  ;;  %v8146_v38 = vld [vmem:[%s14792_s5 + $0xdd0] sm:$0xff]  ;;  %v8109_v10 = vld [vmem:[%s14792_s5 + $0xca8] sm:$0xff] }
 0x7f7   :  { %5824 = vmatpush.msrb.mxu3 %v8026_v3  ;;  %5919 = vmatpush.msrb.mxu1 %v8042_v18  ;;  %v8125_v0 = vld [vmem:[%s14792_s5 + $0xd28] sm:$0xff]  ;;  %v8092_v18 = vld [vmem:[%s14792_s5 + $0xc20] sm:$0xff] }
 0x7f8   :  { %5939 = vmatpush.msrb.mxu2 %v8058_v54  ;;  %5955 = vmatpush.msra.mxu0 %v8078_v22  ;;  %v8145_v3 = vld [vmem:[%s14792_s5 + $0xdc8] sm:$0xff]  ;;  %v8108_v54 = vld [vmem:[%s14792_s5 + $0xca0] sm:$0xff] }
 0x7f9   :  { %5825 = vmatpush.msrb.mxu3 %v8025_v42  ;;  %5920 = vmatpush.msrb.mxu1 %v8041_v13  ;;  %v8124_v22 = vld [vmem:[%s14792_s5 + $0xd20] sm:$0xff]  ;;  %v8091_v13 = vld [vmem:[%s14792_s5 + $0xc18] sm:$0xff] }
 0x7fa   :  { %5940 = vmatpush.msrb.mxu2 %v8057_v23  ;;  %5956 = vmatpush.msra.mxu0 %v8077_v27  ;;  %v8144_v42 = vld [vmem:[%s14792_s5 + $0xdc0] sm:$0xff]  ;;  %v8107_v23 = vld [vmem:[%s14792_s5 + $0xc98] sm:$0xff] }
 0x7fb   :  { %5826 = vmatpush.msrb.mxu3 %v8024_v59  ;;  %5921 = vmatpush.msrb.mxu1 %v8040_v7  ;;  %v8123_v27 = vld [vmem:[%s14792_s5 + $0xd18] sm:$0xff]  ;;  %v8090_v7 = vld [vmem:[%s14792_s5 + $0xc10] sm:$0xff] }
 0x7fc   :  { %5941 = vmatpush.msrb.mxu2 %v8056_v9  ;;  %5957 = vmatpush.msra.mxu0 %v8076_v62  ;;  %v8143_v59 = vld [vmem:[%s14792_s5 + $0xdb8] sm:$0xff]  ;;  %v8106_v9 = vld [vmem:[%s14792_s5 + $0xc90] sm:$0xff] }
 0x7fd   :  { %5827 = vmatmul.f32.vlgmr.msrb.gmra.mxu3 %v13722_v50  ;;  %5922 = vmatmul.f32.vlgmr.msrb.gmra.mxu1 %v13787_v44  ;;  %v8134_v50 = vld [vmem:[%s14792_s5 + $0xd70] sm:$0xff] }
 0x7fe   :  { %5942 = vmatmul.f32.vlgmr.msrb.gmra.mxu2 %v13795_v21  ;;  %6041 = vmatpush.msra.mxu3 %v8103_v32  ;;  %v8074_v44 = vld [vmem:[%s14792_s5 + $0xb90] sm:$0xff]  ;;  %v8117_v21 = vld [vmem:[%s14792_s5 + $0xce8] sm:$0xff] }
 0x7ff   :  { %6061 = vmatpush.msra.mxu1 %v8119_v53  ;;  %6081 = vmatpush.msra.mxu2 %v8135_v25  ;;  %v8122_v62 = vld [vmem:[%s14792_s5 + $0xd10] sm:$0xff]  ;;  %v8089_v53 = vld [vmem:[%s14792_s5 + $0xc08] sm:$0xff] }
 0x800   :  { %5958 = vmatpush.msra.mxu0 %v8075_v1  ;;  %6042 = vmatpush.msra.mxu3 %v8102_v61  ;;  %v8142_v32 = vld [vmem:[%s14792_s5 + $0xdb0] sm:$0xff]  ;;  %v8105_v25 = vld [vmem:[%s14792_s5 + $0xc88] sm:$0xff] }
 0x801   :  { %6062 = vmatpush.msra.mxu1 %v8118_v48  ;;  %6082 = vmatpush.msra.mxu2 %v8134_v50  ;;  %v8121_v1 = vld [vmem:[%s14792_s5 + $0xd08] sm:$0xff]  ;;  %v8088_v48 = vld [vmem:[%s14792_s5 + $0xc00] sm:$0xff] }
 0x802   :  { %5959 = vmatpush.msra.mxu0 %v8074_v44  ;;  %6043 = vmatpush.msra.mxu3 %v8101_v17  ;;  %v8141_v61 = vld [vmem:[%s14792_s5 + $0xda8] sm:$0xff]  ;;  %v8104_v50 = vld [vmem:[%s14792_s5 + $0xc80] sm:$0xff] }
 0x803   :  { %6063 = vmatpush.msra.mxu1 %v8117_v21  ;;  %6083 = vmatpush.msra.mxu2 %v8133_v31  ;;  %v8120_v44 = vld [vmem:[%s14792_s5 + $0xd00] sm:$0xff]  ;;  %v8167_v21 = vld [vmem:[%s14792_s5 + $0xe78] sm:$0xff] }
 0x804   :  { %5960 = vmatpush.msra.mxu0 %v8073_v49  ;;  %6044 = vmatpush.msra.mxu3 %v8100_v12  ;;  %v8140_v17 = vld [vmem:[%s14792_s5 + $0xda0] sm:$0xff]  ;;  %v8183_v31 = vld [vmem:[%s14792_s5 + $0xef8] sm:$0xff] }
 0x805   :  { %6064 = vmatpush.msra.mxu1 %v8116_v34  ;;  %6084 = vmatpush.msra.mxu2 %v8132_v5  ;;  %v8199_v49 = vld [vmem:[%s14792_s5 + $0xf78] sm:$0xff]  ;;  %v8166_v34 = vld [vmem:[%s14792_s5 + $0xe70] sm:$0xff] }
 0x806   :  { %5961 = vmatpush.msra.mxu0 %v8072_v45  ;;  %6045 = vmatpush.msra.mxu3 %v8099_v26  ;;  %v8139_v12 = vld [vmem:[%s14792_s5 + $0xd98] sm:$0xff]  ;;  %v8182_v5 = vld [vmem:[%s14792_s5 + $0xef0] sm:$0xff]  ;;  %v8165_v45 = vld [vmem:[%s14792_s5 + $0xe68] sm:$0xff] }
 0x807   :  { %5962 = vmatmul.f32.vlgmr.msra.gmra.mxu0 %v13804_v6  ;;  %6065 = vmatpush.msra.mxu1 %v8115_v46  ;;  %v8129_v6 = vld [vmem:[%s14792_s5 + $0xd48] sm:$0xff] }
 0x808   :  { %6085 = vmatpush.msra.mxu2 %v8131_v4  ;;  %6176 = vmatpush.msrb.mxu0 %v8151_v20  ;;  %v8197_v26 = vld [vmem:[%s14792_s5 + $0xf68] sm:$0xff]  ;;  %v8164_v4 = vld [vmem:[%s14792_s5 + $0xe60] sm:$0xff] }
 0x809   :  { %6046 = vmatpush.msra.mxu3 %v8098_v33  ;;  %6066 = vmatpush.msra.mxu1 %v8114_v58  ;;  %v8137_v46 = vld [vmem:[%s14792_s5 + $0xd88] sm:$0xff]  ;;  %v8180_v20 = vld [vmem:[%s14792_s5 + $0xee0] sm:$0xff] }
 0x80a   :  { %6086 = vmatpush.msra.mxu2 %v8130_v29  ;;  %6177 = vmatpush.msrb.mxu0 %v8150_v60  ;;  %v8196_v33 = vld [vmem:[%s14792_s5 + $0xf60] sm:$0xff]  ;;  %v8163_v29 = vld [vmem:[%s14792_s5 + $0xe58] sm:$0xff] }
 0x80b   :  { %6047 = vmatpush.msra.mxu3 %v8097_v57  ;;  %6067 = vmatpush.msra.mxu1 %v8113_v8  ;;  %v8136_v58 = vld [vmem:[%s14792_s5 + $0xd80] sm:$0xff]  ;;  %v8179_v60 = vld [vmem:[%s14792_s5 + $0xed8] sm:$0xff] }
 0x80c   :  { %6087 = vmatpush.msra.mxu2 %v8129_v6  ;;  %6178 = vmatpush.msrb.mxu0 %v8149_v19  ;;  %v8195_v57 = vld [vmem:[%s14792_s5 + $0xf58] sm:$0xff]  ;;  %v8162_v6 = vld [vmem:[%s14792_s5 + $0xe50] sm:$0xff] }
 0x80d   :  { %6048 = vmatpush.msra.mxu3 %v8096_v36  ;;  %6068 = vmatpush.msra.mxu1 %v8112_v24  ;;  %v8215_v8 = vld [vmem:[%s14792_s5 + $0xff8] sm:$0xff]  ;;  %v8178_v19 = vld [vmem:[%s14792_s5 + $0xed0] sm:$0xff] }
 0x80e   :  { %6088 = vmatpush.msra.mxu2 %v8128_v2  ;;  %6179 = vmatpush.msrb.mxu0 %v8148_v15  ;;  %v8194_v36 = vld [vmem:[%s14792_s5 + $0xf50] sm:$0xff]  ;;  %v8161_v2 = vld [vmem:[%s14792_s5 + $0xe48] sm:$0xff] }
 0x80f   :  { %6049 = vmatpush.msra.mxu3 %v8095_v37  ;;  %6069 = vmatpush.msra.mxu1 %v8111_v28  ;;  %v8214_v24 = vld [vmem:[%s14792_s5 + $0xff0] sm:$0xff]  ;;  %v8177_v15 = vld [vmem:[%s14792_s5 + $0xec8] sm:$0xff]  ;;  %v8160_v28 = vld [vmem:[%s14792_s5 + $0xe40] sm:$0xff] }
 0x810   :  { %6089 = vmatpush.msra.mxu2 %v8127_v40  ;;  %6180 = vmatpush.msrb.mxu0 %v8147_v11  ;;  %v8213_v37 = vld [vmem:[%s14792_s5 + $0xfe8] sm:$0xff]  ;;  %v8176_v40 = vld [vmem:[%s14792_s5 + $0xec0] sm:$0xff] }
 0x811   :  { %6050 = vmatpush.msra.mxu3 %v8094_v56  ;;  %6070 = vmatpush.msra.mxu1 %v8110_v14  ;;  %v8192_v11 = vld [vmem:[%s14792_s5 + $0xf40] sm:$0xff]  ;;  %v8159_v14 = vld [vmem:[%s14792_s5 + $0xe38] sm:$0xff] }
 0x812   :  { %6090 = vmatpush.msra.mxu2 %v8126_v52  ;;  %6181 = vmatpush.msrb.mxu0 %v8146_v38  ;;  %v8212_v56 = vld [vmem:[%s14792_s5 + $0xfe0] sm:$0xff]  ;;  %v8175_v52 = vld [vmem:[%s14792_s5 + $0xeb8] sm:$0xff] }
 0x813   :  { %6051 = vmatpush.msra.mxu3 %v8093_v30  ;;  %6071 = vmatpush.msra.mxu1 %v8109_v10  ;;  %v8191_v38 = vld [vmem:[%s14792_s5 + $0xf38] sm:$0xff]  ;;  %v8158_v10 = vld [vmem:[%s14792_s5 + $0xe30] sm:$0xff] }
 0x814   :  { %6091 = vmatpush.msra.mxu2 %v8125_v0  ;;  %6182 = vmatpush.msrb.mxu0 %v8145_v3  ;;  %v8211_v30 = vld [vmem:[%s14792_s5 + $0xfd8] sm:$0xff]  ;;  %v8174_v0 = vld [vmem:[%s14792_s5 + $0xeb0] sm:$0xff] }
 0x815   :  { %6052 = vmatpush.msra.mxu3 %v8092_v18  ;;  %6072 = vmatpush.msra.mxu1 %v8108_v54  ;;  %v8190_v3 = vld [vmem:[%s14792_s5 + $0xf30] sm:$0xff]  ;;  %v8157_v54 = vld [vmem:[%s14792_s5 + $0xe28] sm:$0xff] }
 0x816   :  { %6092 = vmatpush.msra.mxu2 %v8124_v22  ;;  %6183 = vmatpush.msrb.mxu0 %v8144_v42  ;;  %v8210_v18 = vld [vmem:[%s14792_s5 + $0xfd0] sm:$0xff]  ;;  %v8173_v22 = vld [vmem:[%s14792_s5 + $0xea8] sm:$0xff] }
 0x817   :  { %6053 = vmatpush.msra.mxu3 %v8091_v13  ;;  %6073 = vmatpush.msra.mxu1 %v8107_v23  ;;  %v8189_v42 = vld [vmem:[%s14792_s5 + $0xf28] sm:$0xff]  ;;  %v8156_v23 = vld [vmem:[%s14792_s5 + $0xe20] sm:$0xff] }
 0x818   :  { %6093 = vmatpush.msra.mxu2 %v8123_v27  ;;  %6184 = vmatpush.msrb.mxu0 %v8143_v59  ;;  %v8209_v13 = vld [vmem:[%s14792_s5 + $0xfc8] sm:$0xff]  ;;  %v8172_v27 = vld [vmem:[%s14792_s5 + $0xea0] sm:$0xff] }
 0x819   :  { %6054 = vmatpush.msra.mxu3 %v8090_v7  ;;  %6074 = vmatpush.msra.mxu1 %v8106_v9  ;;  %v8188_v59 = vld [vmem:[%s14792_s5 + $0xf20] sm:$0xff]  ;;  %v8155_v9 = vld [vmem:[%s14792_s5 + $0xe18] sm:$0xff] }
 0x81a   :  { %6094 = vmatpush.msra.mxu2 %v8122_v62  ;;  %6185 = vmatpush.msrb.mxu0 %v8142_v32  ;;  %v8208_v7 = vld [vmem:[%s14792_s5 + $0xfc0] sm:$0xff]  ;;  %v8171_v62 = vld [vmem:[%s14792_s5 + $0xe98] sm:$0xff] }
 0x81b   :  { %6055 = vmatpush.msra.mxu3 %v8089_v53  ;;  %6075 = vmatpush.msra.mxu1 %v8105_v25  ;;  %v8187_v32 = vld [vmem:[%s14792_s5 + $0xf18] sm:$0xff]  ;;  %v8154_v25 = vld [vmem:[%s14792_s5 + $0xe10] sm:$0xff] }
 0x81c   :  { %6095 = vmatpush.msra.mxu2 %v8121_v1  ;;  %6186 = vmatpush.msrb.mxu0 %v8141_v61  ;;  %v8207_v53 = vld [vmem:[%s14792_s5 + $0xfb8] sm:$0xff]  ;;  %v8170_v1 = vld [vmem:[%s14792_s5 + $0xe90] sm:$0xff] }
 0x81d   :  { %6056 = vmatpush.msra.mxu3 %v8088_v48  ;;  %6076 = vmatpush.msra.mxu1 %v8104_v50  ;;  %v8186_v61 = vld [vmem:[%s14792_s5 + $0xf10] sm:$0xff]  ;;  %v8153_v50 = vld [vmem:[%s14792_s5 + $0xe08] sm:$0xff] }
 0x81e   :  { %6096 = vmatpush.msra.mxu2 %v8120_v44  ;;  %6187 = vmatpush.msrb.mxu0 %v8140_v17  ;;  %v8206_v48 = vld [vmem:[%s14792_s5 + $0xfb0] sm:$0xff]  ;;  %v8169_v44 = vld [vmem:[%s14792_s5 + $0xe88] sm:$0xff] }
 0x81f   :  { %6057 = vmatmul.f32.vlgmr.msra.gmra.mxu3 %v13872_v39  ;;  %6077 = vmatmul.f32.vlgmr.msra.gmra.mxu1 %v13880_v47  ;;  %v8198_v39 = vld [vmem:[%s14792_s5 + $0xf70] sm:$0xff]  ;;  %v8185_v17 = vld [vmem:[%s14792_s5 + $0xf08] sm:$0xff] }
 0x820   :  { %6097 = vmatmul.f32.vlgmr.msra.gmra.mxu2 %v13888_v63  ;;  %6196 = vmatpush.msrb.mxu3 %v8167_v21  ;;  %v8138_v47 = vld [vmem:[%s14792_s5 + $0xd90] sm:$0xff]  ;;  %v8181_v63 = vld [vmem:[%s14792_s5 + $0xee8] sm:$0xff] }
 0x821   :  { %6216 = vmatpush.msrb.mxu1 %v8183_v31  ;;  %6311 = vmatpush.msrb.mxu2 %v8199_v49  ;;  %v8205_v21 = vld [vmem:[%s14792_s5 + $0xfa8] sm:$0xff]  ;;  %v8152_v31 = vld [vmem:[%s14792_s5 + $0xe00] sm:$0xff] }
 0x822   :  { %6188 = vmatpush.msrb.mxu0 %v8139_v12  ;;  %6197 = vmatpush.msrb.mxu3 %v8166_v34  ;;  %v8168_v49 = vld [vmem:[%s14792_s5 + $0xe80] sm:$0xff] }
 0x823   :  { %6217 = vmatpush.msrb.mxu1 %v8182_v5  ;;  %6312 = vmatpush.msrb.mxu2 %v8198_v39  ;;  %v8184_v12 = vld [vmem:[%s14792_s5 + $0xf00] sm:$0xff]  ;;  %v8231_v5 = vld [vmem:[%s14792_s5 + $0x1078] sm:$0xff] }
 0x824   :  { %6189 = vmatpush.msrb.mxu0 %v8138_v47  ;;  %6198 = vmatpush.msrb.mxu3 %v8165_v45  ;;  %v8204_v34 = vld [vmem:[%s14792_s5 + $0xfa0] sm:$0xff]  ;;  %v8247_v39 = vld [vmem:[%s14792_s5 + $0x10f8] sm:$0xff] }
 0x825   :  { %6218 = vmatpush.msrb.mxu1 %v8181_v63  ;;  %6313 = vmatpush.msrb.mxu2 %v8197_v26  ;;  %v8263_v47 = vld [vmem:[%s14792_s5 + $0x1178] sm:$0xff]  ;;  %v8230_v63 = vld [vmem:[%s14792_s5 + $0x1070] sm:$0xff] }
 0x826   :  { %6190 = vmatpush.msrb.mxu0 %v8137_v46  ;;  %6199 = vmatpush.msrb.mxu3 %v8164_v4  ;;  %v8203_v45 = vld [vmem:[%s14792_s5 + $0xf98] sm:$0xff]  ;;  %v8246_v26 = vld [vmem:[%s14792_s5 + $0x10f0] sm:$0xff]  ;;  %v8229_v46 = vld [vmem:[%s14792_s5 + $0x1068] sm:$0xff] }
 0x827   :  { %6219 = vmatpush.msrb.mxu1 %v8180_v20  ;;  %6314 = vmatpush.msrb.mxu2 %v8196_v33  ;;  %v8261_v4 = vld [vmem:[%s14792_s5 + $0x1168] sm:$0xff]  ;;  %v8228_v33 = vld [vmem:[%s14792_s5 + $0x1060] sm:$0xff] }
 0x828   :  { %6191 = vmatpush.msrb.mxu0 %v8136_v58  ;;  %6200 = vmatpush.msrb.mxu3 %v8163_v29  ;;  %v8201_v20 = vld [vmem:[%s14792_s5 + $0xf88] sm:$0xff]  ;;  %v8244_v58 = vld [vmem:[%s14792_s5 + $0x10e0] sm:$0xff] }
 0x829   :  { %6192 = vmatmul.f32.vlgmr.msrb.gmra.mxu0 %v13952_v41  ;;  %6220 = vmatpush.msrb.mxu1 %v8179_v60  ;;  %v8193_v41 = vld [vmem:[%s14792_s5 + $0xf48] sm:$0xff]  ;;  %v8260_v29 = vld [vmem:[%s14792_s5 + $0x1160] sm:$0xff] }
 0x82a   :  { %6315 = vmatpush.msrb.mxu2 %v8195_v57  ;;  %6331 = vmatpush.msra.mxu0 %v8215_v8  ;;  %v8200_v60 = vld [vmem:[%s14792_s5 + $0xf80] sm:$0xff]  ;;  %v8227_v57 = vld [vmem:[%s14792_s5 + $0x1058] sm:$0xff] }
 0x82b   :  { %6201 = vmatpush.msrb.mxu3 %v8162_v6  ;;  %6221 = vmatpush.msrb.mxu1 %v8178_v19  ;;  %v8243_v8 = vld [vmem:[%s14792_s5 + $0x10d8] sm:$0xff] }
 0x82c   :  { %6316 = vmatpush.msrb.mxu2 %v8194_v36  ;;  %6332 = vmatpush.msra.mxu0 %v8214_v24  ;;  %v8259_v6 = vld [vmem:[%s14792_s5 + $0x1158] sm:$0xff]  ;;  %v8226_v36 = vld [vmem:[%s14792_s5 + $0x1050] sm:$0xff] }
 0x82d   :  { %6202 = vmatpush.msrb.mxu3 %v8161_v2  ;;  %6222 = vmatpush.msrb.mxu1 %v8177_v15  ;;  %v8279_v19 = vld [vmem:[%s14792_s5 + $0x11f8] sm:$0xff]  ;;  %v8242_v24 = vld [vmem:[%s14792_s5 + $0x10d0] sm:$0xff] }
 0x82e   :  { %6317 = vmatpush.msrb.mxu2 %v8193_v41  ;;  %6333 = vmatpush.msra.mxu0 %v8213_v37  ;;  %v8258_v2 = vld [vmem:[%s14792_s5 + $0x1150] sm:$0xff]  ;;  %v8225_v41 = vld [vmem:[%s14792_s5 + $0x1048] sm:$0xff] }
 0x82f   :  { %6203 = vmatpush.msrb.mxu3 %v8160_v28  ;;  %6223 = vmatpush.msrb.mxu1 %v8176_v40  ;;  %v8278_v15 = vld [vmem:[%s14792_s5 + $0x11f0] sm:$0xff]  ;;  %v8241_v37 = vld [vmem:[%s14792_s5 + $0x10c8] sm:$0xff]  ;;  %v8224_v40 = vld [vmem:[%s14792_s5 + $0x1040] sm:$0xff] }
 0x830   :  { %6318 = vmatpush.msrb.mxu2 %v8192_v11  ;;  %6334 = vmatpush.msra.mxu0 %v8212_v56  ;;  %v8277_v28 = vld [vmem:[%s14792_s5 + $0x11e8] sm:$0xff]  ;;  %v8240_v11 = vld [vmem:[%s14792_s5 + $0x10c0] sm:$0xff] }
 0x831   :  { %6204 = vmatpush.msrb.mxu3 %v8159_v14  ;;  %6224 = vmatpush.msrb.mxu1 %v8175_v52  ;;  %v8256_v56 = vld [vmem:[%s14792_s5 + $0x1140] sm:$0xff]  ;;  %v8223_v52 = vld [vmem:[%s14792_s5 + $0x1038] sm:$0xff] }
 0x832   :  { %6319 = vmatpush.msrb.mxu2 %v8191_v38  ;;  %6335 = vmatpush.msra.mxu0 %v8211_v30  ;;  %v8276_v14 = vld [vmem:[%s14792_s5 + $0x11e0] sm:$0xff]  ;;  %v8239_v38 = vld [vmem:[%s14792_s5 + $0x10b8] sm:$0xff] }
 0x833   :  { %6205 = vmatpush.msrb.mxu3 %v8158_v10  ;;  %6225 = vmatpush.msrb.mxu1 %v8174_v0  ;;  %v8255_v30 = vld [vmem:[%s14792_s5 + $0x1138] sm:$0xff]  ;;  %v8222_v0 = vld [vmem:[%s14792_s5 + $0x1030] sm:$0xff] }
 0x834   :  { %6320 = vmatpush.msrb.mxu2 %v8190_v3  ;;  %6336 = vmatpush.msra.mxu0 %v8210_v18  ;;  %v8275_v10 = vld [vmem:[%s14792_s5 + $0x11d8] sm:$0xff]  ;;  %v8238_v3 = vld [vmem:[%s14792_s5 + $0x10b0] sm:$0xff] }
 0x835   :  { %6206 = vmatpush.msrb.mxu3 %v8157_v54  ;;  %6226 = vmatpush.msrb.mxu1 %v8173_v22  ;;  %v8254_v18 = vld [vmem:[%s14792_s5 + $0x1130] sm:$0xff]  ;;  %v8221_v22 = vld [vmem:[%s14792_s5 + $0x1028] sm:$0xff] }
 0x836   :  { %6321 = vmatpush.msrb.mxu2 %v8189_v42  ;;  %6337 = vmatpush.msra.mxu0 %v8209_v13  ;;  %v8274_v54 = vld [vmem:[%s14792_s5 + $0x11d0] sm:$0xff]  ;;  %v8237_v42 = vld [vmem:[%s14792_s5 + $0x10a8] sm:$0xff] }
 0x837   :  { %6207 = vmatpush.msrb.mxu3 %v8156_v23  ;;  %6227 = vmatpush.msrb.mxu1 %v8172_v27  ;;  %v8253_v13 = vld [vmem:[%s14792_s5 + $0x1128] sm:$0xff]  ;;  %v8220_v27 = vld [vmem:[%s14792_s5 + $0x1020] sm:$0xff] }
 0x838   :  { %6322 = vmatpush.msrb.mxu2 %v8188_v59  ;;  %6338 = vmatpush.msra.mxu0 %v8208_v7  ;;  %v8273_v23 = vld [vmem:[%s14792_s5 + $0x11c8] sm:$0xff]  ;;  %v8236_v59 = vld [vmem:[%s14792_s5 + $0x10a0] sm:$0xff] }
 0x839   :  { %6208 = vmatpush.msrb.mxu3 %v8155_v9  ;;  %6228 = vmatpush.msrb.mxu1 %v8171_v62  ;;  %v8252_v7 = vld [vmem:[%s14792_s5 + $0x1120] sm:$0xff]  ;;  %v8219_v62 = vld [vmem:[%s14792_s5 + $0x1018] sm:$0xff] }
 0x83a   :  { %6323 = vmatpush.msrb.mxu2 %v8187_v32  ;;  %6339 = vmatpush.msra.mxu0 %v8207_v53  ;;  %v8272_v9 = vld [vmem:[%s14792_s5 + $0x11c0] sm:$0xff]  ;;  %v8235_v32 = vld [vmem:[%s14792_s5 + $0x1098] sm:$0xff] }
 0x83b   :  { %6209 = vmatpush.msrb.mxu3 %v8154_v25  ;;  %6229 = vmatpush.msrb.mxu1 %v8170_v1  ;;  %v8251_v53 = vld [vmem:[%s14792_s5 + $0x1118] sm:$0xff]  ;;  %v8218_v1 = vld [vmem:[%s14792_s5 + $0x1010] sm:$0xff] }
 0x83c   :  { %6324 = vmatpush.msrb.mxu2 %v8186_v61  ;;  %6340 = vmatpush.msra.mxu0 %v8206_v48  ;;  %v8271_v25 = vld [vmem:[%s14792_s5 + $0x11b8] sm:$0xff]  ;;  %v8234_v61 = vld [vmem:[%s14792_s5 + $0x1090] sm:$0xff] }
 0x83d   :  { %6210 = vmatpush.msrb.mxu3 %v8153_v50  ;;  %6230 = vmatpush.msrb.mxu1 %v8169_v44  ;;  %v8250_v48 = vld [vmem:[%s14792_s5 + $0x1110] sm:$0xff]  ;;  %v8217_v44 = vld [vmem:[%s14792_s5 + $0x1008] sm:$0xff] }
 0x83e   :  { %6325 = vmatpush.msrb.mxu2 %v8185_v17  ;;  %6341 = vmatpush.msra.mxu0 %v8205_v21  ;;  %v8270_v50 = vld [vmem:[%s14792_s5 + $0x11b0] sm:$0xff]  ;;  %v8233_v17 = vld [vmem:[%s14792_s5 + $0x1088] sm:$0xff] }
 0x83f   :  { %6211 = vmatpush.msrb.mxu3 %v8152_v31  ;;  %6231 = vmatpush.msrb.mxu1 %v8168_v49  ;;  %v8249_v21 = vld [vmem:[%s14792_s5 + $0x1108] sm:$0xff]  ;;  %v8216_v49 = vld [vmem:[%s14792_s5 + $0x1000] sm:$0xff] }
 0x840   :  { %6326 = vmatpush.msrb.mxu2 %v8184_v12  ;;  %6342 = vmatpush.msra.mxu0 %v8204_v34  ;;  %v8269_v31 = vld [vmem:[%s14792_s5 + $0x11a8] sm:$0xff]  ;;  %v8232_v12 = vld [vmem:[%s14792_s5 + $0x1080] sm:$0xff] }
 0x841   :  { %6212 = vmatmul.f32.vlgmr.msrb.gmra.mxu3 %v13958_v55  ;;  %6232 = vmatmul.f32.vlgmr.msrb.gmra.mxu1 %v13960_v35  ;;  %v8262_v55 = vld [vmem:[%s14792_s5 + $0x1170] sm:$0xff]  ;;  %v8248_v34 = vld [vmem:[%s14792_s5 + $0x1100] sm:$0xff] }
 0x842   :  { %6327 = vmatmul.f32.vlgmr.msrb.gmra.mxu2 %v14032_v43  ;;  %6351 = vmatpush.msra.mxu3 %v8231_v5  ;;  %v8202_v35 = vld [vmem:[%s14792_s5 + $0xf90] sm:$0xff]  ;;  %v8245_v43 = vld [vmem:[%s14792_s5 + $0x10e8] sm:$0xff]  ;;  %v8268_v5 = vld [vmem:[%s14792_s5 + $0x11a0] sm:$0xff] }
 0x843   :  { %6446 = vmatpush.msra.mxu1 %v8247_v39  ;;  %6466 = vmatpush.msra.mxu2 %v8263_v47  ;;  %v8267_v39 = vld [vmem:[%s14792_s5 + $0x1198] sm:$0xff]  ;;  %v6440_v47 = vld [vmem:[#allocation1] sm:$0xff] }
 0x844   :  { %6343 = vmatpush.msra.mxu0 %v8203_v45  ;;  %6352 = vmatpush.msra.mxu3 %v8230_v63  ;;  %v6441_v45 = vld [vmem:[#allocation1 + $0x9] sm:$0xff] }
 0x845   :  { %6447 = vmatpush.msra.mxu1 %v8246_v26  ;;  %6467 = vmatpush.msra.mxu2 %v8262_v55  ;;  %v8266_v63 = vld [vmem:[%s14792_s5 + $0x1190] sm:$0xff]  ;;  %v8265_v26 = vld [vmem:[%s14792_s5 + $0x1188] sm:$0xff]  ;;  %v8264_v55 = vld [vmem:[%s14792_s5 + $0x1180] sm:$0xff] }
 0x846   :  { %6344 = vmatpush.msra.mxu0 %v8202_v35  ;;  %6353 = vmatpush.msra.mxu3 %v8229_v46  ;;  %v5037_v35 = vpop.f32.mrf.mxu3  ;;  %v5057_v46 = vpop.f32.mrf.mxu1 }
 0x847   :  { %6448 = vmatpush.msra.mxu1 %v8245_v43  ;;  %6468 = vmatpush.msra.mxu2 %v8261_v4  ;;  %v5114_v43 = vpop.f32.mrf.mxu0  ;;  %v5077_v4 = vpop.f32.mrf.mxu2 }
 0x848   :  { %6345 = vmatpush.msra.mxu0 %v8201_v20  ;;  %6354 = vmatpush.msra.mxu3 %v8228_v33 }
 0x849   :  { %6449 = vmatpush.msra.mxu1 %v8244_v58  ;;  %6469 = vmatpush.msra.mxu2 %v8260_v29 }
 0x84a   :  { %6346 = vmatpush.msra.mxu0 %v8200_v60  ;;  %6355 = vmatpush.msra.mxu3 %v8227_v57 }
 0x84b   :  { %6347 = vmatmul.f32.vlgmr.msra.gmra.mxu0 %v14040_v51  ;;  %6450 = vmatpush.msra.mxu1 %v8243_v8  ;;  %v8257_v51 = vld [vmem:[%s14792_s5 + $0x1148] sm:$0xff] }
 0x84c   :  { %6470 = vmatpush.msra.mxu2 %v8259_v6  ;;  %6486 = vmatpush.msrb.mxu0 %v8279_v19 }
 0x84d   :  { %6356 = vmatpush.msra.mxu3 %v8226_v36  ;;  %6451 = vmatpush.msra.mxu1 %v8242_v24 }
 0x84e   :  { %6471 = vmatpush.msra.mxu2 %v8258_v2  ;;  %6487 = vmatpush.msrb.mxu0 %v8278_v15  ;;  %v5134_v20 = vpop.f32.mrf.mxu3  ;;  %v5154_v33 = vpop.f32.mrf.mxu1  ;;  %v6520_v15 = vld [vmem:[%s14794_s7 + $0x38] sm:$0xff] }
 0x84f   :  { %6357 = vmatpush.msra.mxu3 %v8225_v41  ;;  %6452 = vmatpush.msra.mxu1 %v8241_v37  ;;  %v5248_v58 = vpop.f32.mrf.mxu2  ;;  %v5268_v29 = vpop.f32.mrf.mxu0  ;;  %v6519_v41 = vld [vmem:[%s14794_s7 + $0x30] sm:$0xff] }
 0x850   :  { %6472 = vmatpush.msra.mxu2 %v8257_v51  ;;  %6488 = vmatpush.msrb.mxu0 %v8277_v28  ;;  %v5058_v51 = vadd.f32 %v5057_v46, %v5037_v35 }
 0x851   :  { %6358 = vmatpush.msra.mxu3 %v8224_v40  ;;  %6453 = vmatpush.msra.mxu1 %v8240_v11 }
 0x852   :  { %6473 = vmatpush.msra.mxu2 %v8256_v56  ;;  %6489 = vmatpush.msrb.mxu0 %v8276_v14  ;;  %v5078_v56 = vadd.f32 %v5077_v4, %v5058_v51  ;;  %v6518_v14 = vld [vmem:[%s14794_s7 + $0x28] sm:$0xff] }
 0x853   :  { %6359 = vmatpush.msra.mxu3 %v8223_v52  ;;  %6454 = vmatpush.msra.mxu1 %v8239_v38 }
 0x854   :  { %6474 = vmatpush.msra.mxu2 %v8255_v30  ;;  %6490 = vmatpush.msrb.mxu0 %v8275_v10  ;;  %v5115_v38 = vadd.f32 %v5114_v43, %v5078_v56  ;;  %v5269_v10 = vadd.f32 %v5268_v29, %v5248_v58 }
 0x855   :  { %6360 = vmatpush.msra.mxu3 %v8222_v0  ;;  %6455 = vmatpush.msra.mxu1 %v8238_v3 }
 0x856   :  { %6475 = vmatpush.msra.mxu2 %v8254_v18  ;;  %6491 = vmatpush.msrb.mxu0 %v8274_v54  ;;  %v5288_v60 = vpop.f32.mrf.mxu3  ;;  %v5383_v57 = vpop.f32.mrf.mxu1  ;;  %v5135_v30 = vadd.f32 %v5134_v20, %v5115_v38  ;;  %v6517_v54 = vld [vmem:[%s14794_s7 + $0x20] sm:$0xff] }
 0x857   :  { %6361 = vmatpush.msra.mxu3 %v8221_v22  ;;  %6456 = vmatpush.msra.mxu1 %v8237_v42  ;;  %v5403_v8 = vpop.f32.mrf.mxu2  ;;  %v5423_v6 = vpop.f32.mrf.mxu0  ;;  %v6516_v22 = vld [vmem:[%s14794_s7 + $0x18] sm:$0xff]  ;;  %v5289_v42 = vadd.f32 %v5288_v60, %v5269_v10  ;;  %v6560_v10 = vld [vmem:[%s14796_s9] sm:$0xff] }
 0x858   :  { %6476 = vmatpush.msra.mxu2 %v8253_v13  ;;  %6492 = vmatpush.msrb.mxu0 %v8273_v23  ;;  %v5404_v13 = vadd.f32 %v5403_v8, %v5383_v57  ;;  %v6515_v23 = vld [vmem:[%s14794_s7 + $0x10] sm:$0xff] }
 0x859   :  { %6362 = vmatpush.msra.mxu3 %v8220_v27  ;;  %6457 = vmatpush.msra.mxu1 %v8236_v59  ;;  %v5155_v27 = vadd.f32 %v5154_v33, %v5135_v30  ;;  %v6561_v30 = vld [vmem:[%s14796_s9 + $0x8] sm:$0x3]  ;;  %s8327_s9 = smov [#allocation4]  }
 0x85a   :  { %6477 = vmatpush.msra.mxu2 %v8252_v7  ;;  %6493 = vmatpush.msrb.mxu0 %v8272_v9  ;;  %v6514_v9 = vld [vmem:[%s14794_s7 + $0x8] sm:$0xff]  ;;  %s6625_s5 = sshll.u32 %s8327_s9, 4  ;;  %s6626_s5 = int_to_ptr.vmem [resolvable:$true] %s6625_s5 }
 0x85b   :  { %6363 = vmatpush.msra.mxu3 %v8219_v62  ;;  %6458 = vmatpush.msra.mxu1 %v8235_v32  ;;  %v5291_v62 = vadd.f32 %v5289_v42, %v5155_v27  ;;  %v5424_v32 = vadd.f32 %v5423_v6, %v5404_v13 }
 0x85c   :  { %6478 = vmatpush.msra.mxu2 %v8251_v53  ;;  %6494 = vmatpush.msrb.mxu0 %v8271_v25  ;;  %v6513_v25 = vld [vmem:[%s14794_s7] sm:$0xff] }
 0x85d   :  { %6364 = vmatpush.msra.mxu3 %v8218_v1  ;;  %6459 = vmatpush.msra.mxu1 %v8234_v61 }
 0x85e   :  { %6479 = vmatpush.msra.mxu2 %v8250_v48  ;;  %6495 = vmatpush.msrb.mxu0 %v8270_v50  ;;  %v5518_v19 = vpop.f32.mrf.mxu3  ;;  %v5538_v36 = vpop.f32.mrf.mxu1 }
 0x85f   :  { %6365 = vmatpush.msra.mxu3 %v8217_v44  ;;  %6460 = vmatpush.msra.mxu1 %v8233_v17  ;;  %v5558_v24 = vpop.f32.mrf.mxu2  ;;  %v5653_v2 = vpop.f32.mrf.mxu0  ;;  %v5539_v59 = vadd.f32 %v5538_v36, %v5518_v19  ;;  %v5426_v44 = vadd.f32 %v5424_v32, %v5291_v62 }
 0x860   :  { %6480 = vmatpush.msra.mxu2 %v8249_v21  ;;  %6496 = vmatpush.msrb.mxu0 %v8269_v31 }
 0x861   :  { %6366 = vmatpush.msra.mxu3 %v8216_v49  ;;  %6461 = vmatpush.msra.mxu1 %v8232_v12  ;;  %v5559_v1 = vadd.f32 %v5558_v24, %v5539_v59  ;;  %v8290_v24 = vld [vmem:[%s14793_s6] ss:$0 sm:$0xff] }
 0x862   :  { %6481 = vmatpush.msra.mxu2 %v8248_v34  ;;  %6497 = vmatpush.msrb.mxu0 %v8268_v5 }
 0x863   :  { %6367 = vmatmul.f32.vlgmr.msra.gmra.mxu3 %v14048_v16  ;;  %6462 = vmatmul.f32.vlgmr.msra.gmra.mxu1 %v6440_v47  ;;  %v6442_v16 = vld [vmem:[#allocation1 + $0x12] sm:$0xff]  ;;  %v5561_v31 = vadd.f32 %v5559_v1, %v5426_v44 }
 0x864   :  { %6482 = vmatmul.f32.vlgmr.msra.gmra.mxu2 %v6441_v45  ;;  %6498 = vmatpush.msrb.mxu0 %v8267_v39 }
 0x865   :  { %6536 = vmatpush.msrb.mxu3 %v6520_v15  ;;  %8283 = vmatpush.msk.msrb.mxu2 %vm6569_vm8, %v6561_v30 }
 0x866   :  { %6499 = vmatpush.msrb.mxu0 %v8266_v63  ;;  %v5673_v37 = vpop.f32.mrf.mxu3  ;;  %v5693_v28 = vpop.f32.mrf.mxu1 }
 0x867   :  { %6537 = vmatpush.msrb.mxu3 %v6519_v41  ;;  %v5788_v40 = vpop.f32.mrf.mxu2  ;;  %v5808_v11 = vpop.f32.mrf.mxu0  ;;  %v5674_v53 = vadd.f32 %v5673_v37, %v5653_v2  ;;  %v8291_v37 = vld [vmem:[%s14795_s8] ss:$0 sm:$0xff]  ;;  %6613 = vmatpush.msrb.mxu2 %v6560_v10 }
 0x868   :  { %6500 = vmatpush.msrb.mxu0 %v8265_v26  ;;  %v5809_v21 = vadd.f32 %v5808_v11, %v5788_v40 }
 0x869   :  { %6538 = vmatpush.msrb.mxu3 %v6518_v14  ;;  %v5694_v17 = vadd.f32 %v5693_v28, %v5674_v53 }
 0x86a   :  { %6501 = vmatpush.msrb.mxu0 %v8264_v55 }
 0x86b   :  { %6502 = vmatmul.f32.vlgmr.msrb.gmra.mxu0 %v6442_v16  ;;  %6539 = vmatpush.msrb.mxu3 %v6517_v54  ;;  %v5696_v5 = vadd.f32 %v5694_v17, %v5561_v31 }
 0x86d   :  { %6540 = vmatpush.msrb.mxu3 %v6516_v22 }
 0x86f   :  { %6541 = vmatpush.msrb.mxu3 %v6515_v23 }
 0x871   :  { %6542 = vmatpush.msrb.mxu3 %v6514_v9 }
 0x873   :  { %6543 = vmatpush.msrb.mxu3 %v6513_v25 }
 0x87a   :  { %v5923_v0 = vpop.f32.mrf.mxu1 }
 0x880   :  { %v5828_v52 = vpop.f32.mrf.mxu3 }
 0x881   :  { %v5943_v3 = vpop.f32.mrf.mxu2  ;;  %v5829_v49 = vadd.f32 %v5828_v52, %v5809_v21 }
 0x882   :  { %v5944_v12 = vadd.f32 %v5943_v3, %v5923_v0  ;;  %v6563_v0 = vld [vmem:[%s14797_s10 + $0x8] sm:$0x3]  ;;  %v6562_v3 = vld [vmem:[%s14797_s10] sm:$0xff] }
 0x883   :  { %v5831_v47 = vadd.f32 %v5829_v49, %v5696_v5  ;;  %8281 = vmatpush.msk.msrb.mxu1 %vm6569_vm8, %v6563_v0 }
 0x884   :  { %v5963_v18 = vpop.f32.mrf.mxu0 }
 0x885   :  { %v5964_v45 = vadd.f32 %v5963_v18, %v5944_v12  ;;  %6588 = vmatpush.msrb.mxu1 %v6562_v3 }
 0x887   :  { %v5966_v46 = vadd.f32 %v5964_v45, %v5831_v47 }
 0x89c   :  { %v6078_v61 = vpop.f32.mrf.mxu1 }
 0x8a2   :  { %v6058_v7 = vpop.f32.mrf.mxu3 }
 0x8a3   :  { %v6098_v48 = vpop.f32.mrf.mxu2  ;;  %v6079_v39 = vadd.f32 %v6078_v61, %v6058_v7 }
 0x8a5   :  { %v6099_v35 = vadd.f32 %v6098_v48, %v6079_v39 }
 0x8a6   :  { %v6193_v50 = vpop.f32.mrf.mxu0 }
 0x8a7   :  { %v6101_v4 = vadd.f32 %v6099_v35, %v5966_v46 }
 0x8be   :  { %v6233_v63 = vpop.f32.mrf.mxu1 }
 0x8c4   :  { %v6213_v34 = vpop.f32.mrf.mxu3 }
 0x8c5   :  { %v6214_v26 = vadd.f32 %v6213_v34, %v6193_v50  ;;  %v6328_v55 = vpop.f32.mrf.mxu2 }
 0x8c7   :  { %v6234_v43 = vadd.f32 %v6233_v63, %v6214_v26 }
 0x8c8   :  { %v6348_v16 = vpop.f32.mrf.mxu0 }
 0x8c9   :  { %v6349_v20 = vadd.f32 %v6348_v16, %v6328_v55  ;;  %v6236_v29 = vadd.f32 %v6234_v43, %v6101_v4 }
 0x8e0   :  { %v6463_v58 = vpop.f32.mrf.mxu1 }
 0x8e6   :  { %v6368_v33 = vpop.f32.mrf.mxu3 }
 0x8e7   :  { %v6369_v60 = vadd.f32 %v6368_v33, %v6349_v20  ;;  %v6483_v57 = vpop.f32.mrf.mxu2 }
 0x8e8   :  { %v6484_v8 = vadd.f32 %v6483_v57, %v6463_v58  ;;  %v6503_v6 = vpop.f32.mrf.mxu0 }
 0x8e9   :  { %v6371_v19 = vadd.f32 %v6369_v60, %v6236_v29 }
 0x8ea   :  { %v6504_v36 = vadd.f32 %v6503_v6, %v6484_v8 }
 0x8ec   :  { %v6506_v2 = vadd.f32 %v6504_v36, %v6371_v19 }
 0x8ee   :  { %v6511_v15 = vadd.f32 %v8290_v24, %v6506_v2 }
 0x8f0   :  { %v6512_v41 = vmax.f32 %v6511_v15, 0.0 }
 0x8f2   :  { %8280 = vmatmul.msk.f32.vlgmr.msrb.gmra.mxu3 %vm495_vm5, %v6512_v41 }
 0x975   :  { %v6545_v51 = vpop.f32.mrf.mxu3 }
 0x976   :  { %v6546_v28 = vadd.f32 %v8291_v37, %v6545_v51 }
 0x978   :  { %v6549_v40 = vsel %vm6548_vm7, %v6546_v28, -inf }
 0x979   :  { %6550 = vmax.xlane.f32.xlu0 %v6549_v40 }
 0x9ec   :  { %v6551_v11 = vpop.xlane.xlu0 %6550 }
 0x9ed   :  { %v6552_v56 = vsub.f32 %v6546_v28, %v6551_v11 }
 0x9ef   :  { %v6553_v14 = vmul.f32 1.442695, %v6552_v56 }
 0x9f1   :  { %8292 = vpow2.f32 %v6553_v14 }
 0x9f7   :  { %v8293_v52 = vpop.eup %8292 }
 0x9f8   :  { %v6555_v38 = vsel %vm6548_vm7, %v8293_v52, 0.0 }
 0x9f9   :  { %6556 = vadd.xlane.f32.xlu1 %v6555_v38 }
 0xa6c   :  { %v6557_v18 = vpop.xlane.xlu1 %6556 }
 0xa6d   :  { %8294 = vrcp.f32 %v6557_v18 }
 0xa73   :  { %v8295_v54 = vpop.eup %8294 }
 0xa74   :  { %v6559_v22 = vmul.f32 %v8295_v54, %v8293_v52 }
 0xa76   :  { %v6565_v42 = vrot.slane %v6559_v22, 2  ;;  %8284 = vmatmul.msk.f32.vlgmr.msrb.gmra.mxu2 %vm6566_vm9, %v6559_v22 }
 0xa78   :  { %8282 = vmatmul.msk.f32.vlgmr.msrb.gmra.mxu1 %vm6566_vm9, %v6565_v42 }
 0xaf5   :  { %v6590_v13 = vpop.f32.mrf.mxu1 }
 0xaf9   :  { %v6615_v23 = vpop.f32.mrf.mxu2 }
 0xafa   :  { %v6616_v27 = vadd.f32 %v6615_v23, %v6590_v13 }
 0xafc   :  { %6619 = vst.msk [vmem:[#allocation4] sm:$0x3] %vm6618_vm10, %v6616_v27 }
 0xafd   :  { %6630 = dma.vmem_to_hbm [thread:$0]  %s6626_s5, 32, %s6628_s2, [#allocation5]  }
 0xafe   :  { %8323 = dma.done.wait [#allocation5], 32  }
 0xaff   :  { %8324 = vsyncadd [#allocation5], 4294967264 }
 0xb00   :  { %6635 = vsyncpa [#allocation5], 1 }

</bundles_post_ra>
